<compile_context>
chip_gen: v7x
topology: tpu7x:2x2x1
jax: 0.10.0
libtpu: 0.0.40
codegen_flags: <defaults>
</compile_context>

<pallas_src>
import numpy as np
import jax
import jax.numpy as jnp
from jax import lax
from jax.experimental import pallas as pl
from jax.experimental.pallas import tpu as pltpu


# ---------------- Pallas kernels ----------------

def _conv1_unrolled_kernel(xp_ref, w_ref, out_ref):
    """Unrolled per-position conv1 + ReLU on the VPU (f32 accumulate, bf16 store).

    xp_ref : (K1, B, P1)  f32 im2col patches, K leading (K1 = 3*2*2 = 12, P1 = 256)
    w_ref  : (K1, C1, P1) f32 per-(channel, position) weights (C1 = 64)
    out_ref: (B, C1, P1)  bf16; out[b,c,p] = relu(sum_k xp[k,b,p] * w[k,c,p])
    """
    K = xp_ref.shape[0]
    acc = xp_ref[0][:, None, :] * w_ref[0][None, :, :]
    for k in range(1, K):  # K=12: statically unrolled, leading-axis (contiguous) reads
        acc = acc + xp_ref[k][:, None, :] * w_ref[k][None, :, :]
    out_ref[...] = jnp.maximum(acc, 0.0).astype(out_ref.dtype)


def _layer2_fc_head_kernel(xp2_ref, w2q_ref, w2s_ref, fc1q_ref, fc1s_ref,
                           fc2_ref, fc3_ref, out_ref, acc_ref):
    """Streaming fused conv2 + fc1 + fc2 + fc3.  One grid step = 7 of the 49 positions.

    xp2_ref : (7, B, 1024)  bf16 layer-2 patches for this position block
    w2q_ref : (7, 64, 1024) int8 per-position conv2 weights
    w2s_ref : (7, 1, 64)    f32  per-(position, out-channel) conv2 dequant scales
    fc1q_ref: (7, 64, 1024) int8 fc1 repacked: fc1[p,c,o] = fc1w[o, c*49 + p] / fc1s[o]
    fc1s_ref: (1, 1024)     f32  per-output fc1 dequant scales (resident)
    fc2_ref : (1024, 512)   bf16 fc2w.T (resident)
    fc3_ref : (512, 10)     f32  fc3w.T (resident)
    out_ref : (B, 10)       f32  logits (written on the last step)
    acc_ref : (B, 1024)     f32  fc1 accumulator scratch
    """
    p = pl.program_id(0)

    @pl.when(p == 0)
    def _():
        acc_ref[...] = jnp.zeros_like(acc_ref)

    xp2 = xp2_ref[...]                                    # (7, B, 1024) bf16
    w2 = w2q_ref[...].astype(jnp.bfloat16)                # int8 -> bf16 is exact
    # conv2: batched (over the 7 positions) matmul on the MXU, f32 accumulation.
    s = lax.dot_general(xp2, w2,
                        dimension_numbers=(((2,), (2,)), ((0,), (0,))),
                        preferred_element_type=jnp.float32)           # (7, B, 64)
    s = s * w2s_ref[...]                                  # dequant, broadcast over batch
    out2 = jnp.maximum(s, 0.0).astype(jnp.bfloat16)       # (7, B, 64)

    # fc1 partial for this position block: batched matmul over positions + reduce.
    fc1 = fc1q_ref[...].astype(jnp.bfloat16)              # (7, 64, 1024)
    t = lax.dot_general(out2, fc1,
                        dimension_numbers=(((2,), (1,)), ((0,), (0,))),
                        preferred_element_type=jnp.float32)           # (7, B, 1024)
    acc_ref[...] += jnp.sum(t, axis=0)                    # (B, 1024) f32

    @pl.when(p == pl.num_programs(0) - 1)
    def _():
        h1 = jnp.maximum(acc_ref[...] * fc1s_ref[...], 0.0)           # fc1 dequant + relu
        h2 = jnp.dot(h1.astype(jnp.bfloat16), fc2_ref[...],
                     preferred_element_type=jnp.float32)              # (B, 512)
        h2 = jnp.maximum(h2, 0.0)
        out_ref[...] = jnp.dot(h2, fc3_ref[...],
                               preferred_element_type=jnp.float32)    # (B, 10)


def _vmem():
    return pl.BlockSpec(memory_space=pltpu.MemorySpace.VMEM)


def conv1_unrolled(xp, w):
    K, B, P = xp.shape
    C = w.shape[1]
    return pl.pallas_call(
        _conv1_unrolled_kernel,
        out_shape=jax.ShapeDtypeStruct((B, C, P), jnp.bfloat16),
        in_specs=[_vmem(), _vmem()],
        out_specs=_vmem(),
    )(xp, w)


def layer2_fc_head(xp2, w2q, w2s, fc1q, fc1s, fc2p, fc3p):
    P2, B, K2 = xp2.shape                 # 49, B, 1024
    C2 = w2q.shape[1]                     # 64
    O1 = fc1s.shape[1]                    # 1024
    O2 = fc2p.shape[1]                    # 512
    n_cls = fc3p.shape[1]                 # 10
    PB = 7                                # positions per grid step (49 = 7 * 7)
    return pl.pallas_call(
        _layer2_fc_head_kernel,
        out_shape=jax.ShapeDtypeStruct((B, n_cls), jnp.float32),
        grid_spec=pltpu.PrefetchScalarGridSpec(
            num_scalar_prefetch=0,
            grid=(P2 // PB,),
            in_specs=[
                pl.BlockSpec((PB, B, K2), lambda p: (p, 0, 0)),    # xp2  (streamed)
                pl.BlockSpec((PB, C2, K2), lambda p: (p, 0, 0)),   # w2q  (streamed)
                pl.BlockSpec((PB, 1, C2), lambda p: (p, 0, 0)),    # w2s  (streamed)
                pl.BlockSpec((PB, C2, K2), lambda p: (p, 0, 0)),   # fc1q (streamed)
                pl.BlockSpec((1, O1), lambda p: (0, 0)),           # fc1s (resident)
                pl.BlockSpec((K2, O2), lambda p: (0, 0)),          # fc2  (resident)
                pl.BlockSpec((O2, n_cls), lambda p: (0, 0)),       # fc3  (resident)
            ],
            out_specs=pl.BlockSpec((B, n_cls), lambda p: (0, 0)),
            scratch_shapes=[pltpu.VMEM((B, O1), jnp.float32)],
        ),
        compiler_params=pltpu.CompilerParams(dimension_semantics=("arbitrary",)),
    )(xp2, w2q, w2s, fc1q, fc1s, fc2p, fc3p)


# ---------------- plain-JAX glue (reshape / slice only) ----------------

def _im2col_2x2_s2_klead(x):
    """(B, C, H, W) -> (C*4, B, (H//2)*(W//2));  k = c*4 + kh*2 + kw, p = h*(W//2) + w."""
    B, C, H, W = x.shape
    xr = x.reshape(B, C, H // 2, 2, W // 2, 2)        # b, c, h, kh, w, kw
    xr = jnp.transpose(xr, (1, 3, 5, 0, 2, 4))        # c, kh, kw, b, h, w
    return xr.reshape(C * 4, B, (H // 2) * (W // 2))


def _im2col_4x4_s2(o1):
    """(B, C, 16, 16) -> (49, B, C*16): overlapping 4x4 / stride-2 patches.
    k2 = c*16 + kh*4 + kw, p2 = h*7 + w (matches the PyTorch unroll ordering)."""
    B, C, H, W = o1.shape
    taps = []
    for kh in range(4):
        for kw in range(4):
            taps.append(o1[:, :, kh:kh + 13:2, kw:kw + 13:2])   # (B, C, 7, 7)
    p = jnp.stack(taps, axis=2)                  # (B, C, 16, 7, 7), axis2 = kh*4+kw
    p = p.reshape(B, C * 16, 49)                 # (B, K2, P2)
    return jnp.transpose(p, (2, 0, 1))           # (P2, B, K2)


def pack_params(conv1w, conv2w, fc1w, fc2w, fc3w):
    """One-time weight repack + int8 quantization (NOT in the per-call hot path)."""
    # conv1: (64,256,3,2,2) -> (12,64,256) f32 (kept f32: v5e has no bf16 VALU)
    c1, p1, ci1, kh1, kw1 = conv1w.shape
    w1p = jnp.transpose(conv1w, (2, 3, 4, 0, 1)).reshape(
        ci1 * kh1 * kw1, c1, p1).astype(jnp.float32)                       # (12, 64, 256)

    # conv2: (64,49,64,4,4) -> (49,64,1024) int8 + per-(position, out-channel) f32 scales
    c2, p2, ci2, kh2, kw2 = conv2w.shape
    k2 = ci2 * kh2 * kw2
    w2f = jnp.transpose(conv2w, (1, 0, 2, 3, 4)).reshape(p2, c2, k2).astype(jnp.float32)
    w2_scale = jnp.maximum(jnp.max(jnp.abs(w2f), axis=2, keepdims=True), 1e-30) / 127.0
    w2q = jnp.clip(jnp.round(w2f / w2_scale), -127.0, 127.0).astype(jnp.int8)   # (49,64,1024)
    w2s = jnp.transpose(w2_scale, (0, 2, 1)).astype(jnp.float32)                # (49,1,64)

    # fc1: (1024, 3136) -> (49,64,1024) int8 + per-output f32 scales
    o1 = fc1w.shape[0]
    fc1f = jnp.transpose(fc1w.reshape(o1, c2, p2), (2, 1, 0)).astype(jnp.float32)  # (49,64,1024)
    fc1_scale = jnp.maximum(
        jnp.max(jnp.abs(fc1f), axis=(0, 1), keepdims=True), 1e-30) / 127.0         # (1,1,1024)
    fc1q = jnp.clip(jnp.round(fc1f / fc1_scale), -127.0, 127.0).astype(jnp.int8)
    fc1s = fc1_scale.reshape(1, o1).astype(jnp.float32)                             # (1,1024)

    fc2p = jnp.transpose(fc2w, (1, 0)).astype(jnp.bfloat16)       # (1024, 512)
    fc3p = jnp.transpose(fc3w, (1, 0)).astype(jnp.float32)        # (512, 10)
    return w1p, w2q, w2s, fc1q, fc1s, fc2p, fc3p


def dequantize_for_reference(w2q, w2s, fc1q, fc1s):
    """Reconstruct the dequantized conv2 / fc1 weights in their original layouts."""
    p2, c2, k2 = w2q.shape
    w2_scale = jnp.transpose(w2s, (0, 2, 1))                      # (49,64,1)
    w2f = w2q.astype(jnp.float32) * w2_scale                      # (49,64,1024)
    conv2w_dq = jnp.transpose(w2f.reshape(p2, c2, k2 // 16, 4, 4), (1, 0, 2, 3, 4))
    o1 = fc1s.shape[1]
    fc1f = fc1q.astype(jnp.float32) * fc1s.reshape(1, 1, o1)      # (49,64,1024)
    fc1w_dq = jnp.transpose(fc1f, (2, 1, 0)).reshape(o1, c2 * p2)
    return conv2w_dq, fc1w_dq


@jax.jit
def hardnet_forward(x, w1p, w2q, w2s, fc1q, fc1s, fc2p, fc3p):
    """Pallas forward of CIFAR10_Type1_Template_Unroll (returns raw fc3 logits).

    x : (B, 3, 32, 32) float32 NCHW; packed params from pack_params().
    """
    B = x.shape[0]
    # layer 1: unrolled 2x2/stride-2 conv, 3 -> 64 channels, 16x16 positions
    xp1 = _im2col_2x2_s2_klead(x)                          # (12, B, 256) f32
    out1 = conv1_unrolled(xp1, w1p)                        # (B, 64, 256) bf16
    o1 = out1.reshape(B, 64, 16, 16)
    # layer 2 patches (overlapping 4x4 / stride 2) + streaming conv2/fc1/fc2/fc3 kernel
    xp2 = _im2col_4x4_s2(o1)                               # (49, B, 1024) bf16
    return layer2_fc_head(xp2, w2q, w2s, fc1q, fc1s, fc2p, fc3p)   # (B, 10)


# ---------------- pure-JAX f32 reference (independent formulation) ----------------

@jax.jit
def reference_forward(x, conv1w, conv2w, fc1w, fc2w, fc3w):
    B = x.shape[0]
    # layer 1
    xp = x.reshape(B, 3, 16, 2, 16, 2).transpose(0, 2, 4, 1, 3, 5)      # (B,16,16,3,2,2)
    w1 = conv1w.reshape(64, 16, 16, 3, 2, 2)
    out1 = jax.nn.relu(jnp.einsum('bhwikl,chwikl->bchw', xp, w1))       # (B,64,16,16)
    # layer 2 (4x4 / stride-2, per-position weights)
    pat = jnp.stack([jnp.stack([lax.dynamic_slice(out1, (0, 0, 2 * h, 2 * w), (B, 64, 4, 4))
                                for w in range(7)], axis=2)
                     for h in range(7)], axis=2)                         # (B,64,7,7,4,4)
    w2 = conv2w.reshape(64, 7, 7, 64, 4, 4)
    out2 = jax.nn.relu(jnp.einsum('bihwkl,chwikl->bchw', pat, w2))       # (B,64,7,7)
    # fc head (channel-major flatten, like torch .view(-1, 3136))
    h1 = jax.nn.relu(out2.reshape(B, 3136) @ fc1w.T)
    h2 = jax.nn.relu(h1 @ fc2w.T)
    return h2 @ fc3w.T


if __name__ == "__main__":
    key = jax.random.PRNGKey(0)
    k1, k2, k3, k4, k5, kx = jax.random.split(key, 6)
    B = 2  # batch is the only free size; spatial/channel/fc dims are fixed by the module
    x = jax.random.normal(kx, (B, 3, 32, 32), jnp.float32)
    conv1w = 0.2 * jax.random.normal(k1, (64, 256, 3, 2, 2), jnp.float32)
    conv2w = 0.03 * jax.random.normal(k2, (64, 49, 64, 4, 4), jnp.float32)
    fc1w = 0.02 * jax.random.normal(k3, (1024, 3136), jnp.float32)
    fc2w = 0.04 * jax.random.normal(k4, (512, 1024), jnp.float32)
    fc3w = 0.06 * jax.random.normal(k5, (10, 512), jnp.float32)

    params = pack_params(conv1w, conv2w, fc1w, fc2w, fc3w)

    out = hardnet_forward(x, *params)
    out = jax.block_until_ready(out)

    # The int8 weight quantization is an intentional approximation; validate the kernel
    # math exactly by comparing against the f32 reference run with the SAME dequantized
    # conv2/fc1 weights (tolerance covers the bf16 MXU operands + bf16 out1/xp2).
    conv2w_dq, fc1w_dq = dequantize_for_reference(params[1], params[2], params[3], params[4])
    ref = jax.block_until_ready(
        reference_forward(x, conv1w, conv2w_dq, fc1w_dq, fc2w, fc3w))
    np.testing.assert_allclose(np.asarray(out), np.asarray(ref), rtol=5e-2, atol=3e-2)

    print("KERNEL_OK")
</pallas_src>

<mosaic_0001>
module attributes {stable_mosaic.version = 11 : i64} {
  func.func @_conv1_unrolled_kernel(%arg0: memref<12x2x256xf32, #tpu.memory_space<vmem>>, %arg1: memref<12x64x256xf32, #tpu.memory_space<vmem>>, %arg2: memref<2x64x256xbf16, #tpu.memory_space<vmem>>) attributes {dimension_semantics = [], scalar_prefetch = 0 : i64, scratch_operands = 0 : i64, tpu.core_type = #tpu.core_type<tc>} {
    %c0 = arith.constant 0 : index
    %c0_0 = arith.constant 0 : index
    %c0_1 = arith.constant 0 : index
    %0 = vector.load %arg0[%c0, %c0_0, %c0_1] : memref<12x2x256xf32, #tpu.memory_space<vmem>>, vector<1x2x256xf32>
    %1 = vector.shape_cast %0 : vector<1x2x256xf32> to vector<2x256xf32>
    %2 = vector.shape_cast %1 : vector<2x256xf32> to vector<2x1x256xf32>
    %c0_2 = arith.constant 0 : index
    %c0_3 = arith.constant 0 : index
    %c0_4 = arith.constant 0 : index
    %3 = vector.load %arg1[%c0_2, %c0_3, %c0_4] : memref<12x64x256xf32, #tpu.memory_space<vmem>>, vector<1x64x256xf32>
    %4 = vector.shape_cast %3 : vector<1x64x256xf32> to vector<64x256xf32>
    %5 = vector.shape_cast %4 : vector<64x256xf32> to vector<1x64x256xf32>
    %6 = vector.broadcast %2 : vector<2x1x256xf32> to vector<2x64x256xf32>
    %7 = vector.broadcast %5 : vector<1x64x256xf32> to vector<2x64x256xf32>
    %8 = arith.mulf %6, %7 : vector<2x64x256xf32>
    %c1 = arith.constant 1 : index
    %c0_5 = arith.constant 0 : index
    %c0_6 = arith.constant 0 : index
    %9 = vector.load %arg0[%c1, %c0_5, %c0_6] : memref<12x2x256xf32, #tpu.memory_space<vmem>>, vector<1x2x256xf32>
    %10 = vector.shape_cast %9 : vector<1x2x256xf32> to vector<2x256xf32>
    %11 = vector.shape_cast %10 : vector<2x256xf32> to vector<2x1x256xf32>
    %c1_7 = arith.constant 1 : index
    %c0_8 = arith.constant 0 : index
    %c0_9 = arith.constant 0 : index
    %12 = vector.load %arg1[%c1_7, %c0_8, %c0_9] : memref<12x64x256xf32, #tpu.memory_space<vmem>>, vector<1x64x256xf32>
    %13 = vector.shape_cast %12 : vector<1x64x256xf32> to vector<64x256xf32>
    %14 = vector.shape_cast %13 : vector<64x256xf32> to vector<1x64x256xf32>
    %15 = vector.broadcast %11 : vector<2x1x256xf32> to vector<2x64x256xf32>
    %16 = vector.broadcast %14 : vector<1x64x256xf32> to vector<2x64x256xf32>
    %17 = arith.mulf %15, %16 : vector<2x64x256xf32>
    %18 = arith.addf %8, %17 : vector<2x64x256xf32>
    %c2 = arith.constant 2 : index
    %c0_10 = arith.constant 0 : index
    %c0_11 = arith.constant 0 : index
    %19 = vector.load %arg0[%c2, %c0_10, %c0_11] : memref<12x2x256xf32, #tpu.memory_space<vmem>>, vector<1x2x256xf32>
    %20 = vector.shape_cast %19 : vector<1x2x256xf32> to vector<2x256xf32>
    %21 = vector.shape_cast %20 : vector<2x256xf32> to vector<2x1x256xf32>
    %c2_12 = arith.constant 2 : index
    %c0_13 = arith.constant 0 : index
    %c0_14 = arith.constant 0 : index
    %22 = vector.load %arg1[%c2_12, %c0_13, %c0_14] : memref<12x64x256xf32, #tpu.memory_space<vmem>>, vector<1x64x256xf32>
    %23 = vector.shape_cast %22 : vector<1x64x256xf32> to vector<64x256xf32>
    %24 = vector.shape_cast %23 : vector<64x256xf32> to vector<1x64x256xf32>
    %25 = vector.broadcast %21 : vector<2x1x256xf32> to vector<2x64x256xf32>
    %26 = vector.broadcast %24 : vector<1x64x256xf32> to vector<2x64x256xf32>
    %27 = arith.mulf %25, %26 : vector<2x64x256xf32>
    %28 = arith.addf %18, %27 : vector<2x64x256xf32>
    %c3 = arith.constant 3 : index
    %c0_15 = arith.constant 0 : index
    %c0_16 = arith.constant 0 : index
    %29 = vector.load %arg0[%c3, %c0_15, %c0_16] : memref<12x2x256xf32, #tpu.memory_space<vmem>>, vector<1x2x256xf32>
    %30 = vector.shape_cast %29 : vector<1x2x256xf32> to vector<2x256xf32>
    %31 = vector.shape_cast %30 : vector<2x256xf32> to vector<2x1x256xf32>
    %c3_17 = arith.constant 3 : index
    %c0_18 = arith.constant 0 : index
    %c0_19 = arith.constant 0 : index
    %32 = vector.load %arg1[%c3_17, %c0_18, %c0_19] : memref<12x64x256xf32, #tpu.memory_space<vmem>>, vector<1x64x256xf32>
    %33 = vector.shape_cast %32 : vector<1x64x256xf32> to vector<64x256xf32>
    %34 = vector.shape_cast %33 : vector<64x256xf32> to vector<1x64x256xf32>
    %35 = vector.broadcast %31 : vector<2x1x256xf32> to vector<2x64x256xf32>
    %36 = vector.broadcast %34 : vector<1x64x256xf32> to vector<2x64x256xf32>
    %37 = arith.mulf %35, %36 : vector<2x64x256xf32>
    %38 = arith.addf %28, %37 : vector<2x64x256xf32>
    %c4 = arith.constant 4 : index
    %c0_20 = arith.constant 0 : index
    %c0_21 = arith.constant 0 : index
    %39 = vector.load %arg0[%c4, %c0_20, %c0_21] : memref<12x2x256xf32, #tpu.memory_space<vmem>>, vector<1x2x256xf32>
    %40 = vector.shape_cast %39 : vector<1x2x256xf32> to vector<2x256xf32>
    %41 = vector.shape_cast %40 : vector<2x256xf32> to vector<2x1x256xf32>
    %c4_22 = arith.constant 4 : index
    %c0_23 = arith.constant 0 : index
    %c0_24 = arith.constant 0 : index
    %42 = vector.load %arg1[%c4_22, %c0_23, %c0_24] : memref<12x64x256xf32, #tpu.memory_space<vmem>>, vector<1x64x256xf32>
    %43 = vector.shape_cast %42 : vector<1x64x256xf32> to vector<64x256xf32>
    %44 = vector.shape_cast %43 : vector<64x256xf32> to vector<1x64x256xf32>
    %45 = vector.broadcast %41 : vector<2x1x256xf32> to vector<2x64x256xf32>
    %46 = vector.broadcast %44 : vector<1x64x256xf32> to vector<2x64x256xf32>
    %47 = arith.mulf %45, %46 : vector<2x64x256xf32>
    %48 = arith.addf %38, %47 : vector<2x64x256xf32>
    %c5 = arith.constant 5 : index
    %c0_25 = arith.constant 0 : index
    %c0_26 = arith.constant 0 : index
    %49 = vector.load %arg0[%c5, %c0_25, %c0_26] : memref<12x2x256xf32, #tpu.memory_space<vmem>>, vector<1x2x256xf32>
    %50 = vector.shape_cast %49 : vector<1x2x256xf32> to vector<2x256xf32>
    %51 = vector.shape_cast %50 : vector<2x256xf32> to vector<2x1x256xf32>
    %c5_27 = arith.constant 5 : index
    %c0_28 = arith.constant 0 : index
    %c0_29 = arith.constant 0 : index
    %52 = vector.load %arg1[%c5_27, %c0_28, %c0_29] : memref<12x64x256xf32, #tpu.memory_space<vmem>>, vector<1x64x256xf32>
    %53 = vector.shape_cast %52 : vector<1x64x256xf32> to vector<64x256xf32>
    %54 = vector.shape_cast %53 : vector<64x256xf32> to vector<1x64x256xf32>
    %55 = vector.broadcast %51 : vector<2x1x256xf32> to vector<2x64x256xf32>
    %56 = vector.broadcast %54 : vector<1x64x256xf32> to vector<2x64x256xf32>
    %57 = arith.mulf %55, %56 : vector<2x64x256xf32>
    %58 = arith.addf %48, %57 : vector<2x64x256xf32>
    %c6 = arith.constant 6 : index
    %c0_30 = arith.constant 0 : index
    %c0_31 = arith.constant 0 : index
    %59 = vector.load %arg0[%c6, %c0_30, %c0_31] : memref<12x2x256xf32, #tpu.memory_space<vmem>>, vector<1x2x256xf32>
    %60 = vector.shape_cast %59 : vector<1x2x256xf32> to vector<2x256xf32>
    %61 = vector.shape_cast %60 : vector<2x256xf32> to vector<2x1x256xf32>
    %c6_32 = arith.constant 6 : index
    %c0_33 = arith.constant 0 : index
    %c0_34 = arith.constant 0 : index
    %62 = vector.load %arg1[%c6_32, %c0_33, %c0_34] : memref<12x64x256xf32, #tpu.memory_space<vmem>>, vector<1x64x256xf32>
    %63 = vector.shape_cast %62 : vector<1x64x256xf32> to vector<64x256xf32>
    %64 = vector.shape_cast %63 : vector<64x256xf32> to vector<1x64x256xf32>
    %65 = vector.broadcast %61 : vector<2x1x256xf32> to vector<2x64x256xf32>
    %66 = vector.broadcast %64 : vector<1x64x256xf32> to vector<2x64x256xf32>
    %67 = arith.mulf %65, %66 : vector<2x64x256xf32>
    %68 = arith.addf %58, %67 : vector<2x64x256xf32>
    %c7 = arith.constant 7 : index
    %c0_35 = arith.constant 0 : index
    %c0_36 = arith.constant 0 : index
    %69 = vector.load %arg0[%c7, %c0_35, %c0_36] : memref<12x2x256xf32, #tpu.memory_space<vmem>>, vector<1x2x256xf32>
    %70 = vector.shape_cast %69 : vector<1x2x256xf32> to vector<2x256xf32>
    %71 = vector.shape_cast %70 : vector<2x256xf32> to vector<2x1x256xf32>
    %c7_37 = arith.constant 7 : index
    %c0_38 = arith.constant 0 : index
    %c0_39 = arith.constant 0 : index
    %72 = vector.load %arg1[%c7_37, %c0_38, %c0_39] : memref<12x64x256xf32, #tpu.memory_space<vmem>>, vector<1x64x256xf32>
    %73 = vector.shape_cast %72 : vector<1x64x256xf32> to vector<64x256xf32>
    %74 = vector.shape_cast %73 : vector<64x256xf32> to vector<1x64x256xf32>
    %75 = vector.broadcast %71 : vector<2x1x256xf32> to vector<2x64x256xf32>
    %76 = vector.broadcast %74 : vector<1x64x256xf32> to vector<2x64x256xf32>
    %77 = arith.mulf %75, %76 : vector<2x64x256xf32>
    %78 = arith.addf %68, %77 : vector<2x64x256xf32>
    %c8 = arith.constant 8 : index
    %c0_40 = arith.constant 0 : index
    %c0_41 = arith.constant 0 : index
    %79 = vector.load %arg0[%c8, %c0_40, %c0_41] : memref<12x2x256xf32, #tpu.memory_space<vmem>>, vector<1x2x256xf32>
    %80 = vector.shape_cast %79 : vector<1x2x256xf32> to vector<2x256xf32>
    %81 = vector.shape_cast %80 : vector<2x256xf32> to vector<2x1x256xf32>
    %c8_42 = arith.constant 8 : index
    %c0_43 = arith.constant 0 : index
    %c0_44 = arith.constant 0 : index
    %82 = vector.load %arg1[%c8_42, %c0_43, %c0_44] : memref<12x64x256xf32, #tpu.memory_space<vmem>>, vector<1x64x256xf32>
    %83 = vector.shape_cast %82 : vector<1x64x256xf32> to vector<64x256xf32>
    %84 = vector.shape_cast %83 : vector<64x256xf32> to vector<1x64x256xf32>
    %85 = vector.broadcast %81 : vector<2x1x256xf32> to vector<2x64x256xf32>
    %86 = vector.broadcast %84 : vector<1x64x256xf32> to vector<2x64x256xf32>
    %87 = arith.mulf %85, %86 : vector<2x64x256xf32>
    %88 = arith.addf %78, %87 : vector<2x64x256xf32>
    %c9 = arith.constant 9 : index
    %c0_45 = arith.constant 0 : index
    %c0_46 = arith.constant 0 : index
    %89 = vector.load %arg0[%c9, %c0_45, %c0_46] : memref<12x2x256xf32, #tpu.memory_space<vmem>>, vector<1x2x256xf32>
    %90 = vector.shape_cast %89 : vector<1x2x256xf32> to vector<2x256xf32>
    %91 = vector.shape_cast %90 : vector<2x256xf32> to vector<2x1x256xf32>
    %c9_47 = arith.constant 9 : index
    %c0_48 = arith.constant 0 : index
    %c0_49 = arith.constant 0 : index
    %92 = vector.load %arg1[%c9_47, %c0_48, %c0_49] : memref<12x64x256xf32, #tpu.memory_space<vmem>>, vector<1x64x256xf32>
    %93 = vector.shape_cast %92 : vector<1x64x256xf32> to vector<64x256xf32>
    %94 = vector.shape_cast %93 : vector<64x256xf32> to vector<1x64x256xf32>
    %95 = vector.broadcast %91 : vector<2x1x256xf32> to vector<2x64x256xf32>
    %96 = vector.broadcast %94 : vector<1x64x256xf32> to vector<2x64x256xf32>
    %97 = arith.mulf %95, %96 : vector<2x64x256xf32>
    %98 = arith.addf %88, %97 : vector<2x64x256xf32>
    %c10 = arith.constant 10 : index
    %c0_50 = arith.constant 0 : index
    %c0_51 = arith.constant 0 : index
    %99 = vector.load %arg0[%c10, %c0_50, %c0_51] : memref<12x2x256xf32, #tpu.memory_space<vmem>>, vector<1x2x256xf32>
    %100 = vector.shape_cast %99 : vector<1x2x256xf32> to vector<2x256xf32>
    %101 = vector.shape_cast %100 : vector<2x256xf32> to vector<2x1x256xf32>
    %c10_52 = arith.constant 10 : index
    %c0_53 = arith.constant 0 : index
    %c0_54 = arith.constant 0 : index
    %102 = vector.load %arg1[%c10_52, %c0_53, %c0_54] : memref<12x64x256xf32, #tpu.memory_space<vmem>>, vector<1x64x256xf32>
    %103 = vector.shape_cast %102 : vector<1x64x256xf32> to vector<64x256xf32>
    %104 = vector.shape_cast %103 : vector<64x256xf32> to vector<1x64x256xf32>
    %105 = vector.broadcast %101 : vector<2x1x256xf32> to vector<2x64x256xf32>
    %106 = vector.broadcast %104 : vector<1x64x256xf32> to vector<2x64x256xf32>
    %107 = arith.mulf %105, %106 : vector<2x64x256xf32>
    %108 = arith.addf %98, %107 : vector<2x64x256xf32>
    %c11 = arith.constant 11 : index
    %c0_55 = arith.constant 0 : index
    %c0_56 = arith.constant 0 : index
    %109 = vector.load %arg0[%c11, %c0_55, %c0_56] : memref<12x2x256xf32, #tpu.memory_space<vmem>>, vector<1x2x256xf32>
    %110 = vector.shape_cast %109 : vector<1x2x256xf32> to vector<2x256xf32>
    %111 = vector.shape_cast %110 : vector<2x256xf32> to vector<2x1x256xf32>
    %c11_57 = arith.constant 11 : index
    %c0_58 = arith.constant 0 : index
    %c0_59 = arith.constant 0 : index
    %112 = vector.load %arg1[%c11_57, %c0_58, %c0_59] : memref<12x64x256xf32, #tpu.memory_space<vmem>>, vector<1x64x256xf32>
    %113 = vector.shape_cast %112 : vector<1x64x256xf32> to vector<64x256xf32>
    %114 = vector.shape_cast %113 : vector<64x256xf32> to vector<1x64x256xf32>
    %115 = vector.broadcast %111 : vector<2x1x256xf32> to vector<2x64x256xf32>
    %116 = vector.broadcast %114 : vector<1x64x256xf32> to vector<2x64x256xf32>
    %117 = arith.mulf %115, %116 : vector<2x64x256xf32>
    %118 = arith.addf %108, %117 : vector<2x64x256xf32>
    %cst = arith.constant 0.000000e+00 : f32
    %119 = vector.broadcast %cst : f32 to vector<2x64x256xf32>
    %120 = arith.maximumf %118, %119 : vector<2x64x256xf32>
    %121 = arith.truncf %120 : vector<2x64x256xf32> to vector<2x64x256xbf16>
    %c0_60 = arith.constant 0 : index
    %c0_61 = arith.constant 0 : index
    %c0_62 = arith.constant 0 : index
    %122 = vector.load %arg2[%c0_60, %c0_61, %c0_62] : memref<2x64x256xbf16, #tpu.memory_space<vmem>>, vector<2x64x256xbf16>
    tpu.vector_store %arg2[%c0_60, %c0_61, %c0_62], %121 {strides = array<i32>} : memref<2x64x256xbf16, #tpu.memory_space<vmem>>, vector<2x64x256xbf16>,
    return
  }
}

module attributes {stable_mosaic.version = 11 : i64} {
  func.func @_layer2_fc_head_kernel(%arg0: i32, %arg1: memref<7x2x1024xbf16, #tpu.memory_space<vmem>>, %arg2: memref<7x64x1024xi8, #tpu.memory_space<vmem>>, %arg3: memref<7x1x64xf32, #tpu.memory_space<vmem>>, %arg4: memref<7x64x1024xi8, #tpu.memory_space<vmem>>, %arg5: memref<1x1024xf32, #tpu.memory_space<vmem>>, %arg6: memref<1024x512xbf16, #tpu.memory_space<vmem>>, %arg7: memref<512x10xf32, #tpu.memory_space<vmem>>, %arg8: memref<2x10xf32, #tpu.memory_space<vmem>>, %arg9: memref<2x1024xf32, #tpu.memory_space<vmem>>) attributes {dimension_semantics = [#tpu.dimension_semantics<arbitrary>], iteration_bounds = array<i64: 7>, scalar_prefetch = 0 : i64, scratch_operands = 1 : i64, tpu.core_type = #tpu.core_type<tc>, window_params = [{transform_indices = @transform_0, window_bounds = array<i64: 7, 2, 1024>}, {transform_indices = @transform_1, window_bounds = array<i64: 7, 64, 1024>}, {transform_indices = @transform_2, window_bounds = array<i64: 7, 1, 64>}, {transform_indices = @transform_3, window_bounds = array<i64: 7, 64, 1024>}, {pipeline_mode = #tpu.pipeline_mode<synchronous>, transform_indices = @transform_4, window_bounds = array<i64: 1, 1024>}, {pipeline_mode = #tpu.pipeline_mode<synchronous>, transform_indices = @transform_5, window_bounds = array<i64: 1024, 512>}, {pipeline_mode = #tpu.pipeline_mode<synchronous>, transform_indices = @transform_6, window_bounds = array<i64: 512, 10>}, {pipeline_mode = #tpu.pipeline_mode<synchronous>, transform_indices = @transform_7, window_bounds = array<i64: 2, 10>}]} {
    %c0_i32 = arith.constant 0 : i32
    %0 = arith.cmpi eq, %arg0, %c0_i32 : i32
    %1 = arith.extui %0 : i1 to i32
    %c0_i32_0 = arith.constant 0 : i32
    %2 = arith.cmpi ne, %1, %c0_i32_0 : i32
    scf.if %2 {
      %cst_20 = arith.constant 0.000000e+00 : f32
      %23 = vector.broadcast %cst_20 : f32 to vector<2x1024xf32>
      %c0_21 = arith.constant 0 : index
      %c0_22 = arith.constant 0 : index
      %24 = vector.load %arg9[%c0_21, %c0_22] : memref<2x1024xf32, #tpu.memory_space<vmem>>, vector<2x1024xf32>
      tpu.vector_store %arg9[%c0_21, %c0_22], %23 {strides = array<i32>} : memref<2x1024xf32, #tpu.memory_space<vmem>>, vector<2x1024xf32>,
    } else {
    }
    %c0 = arith.constant 0 : index
    %c0_1 = arith.constant 0 : index
    %c0_2 = arith.constant 0 : index
    %3 = vector.load %arg1[%c0, %c0_1, %c0_2] : memref<7x2x1024xbf16, #tpu.memory_space<vmem>>, vector<7x2x1024xbf16>
    %c0_3 = arith.constant 0 : index
    %c0_4 = arith.constant 0 : index
    %c0_5 = arith.constant 0 : index
    %4 = vector.load %arg2[%c0_3, %c0_4, %c0_5] : memref<7x64x1024xi8, #tpu.memory_space<vmem>>, vector<7x64x1024xi8>
    %5 = arith.sitofp %4 : vector<7x64x1024xi8> to vector<7x64x1024xbf16>
    %cst = arith.constant dense<0.000000e+00> : vector<7x2x64xf32>
    %6 = tpu.matmul %3, %5, %cst {dimension_numbers = #tpu.dot_dimension_numbers<[2], [2], [1], [1], [0, 0, 0, 1, 1, 1], [0], [0]>} : vector<7x2x1024xbf16>, vector<7x64x1024xbf16>, vector<7x2x64xf32> -> vector<7x2x64xf32>
    %c0_6 = arith.constant 0 : index
    %c0_7 = arith.constant 0 : index
    %c0_8 = arith.constant 0 : index
    %7 = vector.load %arg3[%c0_6, %c0_7, %c0_8] : memref<7x1x64xf32, #tpu.memory_space<vmem>>, vector<7x1x64xf32>
    %8 = vector.broadcast %7 : vector<7x1x64xf32> to vector<7x2x64xf32>
    %9 = arith.mulf %6, %8 : vector<7x2x64xf32>
    %cst_9 = arith.constant 0.000000e+00 : f32
    %10 = vector.broadcast %cst_9 : f32 to vector<7x2x64xf32>
    %11 = arith.maximumf %9, %10 : vector<7x2x64xf32>
    %12 = arith.truncf %11 : vector<7x2x64xf32> to vector<7x2x64xbf16>
    %c0_10 = arith.constant 0 : index
    %c0_11 = arith.constant 0 : index
    %c0_12 = arith.constant 0 : index
    %13 = vector.load %arg4[%c0_10, %c0_11, %c0_12] : memref<7x64x1024xi8, #tpu.memory_space<vmem>>, vector<7x64x1024xi8>
    %14 = arith.sitofp %13 : vector<7x64x1024xi8> to vector<7x64x1024xbf16>
    %cst_13 = arith.constant dense<0.000000e+00> : vector<7x2x1024xf32>
    %15 = tpu.matmul %12, %14, %cst_13 {dimension_numbers = #tpu.dot_dimension_numbers<[2], [1], [1], [2], [0, 0, 0, 1, 1, 2], [0], [0]>} : vector<7x2x64xbf16>, vector<7x64x1024xbf16>, vector<7x2x1024xf32> -> vector<7x2x1024xf32>
    %c0_14 = arith.constant 0 : index
    %c0_15 = arith.constant 0 : index
    %16 = vector.load %arg9[%c0_14, %c0_15] : memref<2x1024xf32, #tpu.memory_space<vmem>>, vector<2x1024xf32>
    %cst_16 = arith.constant dense<0.000000e+00> : vector<2x1024xf32>
    %17 = vector.multi_reduction <add>, %15, %cst_16 [0] : vector<7x2x1024xf32> to vector<2x1024xf32>
    %18 = arith.addf %16, %17 : vector<2x1024xf32>
    %c0_17 = arith.constant 0 : index
    %c0_18 = arith.constant 0 : index
    %19 = vector.load %arg9[%c0_17, %c0_18] : memref<2x1024xf32, #tpu.memory_space<vmem>>, vector<2x1024xf32>
    tpu.vector_store %arg9[%c0_17, %c0_18], %18 {strides = array<i32>} : memref<2x1024xf32, #tpu.memory_space<vmem>>, vector<2x1024xf32>,
    %c6_i32 = arith.constant 6 : i32
    %20 = arith.cmpi eq, %arg0, %c6_i32 : i32
    %21 = arith.extui %20 : i1 to i32
    %c0_i32_19 = arith.constant 0 : i32
    %22 = arith.cmpi ne, %21, %c0_i32_19 : i32
    scf.if %22 {
      %c0_20 = arith.constant 0 : index
      %c0_21 = arith.constant 0 : index
      %23 = vector.load %arg9[%c0_20, %c0_21] : memref<2x1024xf32, #tpu.memory_space<vmem>>, vector<2x1024xf32>
      %c0_22 = arith.constant 0 : index
      %c0_23 = arith.constant 0 : index
      %24 = vector.load %arg5[%c0_22, %c0_23] : memref<1x1024xf32, #tpu.memory_space<vmem>>, vector<1x1024xf32>
      %25 = vector.broadcast %24 : vector<1x1024xf32> to vector<2x1024xf32>
      %26 = arith.mulf %23, %25 : vector<2x1024xf32>
      %cst_24 = arith.constant 0.000000e+00 : f32
      %27 = vector.broadcast %cst_24 : f32 to vector<2x1024xf32>
      %28 = arith.maximumf %26, %27 : vector<2x1024xf32>
      %29 = arith.truncf %28 : vector<2x1024xf32> to vector<2x1024xbf16>
      %c0_25 = arith.constant 0 : index
      %c0_26 = arith.constant 0 : index
      %30 = vector.load %arg6[%c0_25, %c0_26] : memref<1024x512xbf16, #tpu.memory_space<vmem>>, vector<1024x512xbf16>
      %cst_27 = arith.constant dense<0.000000e+00> : vector<2x512xf32>
      %31 = tpu.matmul %29, %30, %cst_27 {dimension_numbers = #tpu.dot_dimension_numbers<[1], [0], [0], [1], [0, 0, 1, 1], [], []>} : vector<2x1024xbf16>, vector<1024x512xbf16>, vector<2x512xf32> -> vector<2x512xf32>
      %cst_28 = arith.constant 0.000000e+00 : f32
      %32 = vector.broadcast %cst_28 : f32 to vector<2x512xf32>
      %33 = arith.maximumf %31, %32 : vector<2x512xf32>
      %c0_29 = arith.constant 0 : index
      %c0_30 = arith.constant 0 : index
      %34 = vector.load %arg7[%c0_29, %c0_30] : memref<512x10xf32, #tpu.memory_space<vmem>>, vector<512x10xf32>
      %cst_31 = arith.constant dense<0.000000e+00> : vector<2x10xf32>
      %35 = tpu.matmul %33, %34, %cst_31 {dimension_numbers = #tpu.dot_dimension_numbers<[1], [0], [0], [1], [0, 0, 1, 1], [], []>} : vector<2x512xf32>, vector<512x10xf32>, vector<2x10xf32> -> vector<2x10xf32>
      %c0_32 = arith.constant 0 : index
      %c0_33 = arith.constant 0 : index
      %36 = vector.load %arg8[%c0_32, %c0_33] : memref<2x10xf32, #tpu.memory_space<vmem>>, vector<2x10xf32>
      tpu.vector_store %arg8[%c0_32, %c0_33], %35 {strides = array<i32>} : memref<2x10xf32, #tpu.memory_space<vmem>>, vector<2x10xf32>,
    } else {
    }
    return
  }
  func.func @transform_0(%arg0: i32) -> (i32, i32, i32) {
    %c0_i32 = arith.constant 0 : i32
    %c0_i32_0 = arith.constant 0 : i32
    %c0_i32_1 = arith.constant 0 : i32
    return %arg0, %c0_i32, %c0_i32_0 : i32, i32, i32
  }
  func.func @transform_1(%arg0: i32) -> (i32, i32, i32) {
    %c0_i32 = arith.constant 0 : i32
    %c0_i32_0 = arith.constant 0 : i32
    %c0_i32_1 = arith.constant 0 : i32
    return %arg0, %c0_i32, %c0_i32_0 : i32, i32, i32
  }
  func.func @transform_2(%arg0: i32) -> (i32, i32, i32) {
    %c0_i32 = arith.constant 0 : i32
    %c0_i32_0 = arith.constant 0 : i32
    %c0_i32_1 = arith.constant 0 : i32
    return %arg0, %c0_i32, %c0_i32_0 : i32, i32, i32
  }
  func.func @transform_3(%arg0: i32) -> (i32, i32, i32) {
    %c0_i32 = arith.constant 0 : i32
    %c0_i32_0 = arith.constant 0 : i32
    %c0_i32_1 = arith.constant 0 : i32
    return %arg0, %c0_i32, %c0_i32_0 : i32, i32, i32
  }
  func.func @transform_4(%arg0: i32) -> (i32, i32) {
    %c0_i32 = arith.constant 0 : i32
    %c0_i32_0 = arith.constant 0 : i32
    %c0_i32_1 = arith.constant 0 : i32
    return %c0_i32, %c0_i32_0 : i32, i32
  }
  func.func @transform_5(%arg0: i32) -> (i32, i32) {
    %c0_i32 = arith.constant 0 : i32
    %c0_i32_0 = arith.constant 0 : i32
    %c0_i32_1 = arith.constant 0 : i32
    return %c0_i32, %c0_i32_0 : i32, i32
  }
  func.func @transform_6(%arg0: i32) -> (i32, i32) {
    %c0_i32 = arith.constant 0 : i32
    %c0_i32_0 = arith.constant 0 : i32
    %c0_i32_1 = arith.constant 0 : i32
    return %c0_i32, %c0_i32_0 : i32, i32
  }
  func.func @transform_7(%arg0: i32) -> (i32, i32) {
    %c0_i32 = arith.constant 0 : i32
    %c0_i32_0 = arith.constant 0 : i32
    %c0_i32_1 = arith.constant 0 : i32
    return %c0_i32, %c0_i32_0 : i32, i32
  }
}

</mosaic_0001>

<bundles_post_ra>
// kernel: hardnet_forward.2
= control target key start
LH: loop header
LB: loop body
LE: loop exit
PB: predicated region body
PF: predicated region fallthrough
CT: control target
= control target key end

     0   :  { %v37_v0 = vlaneseq  ;;  %s3646_s0 = inlined_call_operand.vmem [shape: f32[12,2,256], index: 0, kind: input, shape index: {}]   ;;  %s3647_s1 = inlined_call_operand.vmem [shape: f32[12,64,256], index: 1, kind: input, shape index: {}]   ;;  %s3648_s2 = inlined_call_operand.vmem [shape: bf16[2,64,256], index: 2, kind: output, shape index: {}]  }
   0x1   :  { %v1469_v1 = vld.sshfl [vmem:[%s3646_s0] sm:$0x33 pattern:$0x75316420]  ;;  %v22_v5 = vld [vmem:[%s3647_s1 + $0x8] sm:$0xff]  ;;  %v23_v8 = vld [vmem:[%s3647_s1 + $0x10] sm:$0xff] }
   0x2   :  { %v38_v2 = vshrl.u32 %v37_v0, 7  ;;  %v20_v3 = vcombine.high %v1469_v1, %v1469_v1  ;;  %v21_v4 = vld [vmem:[%s3647_s1] sm:$0xff]  ;;  %v24_v9 = vld [vmem:[%s3647_s1 + $0x18] sm:$0xff]  ;;  %v26_v11 = vld [vmem:[%s3647_s1 + $0x28] sm:$0xff] }
   0x3   :  { %v25_v10 = vld [vmem:[%s3647_s1 + $0x20] sm:$0xff]  ;;  %v27_v12 = vld [vmem:[%s3647_s1 + $0x30] sm:$0xff]  ;;  %v28_v16 = vld [vmem:[%s3647_s1 + $0x38] sm:$0xff] }
   0x4   :  { %v1724_v6 = vsub.s32 0, %v38_v2  ;;  %v1726_v7 = vsub.s32 1, %v38_v2  ;;  %v1471_v15 = vld.sshfl [vmem:[%s3646_s0 + $0x4] sm:$0x33 pattern:$0x75316420] }
   0x5   :  { %v29_v17 = vld [vmem:[%s3647_s1 + $0x40] sm:$0xff]  ;;  %v30_v18 = vld [vmem:[%s3647_s1 + $0x48] sm:$0xff]  ;;  %v31_v20 = vld [vmem:[%s3647_s1 + $0x50] sm:$0xff]  ;;  %v99_v24 = vcombine.high %v1471_v15, %v1471_v15 }
   0x6   :  { %3681 = vst [vmem:[#allocation2_spill] sm:$0xff] %v1724_v6  ;;  %3682 = vst [vmem:[#allocation3_spill] sm:$0xff] %v1726_v7  ;;  %v40_v13 = vrot.slane %v1469_v1, %v1724_v6  ;;  %v44_v14 = vrot.slane %v1469_v1, %v1726_v7  ;;  %v48_v19 = vrot.slane %v20_v3, %v1724_v6  ;;  %v32_v21 = vld [vmem:[%s3647_s1 + $0x58] sm:$0xff]  ;;  %v33_v22 = vld [vmem:[%s3647_s1 + $0x60] sm:$0xff] }
   0x7   :  { %v52_v23 = vrot.slane %v20_v3, %v1726_v7  ;;  %v1769_v25 = vrot.slane %v1471_v15, %v1724_v6  ;;  %v1772_v26 = vrot.slane %v1471_v15, %v1726_v7  ;;  %v34_v27 = vld [vmem:[%s3647_s1 + $0x68] sm:$0xff]  ;;  %v35_v28 = vld [vmem:[%s3647_s1 + $0x70] sm:$0xff]  ;;  %v36_v29 = vld [vmem:[%s3647_s1 + $0x78] sm:$0xff]  ;;  %v132_v15 = vrot.slane %v99_v24, %v1726_v7 }
   0x8   :  { %v1783_v30 = vmul.f32 %v40_v13, %v21_v4  ;;  %v1785_v31 = vmul.f32 %v44_v14, %v22_v5  ;;  %v1787_v32 = vmul.f32 %v40_v13, %v23_v8  ;;  %v1789_v33 = vmul.f32 %v44_v14, %v24_v9  ;;  %v1472_v50 = vld [vmem:[%s3647_s1 + $0x80] sm:$0xff]  ;;  %v1473_v51 = vld [vmem:[%s3647_s1 + $0x88] sm:$0xff]  ;;  %v1474_v56 = vld [vmem:[%s3647_s1 + $0x90] sm:$0xff] }
   0x9   :  { %v1791_v34 = vmul.f32 %v40_v13, %v25_v10  ;;  %v1793_v35 = vmul.f32 %v44_v14, %v26_v11  ;;  %v1795_v36 = vmul.f32 %v40_v13, %v27_v12  ;;  %v1797_v37 = vmul.f32 %v44_v14, %v28_v16  ;;  %v1475_v57 = vld [vmem:[%s3647_s1 + $0x98] sm:$0xff]  ;;  %v1476_v58 = vld [vmem:[%s3647_s1 + $0xa0] sm:$0xff]  ;;  %v1477_v63 = vld [vmem:[%s3647_s1 + $0xa8] sm:$0xff] }
   0xa   :  { %v1799_v38 = vmul.f32 %v40_v13, %v29_v17  ;;  %v1801_v39 = vmul.f32 %v44_v14, %v30_v18  ;;  %v1803_v40 = vmul.f32 %v40_v13, %v31_v20  ;;  %v1805_v41 = vmul.f32 %v44_v14, %v32_v21  ;;  %v1478_v0 = vld [vmem:[%s3647_s1 + $0xb0] sm:$0xff]  ;;  %v1479_v1 = vld [vmem:[%s3647_s1 + $0xb8] sm:$0xff] }
   0xb   :  { %v1807_v42 = vmul.f32 %v40_v13, %v33_v22  ;;  %v1809_v43 = vmul.f32 %v44_v14, %v34_v27  ;;  %v1811_v44 = vmul.f32 %v40_v13, %v35_v28  ;;  %v1813_v45 = vmul.f32 %v44_v14, %v36_v29  ;;  %v1485_v13 = vld [vmem:[%s3647_s1 + $0xe8] sm:$0xff] }
   0xc   :  { %v1815_v46 = vmul.f32 %v48_v19, %v21_v4  ;;  %v1817_v47 = vmul.f32 %v52_v23, %v22_v5  ;;  %v1819_v48 = vmul.f32 %v48_v19, %v23_v8  ;;  %v1821_v49 = vmul.f32 %v52_v23, %v24_v9  ;;  %v1480_v8 = vld [vmem:[%s3647_s1 + $0xc0] sm:$0xff]  ;;  %v1481_v9 = vld [vmem:[%s3647_s1 + $0xc8] sm:$0xff] }
   0xd   :  { %3683 = vst [vmem:[#allocation4_spill] sm:$0xff] %v1807_v42  ;;  %3684 = vst [vmem:[#allocation5_spill] sm:$0xff] %v1809_v43  ;;  %v1829_v52 = vmul.f32 %v48_v19, %v25_v10  ;;  %v1831_v53 = vmul.f32 %v52_v23, %v26_v11  ;;  %v1833_v54 = vmul.f32 %v48_v19, %v27_v12  ;;  %v1482_v10 = vld [vmem:[%s3647_s1 + $0xd0] sm:$0xff]  ;;  %v1483_v11 = vld [vmem:[%s3647_s1 + $0xd8] sm:$0xff] }
   0xe   :  { %3685 = vst [vmem:[#allocation6_spill] sm:$0xff] %v1811_v44  ;;  %3686 = vst [vmem:[#allocation7_spill] sm:$0xff] %v1813_v45  ;;  %v1835_v55 = vmul.f32 %v52_v23, %v28_v16  ;;  %v1846_v59 = vmul.f32 %v48_v19, %v29_v17  ;;  %v1848_v60 = vmul.f32 %v52_v23, %v30_v18  ;;  %v1484_v12 = vld [vmem:[%s3647_s1 + $0xe0] sm:$0xff]  ;;  %v1486_v18 = vld [vmem:[%s3647_s1 + $0xf0] sm:$0xff] }
   0xf   :  { %3687 = vst [vmem:[#allocation8_spill] sm:$0xff] %v1815_v46  ;;  %3688 = vst [vmem:[#allocation9_spill] sm:$0xff] %v1817_v47  ;;  %v1850_v61 = vmul.f32 %v48_v19, %v31_v20  ;;  %v1852_v62 = vmul.f32 %v52_v23, %v32_v21  ;;  %v1863_v2 = vmul.f32 %v48_v19, %v33_v22 }
  0x10   :  { %3689 = vst [vmem:[#allocation10_spill] sm:$0xff] %v1819_v48  ;;  %3690 = vst [vmem:[#allocation11_spill] sm:$0xff] %v1821_v49  ;;  %v1865_v3 = vmul.f32 %v52_v23, %v34_v27  ;;  %v1867_v4 = vmul.f32 %v48_v19, %v35_v28  ;;  %v1869_v5 = vmul.f32 %v52_v23, %v36_v29  ;;  %v1487_v19 = vld [vmem:[%s3647_s1 + $0xf8] sm:$0xff] }
  0x11   :  { %3691 = vst [vmem:[#allocation12_spill] sm:$0xff] %v1829_v52  ;;  %3692 = vst [vmem:[#allocation13_spill] sm:$0xff] %v1831_v53  ;;  %v128_v14 = vrot.slane %v99_v24, %v1724_v6  ;;  %v137_v16 = vmul.f32 %v1472_v50, %v1769_v25  ;;  %v138_v17 = vmul.f32 %v1473_v51, %v1772_v26 }
  0x12   :  { %3693 = vst [vmem:[#allocation14_spill] sm:$0xff] %v1833_v54  ;;  %3694 = vst [vmem:[#allocation15_spill] sm:$0xff] %v1835_v55  ;;  %v139_v20 = vmul.f32 %v1474_v56, %v1769_v25  ;;  %v140_v21 = vmul.f32 %v1475_v57, %v1772_v26  ;;  %v141_v22 = vmul.f32 %v1476_v58, %v1769_v25 }
  0x13   :  { %3695 = vst [vmem:[#allocation16_spill] sm:$0xff] %v1846_v59  ;;  %3696 = vst [vmem:[#allocation17_spill] sm:$0xff] %v1848_v60  ;;  %v142_v23 = vmul.f32 %v1477_v63, %v1772_v26  ;;  %v143_v24 = vmul.f32 %v1478_v0, %v1769_v25  ;;  %v144_v27 = vmul.f32 %v1479_v1, %v1772_v26 }
  0x14   :  { %3697 = vst [vmem:[#allocation18_spill] sm:$0xff] %v1850_v61  ;;  %3698 = vst [vmem:[#allocation19_spill] sm:$0xff] %v1852_v62  ;;  %v145_v28 = vmul.f32 %v1480_v8, %v1769_v25  ;;  %v146_v29 = vmul.f32 %v1481_v9, %v1772_v26  ;;  %v148_v7 = vmul.f32 %v1483_v11, %v1772_v26 }
  0x15   :  { %3699 = vst [vmem:[#allocation20_spill] sm:$0xff] %v1863_v2  ;;  %3700 = vst [vmem:[#allocation21_spill] sm:$0xff] %v1865_v3  ;;  %v150_v3 = vmul.f32 %v1485_v13, %v1772_v26  ;;  %v151_v2 = vmul.f32 %v1486_v18, %v1769_v25  ;;  %v152_v6 = vmul.f32 %v1487_v19, %v1772_v26 }
  0x16   :  { %3701 = vst [vmem:[#allocation22_spill] sm:$0xff] %v1867_v4  ;;  %3702 = vst [vmem:[#allocation23_spill] sm:$0xff] %v1869_v5  ;;  %v147_v5 = vmul.f32 %v1482_v10, %v1769_v25  ;;  %v149_v4 = vmul.f32 %v1484_v12, %v1769_v25  ;;  %v153_v62 = vmul.f32 %v1472_v50, %v128_v14 }
  0x17   :  { %v154_v61 = vmul.f32 %v1473_v51, %v132_v15  ;;  %v155_v60 = vmul.f32 %v1474_v56, %v128_v14  ;;  %v156_v59 = vmul.f32 %v1475_v57, %v132_v15  ;;  %v157_v55 = vmul.f32 %v1476_v58, %v128_v14 }
  0x18   :  { %v158_v54 = vmul.f32 %v1477_v63, %v132_v15  ;;  %v159_v53 = vmul.f32 %v1478_v0, %v128_v14  ;;  %v160_v52 = vmul.f32 %v1479_v1, %v132_v15  ;;  %v161_v49 = vmul.f32 %v1480_v8, %v128_v14 }
  0x19   :  { %v162_v48 = vmul.f32 %v1481_v9, %v132_v15  ;;  %v163_v47 = vmul.f32 %v1482_v10, %v128_v14  ;;  %v164_v46 = vmul.f32 %v1483_v11, %v132_v15  ;;  %v165_v45 = vmul.f32 %v1484_v12, %v128_v14 }
  0x1a   :  { %v166_v44 = vmul.f32 %v1485_v13, %v132_v15  ;;  %v167_v43 = vmul.f32 %v1486_v18, %v128_v14  ;;  %v168_v42 = vmul.f32 %v1487_v19, %v132_v15  ;;  %v1914_v25 = vadd.f32 %v137_v16, %v1783_v30  ;;  %v3728_v15 = vld [vmem:[#allocation16_spill] sm:$0xff] }
  0x1b   :  { %v1917_v26 = vadd.f32 %v138_v17, %v1785_v31  ;;  %v1920_v50 = vadd.f32 %v139_v20, %v1787_v32  ;;  %v1923_v51 = vadd.f32 %v140_v21, %v1789_v33  ;;  %v1926_v56 = vadd.f32 %v141_v22, %v1791_v34  ;;  %v1492_v19 = vld [vmem:[%s3647_s1 + $0x110] sm:$0xff]  ;;  %v1493_v20 = vld [vmem:[%s3647_s1 + $0x118] sm:$0xff]  ;;  %v1494_v21 = vld [vmem:[%s3647_s1 + $0x120] sm:$0xff] }
  0x1c   :  { %v1929_v57 = vadd.f32 %v142_v23, %v1793_v35  ;;  %v1932_v58 = vadd.f32 %v143_v24, %v1795_v36  ;;  %v1935_v30 = vadd.f32 %v144_v27, %v1797_v37  ;;  %v1938_v31 = vadd.f32 %v145_v28, %v1799_v38  ;;  %v3704_v35 = vld [vmem:[#allocation4_spill] sm:$0xff]  ;;  %v3706_v36 = vld [vmem:[#allocation5_spill] sm:$0xff]  ;;  %v3708_v37 = vld [vmem:[#allocation6_spill] sm:$0xff] }
  0x1d   :  { %v1941_v32 = vadd.f32 %v146_v29, %v1801_v39  ;;  %v1944_v33 = vadd.f32 %v147_v5, %v1803_v40  ;;  %v1947_v34 = vadd.f32 %v148_v7, %v1805_v41  ;;  %v1950_v63 = vadd.f32 %v149_v4, %v3704_v35  ;;  %v3710_v38 = vld [vmem:[#allocation7_spill] sm:$0xff]  ;;  %v3712_v39 = vld [vmem:[#allocation8_spill] sm:$0xff]  ;;  %v3714_v40 = vld [vmem:[#allocation9_spill] sm:$0xff] }
  0x1e   :  { %v1953_v0 = vadd.f32 %v150_v3, %v3706_v36  ;;  %v1956_v1 = vadd.f32 %v151_v2, %v3708_v37  ;;  %v1959_v8 = vadd.f32 %v152_v6, %v3710_v38  ;;  %v1962_v9 = vadd.f32 %v153_v62, %v3712_v39  ;;  %v1489_v7 = vld.sshfl [vmem:[%s3646_s0 + $0x8] sm:$0x33 pattern:$0x75316420]  ;;  %v3716_v41 = vld [vmem:[#allocation10_spill] sm:$0xff]  ;;  %v3720_v2 = vld [vmem:[#allocation12_spill] sm:$0xff] }
  0x1f   :  { %3703 = vst [vmem:[#allocation24_spill] sm:$0xff] %v1947_v34  ;;  %3705 = vst [vmem:[#allocation4_spill] sm:$0xff] %v1950_v63  ;;  %v1965_v5 = vadd.f32 %v154_v61, %v3714_v40  ;;  %v1971_v4 = vadd.f32 %v155_v60, %v3716_v41  ;;  %v3718_v3 = vld [vmem:[#allocation11_spill] sm:$0xff]  ;;  %v1977_v11 = vadd.f32 %v157_v55, %v3720_v2  ;;  %v3722_v6 = vld [vmem:[#allocation13_spill] sm:$0xff] }
  0x20   :  { %3707 = vst [vmem:[#allocation5_spill] sm:$0xff] %v1953_v0  ;;  %3709 = vst [vmem:[#allocation6_spill] sm:$0xff] %v1956_v1  ;;  %v1974_v10 = vadd.f32 %v156_v59, %v3718_v3  ;;  %v1980_v12 = vadd.f32 %v158_v54, %v3722_v6  ;;  %v3724_v62 = vld [vmem:[#allocation14_spill] sm:$0xff]  ;;  %v3726_v61 = vld [vmem:[#allocation15_spill] sm:$0xff]  ;;  %v1989_v16 = vadd.f32 %v161_v49, %v3728_v15 }
  0x21   :  { %3711 = vst [vmem:[#allocation7_spill] sm:$0xff] %v1959_v8  ;;  %3713 = vst [vmem:[#allocation8_spill] sm:$0xff] %v1962_v9  ;;  %v1983_v13 = vadd.f32 %v159_v53, %v3724_v62  ;;  %v1986_v14 = vadd.f32 %v160_v52, %v3726_v61  ;;  %v3730_v60 = vld [vmem:[#allocation17_spill] sm:$0xff]  ;;  %v1490_v55 = vld [vmem:[%s3647_s1 + $0x100] sm:$0xff] }
  0x22   :  { %3715 = vst [vmem:[#allocation9_spill] sm:$0xff] %v1965_v5  ;;  %3717 = vst [vmem:[#allocation10_spill] sm:$0xff] %v1971_v4  ;;  %v1992_v17 = vadd.f32 %v162_v48, %v3730_v60  ;;  %v1491_v54 = vld [vmem:[%s3647_s1 + $0x108] sm:$0xff]  ;;  %v3732_v52 = vld [vmem:[#allocation18_spill] sm:$0xff]  ;;  %v211_v48 = vcombine.high %v1489_v7, %v1489_v7 }
  0x23   :  { %3719 = vst [vmem:[#allocation11_spill] sm:$0xff] %v1974_v10  ;;  %3721 = vst [vmem:[#allocation12_spill] sm:$0xff] %v1977_v11  ;;  %v1507_v53 = vld.sshfl [vmem:[%s3646_s0 + $0xc] sm:$0x33 pattern:$0x75316420]  ;;  %v2004_v59 = vadd.f32 %v163_v47, %v3732_v52 }
  0x24   :  { %3723 = vst [vmem:[#allocation13_spill] sm:$0xff] %v1980_v12  ;;  %3725 = vst [vmem:[#allocation14_spill] sm:$0xff] %v1983_v13  ;;  %v3734_v49 = vld [vmem:[#allocation19_spill] sm:$0xff]  ;;  %v3736_v22 = vld [vmem:[#allocation2_spill] sm:$0xff]  ;;  %v2050_v3 = vcombine.high %v1507_v53, %v1507_v53 }
  0x25   :  { %3727 = vst [vmem:[#allocation15_spill] sm:$0xff] %v1986_v14  ;;  %3729 = vst [vmem:[#allocation16_spill] sm:$0xff] %v1989_v16  ;;  %v2007_v18 = vadd.f32 %v164_v46, %v3734_v49  ;;  %v232_v23 = vrot.slane %v1489_v7, %v3736_v22  ;;  %v3737_v47 = vld [vmem:[#allocation20_spill] sm:$0xff]  ;;  %v3739_v46 = vld [vmem:[#allocation21_spill] sm:$0xff]  ;;  %v2053_v2 = vrot.slane %v1507_v53, %v3736_v22 }
  0x26   :  { %3731 = vst [vmem:[#allocation17_spill] sm:$0xff] %v1992_v17  ;;  %3733 = vst [vmem:[#allocation18_spill] sm:$0xff] %v2004_v59  ;;  %v2020_v24 = vadd.f32 %v165_v45, %v3737_v47  ;;  %v2023_v27 = vadd.f32 %v166_v44, %v3739_v46  ;;  %v3741_v28 = vld [vmem:[#allocation22_spill] sm:$0xff]  ;;  %v1495_v35 = vld [vmem:[%s3647_s1 + $0x128] sm:$0xff]  ;;  %v240_v61 = vrot.slane %v211_v48, %v3736_v22 }
  0x27   :  { %3735 = vst [vmem:[#allocation19_spill] sm:$0xff] %v2007_v18  ;;  %v2026_v29 = vadd.f32 %v167_v43, %v3741_v28  ;;  %v1496_v36 = vld [vmem:[%s3647_s1 + $0x130] sm:$0xff]  ;;  %v1497_v37 = vld [vmem:[%s3647_s1 + $0x138] sm:$0xff]  ;;  %v3743_v45 = vld [vmem:[#allocation3_spill] sm:$0xff]  ;;  %v249_v60 = vmul.f32 %v1490_v55, %v232_v23  ;;  %v251_v52 = vmul.f32 %v1492_v19, %v232_v23  ;;  %v253_v28 = vmul.f32 %v1494_v21, %v232_v23 }
  0x28   :  { %3738 = vst [vmem:[#allocation20_spill] sm:$0xff] %v2020_v24  ;;  %3740 = vst [vmem:[#allocation21_spill] sm:$0xff] %v2023_v27  ;;  %v236_v38 = vrot.slane %v1489_v7, %v3743_v45  ;;  %v3744_v39 = vld [vmem:[#allocation23_spill] sm:$0xff]  ;;  %v1498_v43 = vld [vmem:[%s3647_s1 + $0x140] sm:$0xff]  ;;  %v244_v15 = vrot.slane %v211_v48, %v3743_v45  ;;  %v265_v18 = vmul.f32 %v1490_v55, %v240_v61 }
  0x29   :  { %3742 = vst [vmem:[#allocation22_spill] sm:$0xff] %v2026_v29  ;;  %v2039_v44 = vadd.f32 %v168_v42, %v3744_v39  ;;  %v1499_v40 = vld [vmem:[%s3647_s1 + $0x148] sm:$0xff]  ;;  %v1500_v41 = vld [vmem:[%s3647_s1 + $0x150] sm:$0xff]  ;;  %3746 = vst [vmem:[#allocation25_spill] sm:$0xff] %v2050_v3  ;;  %v2056_v42 = vrot.slane %v1507_v53, %v3743_v45  ;;  %v257_v3 = vmul.f32 %v1498_v43, %v232_v23 }
  0x2a   :  { %3747 = vst [vmem:[#allocation26_spill] sm:$0xff] %v2053_v2  ;;  %v1501_v7 = vld [vmem:[%s3647_s1 + $0x158] sm:$0xff]  ;;  %v1502_v6 = vld [vmem:[%s3647_s1 + $0x160] sm:$0xff]  ;;  %v1503_v62 = vld [vmem:[%s3647_s1 + $0x168] sm:$0xff]  ;;  %v250_v47 = vmul.f32 %v1491_v54, %v236_v38  ;;  %v252_v46 = vmul.f32 %v1493_v20, %v236_v38  ;;  %v254_v39 = vmul.f32 %v1495_v35, %v236_v38  ;;  %v256_v2 = vmul.f32 %v1497_v37, %v236_v38 }
  0x2b   :  { %3745 = vst [vmem:[#allocation23_spill] sm:$0xff] %v2039_v44  ;;  %3748 = vst [vmem:[#allocation27_spill] sm:$0xff] %v2056_v42  ;;  %v1504_v53 = vld [vmem:[%s3647_s1 + $0x170] sm:$0xff]  ;;  %v1505_v49 = vld [vmem:[%s3647_s1 + $0x178] sm:$0xff]  ;;  %v255_v42 = vmul.f32 %v1496_v36, %v232_v23  ;;  %v258_v22 = vmul.f32 %v1499_v40, %v236_v38  ;;  %v259_v44 = vmul.f32 %v1500_v41, %v232_v23 }
  0x2c   :  { %v260_v48 = vmul.f32 %v1501_v7, %v236_v38  ;;  %v261_v45 = vmul.f32 %v1502_v6, %v232_v23  ;;  %v262_v29 = vmul.f32 %v1503_v62, %v236_v38  ;;  %v263_v27 = vmul.f32 %v1504_v53, %v232_v23 }
  0x2d   :  { %v264_v24 = vmul.f32 %v1505_v49, %v236_v38  ;;  %v266_v59 = vmul.f32 %v1491_v54, %v244_v15  ;;  %v267_v17 = vmul.f32 %v1492_v19, %v240_v61  ;;  %v268_v16 = vmul.f32 %v1493_v20, %v244_v15 }
  0x2e   :  { %v269_v14 = vmul.f32 %v1494_v21, %v240_v61  ;;  %v270_v13 = vmul.f32 %v1495_v35, %v244_v15  ;;  %v271_v12 = vmul.f32 %v1496_v36, %v240_v61  ;;  %v272_v11 = vmul.f32 %v1497_v37, %v244_v15 }
  0x2f   :  { %v273_v10 = vmul.f32 %v1498_v43, %v240_v61  ;;  %v274_v4 = vmul.f32 %v1499_v40, %v244_v15  ;;  %v275_v5 = vmul.f32 %v1500_v41, %v240_v61  ;;  %v276_v9 = vmul.f32 %v1501_v7, %v244_v15  ;;  %v3762_v40 = vld [vmem:[#allocation10_spill] sm:$0xff] }
  0x30   :  { %v277_v8 = vmul.f32 %v1502_v6, %v240_v61  ;;  %v278_v1 = vmul.f32 %v1503_v62, %v244_v15  ;;  %v279_v0 = vmul.f32 %v1504_v53, %v240_v61  ;;  %v280_v63 = vmul.f32 %v1505_v49, %v244_v15  ;;  %v3776_v61 = vld [vmem:[#allocation17_spill] sm:$0xff] }
  0x31   :  { %v2076_v34 = vadd.f32 %v249_v60, %v1914_v25  ;;  %v2079_v55 = vadd.f32 %v250_v47, %v1917_v26  ;;  %v2082_v54 = vadd.f32 %v251_v52, %v1920_v50  ;;  %v2085_v19 = vadd.f32 %v252_v46, %v1923_v51  ;;  %v1512_v60 = vld [vmem:[%s3647_s1 + $0x1a0] sm:$0xff]  ;;  %v1513_v52 = vld [vmem:[%s3647_s1 + $0x1a8] sm:$0xff]  ;;  %v3784_v46 = vld [vmem:[#allocation21_spill] sm:$0xff] }
  0x32   :  { %v2088_v20 = vadd.f32 %v253_v28, %v1926_v56  ;;  %v2091_v21 = vadd.f32 %v254_v39, %v1929_v57  ;;  %v2094_v23 = vadd.f32 %v255_v42, %v1932_v58  ;;  %v2097_v25 = vadd.f32 %v256_v2, %v1935_v30  ;;  %v3749_v56 = vld [vmem:[#allocation24_spill] sm:$0xff]  ;;  %v3752_v58 = vld [vmem:[#allocation5_spill] sm:$0xff]  ;;  %v3754_v30 = vld [vmem:[#allocation6_spill] sm:$0xff] }
  0x33   :  { %v2100_v26 = vadd.f32 %v257_v3, %v1938_v31  ;;  %v2103_v50 = vadd.f32 %v258_v22, %v1941_v32  ;;  %v2106_v51 = vadd.f32 %v259_v44, %v1944_v33  ;;  %v2109_v35 = vadd.f32 %v260_v48, %v3749_v56  ;;  %v3750_v57 = vld [vmem:[#allocation4_spill] sm:$0xff]  ;;  %v3756_v31 = vld [vmem:[#allocation7_spill] sm:$0xff]  ;;  %v3760_v33 = vld [vmem:[#allocation9_spill] sm:$0xff] }
  0x34   :  { %v2112_v36 = vadd.f32 %v261_v45, %v3750_v57  ;;  %v2115_v37 = vadd.f32 %v262_v29, %v3752_v58  ;;  %v2118_v38 = vadd.f32 %v263_v27, %v3754_v30  ;;  %v2121_v43 = vadd.f32 %v264_v24, %v3756_v31  ;;  %v3758_v32 = vld [vmem:[#allocation8_spill] sm:$0xff]  ;;  %v1508_v45 = vld [vmem:[%s3647_s1 + $0x180] sm:$0xff]  ;;  %v3764_v29 = vld [vmem:[#allocation11_spill] sm:$0xff] }
  0x35   :  { %v2124_v22 = vadd.f32 %v265_v18, %v3758_v32  ;;  %v2127_v44 = vadd.f32 %v266_v59, %v3760_v33  ;;  %v2133_v41 = vadd.f32 %v267_v17, %v3762_v40  ;;  %v2136_v3 = vadd.f32 %v268_v16, %v3764_v29  ;;  %v3766_v27 = vld [vmem:[#allocation12_spill] sm:$0xff]  ;;  %v3768_v24 = vld [vmem:[#allocation13_spill] sm:$0xff]  ;;  %v1509_v59 = vld [vmem:[%s3647_s1 + $0x188] sm:$0xff] }
  0x36   :  { %3751 = vst [vmem:[#allocation24_spill] sm:$0xff] %v2112_v36  ;;  %3753 = vst [vmem:[#allocation4_spill] sm:$0xff] %v2115_v37  ;;  %v2139_v2 = vadd.f32 %v269_v14, %v3766_v27  ;;  %v2142_v42 = vadd.f32 %v270_v13, %v3768_v24  ;;  %v1510_v18 = vld [vmem:[%s3647_s1 + $0x190] sm:$0xff]  ;;  %v1511_v17 = vld [vmem:[%s3647_s1 + $0x198] sm:$0xff]  ;;  %v2163_v15 = vadd.f32 %v274_v4, %v3776_v61 }
  0x37   :  { %3755 = vst [vmem:[#allocation5_spill] sm:$0xff] %v2118_v38  ;;  %3757 = vst [vmem:[#allocation6_spill] sm:$0xff] %v2121_v43  ;;  %v3770_v16 = vld [vmem:[#allocation14_spill] sm:$0xff]  ;;  %v3772_v14 = vld [vmem:[#allocation15_spill] sm:$0xff]  ;;  %v2184_v28 = vadd.f32 %v278_v1, %v3784_v46 }
  0x38   :  { %3759 = vst [vmem:[#allocation7_spill] sm:$0xff] %v2124_v22  ;;  %3761 = vst [vmem:[#allocation8_spill] sm:$0xff] %v2127_v44  ;;  %v2154_v7 = vadd.f32 %v271_v12, %v3770_v16  ;;  %v2157_v6 = vadd.f32 %v272_v11, %v3772_v14  ;;  %v3774_v13 = vld [vmem:[#allocation16_spill] sm:$0xff]  ;;  %v3778_v11 = vld [vmem:[#allocation18_spill] sm:$0xff] }
  0x39   :  { %3763 = vst [vmem:[#allocation9_spill] sm:$0xff] %v2133_v41  ;;  %3765 = vst [vmem:[#allocation10_spill] sm:$0xff] %v2136_v3  ;;  %v2160_v62 = vadd.f32 %v273_v10, %v3774_v13  ;;  %v1514_v12 = vld [vmem:[%s3647_s1 + $0x1b0] sm:$0xff]  ;;  %v2175_v53 = vadd.f32 %v275_v5, %v3778_v11  ;;  %v3780_v10 = vld [vmem:[#allocation19_spill] sm:$0xff] }
  0x3a   :  { %3767 = vst [vmem:[#allocation11_spill] sm:$0xff] %v2139_v2  ;;  %3769 = vst [vmem:[#allocation12_spill] sm:$0xff] %v2142_v42  ;;  %v2178_v49 = vadd.f32 %v276_v9, %v3780_v10  ;;  %v3782_v4 = vld [vmem:[#allocation20_spill] sm:$0xff]  ;;  %v1515_v39 = vld [vmem:[%s3647_s1 + $0x1b8] sm:$0xff] }
  0x3b   :  { %3771 = vst [vmem:[#allocation13_spill] sm:$0xff] %v2154_v7  ;;  %3773 = vst [vmem:[#allocation14_spill] sm:$0xff] %v2157_v6  ;;  %v2181_v47 = vadd.f32 %v277_v8, %v3782_v4  ;;  %v1516_v48 = vld [vmem:[%s3647_s1 + $0x1c0] sm:$0xff]  ;;  %v1517_v5 = vld [vmem:[%s3647_s1 + $0x1c8] sm:$0xff] }
  0x3c   :  { %3775 = vst [vmem:[#allocation15_spill] sm:$0xff] %v2160_v62  ;;  %3777 = vst [vmem:[#allocation16_spill] sm:$0xff] %v2163_v15  ;;  %v3786_v9 = vld [vmem:[#allocation22_spill] sm:$0xff]  ;;  %v3788_v8 = vld [vmem:[#allocation23_spill] sm:$0xff] }
  0x3d   :  { %3779 = vst [vmem:[#allocation17_spill] sm:$0xff] %v2175_v53  ;;  %3781 = vst [vmem:[#allocation18_spill] sm:$0xff] %v2178_v49  ;;  %v2196_v56 = vadd.f32 %v279_v0, %v3786_v9  ;;  %v2199_v57 = vadd.f32 %v280_v63, %v3788_v8  ;;  %v1518_v1 = vld [vmem:[%s3647_s1 + $0x1d0] sm:$0xff]  ;;  %v1519_v58 = vld [vmem:[%s3647_s1 + $0x1d8] sm:$0xff] }
  0x3e   :  { %3783 = vst [vmem:[#allocation19_spill] sm:$0xff] %v2181_v47  ;;  %3785 = vst [vmem:[#allocation20_spill] sm:$0xff] %v2184_v28  ;;  %v1520_v30 = vld [vmem:[%s3647_s1 + $0x1e0] sm:$0xff]  ;;  %v3791_v32 = vld [vmem:[#allocation25_spill] sm:$0xff] }
  0x3f   :  { %3787 = vst [vmem:[#allocation21_spill] sm:$0xff] %v2196_v56  ;;  %3789 = vst [vmem:[#allocation22_spill] sm:$0xff] %v2199_v57  ;;  %v3790_v31 = vld [vmem:[#allocation2_spill] sm:$0xff]  ;;  %v3792_v0 = vld [vmem:[#allocation3_spill] sm:$0xff] }
  0x40   :  { %v352_v33 = vrot.slane %v3791_v32, %v3790_v31  ;;  %v356_v40 = vrot.slane %v3791_v32, %v3792_v0  ;;  %v1521_v63 = vld [vmem:[%s3647_s1 + $0x1e8] sm:$0xff]  ;;  %v1522_v29 = vld [vmem:[%s3647_s1 + $0x1f0] sm:$0xff]  ;;  %v1523_v27 = vld [vmem:[%s3647_s1 + $0x1f8] sm:$0xff] }
  0x41   :  { %v3793_v24 = vld [vmem:[#allocation26_spill] sm:$0xff]  ;;  %v3794_v14 = vld [vmem:[#allocation27_spill] sm:$0xff] }
  0x42   :  { %v361_v16 = vmul.f32 %v1508_v45, %v3793_v24  ;;  %v362_v13 = vmul.f32 %v1509_v59, %v3794_v14  ;;  %v363_v61 = vmul.f32 %v1510_v18, %v3793_v24  ;;  %v364_v11 = vmul.f32 %v1511_v17, %v3794_v14 }
  0x43   :  { %v365_v10 = vmul.f32 %v1512_v60, %v3793_v24  ;;  %v366_v4 = vmul.f32 %v1513_v52, %v3794_v14  ;;  %v367_v46 = vmul.f32 %v1514_v12, %v3793_v24  ;;  %v368_v9 = vmul.f32 %v1515_v39, %v3794_v14 }
  0x44   :  { %v369_v8 = vmul.f32 %v1516_v48, %v3793_v24  ;;  %v370_v32 = vmul.f32 %v1517_v5, %v3794_v14  ;;  %v371_v57 = vmul.f32 %v1518_v1, %v3793_v24  ;;  %v372_v56 = vmul.f32 %v1519_v58, %v3794_v14 }
  0x45   :  { %v373_v28 = vmul.f32 %v1520_v30, %v3793_v24  ;;  %v374_v0 = vmul.f32 %v1521_v63, %v3794_v14  ;;  %v375_v31 = vmul.f32 %v1522_v29, %v3793_v24  ;;  %v376_v47 = vmul.f32 %v1523_v27, %v3794_v14 }
  0x46   :  { %v377_v49 = vmul.f32 %v1508_v45, %v352_v33  ;;  %v378_v53 = vmul.f32 %v1509_v59, %v356_v40  ;;  %v379_v15 = vmul.f32 %v1510_v18, %v352_v33  ;;  %v380_v62 = vmul.f32 %v1511_v17, %v356_v40 }
  0x47   :  { %v381_v6 = vmul.f32 %v1512_v60, %v352_v33  ;;  %v382_v7 = vmul.f32 %v1513_v52, %v356_v40  ;;  %v383_v42 = vmul.f32 %v1514_v12, %v352_v33  ;;  %v384_v2 = vmul.f32 %v1515_v39, %v356_v40 }
  0x48   :  { %v385_v3 = vmul.f32 %v1516_v48, %v352_v33  ;;  %v386_v41 = vmul.f32 %v1517_v5, %v356_v40  ;;  %v387_v44 = vmul.f32 %v1518_v1, %v352_v33  ;;  %v388_v22 = vmul.f32 %v1519_v58, %v356_v40 }
  0x49   :  { %v389_v43 = vmul.f32 %v1520_v30, %v352_v33  ;;  %v390_v38 = vmul.f32 %v1521_v63, %v356_v40  ;;  %v391_v37 = vmul.f32 %v1522_v29, %v352_v33  ;;  %v392_v36 = vmul.f32 %v1523_v27, %v356_v40  ;;  %v1525_v30 = vld.sshfl [vmem:[%s3646_s0 + $0x10] sm:$0x33 pattern:$0x75316420] }
  0x4a   :  { %v2240_v24 = vadd.f32 %v361_v16, %v2076_v34  ;;  %v2243_v45 = vadd.f32 %v362_v13, %v2079_v55  ;;  %v2246_v59 = vadd.f32 %v363_v61, %v2082_v54  ;;  %v2249_v18 = vadd.f32 %v364_v11, %v2085_v19  ;;  %v3822_v27 = vld [vmem:[#allocation16_spill] sm:$0xff]  ;;  %v1529_v11 = vld [vmem:[%s3647_s1 + $0x218] sm:$0xff] }
  0x4b   :  { %v2252_v17 = vadd.f32 %v365_v10, %v2088_v20  ;;  %v2255_v60 = vadd.f32 %v366_v4, %v2091_v21  ;;  %v2258_v52 = vadd.f32 %v367_v46, %v2094_v23  ;;  %v2261_v34 = vadd.f32 %v368_v9, %v2097_v25  ;;  %v3796_v21 = vld [vmem:[#allocation24_spill] sm:$0xff]  ;;  %v3800_v25 = vld [vmem:[#allocation5_spill] sm:$0xff]  ;;  %v1530_v10 = vld [vmem:[%s3647_s1 + $0x220] sm:$0xff] }
  0x4c   :  { %v2264_v55 = vadd.f32 %v369_v8, %v2100_v26  ;;  %v2267_v54 = vadd.f32 %v370_v32, %v2103_v50  ;;  %v2270_v19 = vadd.f32 %v371_v57, %v2106_v51  ;;  %v2273_v20 = vadd.f32 %v372_v56, %v2109_v35  ;;  %v3798_v23 = vld [vmem:[#allocation4_spill] sm:$0xff]  ;;  %v3802_v26 = vld [vmem:[#allocation6_spill] sm:$0xff]  ;;  %v3804_v50 = vld [vmem:[#allocation7_spill] sm:$0xff] }
  0x4d   :  { %v2276_v12 = vadd.f32 %v373_v28, %v3796_v21  ;;  %v2279_v39 = vadd.f32 %v374_v0, %v3798_v23  ;;  %v2282_v48 = vadd.f32 %v375_v31, %v3800_v25  ;;  %v2285_v5 = vadd.f32 %v376_v47, %v3802_v26  ;;  %v3806_v51 = vld [vmem:[#allocation8_spill] sm:$0xff]  ;;  %v3808_v35 = vld [vmem:[#allocation9_spill] sm:$0xff]  ;;  %v3810_v28 = vld [vmem:[#allocation10_spill] sm:$0xff] }
  0x4e   :  { %3795 = vst [vmem:[#allocation23_spill] sm:$0xff] %v2273_v20  ;;  %v2288_v1 = vadd.f32 %v377_v49, %v3804_v50  ;;  %v2291_v57 = vadd.f32 %v378_v53, %v3806_v51  ;;  %v2294_v56 = vadd.f32 %v379_v15, %v3808_v35  ;;  %v2297_v58 = vadd.f32 %v380_v62, %v3810_v28  ;;  %v3812_v31 = vld [vmem:[#allocation11_spill] sm:$0xff]  ;;  %v3814_v47 = vld [vmem:[#allocation12_spill] sm:$0xff]  ;;  %v3816_v49 = vld [vmem:[#allocation13_spill] sm:$0xff] }
  0x4f   :  { %3797 = vst [vmem:[#allocation25_spill] sm:$0xff] %v2276_v12  ;;  %3799 = vst [vmem:[#allocation26_spill] sm:$0xff] %v2279_v39  ;;  %v2303_v33 = vadd.f32 %v381_v6, %v3812_v31  ;;  %v2306_v0 = vadd.f32 %v382_v7, %v3814_v47  ;;  %v2309_v40 = vadd.f32 %v383_v42, %v3816_v49  ;;  %v3818_v53 = vld [vmem:[#allocation14_spill] sm:$0xff]  ;;  %v3820_v15 = vld [vmem:[#allocation15_spill] sm:$0xff] }
  0x50   :  { %3801 = vst [vmem:[#allocation27_spill] sm:$0xff] %v2282_v48  ;;  %3803 = vst [vmem:[#allocation24_spill] sm:$0xff] %v2285_v5  ;;  %v2312_v63 = vadd.f32 %v384_v2, %v3818_v53  ;;  %v1543_v62 = vld.sshfl [vmem:[%s3646_s0 + $0x14] sm:$0x33 pattern:$0x75316420]  ;;  %v2318_v29 = vadd.f32 %v385_v3, %v3820_v15  ;;  %v2321_v16 = vadd.f32 %v386_v41, %v3822_v27 }
  0x51   :  { %3805 = vst [vmem:[#allocation4_spill] sm:$0xff] %v2288_v1  ;;  %3807 = vst [vmem:[#allocation5_spill] sm:$0xff] %v2291_v57  ;;  %v3824_v6 = vld [vmem:[#allocation17_spill] sm:$0xff]  ;;  %v3826_v7 = vld [vmem:[#allocation18_spill] sm:$0xff] }
  0x52   :  { %3809 = vst [vmem:[#allocation6_spill] sm:$0xff] %v2294_v56  ;;  %3811 = vst [vmem:[#allocation7_spill] sm:$0xff] %v2297_v58  ;;  %v2324_v14 = vadd.f32 %v387_v44, %v3824_v6  ;;  %v2327_v13 = vadd.f32 %v388_v22, %v3826_v7  ;;  %v1526_v2 = vld [vmem:[%s3647_s1 + $0x200] sm:$0xff]  ;;  %v1527_v42 = vld [vmem:[%s3647_s1 + $0x208] sm:$0xff]  ;;  %v435_v44 = vcombine.high %v1525_v30, %v1525_v30 }
  0x53   :  { %3813 = vst [vmem:[#allocation8_spill] sm:$0xff] %v2303_v33  ;;  %3815 = vst [vmem:[#allocation9_spill] sm:$0xff] %v2306_v0  ;;  %v2338_v3 = vld.sshfl [vmem:[%s3646_s0 + $0x18] sm:$0x33 pattern:$0x75316420] }
  0x54   :  { %3817 = vst [vmem:[#allocation10_spill] sm:$0xff] %v2309_v40  ;;  %3819 = vst [vmem:[#allocation11_spill] sm:$0xff] %v2312_v63  ;;  %v3829_v41 = vld [vmem:[#allocation19_spill] sm:$0xff]  ;;  %v1528_v22 = vld [vmem:[%s3647_s1 + $0x210] sm:$0xff]  ;;  %v2391_v47 = vcombine.high %v2338_v3, %v2338_v3 }
  0x55   :  { %3821 = vst [vmem:[#allocation12_spill] sm:$0xff] %v2318_v29  ;;  %3823 = vst [vmem:[#allocation13_spill] sm:$0xff] %v2321_v16  ;;  %v2341_v61 = vadd.f32 %v389_v43, %v3829_v41  ;;  %v3831_v4 = vld [vmem:[#allocation2_spill] sm:$0xff]  ;;  %v3832_v9 = vld [vmem:[#allocation3_spill] sm:$0xff] }
  0x56   :  { %3825 = vst [vmem:[#allocation14_spill] sm:$0xff] %v2324_v14  ;;  %3827 = vst [vmem:[#allocation15_spill] sm:$0xff] %v2327_v13  ;;  %v456_v46 = vrot.slane %v1525_v30, %v3831_v4  ;;  %v460_v8 = vrot.slane %v1525_v30, %v3832_v9  ;;  %v3833_v32 = vld [vmem:[#allocation20_spill] sm:$0xff]  ;;  %v3835_v21 = vld [vmem:[#allocation21_spill] sm:$0xff]  ;;  %v2384_v30 = vrot.slane %v1543_v62, %v3831_v4 }
  0x57   :  { %3828 = vst [vmem:[#allocation16_spill] sm:$0xff] %v2338_v3  ;;  %3830 = vst [vmem:[#allocation17_spill] sm:$0xff] %v2341_v61  ;;  %v2355_v43 = vadd.f32 %v390_v38, %v3833_v32  ;;  %v2358_v23 = vadd.f32 %v391_v37, %v3835_v21  ;;  %v3837_v25 = vld [vmem:[#allocation22_spill] sm:$0xff]  ;;  %v1531_v50 = vld [vmem:[%s3647_s1 + $0x228] sm:$0xff]  ;;  %v2372_v38 = vcombine.high %v1543_v62, %v1543_v62 }
  0x58   :  { %v2361_v26 = vadd.f32 %v392_v36, %v3837_v25  ;;  %v1532_v51 = vld [vmem:[%s3647_s1 + $0x230] sm:$0xff]  ;;  %v1533_v35 = vld [vmem:[%s3647_s1 + $0x238] sm:$0xff]  ;;  %v1534_v37 = vld [vmem:[%s3647_s1 + $0x240] sm:$0xff]  ;;  %3840 = vst [vmem:[#allocation22_spill] sm:$0xff] %v2384_v30  ;;  %v2387_v31 = vrot.slane %v1543_v62, %v3832_v9  ;;  %v2395_v49 = vrot.slane %v2338_v3, %v3831_v4  ;;  %v464_v27 = vrot.slane %v435_v44, %v3831_v4 }
  0x59   :  { %3834 = vst [vmem:[#allocation18_spill] sm:$0xff] %v2355_v43  ;;  %3836 = vst [vmem:[#allocation19_spill] sm:$0xff] %v2358_v23  ;;  %v1535_v36 = vld [vmem:[%s3647_s1 + $0x248] sm:$0xff]  ;;  %v1536_v28 = vld [vmem:[%s3647_s1 + $0x250] sm:$0xff]  ;;  %v468_v6 = vrot.slane %v435_v44, %v3832_v9  ;;  %v473_v7 = vmul.f32 %v1526_v2, %v456_v46  ;;  %v474_v41 = vmul.f32 %v1527_v42, %v460_v8 }
  0x5a   :  { %3838 = vst [vmem:[#allocation20_spill] sm:$0xff] %v2361_v26  ;;  %3839 = vst [vmem:[#allocation21_spill] sm:$0xff] %v2372_v38  ;;  %v1537_v53 = vld [vmem:[%s3647_s1 + $0x258] sm:$0xff]  ;;  %v1538_v15 = vld [vmem:[%s3647_s1 + $0x260] sm:$0xff]  ;;  %v475_v25 = vmul.f32 %v1528_v22, %v456_v46  ;;  %v478_v3 = vmul.f32 %v1531_v50, %v460_v8  ;;  %v480_v30 = vmul.f32 %v1533_v35, %v460_v8 }
  0x5b   :  { %3841 = vst [vmem:[#allocation28_spill] sm:$0xff] %v2387_v31  ;;  %3842 = vst [vmem:[#allocation29_spill] sm:$0xff] %v2391_v47  ;;  %v1539_v62 = vld [vmem:[%s3647_s1 + $0x268] sm:$0xff]  ;;  %v1540_v32 = vld [vmem:[%s3647_s1 + $0x270] sm:$0xff]  ;;  %v477_v47 = vmul.f32 %v1530_v10, %v456_v46  ;;  %v479_v31 = vmul.f32 %v1532_v51, %v456_v46  ;;  %v481_v38 = vmul.f32 %v1534_v37, %v456_v46 }
  0x5c   :  { %3843 = vst [vmem:[#allocation30_spill] sm:$0xff] %v2395_v49  ;;  %v1541_v21 = vld [vmem:[%s3647_s1 + $0x278] sm:$0xff]  ;;  %v476_v49 = vmul.f32 %v1529_v11, %v460_v8  ;;  %v482_v4 = vmul.f32 %v1535_v36, %v460_v8  ;;  %v483_v26 = vmul.f32 %v1536_v28, %v456_v46  ;;  %v484_v44 = vmul.f32 %v1537_v53, %v460_v8 }
  0x5d   :  { %v485_v9 = vmul.f32 %v1538_v15, %v456_v46  ;;  %v486_v23 = vmul.f32 %v1539_v62, %v460_v8  ;;  %v487_v43 = vmul.f32 %v1540_v32, %v456_v46  ;;  %v488_v61 = vmul.f32 %v1541_v21, %v460_v8 }
  0x5e   :  { %v489_v13 = vmul.f32 %v1526_v2, %v464_v27  ;;  %v490_v14 = vmul.f32 %v1527_v42, %v468_v6  ;;  %v491_v16 = vmul.f32 %v1528_v22, %v464_v27  ;;  %v492_v29 = vmul.f32 %v1529_v11, %v468_v6 }
  0x5f   :  { %v493_v63 = vmul.f32 %v1530_v10, %v464_v27  ;;  %v494_v40 = vmul.f32 %v1531_v50, %v468_v6  ;;  %v495_v0 = vmul.f32 %v1532_v51, %v464_v27  ;;  %v496_v33 = vmul.f32 %v1533_v35, %v468_v6 }
  0x60   :  { %v497_v58 = vmul.f32 %v1534_v37, %v464_v27  ;;  %v498_v56 = vmul.f32 %v1535_v36, %v468_v6  ;;  %v499_v57 = vmul.f32 %v1536_v28, %v464_v27  ;;  %v500_v1 = vmul.f32 %v1537_v53, %v468_v6  ;;  %v3871_v53 = vld [vmem:[#allocation13_spill] sm:$0xff] }
  0x61   :  { %v501_v5 = vmul.f32 %v1538_v15, %v464_v27  ;;  %v502_v48 = vmul.f32 %v1539_v62, %v468_v6  ;;  %v503_v39 = vmul.f32 %v1540_v32, %v464_v27  ;;  %v504_v12 = vmul.f32 %v1541_v21, %v468_v6  ;;  %v1548_v62 = vld [vmem:[%s3647_s1 + $0x2a0] sm:$0xff]  ;;  %v1549_v27 = vld [vmem:[%s3647_s1 + $0x2a8] sm:$0xff] }
  0x62   :  { %v2415_v20 = vadd.f32 %v473_v7, %v2240_v24  ;;  %v2418_v2 = vadd.f32 %v474_v41, %v2243_v45  ;;  %v2421_v42 = vadd.f32 %v475_v25, %v2246_v59  ;;  %v2424_v22 = vadd.f32 %v476_v49, %v2249_v18  ;;  %v3879_v32 = vld [vmem:[#allocation18_spill] sm:$0xff]  ;;  %v1551_v25 = vld [vmem:[%s3647_s1 + $0x2b8] sm:$0xff] }
  0x63   :  { %v2427_v11 = vadd.f32 %v477_v47, %v2252_v17  ;;  %v2430_v10 = vadd.f32 %v478_v3, %v2255_v60  ;;  %v2433_v46 = vadd.f32 %v479_v31, %v2258_v52  ;;  %v2436_v24 = vadd.f32 %v480_v30, %v2261_v34  ;;  %v3844_v17 = vld [vmem:[#allocation23_spill] sm:$0xff]  ;;  %v3845_v60 = vld [vmem:[#allocation25_spill] sm:$0xff]  ;;  %v3847_v52 = vld [vmem:[#allocation26_spill] sm:$0xff] }
  0x64   :  { %v2439_v45 = vadd.f32 %v481_v38, %v2264_v55  ;;  %v2442_v59 = vadd.f32 %v482_v4, %v2267_v54  ;;  %v2445_v18 = vadd.f32 %v483_v26, %v2270_v19  ;;  %v2448_v8 = vadd.f32 %v484_v44, %v3844_v17  ;;  %v3849_v34 = vld [vmem:[#allocation27_spill] sm:$0xff]  ;;  %v3851_v55 = vld [vmem:[#allocation24_spill] sm:$0xff]  ;;  %v3855_v19 = vld [vmem:[#allocation5_spill] sm:$0xff] }
  0x65   :  { %v2451_v3 = vadd.f32 %v485_v9, %v3845_v60  ;;  %v2454_v50 = vadd.f32 %v486_v23, %v3847_v52  ;;  %v2457_v51 = vadd.f32 %v487_v43, %v3849_v34  ;;  %v2460_v35 = vadd.f32 %v488_v61, %v3851_v55  ;;  %v3853_v54 = vld [vmem:[#allocation4_spill] sm:$0xff]  ;;  %v1544_v9 = vld [vmem:[%s3647_s1 + $0x280] sm:$0xff]  ;;  %v3859_v23 = vld [vmem:[#allocation7_spill] sm:$0xff] }
  0x66   :  { %v2463_v4 = vadd.f32 %v489_v13, %v3853_v54  ;;  %v2466_v26 = vadd.f32 %v490_v14, %v3855_v19  ;;  %v3857_v38 = vld [vmem:[#allocation6_spill] sm:$0xff]  ;;  %v2475_v36 = vadd.f32 %v492_v29, %v3859_v23  ;;  %v3861_v43 = vld [vmem:[#allocation8_spill] sm:$0xff]  ;;  %v3863_v61 = vld [vmem:[#allocation9_spill] sm:$0xff]  ;;  %v2502_v15 = vadd.f32 %v498_v56, %v3871_v53 }
  0x67   :  { %3846 = vst [vmem:[#allocation23_spill] sm:$0xff] %v2451_v3  ;;  %3848 = vst [vmem:[#allocation25_spill] sm:$0xff] %v2454_v50  ;;  %v2472_v37 = vadd.f32 %v491_v16, %v3857_v38  ;;  %v2478_v28 = vadd.f32 %v493_v63, %v3861_v43  ;;  %v2481_v30 = vadd.f32 %v494_v40, %v3863_v61  ;;  %v1545_v14 = vld [vmem:[%s3647_s1 + $0x288] sm:$0xff]  ;;  %v1546_v13 = vld [vmem:[%s3647_s1 + $0x290] sm:$0xff] }
  0x68   :  { %3850 = vst [vmem:[#allocation26_spill] sm:$0xff] %v2457_v51  ;;  %3852 = vst [vmem:[#allocation27_spill] sm:$0xff] %v2460_v35  ;;  %v1547_v16 = vld [vmem:[%s3647_s1 + $0x298] sm:$0xff]  ;;  %v3865_v29 = vld [vmem:[#allocation10_spill] sm:$0xff]  ;;  %v2523_v21 = vadd.f32 %v502_v48, %v3879_v32 }
  0x69   :  { %3854 = vst [vmem:[#allocation24_spill] sm:$0xff] %v2463_v4  ;;  %3856 = vst [vmem:[#allocation4_spill] sm:$0xff] %v2466_v26  ;;  %v2493_v31 = vadd.f32 %v495_v0, %v3865_v29  ;;  %v3867_v63 = vld [vmem:[#allocation11_spill] sm:$0xff]  ;;  %v3869_v40 = vld [vmem:[#allocation12_spill] sm:$0xff] }
  0x6a   :  { %3858 = vst [vmem:[#allocation5_spill] sm:$0xff] %v2472_v37  ;;  %3860 = vst [vmem:[#allocation6_spill] sm:$0xff] %v2475_v36  ;;  %v2496_v47 = vadd.f32 %v496_v33, %v3867_v63  ;;  %v2499_v49 = vadd.f32 %v497_v58, %v3869_v40  ;;  %v1550_v0 = vld [vmem:[%s3647_s1 + $0x2b0] sm:$0xff]  ;;  %v3873_v33 = vld [vmem:[#allocation14_spill] sm:$0xff] }
  0x6b   :  { %3862 = vst [vmem:[#allocation7_spill] sm:$0xff] %v2478_v28  ;;  %3864 = vst [vmem:[#allocation8_spill] sm:$0xff] %v2481_v30  ;;  %v2514_v6 = vadd.f32 %v499_v57, %v3873_v33  ;;  %v3875_v58 = vld [vmem:[#allocation15_spill] sm:$0xff]  ;;  %v3877_v56 = vld [vmem:[#allocation17_spill] sm:$0xff] }
  0x6c   :  { %3866 = vst [vmem:[#allocation9_spill] sm:$0xff] %v2493_v31  ;;  %3868 = vst [vmem:[#allocation10_spill] sm:$0xff] %v2496_v47  ;;  %v2517_v7 = vadd.f32 %v500_v1, %v3875_v58  ;;  %v2520_v41 = vadd.f32 %v501_v5, %v3877_v56  ;;  %v1552_v44 = vld [vmem:[%s3647_s1 + $0x2c0] sm:$0xff]  ;;  %v1553_v57 = vld [vmem:[%s3647_s1 + $0x2c8] sm:$0xff] }
  0x6d   :  { %3870 = vst [vmem:[#allocation11_spill] sm:$0xff] %v2499_v49  ;;  %3872 = vst [vmem:[#allocation12_spill] sm:$0xff] %v2502_v15  ;;  %v3881_v1 = vld [vmem:[#allocation19_spill] sm:$0xff]  ;;  %v3883_v5 = vld [vmem:[#allocation20_spill] sm:$0xff] }
  0x6e   :  { %3874 = vst [vmem:[#allocation13_spill] sm:$0xff] %v2514_v6  ;;  %3876 = vst [vmem:[#allocation14_spill] sm:$0xff] %v2517_v7  ;;  %v2535_v17 = vadd.f32 %v503_v39, %v3881_v1  ;;  %v2538_v60 = vadd.f32 %v504_v12, %v3883_v5  ;;  %v1554_v48 = vld [vmem:[%s3647_s1 + $0x2d0] sm:$0xff]  ;;  %v1555_v52 = vld [vmem:[%s3647_s1 + $0x2d8] sm:$0xff] }
  0x6f   :  { %3878 = vst [vmem:[#allocation15_spill] sm:$0xff] %v2520_v41  ;;  %3880 = vst [vmem:[#allocation17_spill] sm:$0xff] %v2523_v21  ;;  %v1556_v34 = vld [vmem:[%s3647_s1 + $0x2e0] sm:$0xff]  ;;  %v3886_v54 = vld [vmem:[#allocation21_spill] sm:$0xff] }
  0x70   :  { %3882 = vst [vmem:[#allocation18_spill] sm:$0xff] %v2535_v17  ;;  %3884 = vst [vmem:[#allocation19_spill] sm:$0xff] %v2538_v60  ;;  %v3885_v55 = vld [vmem:[#allocation2_spill] sm:$0xff]  ;;  %v3887_v39 = vld [vmem:[#allocation3_spill] sm:$0xff] }
  0x71   :  { %v576_v19 = vrot.slane %v3886_v54, %v3885_v55  ;;  %v580_v38 = vrot.slane %v3886_v54, %v3887_v39  ;;  %v1557_v12 = vld [vmem:[%s3647_s1 + $0x2e8] sm:$0xff]  ;;  %v1558_v23 = vld [vmem:[%s3647_s1 + $0x2f0] sm:$0xff]  ;;  %v1559_v43 = vld [vmem:[%s3647_s1 + $0x2f8] sm:$0xff] }
  0x72   :  { %v3888_v61 = vld [vmem:[#allocation22_spill] sm:$0xff]  ;;  %v3889_v63 = vld [vmem:[#allocation28_spill] sm:$0xff] }
  0x73   :  { %v585_v29 = vmul.f32 %v1544_v9, %v3888_v61  ;;  %v586_v40 = vmul.f32 %v1545_v14, %v3889_v63  ;;  %v587_v53 = vmul.f32 %v1546_v13, %v3888_v61  ;;  %v588_v33 = vmul.f32 %v1547_v16, %v3889_v63 }
  0x74   :  { %v589_v58 = vmul.f32 %v1548_v62, %v3888_v61  ;;  %v590_v56 = vmul.f32 %v1549_v27, %v3889_v63  ;;  %v591_v32 = vmul.f32 %v1550_v0, %v3888_v61  ;;  %v592_v1 = vmul.f32 %v1551_v25, %v3889_v63 }
  0x75   :  { %v593_v5 = vmul.f32 %v1552_v44, %v3888_v61  ;;  %v594_v54 = vmul.f32 %v1553_v57, %v3889_v63  ;;  %v595_v55 = vmul.f32 %v1554_v48, %v3888_v61  ;;  %v596_v60 = vmul.f32 %v1555_v52, %v3889_v63 }
  0x76   :  { %v597_v39 = vmul.f32 %v1556_v34, %v3888_v61  ;;  %v598_v17 = vmul.f32 %v1557_v12, %v3889_v63  ;;  %v599_v21 = vmul.f32 %v1558_v23, %v3888_v61  ;;  %v600_v41 = vmul.f32 %v1559_v43, %v3889_v63  ;;  %v3921_v63 = vld [vmem:[#allocation14_spill] sm:$0xff] }
  0x77   :  { %v601_v7 = vmul.f32 %v1544_v9, %v576_v19  ;;  %v602_v6 = vmul.f32 %v1545_v14, %v580_v38  ;;  %v603_v15 = vmul.f32 %v1546_v13, %v576_v19  ;;  %v604_v49 = vmul.f32 %v1547_v16, %v580_v38 }
  0x78   :  { %v605_v47 = vmul.f32 %v1548_v62, %v576_v19  ;;  %v606_v31 = vmul.f32 %v1549_v27, %v580_v38  ;;  %v607_v30 = vmul.f32 %v1550_v0, %v576_v19  ;;  %v608_v28 = vmul.f32 %v1551_v25, %v580_v38 }
  0x79   :  { %v609_v36 = vmul.f32 %v1552_v44, %v576_v19  ;;  %v610_v37 = vmul.f32 %v1553_v57, %v580_v38  ;;  %v611_v26 = vmul.f32 %v1554_v48, %v576_v19  ;;  %v612_v4 = vmul.f32 %v1555_v52, %v580_v38 }
  0x7a   :  { %v613_v35 = vmul.f32 %v1556_v34, %v576_v19  ;;  %v614_v51 = vmul.f32 %v1557_v12, %v580_v38  ;;  %v615_v50 = vmul.f32 %v1558_v23, %v576_v19  ;;  %v616_v3 = vmul.f32 %v1559_v43, %v580_v38  ;;  %v3905_v34 = vld [vmem:[#allocation6_spill] sm:$0xff] }
  0x7b   :  { %v2579_v61 = vadd.f32 %v585_v29, %v2415_v20  ;;  %v2582_v9 = vadd.f32 %v586_v40, %v2418_v2  ;;  %v2585_v14 = vadd.f32 %v587_v53, %v2421_v42  ;;  %v2588_v13 = vadd.f32 %v588_v33, %v2424_v22  ;;  %v1566_v53 = vld [vmem:[%s3647_s1 + $0x320] sm:$0xff]  ;;  %v1568_v33 = vld [vmem:[%s3647_s1 + $0x330] sm:$0xff] }
  0x7c   :  { %v2591_v16 = vadd.f32 %v589_v58, %v2427_v11  ;;  %v2594_v62 = vadd.f32 %v590_v56, %v2430_v10  ;;  %v2597_v27 = vadd.f32 %v591_v32, %v2433_v46  ;;  %v2600_v20 = vadd.f32 %v592_v1, %v2436_v24  ;;  %v3891_v10 = vld [vmem:[#allocation23_spill] sm:$0xff]  ;;  %v3893_v46 = vld [vmem:[#allocation25_spill] sm:$0xff]  ;;  %v3895_v24 = vld [vmem:[#allocation26_spill] sm:$0xff] }
  0x7d   :  { %v2603_v2 = vadd.f32 %v593_v5, %v2439_v45  ;;  %v2606_v42 = vadd.f32 %v594_v54, %v2442_v59  ;;  %v2609_v22 = vadd.f32 %v595_v55, %v2445_v18  ;;  %v2612_v11 = vadd.f32 %v596_v60, %v2448_v8  ;;  %v3897_v45 = vld [vmem:[#allocation27_spill] sm:$0xff]  ;;  %v3899_v59 = vld [vmem:[#allocation24_spill] sm:$0xff]  ;;  %v3903_v8 = vld [vmem:[#allocation5_spill] sm:$0xff] }
  0x7e   :  { %v2615_v0 = vadd.f32 %v597_v39, %v3891_v10  ;;  %v2618_v25 = vadd.f32 %v598_v17, %v3893_v46  ;;  %v2621_v44 = vadd.f32 %v599_v21, %v3895_v24  ;;  %v2624_v57 = vadd.f32 %v600_v41, %v3897_v45  ;;  %v3901_v18 = vld [vmem:[#allocation4_spill] sm:$0xff]  ;;  %v1562_v21 = vld [vmem:[%s3647_s1 + $0x300] sm:$0xff]  ;;  %v3907_v17 = vld [vmem:[#allocation7_spill] sm:$0xff] }
  0x7f   :  { %3890 = vst [vmem:[#allocation20_spill] sm:$0xff] %v2612_v11  ;;  %v2627_v48 = vadd.f32 %v601_v7, %v3899_v59  ;;  %v2630_v52 = vadd.f32 %v602_v6, %v3901_v18  ;;  %v2633_v60 = vadd.f32 %v603_v15, %v3903_v8  ;;  %v2636_v55 = vadd.f32 %v604_v49, %v3905_v34  ;;  %v3909_v41 = vld [vmem:[#allocation8_spill] sm:$0xff]  ;;  %v3911_v7 = vld [vmem:[#allocation9_spill] sm:$0xff]  ;;  %v3913_v6 = vld [vmem:[#allocation10_spill] sm:$0xff] }
  0x80   :  { %3892 = vst [vmem:[#allocation21_spill] sm:$0xff] %v2615_v0  ;;  %3894 = vst [vmem:[#allocation22_spill] sm:$0xff] %v2618_v25  ;;  %v2642_v19 = vadd.f32 %v605_v47, %v3907_v17  ;;  %v2645_v39 = vadd.f32 %v606_v31, %v3909_v41  ;;  %v2648_v38 = vadd.f32 %v607_v30, %v3911_v7  ;;  %v1563_v49 = vld [vmem:[%s3647_s1 + $0x308] sm:$0xff]  ;;  %v1564_v15 = vld [vmem:[%s3647_s1 + $0x310] sm:$0xff] }
  0x81   :  { %3896 = vst [vmem:[#allocation28_spill] sm:$0xff] %v2621_v44  ;;  %3898 = vst [vmem:[#allocation23_spill] sm:$0xff] %v2624_v57  ;;  %v2651_v12 = vadd.f32 %v608_v28, %v3913_v6  ;;  %v1565_v47 = vld [vmem:[%s3647_s1 + $0x318] sm:$0xff]  ;;  %v3915_v31 = vld [vmem:[#allocation11_spill] sm:$0xff]  ;;  %v2672_v40 = vadd.f32 %v612_v4, %v3921_v63 }
  0x82   :  { %3900 = vst [vmem:[#allocation25_spill] sm:$0xff] %v2627_v48  ;;  %3902 = vst [vmem:[#allocation26_spill] sm:$0xff] %v2630_v52  ;;  %v2663_v23 = vadd.f32 %v609_v36, %v3915_v31  ;;  %v3917_v30 = vld [vmem:[#allocation12_spill] sm:$0xff]  ;;  %v3919_v28 = vld [vmem:[#allocation13_spill] sm:$0xff] }
  0x83   :  { %3904 = vst [vmem:[#allocation27_spill] sm:$0xff] %v2633_v60  ;;  %3906 = vst [vmem:[#allocation24_spill] sm:$0xff] %v2636_v55  ;;  %v2666_v43 = vadd.f32 %v610_v37, %v3917_v30  ;;  %v2669_v29 = vadd.f32 %v611_v26, %v3919_v28  ;;  %v1570_v36 = vld [vmem:[%s3647_s1 + $0x340] sm:$0xff]  ;;  %v3923_v37 = vld [vmem:[#allocation15_spill] sm:$0xff] }
  0x84   :  { %3908 = vst [vmem:[#allocation4_spill] sm:$0xff] %v2642_v19  ;;  %3910 = vst [vmem:[#allocation5_spill] sm:$0xff] %v2645_v39  ;;  %v2684_v58 = vadd.f32 %v613_v35, %v3923_v37  ;;  %v3925_v26 = vld [vmem:[#allocation17_spill] sm:$0xff]  ;;  %v3927_v4 = vld [vmem:[#allocation18_spill] sm:$0xff] }
  0x85   :  { %3912 = vst [vmem:[#allocation6_spill] sm:$0xff] %v2648_v38  ;;  %3914 = vst [vmem:[#allocation7_spill] sm:$0xff] %v2651_v12  ;;  %v2687_v56 = vadd.f32 %v614_v51, %v3925_v26  ;;  %v2690_v32 = vadd.f32 %v615_v50, %v3927_v4  ;;  %v1567_v1 = vld [vmem:[%s3647_s1 + $0x328] sm:$0xff]  ;;  %v1569_v5 = vld [vmem:[%s3647_s1 + $0x338] sm:$0xff] }
  0x86   :  { %3916 = vst [vmem:[#allocation8_spill] sm:$0xff] %v2663_v23  ;;  %3918 = vst [vmem:[#allocation9_spill] sm:$0xff] %v2666_v43  ;;  %v1571_v54 = vld [vmem:[%s3647_s1 + $0x348] sm:$0xff]  ;;  %v3930_v10 = vld [vmem:[#allocation16_spill] sm:$0xff] }
  0x87   :  { %3920 = vst [vmem:[#allocation10_spill] sm:$0xff] %v2669_v29  ;;  %3922 = vst [vmem:[#allocation11_spill] sm:$0xff] %v2672_v40  ;;  %v3929_v35 = vld [vmem:[#allocation3_spill] sm:$0xff]  ;;  %v1572_v50 = vld [vmem:[%s3647_s1 + $0x350] sm:$0xff] }
  0x88   :  { %3924 = vst [vmem:[#allocation12_spill] sm:$0xff] %v2684_v58  ;;  %3926 = vst [vmem:[#allocation13_spill] sm:$0xff] %v2687_v56  ;;  %v684_v46 = vrot.slane %v3930_v10, %v3929_v35  ;;  %v3931_v51 = vld [vmem:[#allocation19_spill] sm:$0xff]  ;;  %v1573_v45 = vld [vmem:[%s3647_s1 + $0x358] sm:$0xff] }
  0x89   :  { %3928 = vst [vmem:[#allocation14_spill] sm:$0xff] %v2690_v32  ;;  %v2704_v24 = vadd.f32 %v616_v3, %v3931_v51  ;;  %v1574_v59 = vld [vmem:[%s3647_s1 + $0x360] sm:$0xff]  ;;  %v3934_v8 = vld [vmem:[#allocation29_spill] sm:$0xff]  ;;  %v1575_v7 = vld [vmem:[%s3647_s1 + $0x368] sm:$0xff] }
  0x8a   :  { %v3933_v18 = vld [vmem:[#allocation2_spill] sm:$0xff]  ;;  %v692_v17 = vrot.slane %v3934_v8, %v3929_v35  ;;  %v1576_v6 = vld [vmem:[%s3647_s1 + $0x370] sm:$0xff]  ;;  %v1577_v31 = vld [vmem:[%s3647_s1 + $0x378] sm:$0xff]  ;;  %v698_v26 = vmul.f32 %v1563_v49, %v684_v46  ;;  %v700_v4 = vmul.f32 %v1565_v47, %v684_v46  ;;  %v702_v10 = vmul.f32 %v1567_v1, %v684_v46 }
  0x8b   :  { %3932 = vst [vmem:[#allocation15_spill] sm:$0xff] %v2704_v24  ;;  %v688_v34 = vrot.slane %v3934_v8, %v3933_v18  ;;  %v3935_v3 = vld [vmem:[#allocation30_spill] sm:$0xff]  ;;  %v704_v51 = vmul.f32 %v1569_v5, %v684_v46  ;;  %v706_v8 = vmul.f32 %v1571_v54, %v684_v46  ;;  %v708_v32 = vmul.f32 %v1573_v45, %v684_v46 }
  0x8c   :  { %v697_v41 = vmul.f32 %v1562_v21, %v3935_v3  ;;  %v699_v30 = vmul.f32 %v1564_v15, %v3935_v3  ;;  %v701_v28 = vmul.f32 %v1566_v53, %v3935_v3  ;;  %v703_v63 = vmul.f32 %v1568_v33, %v3935_v3 }
  0x8d   :  { %v705_v37 = vmul.f32 %v1570_v36, %v3935_v3  ;;  %v707_v24 = vmul.f32 %v1572_v50, %v3935_v3  ;;  %v709_v35 = vmul.f32 %v1574_v59, %v3935_v3  ;;  %v710_v18 = vmul.f32 %v1575_v7, %v684_v46 }
  0x8e   :  { %v711_v56 = vmul.f32 %v1576_v6, %v3935_v3  ;;  %v712_v58 = vmul.f32 %v1577_v31, %v684_v46  ;;  %v713_v40 = vmul.f32 %v1562_v21, %v688_v34  ;;  %v714_v29 = vmul.f32 %v1563_v49, %v692_v17 }
  0x8f   :  { %v715_v43 = vmul.f32 %v1564_v15, %v688_v34  ;;  %v716_v23 = vmul.f32 %v1565_v47, %v692_v17  ;;  %v717_v12 = vmul.f32 %v1566_v53, %v688_v34  ;;  %v718_v38 = vmul.f32 %v1567_v1, %v692_v17 }
  0x90   :  { %v719_v39 = vmul.f32 %v1568_v33, %v688_v34  ;;  %v720_v19 = vmul.f32 %v1569_v5, %v692_v17  ;;  %v721_v55 = vmul.f32 %v1570_v36, %v688_v34  ;;  %v722_v60 = vmul.f32 %v1571_v54, %v692_v17 }
  0x91   :  { %v723_v52 = vmul.f32 %v1572_v50, %v688_v34  ;;  %v724_v48 = vmul.f32 %v1573_v45, %v692_v17  ;;  %v725_v57 = vmul.f32 %v1574_v59, %v688_v34  ;;  %v726_v44 = vmul.f32 %v1575_v7, %v692_v17  ;;  %v3952_v59 = vld [vmem:[#allocation24_spill] sm:$0xff] }
  0x92   :  { %v727_v25 = vmul.f32 %v1576_v6, %v688_v34  ;;  %v728_v0 = vmul.f32 %v1577_v31, %v692_v17  ;;  %v2737_v11 = vadd.f32 %v697_v41, %v2579_v61  ;;  %v2740_v21 = vadd.f32 %v698_v26, %v2582_v9  ;;  %v3960_v41 = vld [vmem:[#allocation7_spill] sm:$0xff]  ;;  %v3971_v26 = vld [vmem:[#allocation12_spill] sm:$0xff] }
  0x93   :  { %v2743_v49 = vadd.f32 %v699_v30, %v2585_v14  ;;  %v2746_v15 = vadd.f32 %v700_v4, %v2588_v13  ;;  %v2749_v47 = vadd.f32 %v701_v28, %v2591_v16  ;;  %v2752_v53 = vadd.f32 %v702_v10, %v2594_v62  ;;  %v3936_v16 = vld [vmem:[#allocation20_spill] sm:$0xff]  ;;  %v3938_v62 = vld [vmem:[#allocation21_spill] sm:$0xff]  ;;  %v1584_v10 = vld [vmem:[%s3647_s1 + $0x3a0] sm:$0xff] }
  0x94   :  { %v2755_v33 = vadd.f32 %v703_v63, %v2597_v27  ;;  %v2758_v61 = vadd.f32 %v704_v51, %v2600_v20  ;;  %v2761_v9 = vadd.f32 %v705_v37, %v2603_v2  ;;  %v2764_v14 = vadd.f32 %v706_v8, %v2606_v42  ;;  %v3940_v27 = vld [vmem:[#allocation22_spill] sm:$0xff]  ;;  %v3942_v20 = vld [vmem:[#allocation28_spill] sm:$0xff]  ;;  %v3944_v2 = vld [vmem:[#allocation23_spill] sm:$0xff] }
  0x95   :  { %v2767_v13 = vadd.f32 %v707_v24, %v2609_v22  ;;  %v2770_v36 = vadd.f32 %v708_v32, %v3936_v16  ;;  %v2773_v1 = vadd.f32 %v709_v35, %v3938_v62  ;;  %v2776_v5 = vadd.f32 %v710_v18, %v3940_v27  ;;  %v3946_v42 = vld [vmem:[#allocation25_spill] sm:$0xff]  ;;  %v3948_v32 = vld [vmem:[#allocation26_spill] sm:$0xff]  ;;  %v3950_v35 = vld [vmem:[#allocation27_spill] sm:$0xff] }
  0x96   :  { %v2779_v54 = vadd.f32 %v711_v56, %v3942_v20  ;;  %v2782_v46 = vadd.f32 %v712_v58, %v3944_v2  ;;  %v2785_v50 = vadd.f32 %v713_v40, %v3946_v42  ;;  %v1579_v22 = vld.sshfl [vmem:[%s3646_s0 + $0x1c] sm:$0x33 pattern:$0x75316420]  ;;  %v2791_v24 = vadd.f32 %v714_v29, %v3948_v32  ;;  %v3954_v56 = vld [vmem:[#allocation4_spill] sm:$0xff]  ;;  %v3958_v40 = vld [vmem:[#allocation6_spill] sm:$0xff] }
  0x97   :  { %3937 = vst [vmem:[#allocation17_spill] sm:$0xff] %v2770_v36  ;;  %3939 = vst [vmem:[#allocation18_spill] sm:$0xff] %v2773_v1  ;;  %v2794_v45 = vadd.f32 %v715_v43, %v3950_v35  ;;  %v2797_v18 = vadd.f32 %v716_v23, %v3952_v59  ;;  %v2800_v34 = vadd.f32 %v717_v12, %v3954_v56  ;;  %v3956_v58 = vld [vmem:[#allocation5_spill] sm:$0xff]  ;;  %v3962_v29 = vld [vmem:[#allocation8_spill] sm:$0xff] }
  0x98   :  { %3941 = vst [vmem:[#allocation16_spill] sm:$0xff] %v2776_v5  ;;  %3943 = vst [vmem:[#allocation19_spill] sm:$0xff] %v2779_v54  ;;  %v2803_v17 = vadd.f32 %v718_v38, %v3956_v58  ;;  %v2806_v3 = vadd.f32 %v719_v39, %v3958_v40  ;;  %v2809_v7 = vadd.f32 %v720_v19, %v3960_v41  ;;  %v1580_v23 = vld [vmem:[%s3647_s1 + $0x380] sm:$0xff]  ;;  %v1581_v12 = vld [vmem:[%s3647_s1 + $0x388] sm:$0xff] }
  0x99   :  { %3945 = vst [vmem:[#allocation29_spill] sm:$0xff] %v2782_v46  ;;  %3947 = vst [vmem:[#allocation30_spill] sm:$0xff] %v2785_v50  ;;  %v2812_v6 = vadd.f32 %v721_v55, %v3962_v29  ;;  %v1597_v38 = vld.sshfl [vmem:[%s3646_s0 + $0x20] sm:$0x33 pattern:$0x75316420]  ;;  %v771_v28 = vcombine.high %v1579_v22, %v1579_v22 }
  0x9a   :  { %3949 = vst [vmem:[#allocation20_spill] sm:$0xff] %v2791_v24  ;;  %3951 = vst [vmem:[#allocation21_spill] sm:$0xff] %v2794_v45  ;;  %v3964_v39 = vld [vmem:[#allocation9_spill] sm:$0xff]  ;;  %v3966_v19 = vld [vmem:[#allocation10_spill] sm:$0xff]  ;;  %v2875_v56 = vcombine.high %v1597_v38, %v1597_v38 }
  0x9b   :  { %3953 = vst [vmem:[#allocation22_spill] sm:$0xff] %v2797_v18  ;;  %3955 = vst [vmem:[#allocation28_spill] sm:$0xff] %v2800_v34  ;;  %v2824_v43 = vadd.f32 %v722_v60, %v3964_v39  ;;  %v2827_v31 = vadd.f32 %v723_v52, %v3966_v19  ;;  %v3968_v55 = vld [vmem:[#allocation11_spill] sm:$0xff]  ;;  %v1582_v63 = vld [vmem:[%s3647_s1 + $0x390] sm:$0xff]  ;;  %v2844_v52 = vadd.f32 %v725_v57, %v3971_v26 }
  0x9c   :  { %3957 = vst [vmem:[#allocation23_spill] sm:$0xff] %v2803_v17  ;;  %3959 = vst [vmem:[#allocation25_spill] sm:$0xff] %v2806_v3  ;;  %v2830_v30 = vadd.f32 %v724_v48, %v3968_v55  ;;  %v1583_v37 = vld [vmem:[%s3647_s1 + $0x398] sm:$0xff]  ;;  %v1585_v51 = vld [vmem:[%s3647_s1 + $0x3a8] sm:$0xff] }
  0x9d   :  { %3961 = vst [vmem:[#allocation26_spill] sm:$0xff] %v2809_v7  ;;  %3963 = vst [vmem:[#allocation27_spill] sm:$0xff] %v2812_v6  ;;  %v2841_v60 = vld.sshfl [vmem:[%s3646_s0 + $0x24] sm:$0x33 pattern:$0x75316420] }
  0x9e   :  { %3965 = vst [vmem:[#allocation24_spill] sm:$0xff] %v2824_v43  ;;  %3967 = vst [vmem:[#allocation4_spill] sm:$0xff] %v2827_v31  ;;  %v3973_v4 = vld [vmem:[#allocation13_spill] sm:$0xff]  ;;  %v1586_v8 = vld [vmem:[%s3647_s1 + $0x3b0] sm:$0xff]  ;;  %v2896_v39 = vcombine.high %v2841_v60, %v2841_v60 }
  0x9f   :  { %3969 = vst [vmem:[#allocation5_spill] sm:$0xff] %v2830_v30  ;;  %3970 = vst [vmem:[#allocation6_spill] sm:$0xff] %v2841_v60  ;;  %v2847_v48 = vadd.f32 %v726_v44, %v3973_v4  ;;  %v3975_v16 = vld [vmem:[#allocation2_spill] sm:$0xff]  ;;  %v3976_v27 = vld [vmem:[#allocation3_spill] sm:$0xff] }
  0xa0   :  { %3972 = vst [vmem:[#allocation7_spill] sm:$0xff] %v2844_v52  ;;  %v792_v62 = vrot.slane %v1579_v22, %v3975_v16  ;;  %v796_v57 = vrot.slane %v1579_v22, %v3976_v27  ;;  %v3977_v20 = vld [vmem:[#allocation14_spill] sm:$0xff]  ;;  %v3979_v44 = vld [vmem:[#allocation15_spill] sm:$0xff]  ;;  %v1587_v32 = vld [vmem:[%s3647_s1 + $0x3b8] sm:$0xff]  ;;  %v800_v40 = vrot.slane %v771_v28, %v3975_v16  ;;  %v804_v41 = vrot.slane %v771_v28, %v3976_v27 }
  0xa1   :  { %3974 = vst [vmem:[#allocation8_spill] sm:$0xff] %v2847_v48  ;;  %v2861_v2 = vadd.f32 %v727_v25, %v3977_v20  ;;  %v2864_v42 = vadd.f32 %v728_v0, %v3979_v44  ;;  %v1588_v35 = vld [vmem:[%s3647_s1 + $0x3c0] sm:$0xff]  ;;  %v1589_v59 = vld [vmem:[%s3647_s1 + $0x3c8] sm:$0xff]  ;;  %3981 = vst [vmem:[#allocation11_spill] sm:$0xff] %v2875_v56  ;;  %v2878_v25 = vrot.slane %v1597_v38, %v3975_v16 }
  0xa2   :  { %v1590_v0 = vld [vmem:[%s3647_s1 + $0x3d0] sm:$0xff]  ;;  %v1591_v22 = vld [vmem:[%s3647_s1 + $0x3d8] sm:$0xff]  ;;  %v1592_v58 = vld [vmem:[%s3647_s1 + $0x3e0] sm:$0xff]  ;;  %v2892_v29 = vrot.slane %v1597_v38, %v3976_v27  ;;  %3984 = vst [vmem:[#allocation14_spill] sm:$0xff] %v2896_v39  ;;  %v809_v28 = vmul.f32 %v1580_v23, %v792_v62  ;;  %v810_v4 = vmul.f32 %v1581_v12, %v796_v57  ;;  %v811_v38 = vmul.f32 %v1582_v63, %v792_v62 }
  0xa3   :  { %3978 = vst [vmem:[#allocation9_spill] sm:$0xff] %v2861_v2  ;;  %3980 = vst [vmem:[#allocation10_spill] sm:$0xff] %v2864_v42  ;;  %v1593_v19 = vld [vmem:[%s3647_s1 + $0x3e8] sm:$0xff]  ;;  %v1594_v55 = vld [vmem:[%s3647_s1 + $0x3f0] sm:$0xff]  ;;  %v812_v20 = vmul.f32 %v1583_v37, %v796_v57  ;;  %v813_v44 = vmul.f32 %v1584_v10, %v792_v62  ;;  %v815_v60 = vmul.f32 %v1586_v8, %v792_v62 }
  0xa4   :  { %3982 = vst [vmem:[#allocation12_spill] sm:$0xff] %v2878_v25  ;;  %3983 = vst [vmem:[#allocation13_spill] sm:$0xff] %v2892_v29  ;;  %v1595_v26 = vld [vmem:[%s3647_s1 + $0x3f8] sm:$0xff]  ;;  %v814_v29 = vmul.f32 %v1585_v51, %v796_v57  ;;  %v816_v39 = vmul.f32 %v1587_v32, %v796_v57  ;;  %v817_v25 = vmul.f32 %v1588_v35, %v792_v62 }
  0xa5   :  { %v818_v27 = vmul.f32 %v1589_v59, %v796_v57  ;;  %v819_v56 = vmul.f32 %v1590_v0, %v792_v62  ;;  %v820_v16 = vmul.f32 %v1591_v22, %v796_v57  ;;  %v821_v42 = vmul.f32 %v1592_v58, %v792_v62 }
  0xa6   :  { %v822_v2 = vmul.f32 %v1593_v19, %v796_v57  ;;  %v823_v48 = vmul.f32 %v1594_v55, %v792_v62  ;;  %v824_v52 = vmul.f32 %v1595_v26, %v796_v57  ;;  %v825_v30 = vmul.f32 %v1580_v23, %v800_v40 }
  0xa7   :  { %v826_v31 = vmul.f32 %v1581_v12, %v804_v41  ;;  %v827_v43 = vmul.f32 %v1582_v63, %v800_v40  ;;  %v828_v6 = vmul.f32 %v1583_v37, %v804_v41  ;;  %v829_v7 = vmul.f32 %v1584_v10, %v800_v40 }
  0xa8   :  { %v830_v3 = vmul.f32 %v1585_v51, %v804_v41  ;;  %v831_v17 = vmul.f32 %v1586_v8, %v800_v40  ;;  %v832_v34 = vmul.f32 %v1587_v32, %v804_v41  ;;  %v833_v18 = vmul.f32 %v1588_v35, %v800_v40 }
  0xa9   :  { %v834_v45 = vmul.f32 %v1589_v59, %v804_v41  ;;  %v835_v24 = vmul.f32 %v1590_v0, %v800_v40  ;;  %v836_v50 = vmul.f32 %v1591_v22, %v804_v41  ;;  %v837_v46 = vmul.f32 %v1592_v58, %v800_v40  ;;  %v4006_v0 = vld [vmem:[#allocation25_spill] sm:$0xff]  ;;  %v4008_v22 = vld [vmem:[#allocation26_spill] sm:$0xff]  ;;  %v1600_v58 = vld [vmem:[%s3647_s1 + $0x410] sm:$0xff] }
  0xaa   :  { %v838_v54 = vmul.f32 %v1593_v19, %v804_v41  ;;  %v839_v5 = vmul.f32 %v1594_v55, %v800_v40  ;;  %v840_v1 = vmul.f32 %v1595_v26, %v804_v41  ;;  %v2908_v36 = vadd.f32 %v809_v28, %v2737_v11  ;;  %v1601_v40 = vld [vmem:[%s3647_s1 + $0x418] sm:$0xff]  ;;  %v1603_v26 = vld [vmem:[%s3647_s1 + $0x428] sm:$0xff]  ;;  %v1604_v28 = vld [vmem:[%s3647_s1 + $0x430] sm:$0xff] }
  0xab   :  { %v2911_v23 = vadd.f32 %v810_v4, %v2740_v21  ;;  %v2914_v12 = vadd.f32 %v811_v38, %v2743_v49  ;;  %v2917_v63 = vadd.f32 %v812_v20, %v2746_v15  ;;  %v2920_v37 = vadd.f32 %v813_v44, %v2749_v47  ;;  %v3985_v47 = vld [vmem:[#allocation17_spill] sm:$0xff]  ;;  %v4024_v44 = vld [vmem:[#allocation10_spill] sm:$0xff] }
  0xac   :  { %v2923_v10 = vadd.f32 %v814_v29, %v2752_v53  ;;  %v2926_v51 = vadd.f32 %v815_v60, %v2755_v33  ;;  %v2929_v11 = vadd.f32 %v816_v39, %v2758_v61  ;;  %v2932_v21 = vadd.f32 %v817_v25, %v2761_v9  ;;  %v3986_v53 = vld [vmem:[#allocation18_spill] sm:$0xff]  ;;  %v3988_v33 = vld [vmem:[#allocation16_spill] sm:$0xff]  ;;  %v3990_v61 = vld [vmem:[#allocation19_spill] sm:$0xff] }
  0xad   :  { %v2935_v49 = vadd.f32 %v818_v27, %v2764_v14  ;;  %v2938_v15 = vadd.f32 %v819_v56, %v2767_v13  ;;  %v2941_v8 = vadd.f32 %v820_v16, %v3985_v47  ;;  %v2944_v62 = vadd.f32 %v821_v42, %v3986_v53  ;;  %v3992_v9 = vld [vmem:[#allocation29_spill] sm:$0xff]  ;;  %v3994_v14 = vld [vmem:[#allocation30_spill] sm:$0xff]  ;;  %v3996_v13 = vld [vmem:[#allocation20_spill] sm:$0xff] }
  0xae   :  { %v2947_v60 = vadd.f32 %v822_v2, %v3988_v33  ;;  %v2950_v57 = vadd.f32 %v823_v48, %v3990_v61  ;;  %v2953_v32 = vadd.f32 %v824_v52, %v3992_v9  ;;  %v2956_v27 = vadd.f32 %v825_v30, %v3994_v14  ;;  %v3998_v16 = vld [vmem:[#allocation21_spill] sm:$0xff]  ;;  %v4000_v42 = vld [vmem:[#allocation22_spill] sm:$0xff]  ;;  %v1599_v52 = vld [vmem:[%s3647_s1 + $0x408] sm:$0xff] }
  0xaf   :  { %3987 = vst [vmem:[#allocation15_spill] sm:$0xff] %v2944_v62  ;;  %v2959_v35 = vadd.f32 %v826_v31, %v3996_v13  ;;  %v2962_v59 = vadd.f32 %v827_v43, %v3998_v16  ;;  %v2965_v56 = vadd.f32 %v828_v6, %v4000_v42  ;;  %v1598_v48 = vld [vmem:[%s3647_s1 + $0x400] sm:$0xff]  ;;  %v4002_v2 = vld [vmem:[#allocation28_spill] sm:$0xff]  ;;  %v4004_v25 = vld [vmem:[#allocation23_spill] sm:$0xff]  ;;  %v2980_v43 = vadd.f32 %v831_v17, %v4006_v0 }
  0xb0   :  { %3989 = vst [vmem:[#allocation17_spill] sm:$0xff] %v2947_v60  ;;  %3991 = vst [vmem:[#allocation18_spill] sm:$0xff] %v2950_v57  ;;  %v2974_v30 = vadd.f32 %v829_v7, %v4002_v2  ;;  %v2977_v31 = vadd.f32 %v830_v3, %v4004_v25  ;;  %v2983_v6 = vadd.f32 %v832_v34, %v4008_v22  ;;  %v1602_v7 = vld [vmem:[%s3647_s1 + $0x420] sm:$0xff]  ;;  %v4010_v3 = vld [vmem:[#allocation27_spill] sm:$0xff] }
  0xb1   :  { %3993 = vst [vmem:[#allocation16_spill] sm:$0xff] %v2953_v32  ;;  %3995 = vst [vmem:[#allocation19_spill] sm:$0xff] %v2956_v27  ;;  %v2995_v41 = vadd.f32 %v833_v18, %v4010_v3  ;;  %v4012_v17 = vld [vmem:[#allocation24_spill] sm:$0xff]  ;;  %v4016_v19 = vld [vmem:[#allocation5_spill] sm:$0xff]  ;;  %v3025_v47 = vadd.f32 %v840_v1, %v4024_v44 }
  0xb2   :  { %3997 = vst [vmem:[#allocation29_spill] sm:$0xff] %v2959_v35  ;;  %3999 = vst [vmem:[#allocation30_spill] sm:$0xff] %v2962_v59  ;;  %v2998_v29 = vadd.f32 %v834_v45, %v4012_v17  ;;  %v4014_v34 = vld [vmem:[#allocation4_spill] sm:$0xff]  ;;  %v3004_v55 = vadd.f32 %v836_v50, %v4016_v19  ;;  %v1605_v18 = vld [vmem:[%s3647_s1 + $0x438] sm:$0xff] }
  0xb3   :  { %4001 = vst [vmem:[#allocation20_spill] sm:$0xff] %v2965_v56  ;;  %4003 = vst [vmem:[#allocation21_spill] sm:$0xff] %v2974_v30  ;;  %v3001_v39 = vadd.f32 %v835_v24, %v4014_v34  ;;  %v4018_v45 = vld [vmem:[#allocation7_spill] sm:$0xff]  ;;  %v4020_v24 = vld [vmem:[#allocation8_spill] sm:$0xff] }
  0xb4   :  { %4005 = vst [vmem:[#allocation22_spill] sm:$0xff] %v2977_v31  ;;  %4007 = vst [vmem:[#allocation28_spill] sm:$0xff] %v2980_v43  ;;  %v3016_v4 = vadd.f32 %v837_v46, %v4018_v45  ;;  %v3019_v38 = vadd.f32 %v838_v54, %v4020_v24  ;;  %v4022_v50 = vld [vmem:[#allocation9_spill] sm:$0xff]  ;;  %v1606_v53 = vld [vmem:[%s3647_s1 + $0x440] sm:$0xff] }
  0xb5   :  { %4009 = vst [vmem:[#allocation23_spill] sm:$0xff] %v2983_v6  ;;  %4011 = vst [vmem:[#allocation25_spill] sm:$0xff] %v2995_v41  ;;  %v3022_v20 = vadd.f32 %v839_v5, %v4022_v50  ;;  %v1607_v33 = vld [vmem:[%s3647_s1 + $0x448] sm:$0xff]  ;;  %v1608_v46 = vld [vmem:[%s3647_s1 + $0x450] sm:$0xff] }
  0xb6   :  { %4013 = vst [vmem:[#allocation26_spill] sm:$0xff] %v2998_v29  ;;  %4015 = vst [vmem:[#allocation27_spill] sm:$0xff] %v3001_v39  ;;  %v1609_v5 = vld [vmem:[%s3647_s1 + $0x458] sm:$0xff]  ;;  %v1610_v1 = vld [vmem:[%s3647_s1 + $0x460] sm:$0xff] }
  0xb7   :  { %4017 = vst [vmem:[#allocation24_spill] sm:$0xff] %v3004_v55  ;;  %4019 = vst [vmem:[#allocation4_spill] sm:$0xff] %v3016_v4  ;;  %v1611_v54 = vld [vmem:[%s3647_s1 + $0x468] sm:$0xff]  ;;  %v4026_v61 = vld [vmem:[#allocation2_spill] sm:$0xff] }
  0xb8   :  { %4021 = vst [vmem:[#allocation5_spill] sm:$0xff] %v3019_v38  ;;  %4023 = vst [vmem:[#allocation7_spill] sm:$0xff] %v3022_v20  ;;  %v4027_v9 = vld [vmem:[#allocation11_spill] sm:$0xff]  ;;  %v4029_v42 = vld [vmem:[#allocation12_spill] sm:$0xff] }
  0xb9   :  { %4025 = vst [vmem:[#allocation8_spill] sm:$0xff] %v3025_v47  ;;  %v912_v14 = vrot.slane %v4027_v9, %v4026_v61  ;;  %v4028_v13 = vld [vmem:[#allocation3_spill] sm:$0xff]  ;;  %v921_v2 = vmul.f32 %v1598_v48, %v4029_v42  ;;  %v4030_v25 = vld [vmem:[#allocation13_spill] sm:$0xff]  ;;  %v1612_v22 = vld [vmem:[%s3647_s1 + $0x470] sm:$0xff]  ;;  %v923_v17 = vmul.f32 %v1600_v58, %v4029_v42  ;;  %v925_v19 = vmul.f32 %v1602_v7, %v4029_v42 }
  0xba   :  { %v916_v16 = vrot.slane %v4027_v9, %v4028_v13  ;;  %v922_v0 = vmul.f32 %v1599_v52, %v4030_v25  ;;  %v1613_v3 = vld [vmem:[%s3647_s1 + $0x478] sm:$0xff]  ;;  %v924_v34 = vmul.f32 %v1601_v40, %v4030_v25  ;;  %v926_v45 = vmul.f32 %v1603_v26, %v4030_v25 }
  0xbb   :  { %v927_v24 = vmul.f32 %v1604_v28, %v4029_v42  ;;  %v928_v50 = vmul.f32 %v1605_v18, %v4030_v25  ;;  %v929_v44 = vmul.f32 %v1606_v53, %v4029_v42  ;;  %v930_v9 = vmul.f32 %v1607_v33, %v4030_v25 }
  0xbc   :  { %v931_v47 = vmul.f32 %v1608_v46, %v4029_v42  ;;  %v932_v20 = vmul.f32 %v1609_v5, %v4030_v25  ;;  %v933_v38 = vmul.f32 %v1610_v1, %v4029_v42  ;;  %v934_v4 = vmul.f32 %v1611_v54, %v4030_v25 }
  0xbd   :  { %v935_v13 = vmul.f32 %v1612_v22, %v4029_v42  ;;  %v936_v61 = vmul.f32 %v1613_v3, %v4030_v25  ;;  %v937_v55 = vmul.f32 %v1598_v48, %v912_v14  ;;  %v938_v39 = vmul.f32 %v1599_v52, %v916_v16  ;;  %v1618_v25 = vld [vmem:[%s3647_s1 + $0x490] sm:$0xff] }
  0xbe   :  { %v939_v29 = vmul.f32 %v1600_v58, %v912_v14  ;;  %v940_v41 = vmul.f32 %v1601_v40, %v916_v16  ;;  %v941_v6 = vmul.f32 %v1602_v7, %v912_v14  ;;  %v942_v43 = vmul.f32 %v1603_v26, %v916_v16 }
  0xbf   :  { %v943_v31 = vmul.f32 %v1604_v28, %v912_v14  ;;  %v944_v30 = vmul.f32 %v1605_v18, %v916_v16  ;;  %v945_v56 = vmul.f32 %v1606_v53, %v912_v14  ;;  %v946_v59 = vmul.f32 %v1607_v33, %v916_v16 }
  0xc0   :  { %v947_v35 = vmul.f32 %v1608_v46, %v912_v14  ;;  %v948_v27 = vmul.f32 %v1609_v5, %v916_v16  ;;  %v949_v32 = vmul.f32 %v1610_v1, %v912_v14  ;;  %v950_v57 = vmul.f32 %v1611_v54, %v916_v16  ;;  %v4050_v54 = vld [vmem:[#allocation22_spill] sm:$0xff] }
  0xc1   :  { %v951_v60 = vmul.f32 %v1612_v22, %v912_v14  ;;  %v952_v62 = vmul.f32 %v1613_v3, %v916_v16  ;;  %v3072_v42 = vadd.f32 %v921_v2, %v2908_v36  ;;  %v3075_v48 = vadd.f32 %v922_v0, %v2911_v23  ;;  %v4056_v16 = vld [vmem:[#allocation25_spill] sm:$0xff]  ;;  %v4058_v2 = vld [vmem:[#allocation26_spill] sm:$0xff] }
  0xc2   :  { %v3078_v52 = vadd.f32 %v923_v17, %v2914_v12  ;;  %v3081_v58 = vadd.f32 %v924_v34, %v2917_v63  ;;  %v3084_v40 = vadd.f32 %v925_v19, %v2920_v37  ;;  %v3087_v7 = vadd.f32 %v926_v45, %v2923_v10  ;;  %v4032_v10 = vld [vmem:[#allocation15_spill] sm:$0xff]  ;;  %v1619_v0 = vld [vmem:[%s3647_s1 + $0x498] sm:$0xff]  ;;  %v1622_v34 = vld [vmem:[%s3647_s1 + $0x4b0] sm:$0xff] }
  0xc3   :  { %v3090_v26 = vadd.f32 %v927_v24, %v2926_v51  ;;  %v3093_v36 = vadd.f32 %v928_v50, %v2929_v11  ;;  %v3096_v23 = vadd.f32 %v929_v44, %v2932_v21  ;;  %v3099_v12 = vadd.f32 %v930_v9, %v2935_v49  ;;  %v4034_v51 = vld [vmem:[#allocation17_spill] sm:$0xff]  ;;  %v4036_v11 = vld [vmem:[#allocation18_spill] sm:$0xff]  ;;  %v4038_v21 = vld [vmem:[#allocation16_spill] sm:$0xff] }
  0xc4   :  { %v3102_v63 = vadd.f32 %v931_v47, %v2938_v15  ;;  %v3105_v37 = vadd.f32 %v932_v20, %v2941_v8  ;;  %v3108_v28 = vadd.f32 %v933_v38, %v4032_v10  ;;  %v3111_v18 = vadd.f32 %v934_v4, %v4034_v51  ;;  %v4040_v49 = vld [vmem:[#allocation19_spill] sm:$0xff]  ;;  %v4042_v15 = vld [vmem:[#allocation29_spill] sm:$0xff]  ;;  %v4044_v8 = vld [vmem:[#allocation30_spill] sm:$0xff] }
  0xc5   :  { %v3114_v53 = vadd.f32 %v935_v13, %v4036_v11  ;;  %v3117_v33 = vadd.f32 %v936_v61, %v4038_v21  ;;  %v3120_v46 = vadd.f32 %v937_v55, %v4040_v49  ;;  %v3123_v47 = vadd.f32 %v938_v39, %v4042_v15  ;;  %v4046_v38 = vld [vmem:[#allocation20_spill] sm:$0xff]  ;;  %v4048_v4 = vld [vmem:[#allocation21_spill] sm:$0xff]  ;;  %v1616_v55 = vld [vmem:[%s3647_s1 + $0x480] sm:$0xff] }
  0xc6   :  { %4031 = vst [vmem:[#allocation9_spill] sm:$0xff] %v3105_v37  ;;  %4033 = vst [vmem:[#allocation10_spill] sm:$0xff] %v3108_v28  ;;  %v3126_v20 = vadd.f32 %v939_v29, %v4044_v8  ;;  %v3129_v5 = vadd.f32 %v940_v41, %v4046_v38  ;;  %v3132_v1 = vadd.f32 %v941_v6, %v4048_v4  ;;  %v1617_v39 = vld [vmem:[%s3647_s1 + $0x488] sm:$0xff]  ;;  %v4052_v61 = vld [vmem:[#allocation28_spill] sm:$0xff] }
  0xc7   :  { %4035 = vst [vmem:[#allocation11_spill] sm:$0xff] %v3111_v18  ;;  %4037 = vst [vmem:[#allocation12_spill] sm:$0xff] %v3114_v53  ;;  %v3135_v14 = vadd.f32 %v942_v43, %v4050_v54  ;;  %v3144_v29 = vadd.f32 %v943_v31, %v4052_v61  ;;  %v4054_v13 = vld [vmem:[#allocation23_spill] sm:$0xff]  ;;  %v3150_v6 = vadd.f32 %v945_v56, %v4056_v16  ;;  %v4063_v56 = vld [vmem:[#allocation24_spill] sm:$0xff] }
  0xc8   :  { %4039 = vst [vmem:[#allocation13_spill] sm:$0xff] %v3117_v33  ;;  %4041 = vst [vmem:[#allocation15_spill] sm:$0xff] %v3120_v46  ;;  %v3147_v41 = vadd.f32 %v944_v30, %v4054_v13  ;;  %v3153_v43 = vadd.f32 %v946_v59, %v4058_v2  ;;  %v3164_v31 = vld.sshfl [vmem:[%s3646_s0 + $0x28] sm:$0x33 pattern:$0x75316420]  ;;  %v3170_v3 = vadd.f32 %v948_v27, %v4063_v56 }
  0xc9   :  { %4043 = vst [vmem:[#allocation17_spill] sm:$0xff] %v3123_v47  ;;  %4045 = vst [vmem:[#allocation18_spill] sm:$0xff] %v3126_v20  ;;  %v4061_v30 = vld [vmem:[#allocation27_spill] sm:$0xff]  ;;  %v1620_v59 = vld [vmem:[%s3647_s1 + $0x4a0] sm:$0xff]  ;;  %v3221_v61 = vcombine.high %v3164_v31, %v3164_v31 }
  0xca   :  { %4047 = vst [vmem:[#allocation16_spill] sm:$0xff] %v3129_v5  ;;  %4049 = vst [vmem:[#allocation19_spill] sm:$0xff] %v3132_v1  ;;  %v3167_v22 = vadd.f32 %v947_v35, %v4061_v30  ;;  %v1621_v17 = vld [vmem:[%s3647_s1 + $0x4a8] sm:$0xff]  ;;  %v4065_v19 = vld [vmem:[#allocation2_spill] sm:$0xff] }
  0xcb   :  { %4051 = vst [vmem:[#allocation29_spill] sm:$0xff] %v3135_v14  ;;  %4053 = vst [vmem:[#allocation30_spill] sm:$0xff] %v3144_v29  ;;  %v4066_v45 = vld [vmem:[#allocation6_spill] sm:$0xff]  ;;  %v4067_v35 = vld [vmem:[#allocation3_spill] sm:$0xff]  ;;  %v3225_v13 = vrot.slane %v3164_v31, %v4065_v19 }
  0xcc   :  { %4055 = vst [vmem:[#allocation20_spill] sm:$0xff] %v3147_v41  ;;  %4057 = vst [vmem:[#allocation21_spill] sm:$0xff] %v3150_v6  ;;  %v1016_v24 = vrot.slane %v4066_v45, %v4065_v19  ;;  %v1020_v50 = vrot.slane %v4066_v45, %v4067_v35  ;;  %v4068_v27 = vld [vmem:[#allocation4_spill] sm:$0xff]  ;;  %v4070_v9 = vld [vmem:[#allocation5_spill] sm:$0xff] }
  0xcd   :  { %4059 = vst [vmem:[#allocation22_spill] sm:$0xff] %v3153_v43  ;;  %4060 = vst [vmem:[#allocation28_spill] sm:$0xff] %v3164_v31  ;;  %v3186_v44 = vadd.f32 %v949_v32, %v4068_v27  ;;  %v3189_v10 = vadd.f32 %v950_v57, %v4070_v9  ;;  %v4072_v51 = vld [vmem:[#allocation7_spill] sm:$0xff]  ;;  %v4074_v21 = vld [vmem:[#allocation8_spill] sm:$0xff] }
  0xce   :  { %4062 = vst [vmem:[#allocation23_spill] sm:$0xff] %v3167_v22  ;;  %4064 = vst [vmem:[#allocation25_spill] sm:$0xff] %v3170_v3  ;;  %v3192_v11 = vadd.f32 %v951_v60, %v4072_v51  ;;  %v3195_v49 = vadd.f32 %v952_v62, %v4074_v21  ;;  %v1623_v15 = vld [vmem:[%s3647_s1 + $0x4b8] sm:$0xff]  ;;  %v1624_v8 = vld [vmem:[%s3647_s1 + $0x4c0] sm:$0xff]  ;;  %v1033_v56 = vmul.f32 %v1616_v55, %v1016_v24 }
  0xcf   :  { %4069 = vst [vmem:[#allocation26_spill] sm:$0xff] %v3186_v44  ;;  %4071 = vst [vmem:[#allocation27_spill] sm:$0xff] %v3189_v10  ;;  %v1625_v32 = vld [vmem:[%s3647_s1 + $0x4c8] sm:$0xff]  ;;  %v1626_v60 = vld [vmem:[%s3647_s1 + $0x4d0] sm:$0xff]  ;;  %v1034_v45 = vmul.f32 %v1617_v39, %v1020_v50  ;;  %v1035_v27 = vmul.f32 %v1618_v25, %v1016_v24  ;;  %v1036_v9 = vmul.f32 %v1619_v0, %v1020_v50 }
  0xd0   :  { %4073 = vst [vmem:[#allocation24_spill] sm:$0xff] %v3192_v11  ;;  %4075 = vst [vmem:[#allocation6_spill] sm:$0xff] %v3195_v49  ;;  %v1627_v62 = vld [vmem:[%s3647_s1 + $0x4d8] sm:$0xff]  ;;  %v1628_v57 = vld [vmem:[%s3647_s1 + $0x4e0] sm:$0xff]  ;;  %v1037_v51 = vmul.f32 %v1620_v59, %v1016_v24  ;;  %v1038_v21 = vmul.f32 %v1621_v17, %v1020_v50  ;;  %v1043_v49 = vmul.f32 %v1626_v60, %v1016_v24 }
  0xd1   :  { %v4076_v38 = vld [vmem:[#allocation14_spill] sm:$0xff]  ;;  %4077 = vst [vmem:[#allocation4_spill] sm:$0xff] %v3221_v61  ;;  %4078 = vst [vmem:[#allocation5_spill] sm:$0xff] %v3225_v13  ;;  %v1629_v16 = vld [vmem:[%s3647_s1 + $0x4e8] sm:$0xff]  ;;  %v1040_v13 = vmul.f32 %v1623_v15, %v1020_v50  ;;  %v1041_v61 = vmul.f32 %v1624_v8, %v1016_v24  ;;  %v1044_v31 = vmul.f32 %v1627_v62, %v1020_v50 }
  0xd2   :  { %v1024_v4 = vrot.slane %v4076_v38, %v4065_v19  ;;  %v1028_v54 = vrot.slane %v4076_v38, %v4067_v35  ;;  %v1630_v2 = vld [vmem:[%s3647_s1 + $0x4f0] sm:$0xff]  ;;  %v1631_v30 = vld [vmem:[%s3647_s1 + $0x4f8] sm:$0xff]  ;;  %v1039_v38 = vmul.f32 %v1622_v34, %v1016_v24  ;;  %v1042_v19 = vmul.f32 %v1625_v32, %v1020_v50 }
  0xd3   :  { %v1045_v35 = vmul.f32 %v1628_v57, %v1016_v24  ;;  %v1046_v11 = vmul.f32 %v1629_v16, %v1020_v50  ;;  %v1047_v10 = vmul.f32 %v1630_v2, %v1016_v24  ;;  %v1048_v44 = vmul.f32 %v1631_v30, %v1020_v50 }
  0xd4   :  { %v1049_v3 = vmul.f32 %v1616_v55, %v1024_v4  ;;  %v1050_v22 = vmul.f32 %v1617_v39, %v1028_v54  ;;  %v1051_v43 = vmul.f32 %v1618_v25, %v1024_v4  ;;  %v1052_v6 = vmul.f32 %v1619_v0, %v1028_v54 }
  0xd5   :  { %v1053_v41 = vmul.f32 %v1620_v59, %v1024_v4  ;;  %v1054_v29 = vmul.f32 %v1621_v17, %v1028_v54  ;;  %v1055_v14 = vmul.f32 %v1622_v34, %v1024_v4  ;;  %v1056_v1 = vmul.f32 %v1623_v15, %v1028_v54 }
  0xd6   :  { %v1057_v5 = vmul.f32 %v1624_v8, %v1024_v4  ;;  %v1058_v20 = vmul.f32 %v1625_v32, %v1028_v54  ;;  %v1059_v47 = vmul.f32 %v1626_v60, %v1024_v4  ;;  %v1060_v46 = vmul.f32 %v1627_v62, %v1028_v54 }
  0xd7   :  { %v1061_v33 = vmul.f32 %v1628_v57, %v1024_v4  ;;  %v1062_v53 = vmul.f32 %v1629_v16, %v1028_v54  ;;  %v1063_v18 = vmul.f32 %v1630_v2, %v1024_v4  ;;  %v1064_v28 = vmul.f32 %v1631_v30, %v1028_v54  ;;  %v4111_v2 = vld [vmem:[#allocation25_spill] sm:$0xff] }
  0xd8   :  { %v3237_v37 = vadd.f32 %v1033_v56, %v3072_v42  ;;  %v3240_v55 = vadd.f32 %v1034_v45, %v3075_v48  ;;  %v3243_v39 = vadd.f32 %v1035_v27, %v3078_v52  ;;  %v3246_v25 = vadd.f32 %v1036_v9, %v3081_v58  ;;  %v1638_v56 = vld [vmem:[%s3647_s1 + $0x520] sm:$0xff]  ;;  %v1640_v45 = vld [vmem:[%s3647_s1 + $0x530] sm:$0xff] }
  0xd9   :  { %v3249_v0 = vadd.f32 %v1037_v51, %v3084_v40  ;;  %v3252_v59 = vadd.f32 %v1038_v21, %v3087_v7  ;;  %v3255_v17 = vadd.f32 %v1039_v38, %v3090_v26  ;;  %v3258_v42 = vadd.f32 %v1040_v13, %v3093_v36  ;;  %v4079_v40 = vld [vmem:[#allocation9_spill] sm:$0xff]  ;;  %v4081_v7 = vld [vmem:[#allocation10_spill] sm:$0xff]  ;;  %v4083_v26 = vld [vmem:[#allocation11_spill] sm:$0xff] }
  0xda   :  { %v3261_v48 = vadd.f32 %v1041_v61, %v3096_v23  ;;  %v3264_v52 = vadd.f32 %v1042_v19, %v3099_v12  ;;  %v3267_v58 = vadd.f32 %v1043_v49, %v3102_v63  ;;  %v3270_v34 = vadd.f32 %v1044_v31, %v4079_v40  ;;  %v4085_v36 = vld [vmem:[#allocation12_spill] sm:$0xff]  ;;  %v4087_v23 = vld [vmem:[#allocation13_spill] sm:$0xff]  ;;  %v4089_v12 = vld [vmem:[#allocation15_spill] sm:$0xff] }
  0xdb   :  { %v3273_v24 = vadd.f32 %v1045_v35, %v4081_v7  ;;  %v3276_v50 = vadd.f32 %v1046_v11, %v4083_v26  ;;  %v3279_v15 = vadd.f32 %v1047_v10, %v4085_v36  ;;  %v3282_v8 = vadd.f32 %v1048_v44, %v4087_v23  ;;  %v4091_v63 = vld [vmem:[#allocation17_spill] sm:$0xff]  ;;  %v4093_v31 = vld [vmem:[#allocation18_spill] sm:$0xff]  ;;  %v4095_v35 = vld [vmem:[#allocation16_spill] sm:$0xff] }
  0xdc   :  { %4080 = vst [vmem:[#allocation7_spill] sm:$0xff] %v3270_v34  ;;  %v3285_v19 = vadd.f32 %v1049_v3, %v4089_v12  ;;  %v3288_v49 = vadd.f32 %v1050_v22, %v4091_v63  ;;  %v3291_v32 = vadd.f32 %v1051_v43, %v4093_v31  ;;  %v3294_v60 = vadd.f32 %v1052_v6, %v4095_v35  ;;  %v1634_v10 = vld [vmem:[%s3647_s1 + $0x500] sm:$0xff]  ;;  %v4097_v11 = vld [vmem:[#allocation19_spill] sm:$0xff]  ;;  %v4099_v44 = vld [vmem:[#allocation29_spill] sm:$0xff] }
  0xdd   :  { %4082 = vst [vmem:[#allocation8_spill] sm:$0xff] %v3273_v24  ;;  %4084 = vst [vmem:[#allocation14_spill] sm:$0xff] %v3276_v50  ;;  %v3300_v62 = vadd.f32 %v1053_v41, %v4097_v11  ;;  %v3303_v57 = vadd.f32 %v1054_v29, %v4099_v44  ;;  %v4101_v3 = vld [vmem:[#allocation30_spill] sm:$0xff]  ;;  %v4103_v22 = vld [vmem:[#allocation20_spill] sm:$0xff]  ;;  %v3330_v30 = vadd.f32 %v1060_v46, %v4111_v2 }
  0xde   :  { %4086 = vst [vmem:[#allocation9_spill] sm:$0xff] %v3279_v15  ;;  %4088 = vst [vmem:[#allocation10_spill] sm:$0xff] %v3282_v8  ;;  %v3306_v4 = vadd.f32 %v1055_v14, %v4101_v3  ;;  %v3309_v54 = vadd.f32 %v1056_v1, %v4103_v22  ;;  %v1635_v6 = vld [vmem:[%s3647_s1 + $0x508] sm:$0xff]  ;;  %v1636_v43 = vld [vmem:[%s3647_s1 + $0x510] sm:$0xff] }
  0xdf   :  { %4090 = vst [vmem:[#allocation11_spill] sm:$0xff] %v3285_v19  ;;  %4092 = vst [vmem:[#allocation12_spill] sm:$0xff] %v3288_v49  ;;  %v1637_v41 = vld [vmem:[%s3647_s1 + $0x518] sm:$0xff]  ;;  %v4107_v14 = vld [vmem:[#allocation22_spill] sm:$0xff] }
  0xe0   :  { %4094 = vst [vmem:[#allocation13_spill] sm:$0xff] %v3291_v32  ;;  %4096 = vst [vmem:[#allocation15_spill] sm:$0xff] %v3294_v60  ;;  %v4105_v29 = vld [vmem:[#allocation21_spill] sm:$0xff]  ;;  %v3324_v13 = vadd.f32 %v1058_v20, %v4107_v14  ;;  %v4109_v1 = vld [vmem:[#allocation23_spill] sm:$0xff] }
  0xe1   :  { %4098 = vst [vmem:[#allocation17_spill] sm:$0xff] %v3300_v62  ;;  %4100 = vst [vmem:[#allocation18_spill] sm:$0xff] %v3303_v57  ;;  %v3321_v61 = vadd.f32 %v1057_v5, %v4105_v29  ;;  %v3327_v16 = vadd.f32 %v1059_v47, %v4109_v1  ;;  %v1642_v5 = vld [vmem:[%s3647_s1 + $0x540] sm:$0xff]  ;;  %v4115_v47 = vld [vmem:[#allocation27_spill] sm:$0xff] }
  0xe2   :  { %4102 = vst [vmem:[#allocation16_spill] sm:$0xff] %v3306_v4  ;;  %4104 = vst [vmem:[#allocation19_spill] sm:$0xff] %v3309_v54  ;;  %v4113_v20 = vld [vmem:[#allocation26_spill] sm:$0xff]  ;;  %v3345_v9 = vadd.f32 %v1062_v53, %v4115_v47  ;;  %v4117_v46 = vld [vmem:[#allocation24_spill] sm:$0xff] }
  0xe3   :  { %4106 = vst [vmem:[#allocation29_spill] sm:$0xff] %v3321_v61  ;;  %4108 = vst [vmem:[#allocation30_spill] sm:$0xff] %v3324_v13  ;;  %v3342_v27 = vadd.f32 %v1061_v33, %v4113_v20  ;;  %v3348_v51 = vadd.f32 %v1063_v18, %v4117_v46  ;;  %v1639_v21 = vld [vmem:[%s3647_s1 + $0x528] sm:$0xff]  ;;  %v1641_v38 = vld [vmem:[%s3647_s1 + $0x538] sm:$0xff] }
  0xe4   :  { %4110 = vst [vmem:[#allocation20_spill] sm:$0xff] %v3327_v16  ;;  %4112 = vst [vmem:[#allocation21_spill] sm:$0xff] %v3330_v30  ;;  %v1643_v40 = vld [vmem:[%s3647_s1 + $0x548] sm:$0xff]  ;;  %v4120_v7 = vld [vmem:[#allocation28_spill] sm:$0xff] }
  0xe5   :  { %4114 = vst [vmem:[#allocation22_spill] sm:$0xff] %v3342_v27  ;;  %4116 = vst [vmem:[#allocation23_spill] sm:$0xff] %v3345_v9  ;;  %v4119_v33 = vld [vmem:[#allocation3_spill] sm:$0xff]  ;;  %v4121_v53 = vld [vmem:[#allocation6_spill] sm:$0xff] }
  0xe6   :  { %4118 = vst [vmem:[#allocation25_spill] sm:$0xff] %v3348_v51  ;;  %v1132_v26 = vrot.slane %v4120_v7, %v4119_v33  ;;  %v3362_v36 = vadd.f32 %v1064_v28, %v4121_v53  ;;  %v1644_v18 = vld [vmem:[%s3647_s1 + $0x550] sm:$0xff]  ;;  %v1645_v23 = vld [vmem:[%s3647_s1 + $0x558] sm:$0xff]  ;;  %v1646_v12 = vld [vmem:[%s3647_s1 + $0x560] sm:$0xff] }
  0xe7   :  { %v4123_v63 = vld [vmem:[#allocation2_spill] sm:$0xff]  ;;  %v4124_v31 = vld [vmem:[#allocation4_spill] sm:$0xff]  ;;  %v4125_v28 = vld [vmem:[#allocation5_spill] sm:$0xff] }
  0xe8   :  { %4122 = vst [vmem:[#allocation26_spill] sm:$0xff] %v3362_v36  ;;  %v1136_v35 = vrot.slane %v4124_v31, %v4123_v63  ;;  %v1140_v11 = vrot.slane %v4124_v31, %v4119_v33  ;;  %v1145_v44 = vmul.f32 %v1634_v10, %v4125_v28  ;;  %v1647_v3 = vld [vmem:[%s3647_s1 + $0x568] sm:$0xff]  ;;  %v1648_v22 = vld [vmem:[%s3647_s1 + $0x570] sm:$0xff]  ;;  %v1649_v29 = vld [vmem:[%s3647_s1 + $0x578] sm:$0xff]  ;;  %v1147_v14 = vmul.f32 %v1636_v43, %v4125_v28 }
  0xe9   :  { %v1149_v1 = vmul.f32 %v1638_v56, %v4125_v28  ;;  %v1151_v2 = vmul.f32 %v1640_v45, %v4125_v28  ;;  %v1153_v20 = vmul.f32 %v1642_v5, %v4125_v28  ;;  %v1146_v47 = vmul.f32 %v1635_v6, %v1132_v26 }
  0xea   :  { %v1148_v46 = vmul.f32 %v1637_v41, %v1132_v26  ;;  %v1150_v7 = vmul.f32 %v1639_v21, %v1132_v26  ;;  %v1152_v53 = vmul.f32 %v1641_v38, %v1132_v26  ;;  %v1154_v31 = vmul.f32 %v1643_v40, %v1132_v26 }
  0xeb   :  { %v1155_v36 = vmul.f32 %v1644_v18, %v4125_v28  ;;  %v1156_v51 = vmul.f32 %v1645_v23, %v1132_v26  ;;  %v1157_v33 = vmul.f32 %v1646_v12, %v4125_v28  ;;  %v1158_v63 = vmul.f32 %v1647_v3, %v1132_v26 }
  0xec   :  { %v1159_v9 = vmul.f32 %v1648_v22, %v4125_v28  ;;  %v1160_v27 = vmul.f32 %v1649_v29, %v1132_v26  ;;  %v1161_v30 = vmul.f32 %v1634_v10, %v1136_v35  ;;  %v1162_v16 = vmul.f32 %v1635_v6, %v1140_v11  ;;  %v4148_v28 = vld [vmem:[#allocation16_spill] sm:$0xff] }
  0xed   :  { %v1163_v13 = vmul.f32 %v1636_v43, %v1136_v35  ;;  %v1164_v61 = vmul.f32 %v1637_v41, %v1140_v11  ;;  %v1165_v54 = vmul.f32 %v1638_v56, %v1136_v35  ;;  %v1166_v4 = vmul.f32 %v1639_v21, %v1140_v11 }
  0xee   :  { %v1167_v57 = vmul.f32 %v1640_v45, %v1136_v35  ;;  %v1168_v62 = vmul.f32 %v1641_v38, %v1140_v11  ;;  %v1169_v60 = vmul.f32 %v1642_v5, %v1136_v35  ;;  %v1170_v32 = vmul.f32 %v1643_v40, %v1140_v11 }
  0xef   :  { %v1171_v49 = vmul.f32 %v1644_v18, %v1136_v35  ;;  %v1172_v19 = vmul.f32 %v1645_v23, %v1140_v11  ;;  %v1173_v8 = vmul.f32 %v1646_v12, %v1136_v35  ;;  %v1174_v15 = vmul.f32 %v1647_v3, %v1140_v11  ;;  %v4142_v12 = vld [vmem:[#allocation15_spill] sm:$0xff] }
  0xf0   :  { %v1175_v50 = vmul.f32 %v1648_v22, %v1136_v35  ;;  %v1176_v24 = vmul.f32 %v1649_v29, %v1140_v11  ;;  %v3395_v34 = vadd.f32 %v1145_v44, %v3237_v37  ;;  %v3398_v10 = vadd.f32 %v1146_v47, %v3240_v55  ;;  %v1657_v47 = vld [vmem:[%s3647_s1 + $0x5a8] sm:$0xff] }
  0xf1   :  { %v3401_v6 = vadd.f32 %v1147_v14, %v3243_v39  ;;  %v3404_v43 = vadd.f32 %v1148_v46, %v3246_v25  ;;  %v3407_v41 = vadd.f32 %v1149_v1, %v3249_v0  ;;  %v3410_v56 = vadd.f32 %v1150_v7, %v3252_v59  ;;  %v4126_v0 = vld [vmem:[#allocation7_spill] sm:$0xff]  ;;  %v4128_v59 = vld [vmem:[#allocation8_spill] sm:$0xff]  ;;  %v4160_v46 = vld [vmem:[#allocation22_spill] sm:$0xff] }
  0xf2   :  { %v3413_v45 = vadd.f32 %v1151_v2, %v3255_v17  ;;  %v3416_v37 = vadd.f32 %v1152_v53, %v3258_v42  ;;  %v3419_v55 = vadd.f32 %v1153_v20, %v3261_v48  ;;  %v3422_v39 = vadd.f32 %v1154_v31, %v3264_v52  ;;  %v4130_v17 = vld [vmem:[#allocation14_spill] sm:$0xff]  ;;  %v4132_v42 = vld [vmem:[#allocation9_spill] sm:$0xff]  ;;  %v4136_v52 = vld [vmem:[#allocation11_spill] sm:$0xff] }
  0xf3   :  { %v3425_v25 = vadd.f32 %v1155_v36, %v3267_v58  ;;  %v3428_v5 = vadd.f32 %v1156_v51, %v4126_v0  ;;  %v3431_v21 = vadd.f32 %v1157_v33, %v4128_v59  ;;  %v3434_v38 = vadd.f32 %v1158_v63, %v4130_v17  ;;  %v4134_v48 = vld [vmem:[#allocation10_spill] sm:$0xff]  ;;  %v1651_v58 = vld.sshfl [vmem:[%s3646_s0 + $0x2c] sm:$0x33 pattern:$0x75316420]  ;;  %v4138_v51 = vld [vmem:[#allocation12_spill] sm:$0xff] }
  0xf4   :  { %v3437_v40 = vadd.f32 %v1159_v9, %v4132_v42  ;;  %v3440_v26 = vadd.f32 %v1160_v27, %v4134_v48  ;;  %v3443_v18 = vadd.f32 %v1161_v30, %v4136_v52  ;;  %v3449_v36 = vadd.f32 %v1162_v16, %v4138_v51  ;;  %v4140_v33 = vld [vmem:[#allocation13_spill] sm:$0xff]  ;;  %v1652_v30 = vld [vmem:[%s3647_s1 + $0x580] sm:$0xff]  ;;  %v4150_v16 = vld [vmem:[#allocation19_spill] sm:$0xff] }
  0xf5   :  { %4127 = vst [vmem:[#allocation27_spill] sm:$0xff] %v3428_v5  ;;  %4129 = vst [vmem:[#allocation24_spill] sm:$0xff] %v3431_v21  ;;  %v3452_v23 = vadd.f32 %v1163_v13, %v4140_v33  ;;  %v3455_v63 = vadd.f32 %v1164_v61, %v4142_v12  ;;  %v4144_v9 = vld [vmem:[#allocation17_spill] sm:$0xff]  ;;  %v4146_v27 = vld [vmem:[#allocation18_spill] sm:$0xff]  ;;  %v3467_v44 = vadd.f32 %v1167_v57, %v4148_v28 }
  0xf6   :  { %4131 = vst [vmem:[#allocation28_spill] sm:$0xff] %v3434_v38  ;;  %4133 = vst [vmem:[#allocation6_spill] sm:$0xff] %v3437_v40  ;;  %v3458_v35 = vadd.f32 %v1165_v54, %v4144_v9  ;;  %v3464_v11 = vadd.f32 %v1166_v4, %v4146_v27  ;;  %v3470_v3 = vadd.f32 %v1168_v62, %v4150_v16  ;;  %v4152_v13 = vld [vmem:[#allocation29_spill] sm:$0xff]  ;;  %v1653_v54 = vld [vmem:[%s3647_s1 + $0x588] sm:$0xff] }
  0xf7   :  { %4135 = vst [vmem:[#allocation4_spill] sm:$0xff] %v3440_v26  ;;  %4137 = vst [vmem:[#allocation5_spill] sm:$0xff] %v3443_v18  ;;  %v3473_v22 = vadd.f32 %v1169_v60, %v4152_v13  ;;  %v1654_v61 = vld [vmem:[%s3647_s1 + $0x590] sm:$0xff]  ;;  %v1655_v4 = vld [vmem:[%s3647_s1 + $0x598] sm:$0xff]  ;;  %v1219_v2 = vcombine.high %v1651_v58, %v1651_v58  ;;  %v3503_v7 = vadd.f32 %v1173_v8, %v4160_v46 }
  0xf8   :  { %4139 = vst [vmem:[#allocation7_spill] sm:$0xff] %v3449_v36  ;;  %4141 = vst [vmem:[#allocation8_spill] sm:$0xff] %v3452_v23  ;;  %v4154_v57 = vld [vmem:[#allocation30_spill] sm:$0xff]  ;;  %v4156_v62 = vld [vmem:[#allocation20_spill] sm:$0xff] }
  0xf9   :  { %4143 = vst [vmem:[#allocation14_spill] sm:$0xff] %v3455_v63  ;;  %4145 = vst [vmem:[#allocation9_spill] sm:$0xff] %v3458_v35  ;;  %v3485_v29 = vadd.f32 %v1170_v32, %v4154_v57  ;;  %v3488_v14 = vadd.f32 %v1171_v49, %v4156_v62  ;;  %v4158_v60 = vld [vmem:[#allocation21_spill] sm:$0xff]  ;;  %v1656_v20 = vld [vmem:[%s3647_s1 + $0x5a0] sm:$0xff] }
  0xfa   :  { %4147 = vst [vmem:[#allocation10_spill] sm:$0xff] %v3464_v11  ;;  %4149 = vst [vmem:[#allocation11_spill] sm:$0xff] %v3467_v44  ;;  %v3491_v1 = vadd.f32 %v1172_v19, %v4158_v60  ;;  %v1658_v32 = vld [vmem:[%s3647_s1 + $0x5b0] sm:$0xff]  ;;  %v4162_v49 = vld [vmem:[#allocation23_spill] sm:$0xff] }
  0xfb   :  { %4151 = vst [vmem:[#allocation12_spill] sm:$0xff] %v3470_v3  ;;  %4153 = vst [vmem:[#allocation13_spill] sm:$0xff] %v3473_v22  ;;  %v3506_v53 = vadd.f32 %v1174_v15, %v4162_v49  ;;  %v1659_v19 = vld [vmem:[%s3647_s1 + $0x5b8] sm:$0xff]  ;;  %v1660_v31 = vld [vmem:[%s3647_s1 + $0x5c0] sm:$0xff] }
  0xfc   :  { %4155 = vst [vmem:[#allocation15_spill] sm:$0xff] %v3485_v29  ;;  %4157 = vst [vmem:[#allocation17_spill] sm:$0xff] %v3488_v14  ;;  %v1661_v0 = vld [vmem:[%s3647_s1 + $0x5c8] sm:$0xff]  ;;  %v4164_v59 = vld [vmem:[#allocation2_spill] sm:$0xff] }
  0xfd   :  { %4159 = vst [vmem:[#allocation18_spill] sm:$0xff] %v3491_v1  ;;  %4161 = vst [vmem:[#allocation16_spill] sm:$0xff] %v3503_v7  ;;  %v1240_v17 = vrot.slane %v1651_v58, %v4164_v59  ;;  %v4165_v42 = vld [vmem:[#allocation3_spill] sm:$0xff]  ;;  %v4166_v48 = vld [vmem:[#allocation25_spill] sm:$0xff] }
  0xfe   :  { %4163 = vst [vmem:[#allocation19_spill] sm:$0xff] %v3506_v53  ;;  %v1244_v8 = vrot.slane %v1651_v58, %v4165_v42  ;;  %v3520_v52 = vadd.f32 %v1175_v50, %v4166_v48  ;;  %v4168_v15 = vld [vmem:[#allocation26_spill] sm:$0xff]  ;;  %v1662_v33 = vld [vmem:[%s3647_s1 + $0x5d0] sm:$0xff]  ;;  %v1663_v12 = vld [vmem:[%s3647_s1 + $0x5d8] sm:$0xff]  ;;  %v1248_v58 = vrot.slane %v1219_v2, %v4164_v59  ;;  %v1252_v50 = vrot.slane %v1219_v2, %v4165_v42 }
  0xff   :  { %v3523_v51 = vadd.f32 %v1176_v24, %v4168_v15  ;;  %v1664_v9 = vld [vmem:[%s3647_s1 + $0x5e0] sm:$0xff]  ;;  %v1665_v24 = vld [vmem:[%s3647_s1 + $0x5e8] sm:$0xff]  ;;  %v1666_v27 = vld [vmem:[%s3647_s1 + $0x5f0] sm:$0xff]  ;;  %v1257_v16 = vmul.f32 %v1652_v30, %v1240_v17  ;;  %v1259_v57 = vmul.f32 %v1654_v61, %v1240_v17  ;;  %v1261_v60 = vmul.f32 %v1656_v20, %v1240_v17 }
 0x100   :  { %4167 = vst [vmem:[#allocation29_spill] sm:$0xff] %v3520_v52  ;;  %v1667_v28 = vld [vmem:[%s3647_s1 + $0x5f8] sm:$0xff]  ;;  %v1258_v13 = vmul.f32 %v1653_v54, %v1244_v8  ;;  %v1260_v62 = vmul.f32 %v1655_v4, %v1244_v8  ;;  %v1262_v46 = vmul.f32 %v1657_v47, %v1244_v8  ;;  %v1263_v49 = vmul.f32 %v1658_v32, %v1240_v17 }
 0x101   :  { %4169 = vst [vmem:[#allocation30_spill] sm:$0xff] %v3523_v51  ;;  %v1264_v2 = vmul.f32 %v1659_v19, %v1244_v8  ;;  %v1265_v59 = vmul.f32 %v1660_v31, %v1240_v17  ;;  %v1266_v42 = vmul.f32 %v1661_v0, %v1244_v8  ;;  %v1267_v48 = vmul.f32 %v1662_v33, %v1240_v17 }
 0x102   :  { %v1268_v15 = vmul.f32 %v1663_v12, %v1244_v8  ;;  %v1269_v51 = vmul.f32 %v1664_v9, %v1240_v17  ;;  %v1270_v52 = vmul.f32 %v1665_v24, %v1244_v8  ;;  %v1271_v53 = vmul.f32 %v1666_v27, %v1240_v17 }
 0x103   :  { %v1272_v7 = vmul.f32 %v1667_v28, %v1244_v8  ;;  %v1273_v1 = vmul.f32 %v1652_v30, %v1248_v58  ;;  %v1274_v14 = vmul.f32 %v1653_v54, %v1252_v50  ;;  %v1275_v29 = vmul.f32 %v1654_v61, %v1248_v58  ;;  %v4173_v8 = vld [vmem:[#allocation6_spill] sm:$0xff] }
 0x104   :  { %v1276_v22 = vmul.f32 %v1655_v4, %v1252_v50  ;;  %v1277_v3 = vmul.f32 %v1656_v20, %v1248_v58  ;;  %v1278_v44 = vmul.f32 %v1657_v47, %v1252_v50  ;;  %v1279_v11 = vmul.f32 %v1658_v32, %v1248_v58 }
 0x105   :  { %v1280_v35 = vmul.f32 %v1659_v19, %v1252_v50  ;;  %v1281_v63 = vmul.f32 %v1660_v31, %v1248_v58  ;;  %v1282_v23 = vmul.f32 %v1661_v0, %v1252_v50  ;;  %v1283_v36 = vmul.f32 %v1662_v33, %v1248_v58  ;;  %v4170_v19 = vld [vmem:[#allocation27_spill] sm:$0xff]  ;;  %v4171_v31 = vld [vmem:[#allocation24_spill] sm:$0xff] }
 0x106   :  { %v1284_v18 = vmul.f32 %v1663_v12, %v1252_v50  ;;  %v1285_v26 = vmul.f32 %v1664_v9, %v1248_v58  ;;  %v1286_v40 = vmul.f32 %v1665_v24, %v1252_v50  ;;  %v1287_v38 = vmul.f32 %v1666_v27, %v1248_v58  ;;  %v4174_v33 = vld [vmem:[#allocation4_spill] sm:$0xff]  ;;  %v4176_v58 = vld [vmem:[#allocation7_spill] sm:$0xff]  ;;  %v4178_v24 = vld [vmem:[#allocation14_spill] sm:$0xff] }
 0x107   :  { %v1288_v21 = vmul.f32 %v1667_v28, %v1252_v50  ;;  %v3546_v5 = vadd.f32 %v1257_v16, %v3395_v34  ;;  %v3549_v30 = vadd.f32 %v1258_v13, %v3398_v10  ;;  %v3552_v54 = vadd.f32 %v1259_v57, %v3401_v6  ;;  %v4177_v50 = vld [vmem:[#allocation8_spill] sm:$0xff]  ;;  %v4179_v27 = vld [vmem:[#allocation9_spill] sm:$0xff]  ;;  %v4180_v28 = vld [vmem:[#allocation10_spill] sm:$0xff] }
 0x108   :  { %v3555_v61 = vadd.f32 %v1260_v62, %v3404_v43  ;;  %v3558_v4 = vadd.f32 %v1261_v60, %v3407_v41  ;;  %v3561_v20 = vadd.f32 %v1262_v46, %v3410_v56  ;;  %v3564_v47 = vadd.f32 %v1263_v49, %v3413_v45  ;;  %v4172_v41 = vld [vmem:[#allocation28_spill] sm:$0xff]  ;;  %v4175_v45 = vld [vmem:[#allocation5_spill] sm:$0xff]  ;;  %v4181_v13 = vld [vmem:[#allocation11_spill] sm:$0xff] }
 0x109   :  { %v1296_v34 = vadd.f32 %v1264_v2, %v3416_v37  ;;  %v1297_v10 = vadd.f32 %v1265_v59, %v3419_v55  ;;  %v1298_v32 = vadd.f32 %v1266_v42, %v3422_v39  ;;  %v1299_v6 = vadd.f32 %v1267_v48, %v3425_v25  ;;  %v4182_v57 = vld [vmem:[#allocation12_spill] sm:$0xff]  ;;  %v4183_v62 = vld [vmem:[#allocation13_spill] sm:$0xff]  ;;  %v4184_v60 = vld [vmem:[#allocation15_spill] sm:$0xff] }
 0x10a   :  { %v1300_v43 = vadd.f32 %v1268_v15, %v4170_v19  ;;  %v1301_v0 = vadd.f32 %v1269_v51, %v4171_v31  ;;  %v1302_v17 = vadd.f32 %v1270_v52, %v4172_v41  ;;  %v1303_v56 = vadd.f32 %v1271_v53, %v4173_v8  ;;  %v4185_v46 = vld [vmem:[#allocation17_spill] sm:$0xff]  ;;  %v4186_v49 = vld [vmem:[#allocation18_spill] sm:$0xff]  ;;  %v4187_v2 = vld [vmem:[#allocation16_spill] sm:$0xff] }
 0x10b   :  { %v1304_v12 = vadd.f32 %v1272_v7, %v4174_v33  ;;  %v1305_v9 = vadd.f32 %v1273_v1, %v4175_v45  ;;  %v1306_v37 = vadd.f32 %v1274_v14, %v4176_v58  ;;  %v1307_v55 = vadd.f32 %v1275_v29, %v4177_v50  ;;  %v4188_v59 = vld [vmem:[#allocation19_spill] sm:$0xff]  ;;  %v4189_v42 = vld [vmem:[#allocation29_spill] sm:$0xff]  ;;  %v4190_v48 = vld [vmem:[#allocation30_spill] sm:$0xff] }
 0x10c   :  { %v1308_v39 = vadd.f32 %v1276_v22, %v4178_v24  ;;  %v1309_v25 = vadd.f32 %v1277_v3, %v4179_v27  ;;  %v1310_v16 = vadd.f32 %v1278_v44, %v4180_v28  ;;  %v1311_v51 = vadd.f32 %v1279_v11, %v4181_v13 }
 0x10d   :  { %v1312_v52 = vadd.f32 %v1280_v35, %v4182_v57  ;;  %v1313_v53 = vadd.f32 %v1281_v63, %v4183_v62  ;;  %v1314_v7 = vadd.f32 %v1282_v23, %v4184_v60  ;;  %v1315_v1 = vadd.f32 %v1283_v36, %v4185_v46 }
 0x10e   :  { %v1316_v14 = vadd.f32 %v1284_v18, %v4186_v49  ;;  %v1317_v29 = vadd.f32 %v1285_v26, %v4187_v2  ;;  %v1318_v22 = vadd.f32 %v1286_v40, %v4188_v59  ;;  %v1319_v3 = vadd.f32 %v1287_v38, %v4189_v42 }
 0x10f   :  { %v1320_v44 = vadd.f32 %v1288_v21, %v4190_v48  ;;  %v1321_v11 = vmax.f32 %v3546_v5, 0.0  ;;  %v1322_v35 = vmax.f32 %v3549_v30, 0.0  ;;  %v1323_v63 = vmax.f32 %v3552_v54, 0.0 }
 0x110   :  { %v1324_v23 = vmax.f32 %v3555_v61, 0.0  ;;  %v1325_v36 = vmax.f32 %v3558_v4, 0.0  ;;  %v1326_v18 = vmax.f32 %v3561_v20, 0.0  ;;  %v1327_v26 = vmax.f32 %v3564_v47, 0.0 }
 0x111   :  { %v1328_v15 = vmax.f32 %v1296_v34, 0.0  ;;  %v1329_v40 = vmax.f32 %v1297_v10, 0.0  ;;  %v1330_v19 = vmax.f32 %v1298_v32, 0.0  ;;  %v1331_v38 = vmax.f32 %v1299_v6, 0.0 }
 0x112   :  { %v1332_v31 = vmax.f32 %v1300_v43, 0.0  ;;  %v1333_v21 = vmax.f32 %v1301_v0, 0.0  ;;  %v1334_v41 = vmax.f32 %v1302_v17, 0.0  ;;  %v1335_v5 = vmax.f32 %v1303_v56, 0.0 }
 0x113   :  { %v1336_v8 = vmax.f32 %v1304_v12, 0.0  ;;  %v1337_v30 = vmax.f32 %v1305_v9, 0.0  ;;  %v1338_v33 = vmax.f32 %v1306_v37, 0.0  ;;  %v1339_v54 = vmax.f32 %v1307_v55, 0.0 }
 0x114   :  { %v1340_v45 = vmax.f32 %v1308_v39, 0.0  ;;  %v1341_v61 = vmax.f32 %v1309_v25, 0.0  ;;  %v1342_v58 = vmax.f32 %v1310_v16, 0.0  ;;  %v1343_v4 = vmax.f32 %v1311_v51, 0.0 }
 0x115   :  { %v1344_v50 = vmax.f32 %v1312_v52, 0.0  ;;  %v1345_v20 = vmax.f32 %v1313_v53, 0.0  ;;  %v1346_v24 = vmax.f32 %v1314_v7, 0.0  ;;  %v1347_v47 = vmax.f32 %v1315_v1, 0.0 }
 0x116   :  { %v1348_v34 = vmax.f32 %v1316_v14, 0.0  ;;  %v1349_v10 = vmax.f32 %v1317_v29, 0.0  ;;  %v1350_v32 = vmax.f32 %v1318_v22, 0.0  ;;  %v1351_v6 = vmax.f32 %v1319_v3, 0.0 }
 0x117   :  { %v1352_v43 = vmax.f32 %v1320_v44, 0.0  ;;  %v1684_v0 = vpack.c.bf16 %v1322_v35, %v1321_v11  ;;  %v1685_v17 = vpack.c.bf16 %v1324_v23, %v1323_v63  ;;  %v1686_v56 = vpack.c.bf16 %v1326_v18, %v1325_v36 }
 0x118   :  { %v1687_v12 = vpack.c.bf16 %v1328_v15, %v1327_v26  ;;  %v1688_v9 = vpack.c.bf16 %v1330_v19, %v1329_v40  ;;  %v1689_v37 = vpack.c.bf16 %v1332_v31, %v1331_v38  ;;  %v1690_v55 = vpack.c.bf16 %v1334_v41, %v1333_v21 }
 0x119   :  { %v1691_v39 = vpack.c.bf16 %v1336_v8, %v1335_v5  ;;  %v1692_v27 = vpack.c.bf16 %v1338_v33, %v1337_v30  ;;  %v1693_v25 = vpack.c.bf16 %v1340_v45, %v1339_v54  ;;  %v1694_v28 = vpack.c.bf16 %v1342_v58, %v1341_v61  ;;  %1449 = vst [vmem:[%s3648_s2] sm:$0xff] %v1684_v0 }
 0x11a   :  { %v1695_v16 = vpack.c.bf16 %v1344_v50, %v1343_v4  ;;  %1450 = vst [vmem:[%s3648_s2 + $0x8] sm:$0xff] %v1685_v17  ;;  %1451 = vst [vmem:[%s3648_s2 + $0x10] sm:$0xff] %v1686_v56  ;;  %v1696_v13 = vpack.c.bf16 %v1346_v24, %v1345_v20  ;;  %v1697_v51 = vpack.c.bf16 %v1348_v34, %v1347_v47 }
 0x11b   :  { %1452 = vst [vmem:[%s3648_s2 + $0x18] sm:$0xff] %v1687_v12  ;;  %v1698_v57 = vpack.c.bf16 %v1350_v32, %v1349_v10  ;;  %v1699_v52 = vpack.c.bf16 %v1352_v43, %v1351_v6  ;;  %1453 = vst [vmem:[%s3648_s2 + $0x20] sm:$0xff] %v1688_v9 }
 0x11c   :  { %1454 = vst [vmem:[%s3648_s2 + $0x28] sm:$0xff] %v1689_v37  ;;  %1455 = vst [vmem:[%s3648_s2 + $0x30] sm:$0xff] %v1690_v55 }
 0x11d   :  { %1456 = vst [vmem:[%s3648_s2 + $0x38] sm:$0xff] %v1691_v39  ;;  %1457 = vst [vmem:[%s3648_s2 + $0x40] sm:$0xff] %v1692_v27 }
 0x11e   :  { %1458 = vst [vmem:[%s3648_s2 + $0x48] sm:$0xff] %v1693_v25  ;;  %1459 = vst [vmem:[%s3648_s2 + $0x50] sm:$0xff] %v1694_v28 }
 0x11f   :  { %1460 = vst [vmem:[%s3648_s2 + $0x58] sm:$0xff] %v1695_v16  ;;  %1461 = vst [vmem:[%s3648_s2 + $0x60] sm:$0xff] %v1696_v13 }
 0x120   :  { %1462 = vst [vmem:[%s3648_s2 + $0x68] sm:$0xff] %v1697_v51  ;;  %1463 = vst [vmem:[%s3648_s2 + $0x70] sm:$0xff] %v1698_v57 }
 0x121   :  { %1464 = vst [vmem:[%s3648_s2 + $0x78] sm:$0xff] %v1699_v52 }

// kernel: hardnet_forward.3
= control target key start
LH: loop header
LB: loop body
LE: loop exit
PB: predicated region body
PF: predicated region fallthrough
CT: control target
= control target key end

     0   :  { %12 = vsyncpa [#allocation4], 0  ;;  %s7271_s24 = smov 0   ;;  %s8908_s0 = inlined_call_operand.vmem [shape: bf16[49,2,1024], index: 0, kind: input, shape index: {}]   ;;  %s8909_s1 = inlined_call_operand.vmem [shape: s8[49,64,1024], index: 1, kind: input, shape index: {}]   ;;  %s8910_s2 = inlined_call_operand.vmem [shape: f32[49,1,64], index: 2, kind: input, shape index: {}]   ;;  %s8911_s3 = inlined_call_operand.vmem [shape: s8[49,64,1024], index: 3, kind: input, shape index: {}]   ;;  %s8912_s4 = inlined_call_operand.vmem [shape: f32[1,1024], index: 4, kind: input, shape index: {}]   ;;  %s8913_s5 = inlined_call_operand.vmem [shape: bf16[1024,512], index: 5, kind: input, shape index: {}]   ;;  %s8914_s6 = inlined_call_operand.vmem [shape: f32[512,10], index: 6, kind: input, shape index: {}]   ;;  %s8915_s7 = inlined_call_operand.hbm [shape: f32[2,10], index: 7, kind: output, shape index: {}]  }
   0x1 LB: > { %s7277_s25 = sadd.s32 4294967295, %s7224_s24   ;;  %p6231_p0 = scmp.ge.s32.totalorder %s7224_s24, 1  ;;  %s7224_s24 = sphi %s7271_s24, %s18_s24  }
   0x2   : > { %p268_p1 = scmp.lt.s32.totalorder %s7224_s24, 8 }
   0x4   : > { %p269_p2 = pnand %p6231_p0, %p268_p1 }
   0x5   : > { %s311_s26 = smul.u32 (!%p269_p2), 7, %s7277_s25  ;;  %p6237_p4 = scmp.ne.s32.totalorder (!%p269_p2), %s7277_s25, 0 }
   0x6   : > { %272 = sbr.rel (%p269_p2) target bundleno = 1697 (0x6a1), region = 48 }
   0x7   : > { %p312_p3 = scmp.lt.s32.totalorder (!%p269_p2), %s311_s26, 48 }
   0xd   : > { %s8917_s26 = smov (!%p312_p3, %s311_s26), 48  ;;  %340 = sbr.rel (%p6237_p4) target bundleno = 20 (0x14), region = 52 }
   0xe   : > { %s6232_s27 = sshll.u32 %s8917_s26, 3  ;;  %s6534_s28 = sshll.u32 %s8917_s26, 7  ;;  %v7226_v0 = vmov (!%p6237_p4), 0.0  }
   0xf   : > { %s7285_s8 = scalar_lea.vmem %s8908_s0, %s6232_s27  ;;  %s7290_s11 = scalar_lea.vmem %s8909_s1, %s6534_s28  ;;  %341 = vst [vmem:[#allocation2] sm:$0xff] (!%p6237_p4), %v7226_v0  ;;  %342 = vst [vmem:[#allocation2 + $0x8] sm:$0xff] (!%p6237_p4), %v7226_v0 }
  0x10   : > { %s7295_s14 = scalar_lea.vmem %s8910_s2, %s8917_s26  ;;  %s7300_s17 = scalar_lea.vmem %s8911_s3, %s6534_s28 }
  0x14 PF: > { %v351_v1 = vld [vmem:[%s7290_s11 + $0x8] sm:$0xff]  ;;  %v350_v3 = vld [vmem:[%s7290_s11] sm:$0xff]  ;;  %v691_v4 = vlaneseq  ;;  %v7227_v12 = vmov 1966171168   ;;  %v353_v37 = vld [vmem:[%s7290_s11 + $0x18] sm:$0xff]  ;;  %vm2618_vm0 = vcmask 523264  }
  0x15   : > { %v367_v2 = vld [vmem:[%s7290_s11 + $0x88] sm:$0xff]  ;;  %v463_v5 = vunpack.c.l.s8.bf16 %v351_v1  ;;  %v471_v6 = vunpack.c.h.s8.bf16 %v351_v1  ;;  %v366_v9 = vld [vmem:[%s7290_s11 + $0x80] sm:$0xff]  ;;  %v462_v10 = vunpack.c.l.s8.bf16 %v350_v3  ;;  %v689_v13 = vunpack.c.l.s4 %v7227_v12  ;;  %v369_v38 = vld [vmem:[%s7290_s11 + $0x98] sm:$0xff]  ;;  %p6273_p5 = scmp.ne.s32.totalorder %s7277_s25, 6 }
  0x16   : > { %v495_v7 = vunpack.c.l.s8.bf16 %v367_v2  ;;  %v503_v8 = vunpack.c.h.s8.bf16 %v367_v2  ;;  %v494_v11 = vunpack.c.l.s8.bf16 %v366_v9  ;;  %v7307_v14 = vshrl.u32 %v691_v4, 7  ;;  %v359_v15 = vld [vmem:[%s7290_s11 + $0x48] sm:$0xff]  ;;  %v7312_v20 = vld [vmem:[%s7285_s8] sm:$0xff]  ;;  %v352_v43 = vld [vmem:[%s7290_s11 + $0x10] sm:$0xff] }
  0x17   : > { %744 = vmatprep.subr.bf16.mxu0 %v463_v5  ;;  %v375_v16 = vld [vmem:[%s7290_s11 + $0xc8] sm:$0xff]  ;;  %v690_v17 = vunpack.c.0.s8 %v689_v13  ;;  %v470_v18 = vunpack.c.h.s8.bf16 %v350_v3  ;;  %v502_v19 = vunpack.c.h.s8.bf16 %v366_v9  ;;  %v479_v22 = vunpack.c.l.s8.bf16 %v359_v15  ;;  %v358_v27 = vld [vmem:[%s7290_s11 + $0x40] sm:$0xff]  ;;  %v368_v44 = vld [vmem:[%s7290_s11 + $0x90] sm:$0xff] }
  0x18   : > { %962 = vmatprep.subr.bf16.mxu1 %v495_v7  ;;  %745 = vmatpush1.bf16.xpose.msra.mxu0 %v462_v10  ;;  %v7315_v21 = vld [vmem:[%s7285_s8 + $0x8] sm:$0xff]  ;;  %v511_v23 = vunpack.c.l.s8.bf16 %v375_v16  ;;  %v374_v28 = vld [vmem:[%s7290_s11 + $0xc0] sm:$0xff]  ;;  %v478_v33 = vunpack.c.l.s8.bf16 %v358_v27  ;;  %v487_v35 = vunpack.c.h.s8.bf16 %v359_v15  ;;  %v519_v36 = vunpack.c.h.s8.bf16 %v375_v16  ;;  %v361_v53 = vld [vmem:[%s7290_s11 + $0x58] sm:$0xff] }
  0x19   : > { %963 = vmatpush1.bf16.xpose.msra.mxu1 %v494_v11  ;;  %746 = vmatprep.subr.bf16.mxu0 %v471_v6  ;;  %v7318_v24 = vsub.s32 %v690_v17, %v7307_v14  ;;  %v510_v34 = vunpack.c.l.s8.bf16 %v374_v28  ;;  %v486_v39 = vunpack.c.h.s8.bf16 %v358_v27  ;;  %v518_v40 = vunpack.c.h.s8.bf16 %v374_v28  ;;  %v377_v54 = vld [vmem:[%s7290_s11 + $0xd8] sm:$0xff]  ;;  %v360_v59 = vld [vmem:[%s7290_s11 + $0x50] sm:$0xff]  ;;  %v355_v3 = vld [vmem:[%s7290_s11 + $0x28] sm:$0xff] }
  0x1a   : > { %964 = vmatprep.subr.bf16.mxu1 %v503_v8  ;;  %v465_v41 = vunpack.c.l.s8.bf16 %v353_v37  ;;  %v497_v42 = vunpack.c.l.s8.bf16 %v369_v38  ;;  %v464_v47 = vunpack.c.l.s8.bf16 %v352_v43  ;;  %v496_v48 = vunpack.c.l.s8.bf16 %v368_v44  ;;  %v376_v60 = vld [vmem:[%s7290_s11 + $0xd0] sm:$0xff]  ;;  %v371_v4 = vld [vmem:[%s7290_s11 + $0xa8] sm:$0xff]  ;;  %v354_v11 = vld [vmem:[%s7290_s11 + $0x20] sm:$0xff] }
  0x1b   : > { %v694_v25 = vrot.slane %v7312_v20, %v7318_v24  ;;  %v912_v26 = vrot.slane %v7315_v21, %v7318_v24  ;;  %v473_v49 = vunpack.c.h.s8.bf16 %v353_v37  ;;  %v505_v50 = vunpack.c.h.s8.bf16 %v369_v38  ;;  %v370_v12 = vld [vmem:[%s7290_s11 + $0xa0] sm:$0xff]  ;;  %v357_v37 = vld [vmem:[%s7290_s11 + $0x38] sm:$0xff] }
  0x1c   : > { %v472_v55 = vunpack.c.h.s8.bf16 %v352_v43  ;;  %v504_v56 = vunpack.c.h.s8.bf16 %v368_v44  ;;  %v481_v57 = vunpack.c.l.s8.bf16 %v361_v53  ;;  %v513_v58 = vunpack.c.l.s8.bf16 %v377_v54  ;;  %v373_v38 = vld [vmem:[%s7290_s11 + $0xb8] sm:$0xff]  ;;  %v356_v43 = vld [vmem:[%s7290_s11 + $0x30] sm:$0xff] }
  0x1d   : > { %v702_v29 = vcombine.high %v694_v25, %v694_v25  ;;  %v920_v30 = vcombine.high %v912_v26, %v912_v26  ;;  %v710_v45 = vrot.slane %v694_v25, %v7318_v24  ;;  %v928_v46 = vrot.slane %v912_v26, %v7318_v24  ;;  %v363_v25 = vld [vmem:[%s7290_s11 + $0x68] sm:$0xff]  ;;  %v372_v44 = vld [vmem:[%s7290_s11 + $0xb0] sm:$0xff] }
  0x1e   : > { %v480_v61 = vunpack.c.l.s8.bf16 %v360_v59  ;;  %v512_v62 = vunpack.c.l.s8.bf16 %v376_v60  ;;  %v489_v63 = vunpack.c.h.s8.bf16 %v361_v53  ;;  %v521_v0 = vunpack.c.h.s8.bf16 %v377_v54  ;;  %v379_v26 = vld [vmem:[%s7290_s11 + $0xe8] sm:$0xff]  ;;  %v365_v53 = vld [vmem:[%s7290_s11 + $0x78] sm:$0xff] }
  0x1f   : > { %v724_v31 = vrot.slane %v702_v29, %v7318_v24  ;;  %v942_v32 = vrot.slane %v920_v30, %v7318_v24  ;;  %v687_v1 = vcombine.high %v7312_v20, %v7312_v20  ;;  %v905_v2 = vcombine.high %v7315_v21, %v7315_v21  ;;  %v381_v54 = vld [vmem:[%s7290_s11 + $0xf8] sm:$0xff] }
  0x20   : > { %747 = vmatpush1.bf16.xpose.msra.mxu0 %v470_v18  ;;  %v488_v5 = vunpack.c.h.s8.bf16 %v360_v59  ;;  %v520_v6 = vunpack.c.h.s8.bf16 %v376_v60  ;;  %v467_v7 = vunpack.c.l.s8.bf16 %v355_v3  ;;  %v499_v8 = vunpack.c.l.s8.bf16 %v371_v4  ;;  %v364_v59 = vld [vmem:[%s7290_s11 + $0x70] sm:$0xff] }
  0x21   : > { %965 = vmatpush1.bf16.xpose.msra.mxu1 %v502_v19  ;;  %748 = vmatprep.subr.bf16.mxu0 %v479_v22  ;;  %v734_v51 = vcombine.high %v724_v31, %v724_v31  ;;  %v952_v52 = vcombine.high %v942_v32, %v942_v32  ;;  %v701_v9 = vrot.slane %v687_v1, %v7318_v24  ;;  %v466_v18 = vunpack.c.l.s8.bf16 %v354_v11  ;;  %v380_v60 = vld [vmem:[%s7290_s11 + $0xf0] sm:$0xff]  ;;  %v383_v1 = vld [vmem:[%s7290_s11 + $0x108] sm:$0xff] }
  0x22   : > { %966 = vmatprep.subr.bf16.mxu1 %v511_v23  ;;  %776 = vmatprep.mubr.bf16.mxu0 %v724_v31  ;;  %v919_v10 = vrot.slane %v905_v2, %v7318_v24  ;;  %v732_v16 = vcombine.high %v710_v45, %v710_v45  ;;  %v950_v17 = vcombine.high %v928_v46, %v928_v46  ;;  %v498_v19 = vunpack.c.l.s8.bf16 %v370_v12  ;;  %v362_v31 = vld [vmem:[%s7290_s11 + $0x60] sm:$0xff]  ;;  %v399_v2 = vld [vmem:[%s7290_s11 + $0x188] sm:$0xff] }
  0x23   : > { %994 = vmatprep.mubr.bf16.mxu1 %v942_v32  ;;  %v703_v13 = vcombine.high %v701_v9, %v701_v9  ;;  %v475_v20 = vunpack.c.h.s8.bf16 %v355_v3  ;;  %v507_v21 = vunpack.c.h.s8.bf16 %v371_v4  ;;  %v474_v27 = vunpack.c.h.s8.bf16 %v354_v11  ;;  %v378_v32 = vld [vmem:[%s7290_s11 + $0xe0] sm:$0xff]  ;;  %v7367_v3 = vld [vmem:[%s7285_s8 + $0x10] sm:$0xff]  ;;  %v7370_v4 = vld [vmem:[%s7285_s8 + $0x18] sm:$0xff] }
  0x24   : > { %v921_v15 = vcombine.high %v919_v10, %v919_v10  ;;  %v506_v28 = vunpack.c.h.s8.bf16 %v370_v12  ;;  %v483_v29 = vunpack.c.l.s8.bf16 %v363_v25  ;;  %v515_v30 = vunpack.c.l.s8.bf16 %v379_v26  ;;  %v382_v11 = vld [vmem:[%s7290_s11 + $0x100] sm:$0xff] }
  0x25   : > { %v731_v22 = vrot.slane %v703_v13, %v7318_v24  ;;  %v398_v12 = vld [vmem:[%s7290_s11 + $0x180] sm:$0xff]  ;;  %vm3790_vm1 = vcmask 1041408   ;;  %vm6147_vm2 = vcmask (!%p6273_p5), 74752  }
  0x26   : > { %v949_v23 = vrot.slane %v921_v15, %v7318_v24 }
  0x28   : > { %749 = vmatpush1.bf16.xpose.msra.mxu0 %v478_v33  ;;  %v482_v33 = vunpack.c.l.s8.bf16 %v362_v31 }
  0x29   : > { %967 = vmatpush1.bf16.xpose.msra.mxu1 %v510_v34  ;;  %750 = vmatprep.subr.bf16.mxu0 %v487_v35  ;;  %v514_v34 = vunpack.c.l.s8.bf16 %v378_v32  ;;  %v491_v35 = vunpack.c.h.s8.bf16 %v363_v25  ;;  %v391_v25 = vld [vmem:[%s7290_s11 + $0x148] sm:$0xff] }
  0x2a   : > { %968 = vmatprep.subr.bf16.mxu1 %v519_v36  ;;  %v523_v36 = vunpack.c.h.s8.bf16 %v379_v26  ;;  %v407_v26 = vld [vmem:[%s7290_s11 + $0x1c8] sm:$0xff] }
  0x30   : > { %751 = vmatpush1.bf16.xpose.msra.mxu0 %v486_v39  ;;  %v490_v39 = vunpack.c.h.s8.bf16 %v362_v31  ;;  %v390_v31 = vld [vmem:[%s7290_s11 + $0x140] sm:$0xff] }
  0x31   : > { %969 = vmatpush1.bf16.xpose.msra.mxu1 %v518_v40  ;;  %784 = vmatprep.subr.bf16.mxu0 %v465_v41  ;;  %v522_v40 = vunpack.c.h.s8.bf16 %v378_v32  ;;  %v469_v41 = vunpack.c.l.s8.bf16 %v357_v37  ;;  %v406_v32 = vld [vmem:[%s7290_s11 + $0x1c0] sm:$0xff] }
  0x32   : > { %1002 = vmatprep.subr.bf16.mxu1 %v497_v42  ;;  %v501_v42 = vunpack.c.l.s8.bf16 %v373_v38 }
  0x37   : > { %777 = vmatmul.mubr.bf16.vlgmr.msra.gmra.mrb[0].mxu0 %v710_v45  ;;  %v717_v45 = vrot.slane %v701_v9, %v7318_v24  ;;  %v1130_v9 = vrot.slane %v7367_v3, %v7318_v24 }
  0x38   : > { %995 = vmatmul.mubr.bf16.vlgmr.msra.gmra.mrb[0].mxu1 %v928_v46  ;;  %785 = vmatpush1.bf16.xpose.msra.mxu0 %v464_v47  ;;  %v935_v46 = vrot.slane %v919_v10, %v7318_v24  ;;  %v468_v47 = vunpack.c.l.s8.bf16 %v356_v43  ;;  %v1348_v10 = vrot.slane %v7370_v4, %v7318_v24 }
  0x39   : > { %1003 = vmatpush1.bf16.xpose.msra.mxu1 %v496_v48  ;;  %786 = vmatprep.subr.bf16.mxu0 %v473_v49  ;;  %v500_v48 = vunpack.c.l.s8.bf16 %v372_v44  ;;  %v477_v49 = vunpack.c.h.s8.bf16 %v357_v37  ;;  %v1138_v13 = vcombine.high %v1130_v9, %v1130_v9  ;;  %v385_v37 = vld [vmem:[%s7290_s11 + $0x118] sm:$0xff] }
  0x3a   : > { %1004 = vmatprep.subr.bf16.mxu1 %v505_v50  ;;  %816 = vmatprep.mubr.bf16.mxu0 %v734_v51  ;;  %v509_v50 = vunpack.c.h.s8.bf16 %v373_v38  ;;  %v735_v51 = vcombine.high %v731_v22, %v731_v22  ;;  %v1356_v15 = vcombine.high %v1348_v10, %v1348_v10  ;;  %v401_v38 = vld [vmem:[%s7290_s11 + $0x198] sm:$0xff] }
  0x3b   : > { %1034 = vmatprep.mubr.bf16.mxu1 %v952_v52  ;;  %v953_v52 = vcombine.high %v949_v23, %v949_v23 }
  0x40   : > { %787 = vmatpush1.bf16.xpose.msra.mxu0 %v472_v55  ;;  %v476_v55 = vunpack.c.h.s8.bf16 %v356_v43  ;;  %v384_v43 = vld [vmem:[%s7290_s11 + $0x110] sm:$0xff] }
  0x41   : > { %1005 = vmatpush1.bf16.xpose.msra.mxu1 %v504_v56  ;;  %788 = vmatprep.subr.bf16.mxu0 %v481_v57  ;;  %v508_v56 = vunpack.c.h.s8.bf16 %v372_v44  ;;  %v485_v57 = vunpack.c.l.s8.bf16 %v365_v53  ;;  %v400_v44 = vld [vmem:[%s7290_s11 + $0x190] sm:$0xff] }
  0x42   : > { %1006 = vmatprep.subr.bf16.mxu1 %v513_v58  ;;  %v517_v58 = vunpack.c.l.s8.bf16 %v381_v54 }
  0x48   : > { %789 = vmatpush1.bf16.xpose.msra.mxu0 %v480_v61  ;;  %v484_v61 = vunpack.c.l.s8.bf16 %v364_v59 }
  0x49   : > { %1007 = vmatpush1.bf16.xpose.msra.mxu1 %v512_v62  ;;  %790 = vmatprep.subr.bf16.mxu0 %v489_v63  ;;  %v516_v62 = vunpack.c.l.s8.bf16 %v380_v60  ;;  %v493_v63 = vunpack.c.h.s8.bf16 %v365_v53  ;;  %v393_v53 = vld [vmem:[%s7290_s11 + $0x158] sm:$0xff] }
  0x4a   : > { %1008 = vmatprep.subr.bf16.mxu1 %v521_v0  ;;  %v525_v0 = vunpack.c.h.s8.bf16 %v381_v54  ;;  %v409_v54 = vld [vmem:[%s7290_s11 + $0x1d8] sm:$0xff] }
  0x50   : > { %791 = vmatpush1.bf16.xpose.msra.mxu0 %v488_v5  ;;  %v492_v5 = vunpack.c.h.s8.bf16 %v364_v59  ;;  %v392_v59 = vld [vmem:[%s7290_s11 + $0x150] sm:$0xff] }
  0x51   : > { %1009 = vmatpush1.bf16.xpose.msra.mxu1 %v520_v6  ;;  %824 = vmatprep.subr.bf16.mxu0 %v467_v7  ;;  %v524_v6 = vunpack.c.h.s8.bf16 %v380_v60  ;;  %v527_v7 = vunpack.c.l.s8.bf16 %v383_v1  ;;  %v408_v60 = vld [vmem:[%s7290_s11 + $0x1d0] sm:$0xff] }
  0x52   : > { %1042 = vmatprep.subr.bf16.mxu1 %v499_v8  ;;  %v559_v8 = vunpack.c.l.s8.bf16 %v399_v2 }
  0x57   : > { %817 = vmatmul.mubr.bf16.vlgmr.msra.gmra.mrb[0].mxu0 %v732_v16  ;;  %v733_v16 = vcombine.high %v717_v45, %v717_v45 }
  0x58   : > { %1035 = vmatmul.mubr.bf16.vlgmr.msra.gmra.mrb[0].mxu1 %v950_v17  ;;  %825 = vmatpush1.bf16.xpose.msra.mxu0 %v466_v18  ;;  %v951_v17 = vcombine.high %v935_v46, %v935_v46  ;;  %v526_v18 = vunpack.c.l.s8.bf16 %v382_v11 }
  0x59   : > { %1043 = vmatpush1.bf16.xpose.msra.mxu1 %v498_v19  ;;  %826 = vmatprep.subr.bf16.mxu0 %v475_v20  ;;  %v558_v19 = vunpack.c.l.s8.bf16 %v398_v12  ;;  %v535_v20 = vunpack.c.h.s8.bf16 %v383_v1  ;;  %v387_v1 = vld [vmem:[%s7290_s11 + $0x128] sm:$0xff] }
  0x5a   : > { %1044 = vmatprep.subr.bf16.mxu1 %v507_v21  ;;  %856 = vmatprep.mubr.bf16.mxu0 %v731_v22  ;;  %v567_v21 = vunpack.c.h.s8.bf16 %v399_v2  ;;  %v1160_v22 = vrot.slane %v1138_v13, %v7318_v24  ;;  %v403_v2 = vld [vmem:[%s7290_s11 + $0x1a8] sm:$0xff]  ;;  %v386_v13 = vld [vmem:[%s7290_s11 + $0x120] sm:$0xff] }
  0x5b   : > { %1074 = vmatprep.mubr.bf16.mxu1 %v949_v23  ;;  %v1378_v23 = vrot.slane %v1356_v15, %v7318_v24  ;;  %v402_v15 = vld [vmem:[%s7290_s11 + $0x1a0] sm:$0xff] }
  0x60   : > { %827 = vmatpush1.bf16.xpose.msra.mxu0 %v474_v27  ;;  %v534_v27 = vunpack.c.h.s8.bf16 %v382_v11 }
  0x61   : > { %1045 = vmatpush1.bf16.xpose.msra.mxu1 %v506_v28  ;;  %828 = vmatprep.subr.bf16.mxu0 %v483_v29  ;;  %v566_v28 = vunpack.c.h.s8.bf16 %v398_v12  ;;  %v543_v29 = vunpack.c.l.s8.bf16 %v391_v25 }
  0x62   : > { %1046 = vmatprep.subr.bf16.mxu1 %v515_v30  ;;  %v575_v30 = vunpack.c.l.s8.bf16 %v407_v26 }
  0x68   : > { %829 = vmatpush1.bf16.xpose.msra.mxu0 %v482_v33  ;;  %v542_v33 = vunpack.c.l.s8.bf16 %v390_v31 }
  0x69   : > { %1047 = vmatpush1.bf16.xpose.msra.mxu1 %v514_v34  ;;  %830 = vmatprep.subr.bf16.mxu0 %v491_v35  ;;  %v574_v34 = vunpack.c.l.s8.bf16 %v406_v32  ;;  %v551_v35 = vunpack.c.h.s8.bf16 %v391_v25  ;;  %v395_v25 = vld [vmem:[%s7290_s11 + $0x168] sm:$0xff] }
  0x6a   : > { %1048 = vmatprep.subr.bf16.mxu1 %v523_v36  ;;  %v583_v36 = vunpack.c.h.s8.bf16 %v407_v26  ;;  %v411_v26 = vld [vmem:[%s7290_s11 + $0x1e8] sm:$0xff] }
  0x70   : > { %831 = vmatpush1.bf16.xpose.msra.mxu0 %v490_v39  ;;  %v550_v39 = vunpack.c.h.s8.bf16 %v390_v31  ;;  %v394_v31 = vld [vmem:[%s7290_s11 + $0x160] sm:$0xff] }
  0x71   : > { %1049 = vmatpush1.bf16.xpose.msra.mxu1 %v522_v40  ;;  %864 = vmatprep.subr.bf16.mxu0 %v469_v41  ;;  %v582_v40 = vunpack.c.h.s8.bf16 %v406_v32  ;;  %v529_v41 = vunpack.c.l.s8.bf16 %v385_v37  ;;  %v410_v32 = vld [vmem:[%s7290_s11 + $0x1e0] sm:$0xff] }
  0x72   : > { %1082 = vmatprep.subr.bf16.mxu1 %v501_v42  ;;  %v561_v42 = vunpack.c.l.s8.bf16 %v401_v38 }
  0x77   : > { %857 = vmatmul.mubr.bf16.vlgmr.msra.gmra.mrb[0].mxu0 %v717_v45  ;;  %v1146_v45 = vrot.slane %v1130_v9, %v7318_v24  ;;  %v531_v9 = vunpack.c.l.s8.bf16 %v387_v1 }
  0x78   : > { %1075 = vmatmul.mubr.bf16.vlgmr.msra.gmra.mrb[0].mxu1 %v935_v46  ;;  %865 = vmatpush1.bf16.xpose.msra.mxu0 %v468_v47  ;;  %v1364_v46 = vrot.slane %v1348_v10, %v7318_v24  ;;  %v528_v47 = vunpack.c.l.s8.bf16 %v384_v43  ;;  %v563_v10 = vunpack.c.l.s8.bf16 %v403_v2 }
  0x79   : > { %1083 = vmatpush1.bf16.xpose.msra.mxu1 %v500_v48  ;;  %866 = vmatprep.subr.bf16.mxu0 %v477_v49  ;;  %v560_v48 = vunpack.c.l.s8.bf16 %v400_v44  ;;  %v537_v49 = vunpack.c.h.s8.bf16 %v385_v37  ;;  %v389_v37 = vld [vmem:[%s7290_s11 + $0x138] sm:$0xff] }
  0x7a   : > { %1084 = vmatprep.subr.bf16.mxu1 %v509_v50  ;;  %896 = vmatprep.mubr.bf16.mxu0 %v735_v51  ;;  %v569_v50 = vunpack.c.h.s8.bf16 %v401_v38  ;;  %v1170_v51 = vcombine.high %v1160_v22, %v1160_v22  ;;  %v405_v38 = vld [vmem:[%s7290_s11 + $0x1b8] sm:$0xff] }
  0x7b   : > { %1114 = vmatprep.mubr.bf16.mxu1 %v953_v52  ;;  %v1388_v52 = vcombine.high %v1378_v23, %v1378_v23 }
  0x80   : > { %867 = vmatpush1.bf16.xpose.msra.mxu0 %v476_v55  ;;  %v536_v55 = vunpack.c.h.s8.bf16 %v384_v43  ;;  %v388_v43 = vld [vmem:[%s7290_s11 + $0x130] sm:$0xff] }
  0x81   : > { %1085 = vmatpush1.bf16.xpose.msra.mxu1 %v508_v56  ;;  %868 = vmatprep.subr.bf16.mxu0 %v485_v57  ;;  %v568_v56 = vunpack.c.h.s8.bf16 %v400_v44  ;;  %v545_v57 = vunpack.c.l.s8.bf16 %v393_v53  ;;  %v404_v44 = vld [vmem:[%s7290_s11 + $0x1b0] sm:$0xff] }
  0x82   : > { %1086 = vmatprep.subr.bf16.mxu1 %v517_v58  ;;  %v577_v58 = vunpack.c.l.s8.bf16 %v409_v54 }
  0x88   : > { %869 = vmatpush1.bf16.xpose.msra.mxu0 %v484_v61  ;;  %v544_v61 = vunpack.c.l.s8.bf16 %v392_v59 }
  0x89   : > { %1087 = vmatpush1.bf16.xpose.msra.mxu1 %v516_v62  ;;  %870 = vmatprep.subr.bf16.mxu0 %v493_v63  ;;  %v576_v62 = vunpack.c.l.s8.bf16 %v408_v60  ;;  %v553_v63 = vunpack.c.h.s8.bf16 %v393_v53  ;;  %v397_v53 = vld [vmem:[%s7290_s11 + $0x178] sm:$0xff] }
  0x8a   : > { %1088 = vmatprep.subr.bf16.mxu1 %v525_v0  ;;  %v585_v0 = vunpack.c.h.s8.bf16 %v409_v54  ;;  %v413_v54 = vld [vmem:[%s7290_s11 + $0x1f8] sm:$0xff] }
  0x90   : > { %871 = vmatpush1.bf16.xpose.msra.mxu0 %v492_v5  ;;  %v1123_v5 = vcombine.high %v7367_v3, %v7367_v3 }
  0x91   : > { %1089 = vmatpush1.bf16.xpose.msra.mxu1 %v524_v6  ;;  %1180 = vmatprep.subr.bf16.mxu0 %v527_v7  ;;  %v1341_v6 = vcombine.high %v7370_v4, %v7370_v4  ;;  %v552_v7 = vunpack.c.h.s8.bf16 %v392_v59  ;;  %v1386_v4 = vcombine.high %v1364_v46, %v1364_v46  ;;  %v396_v59 = vld [vmem:[%s7290_s11 + $0x170] sm:$0xff] }
  0x92   : > { %1398 = vmatprep.subr.bf16.mxu1 %v559_v8  ;;  %v584_v8 = vunpack.c.h.s8.bf16 %v408_v60  ;;  %v1137_v11 = vrot.slane %v1123_v5, %v7318_v24  ;;  %v412_v60 = vld [vmem:[%s7290_s11 + $0x1f0] sm:$0xff]  ;;  %v7423_v5 = vld [vmem:[%s7285_s8 + $0x20] sm:$0xff] }
  0x93   : > { %v1355_v12 = vrot.slane %v1341_v6, %v7318_v24  ;;  %v7426_v6 = vld [vmem:[%s7285_s8 + $0x28] sm:$0xff] }
  0x95   : > { %v1357_v3 = vcombine.high %v1355_v12, %v1355_v12 }
  0x97   : > { %897 = vmatmul.mubr.bf16.vlgmr.msra.gmra.mrb[0].mxu0 %v733_v16  ;;  %v1139_v16 = vcombine.high %v1137_v11, %v1137_v11 }
  0x98   : > { %1115 = vmatmul.mubr.bf16.vlgmr.msra.gmra.mrb[0].mxu1 %v951_v17  ;;  %1181 = vmatpush1.bf16.xpose.msra.mxu0 %v526_v18  ;;  %v1168_v17 = vcombine.high %v1146_v45, %v1146_v45  ;;  %v530_v18 = vunpack.c.l.s8.bf16 %v386_v13 }
  0x99   : > { %1399 = vmatpush1.bf16.xpose.msra.mxu1 %v558_v19  ;;  %1182 = vmatprep.subr.bf16.mxu0 %v535_v20  ;;  %v562_v19 = vunpack.c.l.s8.bf16 %v402_v15  ;;  %v539_v20 = vunpack.c.h.s8.bf16 %v387_v1  ;;  %v415_v1 = vld [vmem:[%s7290_s11 + $0x208] sm:$0xff] }
  0x9a   : > { %1400 = vmatprep.subr.bf16.mxu1 %v567_v21  ;;  %1212 = vmatprep.mubr.bf16.mxu0 %v1160_v22  ;;  %v571_v21 = vunpack.c.h.s8.bf16 %v403_v2  ;;  %v1167_v22 = vrot.slane %v1139_v16, %v7318_v24  ;;  %v431_v2 = vld [vmem:[%s7290_s11 + $0x288] sm:$0xff] }
  0x9b   : > { %1430 = vmatprep.mubr.bf16.mxu1 %v1378_v23  ;;  %v1385_v23 = vrot.slane %v1357_v3, %v7318_v24 }
  0xa0   : > { %1183 = vmatpush1.bf16.xpose.msra.mxu0 %v534_v27  ;;  %v538_v27 = vunpack.c.h.s8.bf16 %v386_v13  ;;  %v414_v13 = vld [vmem:[%s7290_s11 + $0x200] sm:$0xff] }
  0xa1   : > { %1401 = vmatpush1.bf16.xpose.msra.mxu1 %v566_v28  ;;  %1184 = vmatprep.subr.bf16.mxu0 %v543_v29  ;;  %v570_v28 = vunpack.c.h.s8.bf16 %v402_v15  ;;  %v547_v29 = vunpack.c.l.s8.bf16 %v395_v25  ;;  %v430_v15 = vld [vmem:[%s7290_s11 + $0x280] sm:$0xff] }
  0xa2   : > { %1402 = vmatprep.subr.bf16.mxu1 %v575_v30  ;;  %v579_v30 = vunpack.c.l.s8.bf16 %v411_v26 }
  0xa8   : > { %1185 = vmatpush1.bf16.xpose.msra.mxu0 %v542_v33  ;;  %v546_v33 = vunpack.c.l.s8.bf16 %v394_v31 }
  0xa9   : > { %1403 = vmatpush1.bf16.xpose.msra.mxu1 %v574_v34  ;;  %1186 = vmatprep.subr.bf16.mxu0 %v551_v35  ;;  %v578_v34 = vunpack.c.l.s8.bf16 %v410_v32  ;;  %v555_v35 = vunpack.c.h.s8.bf16 %v395_v25  ;;  %v423_v25 = vld [vmem:[%s7290_s11 + $0x248] sm:$0xff] }
  0xaa   : > { %1404 = vmatprep.subr.bf16.mxu1 %v583_v36  ;;  %v587_v36 = vunpack.c.h.s8.bf16 %v411_v26  ;;  %v439_v26 = vld [vmem:[%s7290_s11 + $0x2c8] sm:$0xff] }
  0xb0   : > { %1187 = vmatpush1.bf16.xpose.msra.mxu0 %v550_v39  ;;  %v554_v39 = vunpack.c.h.s8.bf16 %v394_v31  ;;  %v422_v31 = vld [vmem:[%s7290_s11 + $0x240] sm:$0xff] }
  0xb1   : > { %1405 = vmatpush1.bf16.xpose.msra.mxu1 %v582_v40  ;;  %1220 = vmatprep.subr.bf16.mxu0 %v529_v41  ;;  %v586_v40 = vunpack.c.h.s8.bf16 %v410_v32  ;;  %v533_v41 = vunpack.c.l.s8.bf16 %v389_v37  ;;  %v438_v32 = vld [vmem:[%s7290_s11 + $0x2c0] sm:$0xff] }
  0xb2   : > { %1438 = vmatprep.subr.bf16.mxu1 %v561_v42  ;;  %v565_v42 = vunpack.c.l.s8.bf16 %v405_v38 }
  0xb7   : > { %1213 = vmatmul.mubr.bf16.vlgmr.msra.gmra.mrb[4].mxu0 %v1146_v45  ;;  %v1153_v45 = vrot.slane %v1137_v11, %v7318_v24  ;;  %v1566_v11 = vrot.slane %v7423_v5, %v7318_v24 }
  0xb8   : > { %1431 = vmatmul.mubr.bf16.vlgmr.msra.gmra.mrb[4].mxu1 %v1364_v46  ;;  %1221 = vmatpush1.bf16.xpose.msra.mxu0 %v528_v47  ;;  %v1371_v46 = vrot.slane %v1355_v12, %v7318_v24  ;;  %v532_v47 = vunpack.c.l.s8.bf16 %v388_v43  ;;  %v1784_v12 = vrot.slane %v7426_v6, %v7318_v24 }
  0xb9   : > { %1439 = vmatpush1.bf16.xpose.msra.mxu1 %v560_v48  ;;  %1222 = vmatprep.subr.bf16.mxu0 %v537_v49  ;;  %v564_v48 = vunpack.c.l.s8.bf16 %v404_v44  ;;  %v541_v49 = vunpack.c.h.s8.bf16 %v389_v37  ;;  %v1574_v16 = vcombine.high %v1566_v11, %v1566_v11  ;;  %v417_v37 = vld [vmem:[%s7290_s11 + $0x218] sm:$0xff] }
  0xba   : > { %1440 = vmatprep.subr.bf16.mxu1 %v569_v50  ;;  %1252 = vmatprep.mubr.bf16.mxu0 %v1170_v51  ;;  %v573_v50 = vunpack.c.h.s8.bf16 %v405_v38  ;;  %v1171_v51 = vcombine.high %v1167_v22, %v1167_v22  ;;  %v1792_v3 = vcombine.high %v1784_v12, %v1784_v12  ;;  %v433_v38 = vld [vmem:[%s7290_s11 + $0x298] sm:$0xff] }
  0xbb   : > { %1470 = vmatprep.mubr.bf16.mxu1 %v1388_v52  ;;  %v1389_v52 = vcombine.high %v1385_v23, %v1385_v23 }
  0xc0   : > { %1223 = vmatpush1.bf16.xpose.msra.mxu0 %v536_v55  ;;  %v540_v55 = vunpack.c.h.s8.bf16 %v388_v43  ;;  %v416_v43 = vld [vmem:[%s7290_s11 + $0x210] sm:$0xff] }
  0xc1   : > { %1441 = vmatpush1.bf16.xpose.msra.mxu1 %v568_v56  ;;  %1224 = vmatprep.subr.bf16.mxu0 %v545_v57  ;;  %v572_v56 = vunpack.c.h.s8.bf16 %v404_v44  ;;  %v549_v57 = vunpack.c.l.s8.bf16 %v397_v53  ;;  %v432_v44 = vld [vmem:[%s7290_s11 + $0x290] sm:$0xff] }
  0xc2   : > { %1442 = vmatprep.subr.bf16.mxu1 %v577_v58  ;;  %v581_v58 = vunpack.c.l.s8.bf16 %v413_v54 }
  0xc8   : > { %1225 = vmatpush1.bf16.xpose.msra.mxu0 %v544_v61  ;;  %v548_v61 = vunpack.c.l.s8.bf16 %v396_v59 }
  0xc9   : > { %1443 = vmatpush1.bf16.xpose.msra.mxu1 %v576_v62  ;;  %1226 = vmatprep.subr.bf16.mxu0 %v553_v63  ;;  %v580_v62 = vunpack.c.l.s8.bf16 %v412_v60  ;;  %v557_v63 = vunpack.c.h.s8.bf16 %v397_v53  ;;  %v425_v53 = vld [vmem:[%s7290_s11 + $0x258] sm:$0xff] }
  0xca   : > { %1444 = vmatprep.subr.bf16.mxu1 %v585_v0  ;;  %v589_v0 = vunpack.c.h.s8.bf16 %v413_v54  ;;  %v441_v54 = vld [vmem:[%s7290_s11 + $0x2d8] sm:$0xff] }
  0xd0   : > { %1227 = vmatpush1.bf16.xpose.msra.mxu0 %v552_v7  ;;  %v556_v7 = vunpack.c.h.s8.bf16 %v396_v59  ;;  %v424_v59 = vld [vmem:[%s7290_s11 + $0x250] sm:$0xff] }
  0xd1   : > { %1445 = vmatpush1.bf16.xpose.msra.mxu1 %v584_v8  ;;  %1260 = vmatprep.subr.bf16.mxu0 %v531_v9  ;;  %v588_v8 = vunpack.c.h.s8.bf16 %v412_v60  ;;  %v591_v9 = vunpack.c.l.s8.bf16 %v415_v1  ;;  %v440_v60 = vld [vmem:[%s7290_s11 + $0x2d0] sm:$0xff] }
  0xd2   : > { %1478 = vmatprep.subr.bf16.mxu1 %v563_v10  ;;  %v623_v10 = vunpack.c.l.s8.bf16 %v431_v2 }
  0xd7   : > { %1253 = vmatmul.mubr.bf16.vlgmr.msra.gmra.mrb[4].mxu0 %v1168_v17  ;;  %v1169_v17 = vcombine.high %v1153_v45, %v1153_v45 }
  0xd8   : > { %1471 = vmatmul.mubr.bf16.vlgmr.msra.gmra.mrb[4].mxu1 %v1386_v4  ;;  %1261 = vmatpush1.bf16.xpose.msra.mxu0 %v530_v18  ;;  %v1387_v4 = vcombine.high %v1371_v46, %v1371_v46  ;;  %v590_v18 = vunpack.c.l.s8.bf16 %v414_v13 }
  0xd9   : > { %1479 = vmatpush1.bf16.xpose.msra.mxu1 %v562_v19  ;;  %1262 = vmatprep.subr.bf16.mxu0 %v539_v20  ;;  %v622_v19 = vunpack.c.l.s8.bf16 %v430_v15  ;;  %v599_v20 = vunpack.c.h.s8.bf16 %v415_v1  ;;  %v419_v1 = vld [vmem:[%s7290_s11 + $0x228] sm:$0xff] }
  0xda   : > { %1480 = vmatprep.subr.bf16.mxu1 %v571_v21  ;;  %1292 = vmatprep.mubr.bf16.mxu0 %v1167_v22  ;;  %v631_v21 = vunpack.c.h.s8.bf16 %v431_v2  ;;  %v1596_v22 = vrot.slane %v1574_v16, %v7318_v24  ;;  %v435_v2 = vld [vmem:[%s7290_s11 + $0x2a8] sm:$0xff]  ;;  %v418_v16 = vld [vmem:[%s7290_s11 + $0x220] sm:$0xff] }
  0xdb   : > { %1510 = vmatprep.mubr.bf16.mxu1 %v1385_v23  ;;  %v1814_v23 = vrot.slane %v1792_v3, %v7318_v24  ;;  %v434_v3 = vld [vmem:[%s7290_s11 + $0x2a0] sm:$0xff] }
  0xe0   : > { %1263 = vmatpush1.bf16.xpose.msra.mxu0 %v538_v27  ;;  %v598_v27 = vunpack.c.h.s8.bf16 %v414_v13 }
  0xe1   : > { %1481 = vmatpush1.bf16.xpose.msra.mxu1 %v570_v28  ;;  %1264 = vmatprep.subr.bf16.mxu0 %v547_v29  ;;  %v630_v28 = vunpack.c.h.s8.bf16 %v430_v15  ;;  %v607_v29 = vunpack.c.l.s8.bf16 %v423_v25 }
  0xe2   : > { %1482 = vmatprep.subr.bf16.mxu1 %v579_v30  ;;  %v639_v30 = vunpack.c.l.s8.bf16 %v439_v26 }
  0xe8   : > { %1265 = vmatpush1.bf16.xpose.msra.mxu0 %v546_v33  ;;  %v606_v33 = vunpack.c.l.s8.bf16 %v422_v31 }
  0xe9   : > { %1483 = vmatpush1.bf16.xpose.msra.mxu1 %v578_v34  ;;  %1266 = vmatprep.subr.bf16.mxu0 %v555_v35  ;;  %v638_v34 = vunpack.c.l.s8.bf16 %v438_v32  ;;  %v615_v35 = vunpack.c.h.s8.bf16 %v423_v25  ;;  %v427_v25 = vld [vmem:[%s7290_s11 + $0x268] sm:$0xff] }
  0xea   : > { %1484 = vmatprep.subr.bf16.mxu1 %v587_v36  ;;  %v647_v36 = vunpack.c.h.s8.bf16 %v439_v26  ;;  %v443_v26 = vld [vmem:[%s7290_s11 + $0x2e8] sm:$0xff] }
  0xf0   : > { %1267 = vmatpush1.bf16.xpose.msra.mxu0 %v554_v39  ;;  %v614_v39 = vunpack.c.h.s8.bf16 %v422_v31  ;;  %v426_v31 = vld [vmem:[%s7290_s11 + $0x260] sm:$0xff] }
  0xf1   : > { %1485 = vmatpush1.bf16.xpose.msra.mxu1 %v586_v40  ;;  %1300 = vmatprep.subr.bf16.mxu0 %v533_v41  ;;  %v646_v40 = vunpack.c.h.s8.bf16 %v438_v32  ;;  %v593_v41 = vunpack.c.l.s8.bf16 %v417_v37  ;;  %v442_v32 = vld [vmem:[%s7290_s11 + $0x2e0] sm:$0xff] }
  0xf2   : > { %1518 = vmatprep.subr.bf16.mxu1 %v565_v42  ;;  %v625_v42 = vunpack.c.l.s8.bf16 %v433_v38 }
  0xf7   : > { %1293 = vmatmul.mubr.bf16.vlgmr.msra.gmra.mrb[4].mxu0 %v1153_v45  ;;  %v1582_v45 = vrot.slane %v1566_v11, %v7318_v24  ;;  %v595_v11 = vunpack.c.l.s8.bf16 %v419_v1 }
  0xf8   : > { %1511 = vmatmul.mubr.bf16.vlgmr.msra.gmra.mrb[4].mxu1 %v1371_v46  ;;  %1301 = vmatpush1.bf16.xpose.msra.mxu0 %v532_v47  ;;  %v1800_v46 = vrot.slane %v1784_v12, %v7318_v24  ;;  %v592_v47 = vunpack.c.l.s8.bf16 %v416_v43  ;;  %v627_v12 = vunpack.c.l.s8.bf16 %v435_v2 }
  0xf9   : > { %1519 = vmatpush1.bf16.xpose.msra.mxu1 %v564_v48  ;;  %1302 = vmatprep.subr.bf16.mxu0 %v541_v49  ;;  %v624_v48 = vunpack.c.l.s8.bf16 %v432_v44  ;;  %v601_v49 = vunpack.c.h.s8.bf16 %v417_v37 }
  0xfa   : > { %1520 = vmatprep.subr.bf16.mxu1 %v573_v50  ;;  %1332 = vmatprep.mubr.bf16.mxu0 %v1171_v51  ;;  %v633_v50 = vunpack.c.h.s8.bf16 %v433_v38  ;;  %v1606_v51 = vcombine.high %v1596_v22, %v1596_v22 }
  0xfb   : > { %1550 = vmatprep.mubr.bf16.mxu1 %v1389_v52  ;;  %v1824_v52 = vcombine.high %v1814_v23, %v1814_v23 }
 0x100   : > { %1303 = vmatpush1.bf16.xpose.msra.mxu0 %v540_v55  ;;  %v600_v55 = vunpack.c.h.s8.bf16 %v416_v43 }
 0x101   : > { %1521 = vmatpush1.bf16.xpose.msra.mxu1 %v572_v56  ;;  %1304 = vmatprep.subr.bf16.mxu0 %v549_v57  ;;  %v632_v56 = vunpack.c.h.s8.bf16 %v432_v44  ;;  %v609_v57 = vunpack.c.l.s8.bf16 %v425_v53 }
 0x102   : > { %1522 = vmatprep.subr.bf16.mxu1 %v581_v58  ;;  %v641_v58 = vunpack.c.l.s8.bf16 %v441_v54 }
 0x108   : > { %1305 = vmatpush1.bf16.xpose.msra.mxu0 %v548_v61  ;;  %v608_v61 = vunpack.c.l.s8.bf16 %v424_v59 }
 0x109   : > { %1523 = vmatpush1.bf16.xpose.msra.mxu1 %v580_v62  ;;  %1306 = vmatprep.subr.bf16.mxu0 %v557_v63  ;;  %v640_v62 = vunpack.c.l.s8.bf16 %v440_v60  ;;  %v617_v63 = vunpack.c.h.s8.bf16 %v425_v53 }
 0x10a   : > { %1524 = vmatprep.subr.bf16.mxu1 %v589_v0  ;;  %v649_v0 = vunpack.c.h.s8.bf16 %v441_v54 }
 0x110   : > { %1307 = vmatpush1.bf16.xpose.msra.mxu0 %v556_v7  ;;  %v1559_v7 = vcombine.high %v7423_v5, %v7423_v5 }
 0x111   : > { %1525 = vmatpush1.bf16.xpose.msra.mxu1 %v588_v8  ;;  %1616 = vmatprep.subr.bf16.mxu0 %v591_v9  ;;  %v1777_v8 = vcombine.high %v7426_v6, %v7426_v6  ;;  %v616_v9 = vunpack.c.h.s8.bf16 %v424_v59 }
 0x112   : > { %1834 = vmatprep.subr.bf16.mxu1 %v623_v10  ;;  %v648_v10 = vunpack.c.h.s8.bf16 %v440_v60  ;;  %v7457_v13 = vrot.slane %v1559_v7, %v7318_v24  ;;  %v428_v7 = vld [vmem:[%s7290_s11 + $0x270] sm:$0xff] }
 0x113   : > { %v7460_v15 = vrot.slane %v1777_v8, %v7318_v24  ;;  %v444_v8 = vld [vmem:[%s7290_s11 + $0x2f0] sm:$0xff] }
 0x114   : > { %v1575_v5 = vcombine.high %v7457_v13, %v7457_v13  ;;  %v1589_v53 = vrot.slane %v7457_v13, %v7318_v24  ;;  %v447_v13 = vld [vmem:[%s7290_s11 + $0x308] sm:$0xff] }
 0x115   : > { %v1793_v6 = vcombine.high %v7460_v15, %v7460_v15  ;;  %v1807_v54 = vrot.slane %v7460_v15, %v7318_v24  ;;  %v2283_v15 = vld [vmem:[%s7300_s17 + $0x8] sm:$0xff] }
 0x117   : > { %1333 = vmatmul.mubr.bf16.vlgmr.msra.gmra.mrb[4].mxu0 %v1169_v17  ;;  %v1604_v17 = vcombine.high %v1582_v45, %v1582_v45 }
 0x118   : > { %1551 = vmatmul.mubr.bf16.vlgmr.msra.gmra.mrb[4].mxu1 %v1387_v4  ;;  %1617 = vmatpush1.bf16.xpose.msra.mxu0 %v590_v18  ;;  %v1822_v4 = vcombine.high %v1800_v46, %v1800_v46  ;;  %v594_v18 = vunpack.c.l.s8.bf16 %v418_v16 }
 0x119   : > { %1835 = vmatpush1.bf16.xpose.msra.mxu1 %v622_v19  ;;  %1618 = vmatprep.subr.bf16.mxu0 %v599_v20  ;;  %v626_v19 = vunpack.c.l.s8.bf16 %v434_v3  ;;  %v603_v20 = vunpack.c.h.s8.bf16 %v419_v1 }
 0x11a   : > { %1836 = vmatprep.subr.bf16.mxu1 %v631_v21  ;;  %1648 = vmatprep.mubr.bf16.mxu0 %v1596_v22  ;;  %v635_v21 = vunpack.c.h.s8.bf16 %v435_v2  ;;  %v7469_v22 = vrot.slane %v1575_v5, %v7318_v24  ;;  %v652_v5 = vunpack.c.h.s8.bf16 %v444_v8 }
 0x11b   : > { %1866 = vmatprep.mubr.bf16.mxu1 %v1814_v23  ;;  %v7472_v23 = vrot.slane %v1793_v6, %v7318_v24  ;;  %v655_v6 = vunpack.c.l.s8.bf16 %v447_v13 }
 0x11c   : > { %v1607_v59 = vcombine.high %v7469_v22, %v7469_v22 }
 0x11d   : > { %v1825_v60 = vcombine.high %v7472_v23, %v7472_v23 }
 0x120   : > { %1619 = vmatpush1.bf16.xpose.msra.mxu0 %v598_v27  ;;  %v602_v27 = vunpack.c.h.s8.bf16 %v418_v16  ;;  %v7503_v16 = vld [vmem:[%s7285_s8 + $0x30] sm:$0xff] }
 0x121   : > { %1837 = vmatpush1.bf16.xpose.msra.mxu1 %v630_v28  ;;  %1620 = vmatprep.subr.bf16.mxu0 %v607_v29  ;;  %v634_v28 = vunpack.c.h.s8.bf16 %v434_v3  ;;  %v611_v29 = vunpack.c.l.s8.bf16 %v427_v25  ;;  %v620_v3 = vunpack.c.h.s8.bf16 %v428_v7 }
 0x122   : > { %1838 = vmatprep.subr.bf16.mxu1 %v639_v30  ;;  %v643_v30 = vunpack.c.l.s8.bf16 %v443_v26 }
 0x128   : > { %1621 = vmatpush1.bf16.xpose.msra.mxu0 %v606_v33  ;;  %v610_v33 = vunpack.c.l.s8.bf16 %v426_v31 }
 0x129   : > { %1839 = vmatpush1.bf16.xpose.msra.mxu1 %v638_v34  ;;  %1622 = vmatprep.subr.bf16.mxu0 %v615_v35  ;;  %v642_v34 = vunpack.c.l.s8.bf16 %v442_v32  ;;  %v619_v35 = vunpack.c.h.s8.bf16 %v427_v25 }
 0x12a   : > { %1840 = vmatprep.subr.bf16.mxu1 %v647_v36  ;;  %v651_v36 = vunpack.c.h.s8.bf16 %v443_v26  ;;  %v2403_v26 = vunpack.c.h.s8.bf16 %v2283_v15 }
 0x130   : > { %1623 = vmatpush1.bf16.xpose.msra.mxu0 %v614_v39  ;;  %v421_v39 = vld [vmem:[%s7290_s11 + $0x238] sm:$0xff] }
 0x131   : > { %1841 = vmatpush1.bf16.xpose.msra.mxu1 %v646_v40  ;;  %1656 = vmatprep.subr.bf16.mxu0 %v593_v41  ;;  %v437_v40 = vld [vmem:[%s7290_s11 + $0x2b8] sm:$0xff] }
 0x132   : > { %1874 = vmatprep.subr.bf16.mxu1 %v625_v42 }
 0x137   : > { %1649 = vmatmul.mubr.bf16.vlgmr.msra.gmra.mrb[8].mxu0 %v1582_v45  ;;  %v618_v45 = vunpack.c.h.s8.bf16 %v426_v31 }
 0x138   : > { %1867 = vmatmul.mubr.bf16.vlgmr.msra.gmra.mrb[8].mxu1 %v1800_v46  ;;  %1657 = vmatpush1.bf16.xpose.msra.mxu0 %v592_v47  ;;  %v650_v46 = vunpack.c.h.s8.bf16 %v442_v32  ;;  %v2290_v32 = vld [vmem:[%s7300_s17 + $0x40] sm:$0xff] }
 0x139   : > { %1875 = vmatpush1.bf16.xpose.msra.mxu1 %v624_v48  ;;  %1658 = vmatprep.subr.bf16.mxu0 %v601_v49  ;;  %v597_v49 = vunpack.c.l.s8.bf16 %v421_v39 }
 0x13a   : > { %1876 = vmatprep.subr.bf16.mxu1 %v633_v50  ;;  %1688 = vmatprep.mubr.bf16.mxu0 %v1606_v51  ;;  %v629_v50 = vunpack.c.l.s8.bf16 %v437_v40  ;;  %v420_v51 = vld [vmem:[%s7290_s11 + $0x230] sm:$0xff] }
 0x13b   : > { %1906 = vmatprep.mubr.bf16.mxu1 %v1824_v52  ;;  %v436_v52 = vld [vmem:[%s7290_s11 + $0x2b0] sm:$0xff] }
 0x140   : > { %1659 = vmatpush1.bf16.xpose.msra.mxu0 %v600_v55  ;;  %v596_v55 = vunpack.c.l.s8.bf16 %v420_v51 }
 0x141   : > { %1877 = vmatpush1.bf16.xpose.msra.mxu1 %v632_v56  ;;  %1660 = vmatprep.subr.bf16.mxu0 %v609_v57  ;;  %v628_v56 = vunpack.c.l.s8.bf16 %v436_v52  ;;  %v605_v57 = vunpack.c.h.s8.bf16 %v421_v39  ;;  %v2410_v39 = vunpack.c.l.s8.bf16 %v2290_v32 }
 0x142   : > { %1878 = vmatprep.subr.bf16.mxu1 %v641_v58  ;;  %v637_v58 = vunpack.c.h.s8.bf16 %v437_v40 }
 0x148   : > { %1661 = vmatpush1.bf16.xpose.msra.mxu0 %v608_v61  ;;  %v429_v61 = vld [vmem:[%s7290_s11 + $0x278] sm:$0xff] }
 0x149   : > { %1879 = vmatpush1.bf16.xpose.msra.mxu1 %v640_v62  ;;  %1662 = vmatprep.subr.bf16.mxu0 %v617_v63  ;;  %v445_v62 = vld [vmem:[%s7290_s11 + $0x2f8] sm:$0xff]  ;;  %v604_v63 = vunpack.c.h.s8.bf16 %v420_v51  ;;  %v613_v1 = vunpack.c.l.s8.bf16 %v429_v61 }
 0x14a   : > { %1880 = vmatprep.subr.bf16.mxu1 %v649_v0  ;;  %v636_v0 = vunpack.c.h.s8.bf16 %v436_v52  ;;  %v645_v2 = vunpack.c.l.s8.bf16 %v445_v62 }
 0x150   : > { %1663 = vmatpush1.bf16.xpose.msra.mxu0 %v616_v9  ;;  %v612_v9 = vunpack.c.l.s8.bf16 %v428_v7 }
 0x151   : > { %1881 = vmatpush1.bf16.xpose.msra.mxu1 %v648_v10  ;;  %1696 = vmatprep.subr.bf16.mxu0 %v595_v11  ;;  %v644_v10 = vunpack.c.l.s8.bf16 %v444_v8  ;;  %v621_v11 = vunpack.c.h.s8.bf16 %v429_v61 }
 0x152   : > { %1914 = vmatprep.subr.bf16.mxu1 %v627_v12  ;;  %v653_v12 = vunpack.c.h.s8.bf16 %v445_v62  ;;  %v2287_v62 = vld [vmem:[%s7300_s17 + $0x28] sm:$0xff] }
 0x157   : > { %1689 = vmatmul.mubr.bf16.vlgmr.msra.gmra.mrb[8].mxu0 %v1604_v17  ;;  %v2395_v17 = vunpack.c.l.s8.bf16 %v2283_v15 }
 0x158   : > { %1907 = vmatmul.mubr.bf16.vlgmr.msra.gmra.mrb[8].mxu1 %v1822_v4  ;;  %1697 = vmatpush1.bf16.xpose.msra.mxu0 %v594_v18  ;;  %v7507_v4 = vrot.slane %v7503_v16, %v7318_v24  ;;  %v446_v18 = vld [vmem:[%s7290_s11 + $0x300] sm:$0xff] }
 0x159   : > { %1915 = vmatpush1.bf16.xpose.msra.mxu1 %v626_v19  ;;  %1698 = vmatprep.subr.bf16.mxu0 %v603_v20  ;;  %v2282_v19 = vld [vmem:[%s7300_s17] sm:$0xff] }
 0x15a   : > { %1916 = vmatprep.subr.bf16.mxu1 %v635_v21  ;;  %1728 = vmatprep.mubr.bf16.mxu0 %v7469_v22  ;;  %v2010_v20 = vcombine.high %v7507_v4, %v7507_v4  ;;  %v1605_v21 = vcombine.high %v1589_v53, %v1589_v53  ;;  %v1823_v22 = vcombine.high %v1807_v54, %v1807_v54  ;;  %v2394_v25 = vunpack.c.l.s8.bf16 %v2282_v19 }
 0x15b   : > { %1946 = vmatprep.mubr.bf16.mxu1 %v7472_v23  ;;  %v654_v23 = vunpack.c.l.s8.bf16 %v446_v18  ;;  %v7539_v7 = vrot.slane %v7507_v4, %v7318_v24 }
 0x160   : > { %1699 = vmatpush1.bf16.xpose.msra.mxu0 %v602_v27  ;;  %v663_v27 = vunpack.c.h.s8.bf16 %v447_v13 }
 0x161   : > { %1917 = vmatpush1.bf16.xpose.msra.mxu1 %v634_v28  ;;  %1700 = vmatprep.subr.bf16.mxu0 %v611_v29  ;;  %v2291_v28 = vld [vmem:[%s7300_s17 + $0x48] sm:$0xff]  ;;  %v7515_v29 = vrot.slane %v2010_v20, %v7318_v24  ;;  %v2289_v20 = vld [vmem:[%s7300_s17 + $0x38] sm:$0xff] }
 0x162   : > { %1918 = vmatprep.subr.bf16.mxu1 %v643_v30  ;;  %v2402_v30 = vunpack.c.h.s8.bf16 %v2282_v19  ;;  %v2411_v31 = vunpack.c.l.s8.bf16 %v2291_v28 }
 0x163   : > { %v2042_v13 = vcombine.high %v7515_v29, %v7515_v29 }
 0x168   : > { %1701 = vmatpush1.bf16.xpose.msra.mxu0 %v610_v33  ;;  %v6238_v33 = vld [vmem:[%s7295_s14] ss:$0 sm:$0xff] }
 0x169   : > { %1919 = vmatpush1.bf16.xpose.msra.mxu1 %v642_v34  ;;  %1702 = vmatprep.subr.bf16.mxu0 %v619_v35  ;;  %v7228_v34 = vmov 0   ;;  %v455_v35 = vld [vmem:[%s7290_s11 + $0x348] sm:$0xff] }
 0x16a   : > { %1920 = vmatprep.subr.bf16.mxu1 %v651_v36  ;;  %v7480_v37 = vpop.f32.mrb[0].mxu0  ;;  %v662_v36 = vunpack.c.h.s8.bf16 %v446_v18  ;;  %v679_v52 = vunpack.c.h.s8.bf16 %v455_v35 }
 0x16b   : > { %v7482_v38 = vpop.f32.mrb[0].mxu1  ;;  %v900_v41 = vpop.f32.mrb[1].mxu0  ;;  %v2261_v40 = vmul.f32 %v6238_v33, %v7480_v37  ;;  %v2296_v33 = vld [vmem:[%s7300_s17 + $0x70] sm:$0xff] }
 0x16c   : > { %v1118_v42 = vpop.f32.mrb[1].mxu1  ;;  %v901_v43 = vpop.f32.mrb[2].mxu0  ;;  %v2419_v41 = vunpack.c.h.s8.bf16 %v2291_v28  ;;  %v2409_v28 = vunpack.c.h.s8.bf16 %v2289_v20 }
 0x16d   : > { %v1119_v44 = vpop.f32.mrb[2].mxu1  ;;  %v902_v47 = vpop.f32.mrb[3].mxu0  ;;  %v671_v42 = vunpack.c.l.s8.bf16 %v455_v35  ;;  %v2285_v43 = vld [vmem:[%s7300_s17 + $0x18] sm:$0xff]  ;;  %v451_v35 = vld [vmem:[%s7290_s11 + $0x328] sm:$0xff] }
 0x16e   : > { %v1120_v48 = vpop.f32.mrb[3].mxu1  ;;  %v2418_v44 = vunpack.c.h.s8.bf16 %v2290_v32  ;;  %v454_v47 = vld [vmem:[%s7290_s11 + $0x340] sm:$0xff]  ;;  %v2405_v51 = vunpack.c.h.s8.bf16 %v2285_v43 }
 0x16f   : > { %v2284_v48 = vld [vmem:[%s7300_s17 + $0x10] sm:$0xff] }
 0x170   : > { %1703 = vmatpush1.bf16.xpose.msra.mxu0 %v618_v45  ;;  %v2268_v45 = vmax.f32 %v2261_v40, 0.0  ;;  %v2396_v37 = vunpack.c.l.s8.bf16 %v2284_v48  ;;  %v2416_v40 = vunpack.c.l.s8.bf16 %v2296_v33 }
 0x171   : > { %1921 = vmatpush1.bf16.xpose.msra.mxu1 %v650_v46  ;;  %1736 = vmatprep.subr.bf16.mxu0 %v597_v49  ;;  %v2397_v46 = vunpack.c.l.s8.bf16 %v2285_v43  ;;  %v670_v49 = vunpack.c.l.s8.bf16 %v454_v47  ;;  %v2299_v43 = vld [vmem:[%s7300_s17 + $0x88] sm:$0xff] }
 0x172   : > { %1954 = vmatprep.subr.bf16.mxu1 %v629_v50  ;;  %v7526_v50 = vpack.c.bf16 %v2268_v45, %v2268_v45  ;;  %v2424_v45 = vunpack.c.h.s8.bf16 %v2296_v33 }
 0x177   : > { %1729 = vmatmul.mubr.bf16.vlgmr.msra.gmra.mrb[8].mxu0 %v1589_v53  ;;  %v2293_v53 = vld [vmem:[%s7300_s17 + $0x58] sm:$0xff] }
 0x178   : > { %1947 = vmatmul.mubr.bf16.vlgmr.msra.gmra.mrb[8].mxu1 %v1807_v54  ;;  %1737 = vmatpush1.bf16.xpose.msra.mxu0 %v596_v55  ;;  %v2404_v54 = vunpack.c.h.s8.bf16 %v2284_v48  ;;  %v2413_v55 = vunpack.c.l.s8.bf16 %v2293_v53 }
 0x179   : > { %1955 = vmatpush1.bf16.xpose.msra.mxu1 %v628_v56  ;;  %1738 = vmatprep.subr.bf16.mxu0 %v605_v57  ;;  %v2292_v56 = vld [vmem:[%s7300_s17 + $0x50] sm:$0xff]  ;;  %v449_v57 = vld [vmem:[%s7290_s11 + $0x318] sm:$0xff] }
 0x17a   : > { %1956 = vmatprep.subr.bf16.mxu1 %v637_v58  ;;  %1768 = vmatprep.mubr.bf16.mxu0 %v1607_v59  ;;  %v678_v58 = vunpack.c.h.s8.bf16 %v454_v47  ;;  %v2412_v59 = vunpack.c.l.s8.bf16 %v2292_v56  ;;  %v657_v61 = vunpack.c.l.s8.bf16 %v449_v57  ;;  %v450_v47 = vld [vmem:[%s7290_s11 + $0x320] sm:$0xff] }
 0x17b   : > { %1986 = vmatprep.mubr.bf16.mxu1 %v1825_v60  ;;  %v2421_v60 = vunpack.c.h.s8.bf16 %v2293_v53  ;;  %v667_v53 = vunpack.c.h.s8.bf16 %v451_v35 }
 0x180   : > { %1739 = vmatpush1.bf16.xpose.msra.mxu0 %v604_v63  ;;  %v2420_v63 = vunpack.c.h.s8.bf16 %v2292_v56 }
 0x181   : > { %1957 = vmatpush1.bf16.xpose.msra.mxu1 %v636_v0  ;;  %1740 = vmatprep.subr.bf16.mxu0 %v613_v1  ;;  %v2399_v0 = vunpack.c.l.s8.bf16 %v2287_v62  ;;  %v448_v1 = vld [vmem:[%s7290_s11 + $0x310] sm:$0xff] }
 0x182   : > { %1958 = vmatprep.subr.bf16.mxu1 %v645_v2  ;;  %v2286_v2 = vld [vmem:[%s7300_s17 + $0x20] sm:$0xff]  ;;  %v656_v8 = vunpack.c.l.s8.bf16 %v448_v1 }
 0x183   : > { %v2406_v15 = vunpack.c.h.s8.bf16 %v2286_v2 }
 0x188   : > { %1741 = vmatpush1.bf16.xpose.msra.mxu0 %v612_v9  ;;  %v2398_v9 = vunpack.c.l.s8.bf16 %v2286_v2 }
 0x189   : > { %1959 = vmatpush1.bf16.xpose.msra.mxu1 %v644_v10  ;;  %1742 = vmatprep.subr.bf16.mxu0 %v621_v11  ;;  %v2407_v10 = vunpack.c.h.s8.bf16 %v2287_v62  ;;  %v665_v11 = vunpack.c.h.s8.bf16 %v449_v57 }
 0x18a   : > { %1960 = vmatprep.subr.bf16.mxu1 %v653_v12  ;;  %v2295_v12 = vld [vmem:[%s7300_s17 + $0x68] sm:$0xff] }
 0x18b   : > { %v2423_v18 = vunpack.c.h.s8.bf16 %v2295_v12 }
 0x190   : > { %1743 = vmatpush1.bf16.xpose.msra.mxu0 %v620_v3  ;;  %v2415_v3 = vunpack.c.l.s8.bf16 %v2295_v12 }
 0x191   : > { %1961 = vmatpush1.bf16.xpose.msra.mxu1 %v652_v5  ;;  %2052 = vmatprep.subr.bf16.mxu0 %v655_v6  ;;  %v2294_v5 = vld [vmem:[%s7300_s17 + $0x60] sm:$0xff]  ;;  %v457_v6 = vld [vmem:[%s7290_s11 + $0x358] sm:$0xff] }
 0x192   : > { %2622 = vmatprep.subr.bf16.mxu1 %v2395_v17  ;;  %v664_v17 = vunpack.c.h.s8.bf16 %v448_v1  ;;  %v2414_v4 = vunpack.c.l.s8.bf16 %v2294_v5  ;;  %v673_v19 = vunpack.c.l.s8.bf16 %v457_v6  ;;  %v2301_v1 = vld [vmem:[%s7300_s17 + $0x98] sm:$0xff] }
 0x197   : > { %1769 = vmatmul.mubr.bf16.vlgmr.msra.gmra.mrb[8].mxu0 %v1605_v21  ;;  %v2422_v21 = vunpack.c.h.s8.bf16 %v2294_v5 }
 0x198   : > { %1987 = vmatmul.mubr.bf16.vlgmr.msra.gmra.mrb[8].mxu1 %v1823_v22  ;;  %2053 = vmatpush1.bf16.xpose.msra.mxu0 %v654_v23  ;;  %v2401_v22 = vunpack.c.l.s8.bf16 %v2289_v20  ;;  %v456_v23 = vld [vmem:[%s7290_s11 + $0x350] sm:$0xff] }
 0x199   : > { %2623 = vmatpush1.bf16.msra.mxu1 %v2394_v25  ;;  %2054 = vmatprep.subr.bf16.mxu0 %v663_v27  ;;  %v2288_v25 = vld [vmem:[%s7300_s17 + $0x30] sm:$0xff] }
 0x19a   : > { %2624 = vmatprep.subr.bf16.mxu1 %v2403_v26  ;;  %2654 = vmatprep.mubr.bf16.mxu1 %v7228_v34  ;;  %v672_v26 = vunpack.c.l.s8.bf16 %v456_v23  ;;  %v2400_v27 = vunpack.c.l.s8.bf16 %v2288_v25 }
 0x19b   : > { %2084 = vmatprep.mubr.bf16.mxu0 %v7515_v29  ;;  %v681_v29 = vunpack.c.h.s8.bf16 %v457_v6 }
 0x19d   : > { %2625 = vmatpush1.bf16.msra.mxu1 %v2402_v30  ;;  %v2297_v30 = vld [vmem:[%s7300_s17 + $0x78] sm:$0xff] }
 0x19e   : > { %2626 = vmatprep.subr.bf16.mxu1 %v2411_v31  ;;  %v2408_v31 = vunpack.c.h.s8.bf16 %v2288_v25  ;;  %v2417_v32 = vunpack.c.l.s8.bf16 %v2297_v30 }
 0x1a0   : > { %2055 = vmatpush1.bf16.xpose.msra.mxu0 %v662_v36  ;;  %v1995_v36 = vcombine.high %v7503_v16, %v7503_v16  ;;  %v2298_v16 = vld [vmem:[%s7300_s17 + $0x80] sm:$0xff] }
 0x1a1   : > { %2627 = vmatpush1.bf16.msra.mxu1 %v2410_v39  ;;  %2056 = vmatprep.subr.bf16.mxu0 %v671_v42  ;;  %v680_v39 = vunpack.c.h.s8.bf16 %v456_v23  ;;  %v659_v42 = vunpack.c.l.s8.bf16 %v451_v35  ;;  %v2434_v56 = vunpack.c.h.s8.bf16 %v2298_v16  ;;  %v452_v35 = vld [vmem:[%s7290_s11 + $0x330] sm:$0xff] }
 0x1a2   : > { %2628 = vmatprep.subr.bf16.mxu1 %v2419_v41  ;;  %v2425_v41 = vunpack.c.h.s8.bf16 %v2297_v30 }
 0x1a5   : > { %2629 = vmatpush1.bf16.msra.mxu1 %v2418_v44  ;;  %v7563_v44 = vrot.slane %v1995_v36, %v7318_v24  ;;  %v2302_v36 = vld [vmem:[%s7300_s17 + $0xa0] sm:$0xff] }
 0x1a6   : > { %2663 = vmatprep.subr.bf16.mxu1 %v2397_v46  ;;  %v2427_v46 = vunpack.c.l.s8.bf16 %v2299_v43 }
 0x1a7   : > { %v2011_v48 = vcombine.high %v7563_v44, %v7563_v44 }
 0x1a8   : > { %6245 = vmatmul.mubr.msk.bf16.vlgmr.msra.gmra.mrb[12].mxu1 %vm2618_vm0, %v7526_v50  ;;  %2057 = vmatpush1.bf16.xpose.msra.mxu0 %v670_v49  ;;  %v2040_v49 = vcombine.high %v7539_v7, %v7539_v7 }
 0x1a9   : > { %2664 = vmatpush1.bf16.msra.mxu1 %v2396_v37  ;;  %2058 = vmatprep.subr.bf16.mxu0 %v679_v52  ;;  %v658_v37 = vunpack.c.l.s8.bf16 %v450_v47  ;;  %v2435_v52 = vunpack.c.h.s8.bf16 %v2299_v43 }
 0x1aa   : > { %2665 = vmatprep.subr.bf16.mxu1 %v2405_v51  ;;  %2695 = vmatprep.mubr.bf16.mxu1 %v7228_v34  ;;  %v2426_v51 = vunpack.c.l.s8.bf16 %v2298_v16  ;;  %v461_v16 = vld [vmem:[%s7290_s11 + $0x378] sm:$0xff] }
 0x1ad   : > { %2666 = vmatpush1.bf16.msra.mxu1 %v2404_v54  ;;  %v2307_v54 = vld [vmem:[%s7300_s17 + $0xc8] sm:$0xff] }
 0x1ae   : > { %2667 = vmatprep.subr.bf16.mxu1 %v2413_v55  ;;  %v7573_v55 = vrot.slane %v2011_v48, %v7318_v24  ;;  %v2443_v57 = vunpack.c.l.s8.bf16 %v2307_v54  ;;  %v668_v48 = vunpack.c.h.s8.bf16 %v452_v35 }
 0x1b0   : > { %2059 = vmatpush1.bf16.xpose.msra.mxu0 %v678_v58  ;;  %v2306_v58 = vld [vmem:[%s7300_s17 + $0xc0] sm:$0xff] }
 0x1b1   : > { %2668 = vmatpush1.bf16.msra.mxu1 %v2412_v59  ;;  %2092 = vmatprep.subr.bf16.mxu0 %v657_v61  ;;  %v6239_v59 = vld [vmem:[%s7295_s14 + $0x1] ss:$0 sm:$0xff]  ;;  %v666_v61 = vunpack.c.h.s8.bf16 %v450_v47  ;;  %v2450_v2 = vunpack.c.h.s8.bf16 %v2306_v58 }
 0x1b2   : > { %2669 = vmatprep.subr.bf16.mxu1 %v2421_v60  ;;  %v459_v60 = vld [vmem:[%s7290_s11 + $0x368] sm:$0xff]  ;;  %v2262_v62 = vmul.f32 %v6239_v59, %v7482_v38  ;;  %v2437_v38 = vunpack.c.h.s8.bf16 %v2301_v1  ;;  %v2310_v47 = vld [vmem:[%s7300_s17 + $0xe0] sm:$0xff] }
 0x1b5   : > { %2670 = vmatpush1.bf16.msra.mxu1 %v2420_v63  ;;  %v2451_v63 = vunpack.c.h.s8.bf16 %v2307_v54 }
 0x1b6   : > { %2704 = vmatprep.subr.bf16.mxu1 %v2399_v0  ;;  %v675_v0 = vunpack.c.l.s8.bf16 %v459_v60 }
 0x1b7   : > { %2085 = vmatmul.mubr.bf16.vlgmr.msra.gmra.mrb[12].mxu0 %v7539_v7  ;;  %v2269_v7 = vmax.f32 %v2262_v62, 0.0 }
 0x1b8   : > { %6246 = vmatmul.mubr.msk.bf16.vlgmr.msra.gmra.mrb[16].mxu1 %vm2618_vm0, %v7526_v50  ;;  %2093 = vmatpush1.bf16.xpose.msra.mxu0 %v656_v8  ;;  %v2429_v8 = vunpack.c.l.s8.bf16 %v2301_v1 }
 0x1b9   : > { %2705 = vmatpush1.bf16.msra.mxu1 %v2398_v9  ;;  %2094 = vmatprep.subr.bf16.mxu0 %v665_v11  ;;  %v458_v9 = vld [vmem:[%s7290_s11 + $0x360] sm:$0xff] }
 0x1ba   : > { %2706 = vmatprep.subr.bf16.mxu1 %v2407_v10  ;;  %2736 = vmatprep.mubr.bf16.mxu1 %v7228_v34  ;;  %v2300_v10 = vld [vmem:[%s7300_s17 + $0x90] sm:$0xff]  ;;  %v674_v11 = vunpack.c.l.s8.bf16 %v458_v9  ;;  %v682_v25 = vunpack.c.h.s8.bf16 %v458_v9  ;;  %v2317_v9 = vld [vmem:[%s7300_s17 + $0x118] sm:$0xff] }
 0x1bb   : > { %2124 = vmatprep.mubr.bf16.mxu0 %v2042_v13  ;;  %v2428_v12 = vunpack.c.l.s8.bf16 %v2300_v10  ;;  %v7586_v13 = vpack.c.bf16 %v2269_v7, %v2269_v7  ;;  %v2436_v5 = vunpack.c.h.s8.bf16 %v2300_v10 }
 0x1bd   : > { %2707 = vmatpush1.bf16.msra.mxu1 %v2406_v15  ;;  %v683_v15 = vunpack.c.h.s8.bf16 %v459_v60  ;;  %v685_v60 = vunpack.c.h.s8.bf16 %v461_v16 }
 0x1be   : > { %2708 = vmatprep.subr.bf16.mxu1 %v2415_v3  ;;  %v2309_v3 = vld [vmem:[%s7300_s17 + $0xd8] sm:$0xff] }
 0x1bf   : > { %v2445_v6 = vunpack.c.l.s8.bf16 %v2309_v3 }
 0x1c0   : > { %2095 = vmatpush1.bf16.xpose.msra.mxu0 %v664_v17  ;;  %v2308_v17 = vld [vmem:[%s7300_s17 + $0xd0] sm:$0xff] }
 0x1c1   : > { %2709 = vmatpush1.bf16.msra.mxu1 %v2414_v4  ;;  %2096 = vmatprep.subr.bf16.mxu0 %v673_v19  ;;  %v453_v19 = vld [vmem:[%s7290_s11 + $0x338] sm:$0xff] }
 0x1c2   : > { %2710 = vmatprep.subr.bf16.mxu1 %v2423_v18  ;;  %v661_v30 = vunpack.c.l.s8.bf16 %v453_v19  ;;  %v669_v43 = vunpack.c.h.s8.bf16 %v453_v19  ;;  %v2323_v19 = vld [vmem:[%s7300_s17 + $0x148] sm:$0xff] }
 0x1c5   : > { %2711 = vmatpush1.bf16.msra.mxu1 %v2422_v21 }
 0x1c6   : > { %2745 = vmatprep.subr.bf16.mxu1 %v2401_v22 }
 0x1c8   : > { %6247 = vmatmul.mubr.msk.bf16.vlgmr.msra.gmra.mrb[20].mxu1 %vm2618_vm0, %v7526_v50  ;;  %2097 = vmatpush1.bf16.xpose.msra.mxu0 %v672_v26  ;;  %v2444_v26 = vunpack.c.l.s8.bf16 %v2308_v17 }
 0x1c9   : > { %2746 = vmatpush1.bf16.msra.mxu1 %v2400_v27  ;;  %2098 = vmatprep.subr.bf16.mxu0 %v681_v29  ;;  %v2453_v29 = vunpack.c.h.s8.bf16 %v2309_v3 }
 0x1ca   : > { %2747 = vmatprep.subr.bf16.mxu1 %v2409_v28  ;;  %2777 = vmatprep.mubr.bf16.mxu1 %v7228_v34 }
 0x1cd   : > { %2748 = vmatpush1.bf16.msra.mxu1 %v2408_v31  ;;  %v2303_v31 = vld [vmem:[%s7300_s17 + $0xa8] sm:$0xff] }
 0x1ce   : > { %2749 = vmatprep.subr.bf16.mxu1 %v2417_v32  ;;  %v2452_v32 = vunpack.c.h.s8.bf16 %v2308_v17  ;;  %v2431_v33 = vunpack.c.l.s8.bf16 %v2303_v31  ;;  %v2469_v17 = vunpack.c.h.s8.bf16 %v2317_v9 }
 0x1d0   : > { %2099 = vmatpush1.bf16.xpose.msra.mxu0 %v680_v39  ;;  %v7603_v39 = vrot.slane %v7563_v44, %v7318_v24  ;;  %v2438_v24 = vunpack.c.h.s8.bf16 %v2302_v36 }
 0x1d1   : > { %2750 = vmatpush1.bf16.msra.mxu1 %v2416_v40  ;;  %2132 = vmatprep.subr.bf16.mxu0 %v659_v42  ;;  %v660_v40 = vunpack.c.l.s8.bf16 %v452_v35  ;;  %v2439_v42 = vunpack.c.h.s8.bf16 %v2303_v31  ;;  %v2483_v31 = vunpack.c.h.s8.bf16 %v2323_v19  ;;  %v2321_v35 = vld [vmem:[%s7300_s17 + $0x138] sm:$0xff] }
 0x1d2   : > { %2751 = vmatprep.subr.bf16.mxu1 %v2425_v41  ;;  %v2430_v41 = vunpack.c.l.s8.bf16 %v2302_v36 }
 0x1d5   : > { %2752 = vmatpush1.bf16.msra.mxu1 %v2424_v45  ;;  %v2311_v45 = vld [vmem:[%s7300_s17 + $0xe8] sm:$0xff] }
 0x1d6   : > { %2789 = vmatprep.subr.bf16.mxu1 %v2427_v46  ;;  %v2043_v46 = vcombine.high %v7573_v55, %v7573_v55  ;;  %v2447_v44 = vunpack.c.l.s8.bf16 %v2311_v45 }
 0x1d7   : > { %2125 = vmatmul.mubr.bf16.vlgmr.msra.gmra.mrb[12].mxu0 %v2040_v49  ;;  %v2446_v49 = vunpack.c.l.s8.bf16 %v2310_v47 }
 0x1d8   : > { %6248 = vmatmul.mubr.msk.bf16.vlgmr.msra.gmra.mrb[24].mxu1 %vm2618_vm0, %v7526_v50  ;;  %2133 = vmatpush1.bf16.xpose.msra.mxu0 %v658_v37  ;;  %v2442_v50 = vunpack.c.l.s8.bf16 %v2306_v58  ;;  %v2455_v37 = vunpack.c.h.s8.bf16 %v2311_v45 }
 0x1d9   : > { %2790 = vmatpush1.bf16.msra.mxu1 %v2426_v51  ;;  %2134 = vmatprep.subr.bf16.mxu0 %v667_v53  ;;  %v677_v51 = vunpack.c.l.s8.bf16 %v461_v16  ;;  %v2454_v53 = vunpack.c.h.s8.bf16 %v2310_v47  ;;  %v2473_v47 = vunpack.c.h.s8.bf16 %v2321_v35  ;;  %v2327_v16 = vld [vmem:[%s7300_s17 + $0x168] sm:$0xff] }
 0x1da   : > { %2791 = vmatprep.subr.bf16.mxu1 %v2435_v52  ;;  %2821 = vmatprep.mubr.bf16.mxu1 %v7228_v34  ;;  %v2305_v52 = vld [vmem:[%s7300_s17 + $0xb8] sm:$0xff] }
 0x1db   : > { %2164 = vmatprep.mubr.bf16.mxu0 %v7573_v55  ;;  %v2433_v54 = vunpack.c.l.s8.bf16 %v2305_v52  ;;  %v460_v55 = vld [vmem:[%s7290_s11 + $0x370] sm:$0xff]  ;;  %v2441_v59 = vunpack.c.h.s8.bf16 %v2305_v52 }
 0x1dc   : > { %v684_v1 = vunpack.c.h.s8.bf16 %v460_v55 }
 0x1dd   : > { %2792 = vmatpush1.bf16.msra.mxu1 %v2434_v56  ;;  %v2304_v56 = vld [vmem:[%s7300_s17 + $0xb0] sm:$0xff] }
 0x1de   : > { %2793 = vmatprep.subr.bf16.mxu1 %v2443_v57  ;;  %v676_v57 = vunpack.c.l.s8.bf16 %v460_v55  ;;  %v2432_v58 = vunpack.c.l.s8.bf16 %v2304_v56 }
 0x1e0   : > { %2135 = vmatpush1.bf16.xpose.msra.mxu0 %v666_v61  ;;  %v2313_v61 = vld [vmem:[%s7300_s17 + $0xf8] sm:$0xff] }
 0x1e1   : > { %2794 = vmatpush1.bf16.msra.mxu1 %v2442_v50  ;;  %2136 = vmatprep.subr.bf16.mxu0 %v675_v0  ;;  %v2440_v50 = vunpack.c.h.s8.bf16 %v2304_v56  ;;  %v2449_v62 = vunpack.c.l.s8.bf16 %v2313_v61  ;;  %v2315_v0 = vld [vmem:[%s7300_s17 + $0x108] sm:$0xff]  ;;  %v2457_v7 = vunpack.c.h.s8.bf16 %v2313_v61 }
 0x1e2   : > { %2795 = vmatprep.subr.bf16.mxu1 %v2451_v63  ;;  %v2312_v63 = vld [vmem:[%s7300_s17 + $0xf0] sm:$0xff] }
 0x1e3   : > { %v2456_v10 = vunpack.c.h.s8.bf16 %v2312_v63 }
 0x1e5   : > { %2796 = vmatpush1.bf16.msra.mxu1 %v2450_v2  ;;  %v2448_v2 = vunpack.c.l.s8.bf16 %v2312_v63 }
 0x1e6   : > { %2830 = vmatprep.subr.bf16.mxu1 %v2429_v8  ;;  %v2459_v8 = vunpack.c.l.s8.bf16 %v2315_v0 }
 0x1e8   : > { %6249 = vmatmul.mubr.msk.bf16.vlgmr.msra.gmra.mrb[28].mxu1 %vm2618_vm0, %v7586_v13  ;;  %2137 = vmatpush1.bf16.xpose.msra.mxu0 %v674_v11  ;;  %v2461_v11 = vunpack.c.l.s8.bf16 %v2317_v9 }
 0x1e9   : > { %2831 = vmatpush1.bf16.msra.mxu1 %v2428_v12  ;;  %2138 = vmatprep.subr.bf16.mxu0 %v683_v15  ;;  %v2314_v12 = vld [vmem:[%s7300_s17 + $0x100] sm:$0xff]  ;;  %v2041_v15 = vcombine.high %v7603_v39, %v7603_v39 }
 0x1ea   : > { %2832 = vmatprep.subr.bf16.mxu1 %v2437_v38  ;;  %v7592_v4 = vpop.f32.mrb[4].mxu0  ;;  %2862 = vmatprep.mubr.bf16.mxu1 %v7228_v34  ;;  %v2316_v38 = vld [vmem:[%s7300_s17 + $0x110] sm:$0xff]  ;;  %v2458_v3 = vunpack.c.l.s8.bf16 %v2314_v12 }
 0x1eb   : > { %v7594_v18 = vpop.f32.mrb[4].mxu1  ;;  %v1336_v20 = vpop.f32.mrb[5].mxu0 }
 0x1ec   : > { %v1554_v21 = vpop.f32.mrb[5].mxu1  ;;  %v1337_v22 = vpop.f32.mrb[6].mxu0  ;;  %v2325_v20 = vld [vmem:[%s7300_s17 + $0x158] sm:$0xff] }
 0x1ed   : > { %v1555_v23 = vpop.f32.mrb[6].mxu1  ;;  %2833 = vmatpush1.bf16.msra.mxu1 %v2436_v5  ;;  %v1338_v27 = vpop.f32.mrb[7].mxu0  ;;  %v2460_v5 = vunpack.c.l.s8.bf16 %v2316_v38  ;;  %v2466_v21 = vunpack.c.h.s8.bf16 %v2314_v12  ;;  %v2468_v22 = vunpack.c.h.s8.bf16 %v2316_v38 }
 0x1ee   : > { %v1556_v28 = vpop.f32.mrb[7].mxu1  ;;  %2834 = vmatprep.subr.bf16.mxu1 %v2445_v6  ;;  %v2467_v6 = vunpack.c.h.s8.bf16 %v2315_v0  ;;  %v2475_v23 = vunpack.c.l.s8.bf16 %v2323_v19  ;;  %v2324_v27 = vld [vmem:[%s7300_s17 + $0x150] sm:$0xff]  ;;  %v2330_v0 = vld [vmem:[%s7300_s17 + $0x180] sm:$0xff] }
 0x1ef   : > { %v6240_v28 = vld [vmem:[%s7295_s14 + $0x2] ss:$0 sm:$0xff]  ;;  %v2498_v12 = vunpack.c.h.s8.bf16 %v2330_v0 }
 0x1f0   : > { %2139 = vmatpush1.bf16.xpose.msra.mxu0 %v682_v25  ;;  %v2477_v25 = vunpack.c.l.s8.bf16 %v2325_v20 }
 0x1f1   : > { %2835 = vmatpush1.bf16.msra.mxu1 %v2444_v26  ;;  %2172 = vmatprep.subr.bf16.mxu0 %v661_v30  ;;  %v2322_v26 = vld [vmem:[%s7300_s17 + $0x140] sm:$0xff]  ;;  %v2263_v30 = vmul.f32 %v6240_v28, %v7592_v4 }
 0x1f2   : > { %2836 = vmatprep.subr.bf16.mxu1 %v2453_v29  ;;  %v2476_v29 = vunpack.c.l.s8.bf16 %v2324_v27  ;;  %v2482_v36 = vunpack.c.h.s8.bf16 %v2322_v26  ;;  %v2318_v4 = vld [vmem:[%s7300_s17 + $0x120] sm:$0xff] }
 0x1f3   : > { %v2462_v45 = vunpack.c.l.s8.bf16 %v2318_v4 }
 0x1f5   : > { %2837 = vmatpush1.bf16.msra.mxu1 %v2452_v32  ;;  %v2485_v32 = vunpack.c.h.s8.bf16 %v2325_v20 }
 0x1f6   : > { %2871 = vmatprep.subr.bf16.mxu1 %v2431_v33  ;;  %v2319_v33 = vld [vmem:[%s7300_s17 + $0x128] sm:$0xff] }
 0x1f7   : > { %2165 = vmatmul.mubr.bf16.vlgmr.msra.gmra.mrb[12].mxu0 %v7603_v39  ;;  %v2484_v39 = vunpack.c.h.s8.bf16 %v2324_v27 }
 0x1f8   : > { %6250 = vmatmul.mubr.msk.bf16.vlgmr.msra.gmra.mrb[32].mxu1 %vm2618_vm0, %v7586_v13  ;;  %2173 = vmatpush1.bf16.xpose.msra.mxu0 %v660_v40  ;;  %v2270_v40 = vmax.f32 %v2263_v30, 0.0 }
 0x1f9   : > { %2872 = vmatpush1.bf16.msra.mxu1 %v2430_v41  ;;  %2174 = vmatprep.subr.bf16.mxu0 %v669_v43  ;;  %v2463_v41 = vunpack.c.l.s8.bf16 %v2319_v33  ;;  %v2320_v43 = vld [vmem:[%s7300_s17 + $0x130] sm:$0xff] }
 0x1fa   : > { %2873 = vmatprep.subr.bf16.mxu1 %v2439_v42  ;;  %2903 = vmatprep.mubr.bf16.mxu1 %v7228_v34  ;;  %v2465_v42 = vunpack.c.l.s8.bf16 %v2321_v35 }
 0x1fb   : > { %2204 = vmatprep.mubr.bf16.mxu0 %v2043_v46  ;;  %v2464_v46 = vunpack.c.l.s8.bf16 %v2320_v43 }
 0x1fd   : > { %2874 = vmatpush1.bf16.msra.mxu1 %v2438_v24  ;;  %v2277_v24 = vpack.c.bf16 %v2270_v40, %v2270_v40  ;;  %v2343_v40 = vld [vmem:[%s7300_s17 + $0x1e8] sm:$0xff] }
 0x1fe   : > { %2875 = vmatprep.subr.bf16.mxu1 %v2447_v44  ;;  %v2471_v44 = vunpack.c.h.s8.bf16 %v2319_v33 }
 0x200   : > { %2175 = vmatpush1.bf16.xpose.msra.mxu0 %v668_v48  ;;  %v2329_v48 = vld [vmem:[%s7300_s17 + $0x178] sm:$0xff] }
 0x201   : > { %2876 = vmatpush1.bf16.msra.mxu1 %v2446_v49  ;;  %2176 = vmatprep.subr.bf16.mxu0 %v677_v51  ;;  %v2470_v49 = vunpack.c.h.s8.bf16 %v2318_v4  ;;  %v2479_v51 = vunpack.c.l.s8.bf16 %v2327_v16  ;;  %v2481_v52 = vunpack.c.l.s8.bf16 %v2329_v48 }
 0x202   : > { %2877 = vmatprep.subr.bf16.mxu1 %v2455_v37  ;;  %v2472_v37 = vunpack.c.h.s8.bf16 %v2320_v43  ;;  %v2511_v43 = vunpack.c.l.s8.bf16 %v2343_v40 }
 0x205   : > { %2878 = vmatpush1.bf16.msra.mxu1 %v2454_v53  ;;  %v2326_v53 = vld [vmem:[%s7300_s17 + $0x160] sm:$0xff] }
 0x206   : > { %2912 = vmatprep.subr.bf16.mxu1 %v2433_v54  ;;  %v2328_v54 = vld [vmem:[%s7300_s17 + $0x170] sm:$0xff]  ;;  %v2478_v55 = vunpack.c.l.s8.bf16 %v2326_v53  ;;  %v2486_v61 = vunpack.c.h.s8.bf16 %v2326_v53 }
 0x207   : > { %v2480_v56 = vunpack.c.l.s8.bf16 %v2328_v54 }
 0x208   : > { %6251 = vmatmul.mubr.msk.bf16.vlgmr.msra.gmra.mrb[36].mxu1 %vm2618_vm0, %v7586_v13  ;;  %2177 = vmatpush1.bf16.xpose.msra.mxu0 %v676_v57  ;;  %v2487_v57 = vunpack.c.h.s8.bf16 %v2327_v16  ;;  %v2519_v16 = vunpack.c.h.s8.bf16 %v2343_v40 }
 0x209   : > { %2913 = vmatpush1.bf16.msra.mxu1 %v2432_v58  ;;  %2178 = vmatprep.subr.bf16.mxu0 %v685_v60  ;;  %v2489_v58 = vunpack.c.h.s8.bf16 %v2329_v48  ;;  %v2333_v60 = vld [vmem:[%s7300_s17 + $0x198] sm:$0xff] }
 0x20a   : > { %2914 = vmatprep.subr.bf16.mxu1 %v2441_v59  ;;  %2944 = vmatprep.mubr.bf16.mxu1 %v7228_v34  ;;  %v2331_v59 = vld [vmem:[%s7300_s17 + $0x188] sm:$0xff]  ;;  %v2493_v63 = vunpack.c.l.s8.bf16 %v2333_v60  ;;  %v2501_v9 = vunpack.c.h.s8.bf16 %v2333_v60 }
 0x20d   : > { %2915 = vmatpush1.bf16.msra.mxu1 %v2440_v50  ;;  %v2488_v50 = vunpack.c.h.s8.bf16 %v2328_v54 }
 0x20e   : > { %2916 = vmatprep.subr.bf16.mxu1 %v2449_v62  ;;  %v2491_v62 = vunpack.c.l.s8.bf16 %v2331_v59 }
 0x210   : > { %2179 = vmatpush1.bf16.xpose.msra.mxu0 %v684_v1  ;;  %v2332_v1 = vld [vmem:[%s7300_s17 + $0x190] sm:$0xff] }
 0x211   : > { %2917 = vmatpush1.bf16.msra.mxu1 %v2448_v2  ;;  %2956 = vmatprep.subr.bf16.mxu0 %v2459_v8  ;;  %v2490_v2 = vunpack.c.l.s8.bf16 %v2330_v0  ;;  %v2499_v8 = vunpack.c.h.s8.bf16 %v2331_v59  ;;  %v2500_v38 = vunpack.c.h.s8.bf16 %v2332_v1 }
 0x212   : > { %2918 = vmatprep.subr.bf16.mxu1 %v2457_v7  ;;  %v2492_v7 = vunpack.c.l.s8.bf16 %v2332_v1 }
 0x215   : > { %2919 = vmatpush1.bf16.msra.mxu1 %v2456_v10  ;;  %v2339_v10 = vld [vmem:[%s7300_s17 + $0x1c8] sm:$0xff] }
 0x216   : > { %2997 = vmatprep.subr.bf16.mxu1 %v2461_v11  ;;  %v2341_v11 = vld [vmem:[%s7300_s17 + $0x1d8] sm:$0xff] }
 0x217   : > { %2205 = vmatmul.mubr.bf16.vlgmr.msra.gmra.mrb[12].mxu0 %v2041_v15  ;;  %v2507_v15 = vunpack.c.l.s8.bf16 %v2339_v10 }
 0x218   : > { %6252 = vmatmul.mubr.msk.bf16.vlgmr.msra.gmra.mrb[40].mxu1 %vm2618_vm0, %v7586_v13  ;;  %2957 = vmatpush1.bf16.msra.mxu0 %v2458_v3  ;;  %v2474_v13 = vunpack.c.l.s8.bf16 %v2322_v26  ;;  %v2509_v3 = vunpack.c.l.s8.bf16 %v2341_v11  ;;  %v2337_v26 = vld [vmem:[%s7300_s17 + $0x1b8] sm:$0xff] }
 0x219   : > { %2998 = vmatpush1.bf16.msra.mxu1 %v2460_v5  ;;  %2958 = vmatprep.subr.bf16.mxu0 %v2467_v6  ;;  %v2338_v5 = vld [vmem:[%s7300_s17 + $0x1c0] sm:$0xff]  ;;  %v2340_v6 = vld [vmem:[%s7300_s17 + $0x1d0] sm:$0xff]  ;;  %v2497_v30 = vunpack.c.l.s8.bf16 %v2337_v26 }
 0x21a   : > { %2999 = vmatprep.subr.bf16.mxu1 %v2469_v17  ;;  %2988 = vmatprep.mubr.bf16.mxu0 %v7228_v34  ;;  %v6241_v17 = vld [vmem:[%s7295_s14 + $0x3] ss:$0 sm:$0xff]  ;;  %v2506_v19 = vunpack.c.l.s8.bf16 %v2338_v5  ;;  %v2508_v20 = vunpack.c.l.s8.bf16 %v2340_v6  ;;  %v2514_v27 = vunpack.c.h.s8.bf16 %v2338_v5  ;;  %v2516_v28 = vunpack.c.h.s8.bf16 %v2340_v6 }
 0x21b   : > { %3029 = vmatprep.mubr.bf16.mxu1 %v7228_v34 }
 0x21c   : > { %2959 = vmatpush1.bf16.msra.mxu0 %v2466_v21  ;;  %v2264_v21 = vmul.f32 %v6241_v17, %v7594_v18  ;;  %v2334_v18 = vld [vmem:[%s7300_s17 + $0x1a0] sm:$0xff] }
 0x21d   : > { %3000 = vmatpush1.bf16.msra.mxu1 %v2468_v22  ;;  %2960 = vmatprep.subr.bf16.mxu0 %v2475_v23  ;;  %v2515_v22 = vunpack.c.h.s8.bf16 %v2339_v10  ;;  %v2517_v23 = vunpack.c.h.s8.bf16 %v2341_v11  ;;  %v6242_v17 = vld [vmem:[%s7295_s14 + $0x4] ss:$0 sm:$0xff] }
 0x21e   : > { %3001 = vmatprep.subr.bf16.mxu1 %v2477_v25  ;;  %v2335_v25 = vld [vmem:[%s7300_s17 + $0x1a8] sm:$0xff] }
 0x220   : > { %2961 = vmatpush1.bf16.msra.mxu0 %v2474_v13  ;;  %v2271_v13 = vmax.f32 %v2264_v21, 0.0 }
 0x221   : > { %3002 = vmatpush1.bf16.msra.mxu1 %v2476_v29  ;;  %2962 = vmatprep.subr.bf16.mxu0 %v2483_v31  ;;  %v2495_v29 = vunpack.c.l.s8.bf16 %v2335_v25  ;;  %v2336_v31 = vld [vmem:[%s7300_s17 + $0x1b0] sm:$0xff] }
 0x222   : > { %3003 = vmatprep.subr.bf16.mxu1 %v2485_v32  ;;  %v2494_v32 = vunpack.c.l.s8.bf16 %v2334_v18  ;;  %v2496_v33 = vunpack.c.l.s8.bf16 %v2336_v31  ;;  %v2278_v35 = vpack.c.bf16 %v2271_v13, %v2271_v13  ;;  %v2504_v4 = vunpack.c.h.s8.bf16 %v2336_v31 }
 0x224   : > { %2963 = vmatpush1.bf16.msra.mxu0 %v2482_v36  ;;  %v2503_v36 = vunpack.c.h.s8.bf16 %v2335_v25  ;;  %v2350_v25 = vld [vmem:[%s7300_s17 + $0x220] sm:$0xff] }
 0x225   : > { %3004 = vmatpush1.bf16.msra.mxu1 %v2484_v39  ;;  %3038 = vmatprep.subr.bf16.mxu0 %v2463_v41  ;;  %v2505_v39 = vunpack.c.h.s8.bf16 %v2337_v26  ;;  %v2345_v41 = vld [vmem:[%s7300_s17 + $0x1f8] sm:$0xff]  ;;  %v2352_v26 = vld [vmem:[%s7300_s17 + $0x230] sm:$0xff]  ;;  %v2534_v40 = vunpack.c.h.s8.bf16 %v2350_v25 }
 0x226   : > { %3079 = vmatprep.subr.bf16.mxu1 %v2465_v42  ;;  %v2502_v42 = vunpack.c.h.s8.bf16 %v2334_v18  ;;  %v2521_v48 = vunpack.c.h.s8.bf16 %v2345_v41  ;;  %v2526_v18 = vunpack.c.l.s8.bf16 %v2350_v25  ;;  %v2528_v31 = vunpack.c.l.s8.bf16 %v2352_v26 }
 0x227   : > { %6253 = vmatmul.mubr.msk.bf16.vlgmr.msra.gmra.mrb[16].mxu0 %vm2618_vm0, %v2277_v24 }
 0x228   : > { %6254 = vmatmul.mubr.msk.bf16.vlgmr.msra.gmra.mrb[44].mxu1 %vm2618_vm0, %v2277_v24  ;;  %3039 = vmatpush1.bf16.msra.mxu0 %v2462_v45  ;;  %v2513_v45 = vunpack.c.l.s8.bf16 %v2345_v41  ;;  %v2536_v41 = vunpack.c.h.s8.bf16 %v2352_v26  ;;  %v2366_v26 = vld [vmem:[%s7300_s17 + $0x2a0] sm:$0xff] }
 0x229   : > { %3080 = vmatpush1.bf16.msra.mxu1 %v2464_v46  ;;  %3040 = vmatprep.subr.bf16.mxu0 %v2471_v44  ;;  %v2342_v46 = vld [vmem:[%s7300_s17 + $0x1e0] sm:$0xff] }
 0x22a   : > { %3081 = vmatprep.subr.bf16.mxu1 %v2473_v47  ;;  %3070 = vmatprep.mubr.bf16.mxu0 %v7228_v34  ;;  %v2510_v44 = vunpack.c.l.s8.bf16 %v2342_v46 }
 0x22b   : > { %3111 = vmatprep.mubr.bf16.mxu1 %v7228_v34 }
 0x22c   : > { %3041 = vmatpush1.bf16.msra.mxu0 %v2470_v49  ;;  %v2347_v49 = vld [vmem:[%s7300_s17 + $0x208] sm:$0xff] }
 0x22d   : > { %3082 = vmatpush1.bf16.msra.mxu1 %v2472_v37  ;;  %3042 = vmatprep.subr.bf16.mxu0 %v2479_v51  ;;  %v2349_v37 = vld [vmem:[%s7300_s17 + $0x218] sm:$0xff]  ;;  %v2518_v51 = vunpack.c.h.s8.bf16 %v2342_v46  ;;  %v2523_v53 = vunpack.c.l.s8.bf16 %v2347_v49  ;;  %v2531_v59 = vunpack.c.h.s8.bf16 %v2347_v49 }
 0x22e   : > { %3083 = vmatprep.subr.bf16.mxu1 %v2481_v52  ;;  %v2525_v54 = vunpack.c.l.s8.bf16 %v2349_v37  ;;  %v2533_v60 = vunpack.c.h.s8.bf16 %v2349_v37 }
 0x230   : > { %3043 = vmatpush1.bf16.msra.mxu0 %v2478_v55  ;;  %v2346_v55 = vld [vmem:[%s7300_s17 + $0x200] sm:$0xff] }
 0x231   : > { %3084 = vmatpush1.bf16.msra.mxu1 %v2480_v56  ;;  %3044 = vmatprep.subr.bf16.mxu0 %v2487_v57  ;;  %v2348_v56 = vld [vmem:[%s7300_s17 + $0x210] sm:$0xff]  ;;  %v2522_v57 = vunpack.c.l.s8.bf16 %v2346_v55 }
 0x232   : > { %3085 = vmatprep.subr.bf16.mxu1 %v2489_v58  ;;  %v2524_v58 = vunpack.c.l.s8.bf16 %v2348_v56 }
 0x234   : > { %3045 = vmatpush1.bf16.msra.mxu0 %v2486_v61  ;;  %v2355_v61 = vld [vmem:[%s7300_s17 + $0x248] sm:$0xff] }
 0x235   : > { %3086 = vmatpush1.bf16.msra.mxu1 %v2488_v50  ;;  %3123 = vmatprep.subr.bf16.mxu0 %v2491_v62  ;;  %v2357_v50 = vld [vmem:[%s7300_s17 + $0x258] sm:$0xff]  ;;  %v2530_v62 = vunpack.c.h.s8.bf16 %v2346_v55  ;;  %v2539_v0 = vunpack.c.l.s8.bf16 %v2355_v61  ;;  %v2547_v10 = vunpack.c.h.s8.bf16 %v2355_v61  ;;  %v2362_v55 = vld [vmem:[%s7300_s17 + $0x280] sm:$0xff] }
 0x236   : > { %3164 = vmatprep.subr.bf16.mxu1 %v2493_v63  ;;  %v2532_v63 = vunpack.c.h.s8.bf16 %v2348_v56  ;;  %v2541_v1 = vunpack.c.l.s8.bf16 %v2357_v50  ;;  %v2549_v11 = vunpack.c.h.s8.bf16 %v2357_v50  ;;  %v2364_v56 = vld [vmem:[%s7300_s17 + $0x290] sm:$0xff] }
 0x237   : > { %6255 = vmatmul.mubr.msk.bf16.vlgmr.msra.gmra.mrb[20].mxu0 %vm2618_vm0, %v2277_v24 }
 0x238   : > { %6256 = vmatmul.mubr.msk.bf16.vlgmr.msra.gmra.mrb[48].mxu1 %vm2618_vm0, %v2277_v24  ;;  %3124 = vmatpush1.bf16.msra.mxu0 %v2490_v2  ;;  %v2344_v24 = vld [vmem:[%s7300_s17 + $0x1f0] sm:$0xff]  ;;  %v2354_v2 = vld [vmem:[%s7300_s17 + $0x240] sm:$0xff] }
 0x239   : > { %3165 = vmatpush1.bf16.msra.mxu1 %v2492_v7  ;;  %3125 = vmatprep.subr.bf16.mxu0 %v2499_v8  ;;  %v2512_v47 = vunpack.c.l.s8.bf16 %v2344_v24  ;;  %v2520_v52 = vunpack.c.h.s8.bf16 %v2344_v24  ;;  %v2356_v7 = vld [vmem:[%s7300_s17 + $0x250] sm:$0xff]  ;;  %v2538_v8 = vunpack.c.l.s8.bf16 %v2354_v2 }
 0x23a   : > { %3166 = vmatprep.subr.bf16.mxu1 %v2501_v9  ;;  %3155 = vmatprep.mubr.bf16.mxu0 %v7228_v34  ;;  %v2540_v9 = vunpack.c.l.s8.bf16 %v2356_v7 }
 0x23b   : > { %3196 = vmatprep.mubr.bf16.mxu1 %v7228_v34 }
 0x23c   : > { %3126 = vmatpush1.bf16.msra.mxu0 %v2498_v12  ;;  %v2351_v12 = vld [vmem:[%s7300_s17 + $0x228] sm:$0xff] }
 0x23d   : > { %3167 = vmatpush1.bf16.msra.mxu1 %v2500_v38  ;;  %3127 = vmatprep.subr.bf16.mxu0 %v2507_v15  ;;  %v2353_v38 = vld [vmem:[%s7300_s17 + $0x238] sm:$0xff]  ;;  %v2546_v15 = vunpack.c.h.s8.bf16 %v2354_v2  ;;  %v2527_v5 = vunpack.c.l.s8.bf16 %v2351_v12 }
 0x23e   : > { %3168 = vmatprep.subr.bf16.mxu1 %v2509_v3  ;;  %v2548_v3 = vunpack.c.h.s8.bf16 %v2356_v7  ;;  %v2529_v6 = vunpack.c.l.s8.bf16 %v2353_v38 }
 0x240   : > { %3128 = vmatpush1.bf16.msra.mxu0 %v2506_v19 }
 0x241   : > { %3169 = vmatpush1.bf16.msra.mxu1 %v2508_v20  ;;  %3129 = vmatprep.subr.bf16.mxu0 %v2515_v22 }
 0x242   : > { %3170 = vmatprep.subr.bf16.mxu1 %v2517_v23 }
 0x244   : > { %3130 = vmatpush1.bf16.msra.mxu0 %v2514_v27 }
 0x245   : > { %3171 = vmatpush1.bf16.msra.mxu1 %v2516_v28  ;;  %3205 = vmatprep.subr.bf16.mxu0 %v2495_v29 }
 0x246   : > { %3246 = vmatprep.subr.bf16.mxu1 %v2497_v30 }
 0x247   : > { %6257 = vmatmul.mubr.msk.bf16.vlgmr.msra.gmra.mrb[24].mxu0 %vm2618_vm0, %v2278_v35 }
 0x248   : > { %6258 = vmatmul.mubr.msk.bf16.vlgmr.msra.gmra.mrb[52].mxu1 %vm2618_vm0, %v2278_v35  ;;  %3206 = vmatpush1.bf16.msra.mxu0 %v2494_v32 }
 0x249   : > { %3247 = vmatpush1.bf16.msra.mxu1 %v2496_v33  ;;  %3207 = vmatprep.subr.bf16.mxu0 %v2503_v36  ;;  %v2535_v33 = vunpack.c.h.s8.bf16 %v2351_v12  ;;  %v2359_v36 = vld [vmem:[%s7300_s17 + $0x268] sm:$0xff] }
 0x24a   : > { %3248 = vmatprep.subr.bf16.mxu1 %v2505_v39  ;;  %3237 = vmatprep.mubr.bf16.mxu0 %v7228_v34  ;;  %v2361_v39 = vld [vmem:[%s7300_s17 + $0x278] sm:$0xff] }
 0x24b   : > { %3278 = vmatprep.mubr.bf16.mxu1 %v7228_v34 }
 0x24c   : > { %3208 = vmatpush1.bf16.msra.mxu0 %v2502_v42  ;;  %v2543_v42 = vunpack.c.l.s8.bf16 %v2359_v36 }
 0x24d   : > { %3249 = vmatpush1.bf16.msra.mxu1 %v2504_v4  ;;  %3209 = vmatprep.subr.bf16.mxu0 %v2511_v43  ;;  %v2545_v4 = vunpack.c.l.s8.bf16 %v2361_v39  ;;  %v2358_v43 = vld [vmem:[%s7300_s17 + $0x260] sm:$0xff] }
 0x24e   : > { %3250 = vmatprep.subr.bf16.mxu1 %v2513_v45  ;;  %v2360_v45 = vld [vmem:[%s7300_s17 + $0x270] sm:$0xff]  ;;  %v2542_v46 = vunpack.c.l.s8.bf16 %v2358_v43  ;;  %v2550_v37 = vunpack.c.h.s8.bf16 %v2358_v43 }
 0x24f   : > { %v2544_v24 = vunpack.c.l.s8.bf16 %v2360_v45 }
 0x250   : > { %3210 = vmatpush1.bf16.msra.mxu0 %v2510_v44  ;;  %v2551_v44 = vunpack.c.h.s8.bf16 %v2359_v36  ;;  %v2566_v36 = vunpack.c.h.s8.bf16 %v2366_v26 }
 0x251   : > { %3251 = vmatpush1.bf16.msra.mxu1 %v2512_v47  ;;  %3211 = vmatprep.subr.bf16.mxu0 %v2519_v16  ;;  %v2553_v47 = vunpack.c.h.s8.bf16 %v2361_v39  ;;  %v2363_v16 = vld [vmem:[%s7300_s17 + $0x288] sm:$0xff] }
 0x252   : > { %3252 = vmatprep.subr.bf16.mxu1 %v2521_v48  ;;  %v2365_v48 = vld [vmem:[%s7300_s17 + $0x298] sm:$0xff]  ;;  %v2563_v61 = vunpack.c.h.s8.bf16 %v2363_v16 }
 0x253   : > { %v2565_v50 = vunpack.c.h.s8.bf16 %v2365_v48 }
 0x254   : > { %3212 = vmatpush1.bf16.msra.mxu0 %v2518_v51  ;;  %v2552_v51 = vunpack.c.h.s8.bf16 %v2360_v45 }
 0x255   : > { %3253 = vmatpush1.bf16.msra.mxu1 %v2520_v52  ;;  %3290 = vmatprep.subr.bf16.mxu0 %v2523_v53  ;;  %v2555_v53 = vunpack.c.l.s8.bf16 %v2363_v16 }
 0x256   : > { %3331 = vmatprep.subr.bf16.mxu1 %v2525_v54  ;;  %v2557_v54 = vunpack.c.l.s8.bf16 %v2365_v48 }
 0x257   : > { %6259 = vmatmul.mubr.msk.bf16.vlgmr.msra.gmra.mrb[28].mxu0 %vm2618_vm0, %v2278_v35 }
 0x258   : > { %6260 = vmatmul.mubr.msk.bf16.vlgmr.msra.gmra.mrb[56].mxu1 %vm2618_vm0, %v2278_v35  ;;  %3291 = vmatpush1.bf16.msra.mxu0 %v2522_v57  ;;  %v2537_v35 = vunpack.c.h.s8.bf16 %v2353_v38 }
 0x259   : > { %3332 = vmatpush1.bf16.msra.mxu1 %v2524_v58  ;;  %3292 = vmatprep.subr.bf16.mxu0 %v2531_v59  ;;  %v2554_v59 = vunpack.c.l.s8.bf16 %v2362_v55 }
 0x25a   : > { %3333 = vmatprep.subr.bf16.mxu1 %v2533_v60  ;;  %3322 = vmatprep.mubr.bf16.mxu0 %v7228_v34  ;;  %v2556_v60 = vunpack.c.l.s8.bf16 %v2364_v56 }
 0x25b   : > { %3363 = vmatprep.mubr.bf16.mxu1 %v7228_v34 }
 0x25c   : > { %3293 = vmatpush1.bf16.msra.mxu0 %v2530_v62  ;;  %v2371_v62 = vld [vmem:[%s7300_s17 + $0x2c8] sm:$0xff] }
 0x25d   : > { %3334 = vmatpush1.bf16.msra.mxu1 %v2532_v63  ;;  %3294 = vmatprep.subr.bf16.mxu0 %v2539_v0  ;;  %v2373_v63 = vld [vmem:[%s7300_s17 + $0x2d8] sm:$0xff]  ;;  %v2562_v0 = vunpack.c.h.s8.bf16 %v2362_v55  ;;  %v2571_v2 = vunpack.c.l.s8.bf16 %v2371_v62  ;;  %v2378_v55 = vld [vmem:[%s7300_s17 + $0x300] sm:$0xff] }
 0x25e   : > { %3335 = vmatprep.subr.bf16.mxu1 %v2541_v1  ;;  %v2564_v1 = vunpack.c.h.s8.bf16 %v2364_v56  ;;  %v2573_v7 = vunpack.c.l.s8.bf16 %v2373_v63  ;;  %v2380_v56 = vld [vmem:[%s7300_s17 + $0x310] sm:$0xff] }
 0x260   : > { %3295 = vmatpush1.bf16.msra.mxu0 %v2538_v8  ;;  %v2370_v8 = vld [vmem:[%s7300_s17 + $0x2c0] sm:$0xff] }
 0x261   : > { %3336 = vmatpush1.bf16.msra.mxu1 %v2540_v9  ;;  %3296 = vmatprep.subr.bf16.mxu0 %v2547_v10  ;;  %v2372_v9 = vld [vmem:[%s7300_s17 + $0x2d0] sm:$0xff]  ;;  %v6243_v10 = vld [vmem:[%s7295_s14 + $0x5] ss:$0 sm:$0xff] }
 0x262   : > { %3337 = vmatprep.subr.bf16.mxu1 %v2549_v11  ;;  %v2570_v11 = vunpack.c.l.s8.bf16 %v2370_v8  ;;  %v2572_v12 = vunpack.c.l.s8.bf16 %v2372_v9 }
 0x264   : > { %3297 = vmatpush1.bf16.msra.mxu0 %v2546_v15  ;;  %v2579_v15 = vunpack.c.h.s8.bf16 %v2371_v62  ;;  %v2387_v62 = vld [vmem:[%s7300_s17 + $0x348] sm:$0xff] }
 0x265   : > { %3338 = vmatpush1.bf16.msra.mxu1 %v2548_v3  ;;  %3372 = vmatprep.subr.bf16.mxu0 %v2527_v5  ;;  %v2581_v3 = vunpack.c.h.s8.bf16 %v2373_v63  ;;  %v2367_v5 = vld [vmem:[%s7300_s17 + $0x2a8] sm:$0xff]  ;;  %v2389_v63 = vld [vmem:[%s7300_s17 + $0x358] sm:$0xff] }
 0x266   : > { %3413 = vmatprep.subr.bf16.mxu1 %v2529_v6  ;;  %v2369_v6 = vld [vmem:[%s7300_s17 + $0x2b8] sm:$0xff] }
 0x267   : > { %v2561_v25 = vunpack.c.l.s8.bf16 %v2369_v6 }
 0x26a   : > { %v1770_v19 = vpop.f32.mrb[8].mxu0 }
 0x26b   : > { %v7691_v20 = vpop.f32.mrb[8].mxu1  ;;  %v2265_v21 = vmul.f32 %v6242_v17, %v1770_v19  ;;  %v1772_v22 = vpop.f32.mrb[9].mxu0  ;;  %v2578_v19 = vunpack.c.h.s8.bf16 %v2370_v8  ;;  %v2386_v8 = vld [vmem:[%s7300_s17 + $0x340] sm:$0xff] }
 0x26c   : > { %v1990_v23 = vpop.f32.mrb[9].mxu1  ;;  %v1773_v27 = vpop.f32.mrb[10].mxu0  ;;  %v2266_v38 = vmul.f32 %v6243_v10, %v7691_v20  ;;  %v2559_v20 = vunpack.c.l.s8.bf16 %v2367_v5  ;;  %v2602_v10 = vunpack.c.l.s8.bf16 %v2386_v8 }
 0x26d   : > { %v1991_v28 = vpop.f32.mrb[10].mxu1  ;;  %v2272_v13 = vmax.f32 %v2265_v21, 0.0  ;;  %v1774_v29 = vpop.f32.mrb[11].mxu0  ;;  %v2580_v21 = vunpack.c.h.s8.bf16 %v2372_v9  ;;  %v2368_v27 = vld [vmem:[%s7300_s17 + $0x2b0] sm:$0xff] }
 0x26e   : > { %v1992_v30 = vpop.f32.mrb[11].mxu1  ;;  %v2273_v22 = vmax.f32 %v2266_v38, 0.0  ;;  %v2558_v29 = vunpack.c.l.s8.bf16 %v2366_v26  ;;  %v2568_v39 = vunpack.c.h.s8.bf16 %v2368_v27  ;;  %v2388_v9 = vld [vmem:[%s7300_s17 + $0x350] sm:$0xff]  ;;  %v2613_v38 = vunpack.c.h.s8.bf16 %v2389_v63 }
 0x26f   : > { %v2279_v32 = vpack.c.bf16 %v2272_v13, %v2272_v13  ;;  %v2560_v30 = vunpack.c.l.s8.bf16 %v2368_v27 }
 0x271   : > { %6261 = vmatmul.mubr.msk.bf16.vlgmr.msra.gmra.mrb[32].mxu0 %vm2618_vm0, %v2279_v32  ;;  %6262 = vmatmul.mubr.msk.bf16.vlgmr.msra.gmra.mrb[60].mxu1 %vm2618_vm0, %v2279_v32 }
 0x272   : > { %3373 = vmatpush1.bf16.msra.mxu0 %v2526_v18  ;;  %3414 = vmatpush1.bf16.msra.mxu1 %v2528_v31  ;;  %v2280_v18 = vpack.c.bf16 %v2273_v22, %v2273_v22  ;;  %v2567_v31 = vunpack.c.h.s8.bf16 %v2367_v5 }
 0x273   : > { %3374 = vmatprep.subr.bf16.mxu0 %v2535_v33  ;;  %3415 = vmatprep.subr.bf16.mxu1 %v2537_v35  ;;  %v2375_v33 = vld [vmem:[%s7300_s17 + $0x2e8] sm:$0xff]  ;;  %v2377_v35 = vld [vmem:[%s7300_s17 + $0x2f8] sm:$0xff] }
 0x274   : > { %3404 = vmatprep.mubr.bf16.mxu0 %v7228_v34  ;;  %3445 = vmatprep.mubr.bf16.mxu1 %v7228_v34 }
 0x276   : > { %3375 = vmatpush1.bf16.msra.mxu0 %v2534_v40  ;;  %3416 = vmatpush1.bf16.msra.mxu1 %v2536_v41  ;;  %v2575_v40 = vunpack.c.l.s8.bf16 %v2375_v33  ;;  %v2577_v41 = vunpack.c.l.s8.bf16 %v2377_v35 }
 0x277   : > { %3376 = vmatprep.subr.bf16.mxu0 %v2543_v42  ;;  %3417 = vmatprep.subr.bf16.mxu1 %v2545_v4  ;;  %v2374_v42 = vld [vmem:[%s7300_s17 + $0x2e0] sm:$0xff]  ;;  %v2376_v4 = vld [vmem:[%s7300_s17 + $0x2f0] sm:$0xff] }
 0x278   : > { %v2574_v43 = vunpack.c.l.s8.bf16 %v2374_v42  ;;  %v2576_v45 = vunpack.c.l.s8.bf16 %v2376_v4  ;;  %v2582_v48 = vunpack.c.h.s8.bf16 %v2374_v42 }
 0x27a   : > { %3377 = vmatpush1.bf16.msra.mxu0 %v2542_v46  ;;  %3418 = vmatpush1.bf16.msra.mxu1 %v2544_v24  ;;  %v2583_v46 = vunpack.c.h.s8.bf16 %v2375_v33  ;;  %v2585_v24 = vunpack.c.h.s8.bf16 %v2377_v35 }
 0x27b   : > { %v7705_v49 = vpop.f32.mrb[12].mxu1  ;;  %3378 = vmatprep.subr.bf16.mxu0 %v2551_v44  ;;  %3419 = vmatprep.subr.bf16.mxu1 %v2553_v47  ;;  %v2379_v44 = vld [vmem:[%s7300_s17 + $0x308] sm:$0xff]  ;;  %v2381_v47 = vld [vmem:[%s7300_s17 + $0x318] sm:$0xff] }
 0x27c   : > { %v7707_v52 = vpop.f32.mrb[13].mxu1 }
 0x27d   : > { %v2660_v57 = vpop.f32.mrb[14].mxu1 }
 0x27e   : > { %v2661_v58 = vpop.f32.mrb[15].mxu1  ;;  %3379 = vmatpush1.bf16.msra.mxu0 %v2550_v37  ;;  %3420 = vmatpush1.bf16.msra.mxu1 %v2552_v51  ;;  %v2584_v37 = vunpack.c.h.s8.bf16 %v2376_v4 }
 0x27f   : > { %3457 = vmatprep.subr.bf16.mxu0 %v2555_v53  ;;  %3498 = vmatprep.subr.bf16.mxu1 %v2557_v54  ;;  %v2587_v53 = vunpack.c.l.s8.bf16 %v2379_v44  ;;  %v2589_v54 = vunpack.c.l.s8.bf16 %v2381_v47 }
 0x281   : > { %6263 = vmatmul.mubr.msk.bf16.vlgmr.msra.gmra.mrb[36].mxu0 %vm2618_vm0, %v2279_v32  ;;  %6264 = vmatmul.mubr.msk.bf16.vlgmr.msra.gmra.mrb[64].mxu1 %vm2618_vm0, %v2279_v32  ;;  %v2569_v32 = vunpack.c.h.s8.bf16 %v2369_v6  ;;  %v2610_v6 = vunpack.c.h.s8.bf16 %v2386_v8 }
 0x282   : > { %3458 = vmatpush1.bf16.msra.mxu0 %v2554_v59  ;;  %3499 = vmatpush1.bf16.msra.mxu1 %v2556_v60  ;;  %v2586_v59 = vunpack.c.l.s8.bf16 %v2378_v55  ;;  %v2588_v60 = vunpack.c.l.s8.bf16 %v2380_v56 }
 0x283   : > { %3459 = vmatprep.subr.bf16.mxu0 %v2563_v61  ;;  %3500 = vmatprep.subr.bf16.mxu1 %v2565_v50  ;;  %v2595_v61 = vunpack.c.h.s8.bf16 %v2379_v44  ;;  %v2597_v50 = vunpack.c.h.s8.bf16 %v2381_v47 }
 0x284   : > { %3489 = vmatprep.mubr.bf16.mxu0 %v7228_v34  ;;  %3530 = vmatprep.mubr.bf16.mxu1 %v7228_v34 }
 0x286   : > { %3460 = vmatpush1.bf16.msra.mxu0 %v2562_v0  ;;  %3501 = vmatpush1.bf16.msra.mxu1 %v2564_v1  ;;  %v2594_v0 = vunpack.c.h.s8.bf16 %v2378_v55  ;;  %v2596_v1 = vunpack.c.h.s8.bf16 %v2380_v56  ;;  %v6244_v55 = vld [vmem:[%s7295_s14 + $0x6] ss:$0 sm:$0xff] }
 0x287   : > { %3461 = vmatprep.subr.bf16.mxu0 %v2571_v2  ;;  %3502 = vmatprep.subr.bf16.mxu1 %v2573_v7  ;;  %v2603_v2 = vunpack.c.l.s8.bf16 %v2387_v62  ;;  %v2605_v7 = vunpack.c.l.s8.bf16 %v2389_v63 }
 0x28a   : > { %3462 = vmatpush1.bf16.msra.mxu0 %v2570_v11  ;;  %3503 = vmatpush1.bf16.msra.mxu1 %v2572_v12  ;;  %v2604_v11 = vunpack.c.l.s8.bf16 %v2388_v9  ;;  %v2611_v12 = vunpack.c.h.s8.bf16 %v2387_v62 }
 0x28b   : > { %v7723_v17 = vpop.f32.mrb[16].mxu1  ;;  %3463 = vmatprep.subr.bf16.mxu0 %v2579_v15  ;;  %3504 = vmatprep.subr.bf16.mxu1 %v2581_v3  ;;  %v7754_v15 = vld [vmem:[%s7300_s17 + $0x328] sm:$0xff]  ;;  %v7757_v3 = vld [vmem:[%s7300_s17 + $0x338] sm:$0xff] }
 0x28c   : > { %v7725_v23 = vpop.f32.mrb[17].mxu1  ;;  %v2591_v22 = vunpack.c.l.s8.bf16 %v7754_v15 }
 0x28d   : > { %v2701_v28 = vpop.f32.mrb[18].mxu1 }
 0x28e   : > { %v2702_v13 = vpop.f32.mrb[19].mxu1  ;;  %3464 = vmatpush1.bf16.msra.mxu0 %v2578_v19  ;;  %3505 = vmatpush1.bf16.msra.mxu1 %v2580_v21  ;;  %v2612_v19 = vunpack.c.h.s8.bf16 %v2388_v9  ;;  %v3791_v28 = vsel %vm3790_vm1, %v7705_v49, 0.0 }
 0x28f   : > { %3539 = vmatprep.subr.bf16.mxu0 %v2559_v20  ;;  %3580 = vmatprep.subr.bf16.mxu1 %v2561_v25  ;;  %v2593_v20 = vunpack.c.l.s8.bf16 %v7757_v3 }
 0x291   : > { %6265 = vmatmul.mubr.msk.bf16.vlgmr.msra.gmra.mrb[40].mxu0 %vm2618_vm0, %v2280_v18  ;;  %6266 = vmatmul.mubr.msk.bf16.vlgmr.msra.gmra.mrb[68].mxu1 %vm2618_vm0, %v2280_v18 }
 0x292   : > { %3540 = vmatpush1.bf16.msra.mxu0 %v2558_v29  ;;  %3581 = vmatpush1.bf16.msra.mxu1 %v2560_v30  ;;  %v3804_v30 = vsel %vm3790_vm1, %v7707_v52, 0.0 }
 0x293   : > { %3541 = vmatprep.subr.bf16.mxu0 %v2567_v31  ;;  %3582 = vmatprep.subr.bf16.mxu1 %v2569_v32 }
 0x294   : > { %3571 = vmatprep.mubr.bf16.mxu0 %v7228_v34  ;;  %3612 = vmatprep.mubr.bf16.mxu1 %v7228_v34 }
 0x296   : > { %3542 = vmatpush1.bf16.msra.mxu0 %v2566_v36  ;;  %3583 = vmatpush1.bf16.msra.mxu1 %v2568_v39  ;;  %v3817_v39 = vsel %vm3790_vm1, %v7723_v17, 0.0 }
 0x297   : > { %3543 = vmatprep.subr.bf16.mxu0 %v2575_v40  ;;  %3584 = vmatprep.subr.bf16.mxu1 %v2577_v41  ;;  %v3830_v41 = vsel %vm3790_vm1, %v7725_v23, 0.0 }
 0x29a   : > { %3544 = vmatpush1.bf16.msra.mxu0 %v2574_v43  ;;  %3585 = vmatpush1.bf16.msra.mxu1 %v2576_v45 }
 0x29b   : > { %v7739_v16 = vpop.f32.mrb[20].mxu1  ;;  %3545 = vmatprep.subr.bf16.mxu0 %v2583_v46  ;;  %3586 = vmatprep.subr.bf16.mxu1 %v2585_v24 }
 0x29c   : > { %v7741_v51 = vpop.f32.mrb[21].mxu1  ;;  %v3843_v24 = vsel %vm3790_vm1, %v7739_v16, 0.0 }
 0x29d   : > { %v2742_v57 = vpop.f32.mrb[22].mxu1  ;;  %v3856_v23 = vsel %vm3790_vm1, %v7741_v51, 0.0  ;;  %v2384_v51 = vld [vmem:[%s7300_s17 + $0x330] sm:$0xff] }
 0x29e   : > { %v2743_v58 = vpop.f32.mrb[23].mxu1  ;;  %3546 = vmatpush1.bf16.msra.mxu0 %v2582_v48  ;;  %3587 = vmatpush1.bf16.msra.mxu1 %v2584_v37 }
 0x29f   : > { %3624 = vmatprep.subr.bf16.mxu0 %v2587_v53  ;;  %3665 = vmatprep.subr.bf16.mxu1 %v2589_v54 }
 0x2a1   : > { %6267 = vmatmul.mubr.msk.bf16.vlgmr.msra.gmra.mrb[44].mxu0 %vm2618_vm0, %v2280_v18  ;;  %6268 = vmatmul.mubr.msk.bf16.vlgmr.msra.gmra.mrb[72].mxu1 %vm2618_vm0, %v2280_v18 }
 0x2a2   : > { %3625 = vmatpush1.bf16.msra.mxu0 %v2586_v59  ;;  %3666 = vmatpush1.bf16.msra.mxu1 %v2588_v60 }
 0x2a3   : > { %3626 = vmatprep.subr.bf16.mxu0 %v2595_v61  ;;  %3667 = vmatprep.subr.bf16.mxu1 %v2597_v50  ;;  %v2382_v50 = vld [vmem:[%s7300_s17 + $0x320] sm:$0xff] }
 0x2a4   : > { %3656 = vmatprep.mubr.bf16.mxu0 %v7228_v34  ;;  %3697 = vmatprep.mubr.bf16.mxu1 %v7228_v34 }
 0x2a6   : > { %3627 = vmatpush1.bf16.msra.mxu0 %v2594_v0  ;;  %3668 = vmatpush1.bf16.msra.mxu1 %v2596_v1 }
 0x2a7   : > { %3628 = vmatprep.subr.bf16.mxu0 %v2603_v2  ;;  %3669 = vmatprep.subr.bf16.mxu1 %v2605_v7 }
 0x2aa   : > { %3629 = vmatpush1.bf16.msra.mxu0 %v2602_v10  ;;  %3670 = vmatpush1.bf16.msra.mxu1 %v2604_v11  ;;  %v2590_v11 = vunpack.c.l.s8.bf16 %v2382_v50 }
 0x2ab   : > { %v2779_v5 = vpop.f32.mrb[24].mxu1  ;;  %3630 = vmatprep.subr.bf16.mxu0 %v2611_v12  ;;  %3671 = vmatprep.subr.bf16.mxu1 %v2613_v38  ;;  %v2592_v12 = vunpack.c.l.s8.bf16 %v2384_v51 }
 0x2ac   : > { %v2781_v21 = vpop.f32.mrb[25].mxu1  ;;  %v3869_v16 = vsel %vm3790_vm1, %v2779_v5, 0.0  ;;  %v2599_v5 = vunpack.c.h.s8.bf16 %v7754_v15 }
 0x2ad   : > { %v2783_v25 = vpop.f32.mrb[26].mxu1  ;;  %v3882_v62 = vsel %vm3790_vm1, %v2781_v21, 0.0  ;;  %v2393_v21 = vld [vmem:[%s7300_s17 + $0x378] sm:$0xff] }
 0x2ae   : > { %v2784_v26 = vpop.f32.mrb[27].mxu1  ;;  %3631 = vmatpush1.bf16.msra.mxu0 %v2610_v6  ;;  %3672 = vmatpush1.bf16.msra.mxu1 %v2612_v19  ;;  %v2601_v6 = vunpack.c.h.s8.bf16 %v7757_v3  ;;  %v2391_v19 = vld [vmem:[%s7300_s17 + $0x368] sm:$0xff] }
 0x2af   : > { %3706 = vmatprep.subr.bf16.mxu0 %v2591_v22  ;;  %3747 = vmatprep.subr.bf16.mxu1 %v2593_v20  ;;  %v2598_v22 = vunpack.c.h.s8.bf16 %v2382_v50  ;;  %v2600_v20 = vunpack.c.h.s8.bf16 %v2384_v51  ;;  %v2607_v25 = vunpack.c.l.s8.bf16 %v2391_v19  ;;  %v2609_v26 = vunpack.c.l.s8.bf16 %v2393_v21 }
 0x2bb   : > { %v2823_v27 = vpop.f32.mrb[28].mxu1 }
 0x2bc   : > { %v3792_v13 = vsel %vm3790_vm1, %v2823_v27, 0.0  ;;  %v2825_v29 = vpop.f32.mrb[29].mxu1  ;;  %v2390_v27 = vld [vmem:[%s7300_s17 + $0x360] sm:$0xff] }
 0x2bd   : > { %v7766_v18 = vadd.f32 %v3792_v13, %v3791_v28  ;;  %v3805_v31 = vsel %vm3790_vm1, %v2825_v29, 0.0  ;;  %v2827_v32 = vpop.f32.mrb[30].mxu1  ;;  %v2392_v28 = vld [vmem:[%s7300_s17 + $0x370] sm:$0xff]  ;;  %v2606_v15 = vunpack.c.l.s8.bf16 %v2390_v27  ;;  %v2615_v13 = vunpack.c.h.s8.bf16 %v2391_v19 }
 0x2be   : > { %v7769_v33 = vadd.f32 %v3805_v31, %v3804_v30  ;;  %v2828_v35 = vpop.f32.mrb[31].mxu1  ;;  %v2608_v3 = vunpack.c.l.s8.bf16 %v2392_v28  ;;  %v2617_v29 = vunpack.c.h.s8.bf16 %v2393_v21  ;;  %v2614_v32 = vunpack.c.h.s8.bf16 %v2390_v27 }
 0x2bf   : > { %v2616_v35 = vunpack.c.h.s8.bf16 %v2392_v28 }
 0x2cb   : > { %v2864_v36 = vpop.f32.mrb[32].mxu1 }
 0x2cc   : > { %v3818_v49 = vsel %vm3790_vm1, %v2864_v36, 0.0  ;;  %v2866_v40 = vpop.f32.mrb[33].mxu1 }
 0x2cd   : > { %v7776_v52 = vadd.f32 %v3818_v49, %v3817_v39  ;;  %v3831_v42 = vsel %vm3790_vm1, %v2866_v40, 0.0  ;;  %v2868_v4 = vpop.f32.mrb[34].mxu1 }
 0x2ce   : > { %v7779_v43 = vadd.f32 %v3831_v42, %v3830_v41  ;;  %v2869_v45 = vpop.f32.mrb[35].mxu1 }
 0x2db   : > { %v2905_v46 = vpop.f32.mrb[36].mxu1 }
 0x2dc   : > { %v3844_v17 = vsel %vm3790_vm1, %v2905_v46, 0.0  ;;  %v2907_v44 = vpop.f32.mrb[37].mxu1 }
 0x2dd   : > { %v7786_v47 = vadd.f32 %v3844_v17, %v3843_v24  ;;  %v3857_v48 = vsel %vm3790_vm1, %v2907_v44, 0.0  ;;  %v2909_v37 = vpop.f32.mrb[38].mxu1 }
 0x2de   : > { %v7789_v53 = vadd.f32 %v3857_v48, %v3856_v23  ;;  %v2910_v54 = vpop.f32.mrb[39].mxu1 }
 0x2ea   : > { %v2206_v56 = vpop.f32.mrb[12].mxu0 }
 0x2eb   : > { %v2946_v57 = vpop.f32.mrb[40].mxu1  ;;  %v2267_v58 = vmul.f32 %v6244_v55, %v2206_v56  ;;  %v2208_v60 = vpop.f32.mrb[13].mxu0 }
 0x2ec   : > { %v3870_v59 = vsel %vm3790_vm1, %v2946_v57, 0.0  ;;  %v2948_v61 = vpop.f32.mrb[41].mxu1  ;;  %v2209_v1 = vpop.f32.mrb[14].mxu0 }
 0x2ed   : > { %v7797_v63 = vadd.f32 %v3870_v59, %v3869_v16  ;;  %v3883_v0 = vsel %vm3790_vm1, %v2948_v61, 0.0  ;;  %v2950_v2 = vpop.f32.mrb[42].mxu1  ;;  %v2274_v7 = vmax.f32 %v2267_v58, 0.0  ;;  %v2210_v9 = vpop.f32.mrb[15].mxu0 }
 0x2ee   : > { %v7800_v8 = vadd.f32 %v3883_v0, %v3882_v62  ;;  %v2951_v10 = vpop.f32.mrb[43].mxu1 }
 0x2ef   : > { %v2281_v38 = vpack.c.bf16 %v2274_v7, %v2274_v7 }
 0x2f1   : > { %6269 = vmatmul.mubr.msk.bf16.vlgmr.msra.gmra.mrb[48].mxu0 %vm2618_vm0, %v2281_v38  ;;  %6270 = vmatmul.mubr.msk.bf16.vlgmr.msra.gmra.mrb[76].mxu1 %vm2618_vm0, %v2281_v38 }
 0x2f2   : > { %3707 = vmatpush1.bf16.msra.mxu0 %v2590_v11  ;;  %3748 = vmatpush1.bf16.msra.mxu1 %v2592_v12 }
 0x2f3   : > { %3708 = vmatprep.subr.bf16.mxu0 %v2599_v5  ;;  %3749 = vmatprep.subr.bf16.mxu1 %v2601_v6 }
 0x2f4   : > { %3738 = vmatprep.mubr.bf16.mxu0 %v7228_v34  ;;  %3779 = vmatprep.mubr.bf16.mxu1 %v7228_v34 }
 0x2f6   : > { %3709 = vmatpush1.bf16.msra.mxu0 %v2598_v22  ;;  %3750 = vmatpush1.bf16.msra.mxu1 %v2600_v20 }
 0x2f7   : > { %3710 = vmatprep.subr.bf16.mxu0 %v2607_v25  ;;  %3751 = vmatprep.subr.bf16.mxu1 %v2609_v26 }
 0x2fa   : > { %3711 = vmatpush1.bf16.msra.mxu0 %v2606_v15  ;;  %3752 = vmatpush1.bf16.msra.mxu1 %v2608_v3  ;;  %v2990_v30 = vpop.f32.mrb[16].mxu0 }
 0x2fb   : > { %v3031_v31 = vpop.f32.mrb[44].mxu1  ;;  %v3794_v36 = vsel %vm3790_vm1, %v2990_v30, 0.0  ;;  %v2992_v49 = vpop.f32.mrb[17].mxu0  ;;  %3712 = vmatprep.subr.bf16.mxu0 %v2615_v13  ;;  %3753 = vmatprep.subr.bf16.mxu1 %v2617_v29 }
 0x2fc   : > { %v3820_v39 = vsel %vm3790_vm1, %v3031_v31, 0.0  ;;  %v3033_v34 = vpop.f32.mrb[45].mxu1  ;;  %v3795_v40 = vadd.f32 %v3794_v36, %v7766_v18  ;;  %v3807_v42 = vsel %vm3790_vm1, %v2992_v49, 0.0  ;;  %v2994_v45 = vpop.f32.mrb[18].mxu0 }
 0x2fd   : > { %v3821_v41 = vadd.f32 %v3820_v39, %v7776_v52  ;;  %v3833_v4 = vsel %vm3790_vm1, %v3033_v34, 0.0  ;;  %v3035_v46 = vpop.f32.mrb[46].mxu1  ;;  %v3808_v24 = vadd.f32 %v3807_v42, %v7769_v33  ;;  %v2995_v44 = vpop.f32.mrb[19].mxu0 }
 0x2fe   : > { %v3834_v17 = vadd.f32 %v3833_v4, %v7779_v43  ;;  %v3036_v23 = vpop.f32.mrb[47].mxu1  ;;  %3713 = vmatpush1.bf16.msra.mxu0 %v2614_v32  ;;  %3754 = vmatpush1.bf16.msra.mxu1 %v2616_v35 }
 0x301   : > { %6271 = vmatmul.mubr.msk.bf16.vlgmr.msra.gmra.mrb[52].mxu0 %vm2618_vm0, %v2281_v38  ;;  %6272 = vmatmul.mubr.msk.bf16.vlgmr.msra.gmra.mrb[80].mxu1 %vm2618_vm0, %v2281_v38 }
 0x30a   : > { %v3072_v18 = vpop.f32.mrb[20].mxu0 }
 0x30b   : > { %v3113_v52 = vpop.f32.mrb[48].mxu1  ;;  %v3846_v48 = vsel %vm3790_vm1, %v3072_v18, 0.0  ;;  %v3074_v54 = vpop.f32.mrb[21].mxu0 }
 0x30c   : > { %v3872_v37 = vsel %vm3790_vm1, %v3113_v52, 0.0  ;;  %v3115_v55 = vpop.f32.mrb[49].mxu1  ;;  %v3847_v33 = vadd.f32 %v3846_v48, %v7786_v47  ;;  %v3859_v56 = vsel %vm3790_vm1, %v3074_v54, 0.0  ;;  %v3076_v16 = vpop.f32.mrb[22].mxu0 }
 0x30d   : > { %v3873_v43 = vadd.f32 %v3872_v37, %v7797_v63  ;;  %v3885_v57 = vsel %vm3790_vm1, %v3115_v55, 0.0  ;;  %v3117_v58 = vpop.f32.mrb[50].mxu1  ;;  %v3860_v59 = vadd.f32 %v3859_v56, %v7789_v53  ;;  %v3077_v61 = vpop.f32.mrb[23].mxu0 }
 0x30e   : > { %v3886_v60 = vadd.f32 %v3885_v57, %v7800_v8  ;;  %v3118_v50 = vpop.f32.mrb[51].mxu1 }
 0x31a   : > { %v3157_v51 = vpop.f32.mrb[24].mxu0 }
 0x31b   : > { %v3198_v62 = vpop.f32.mrb[52].mxu1  ;;  %v3796_v0 = vsel %vm3790_vm1, %v3157_v51, 0.0  ;;  %v3159_v1 = vpop.f32.mrb[25].mxu0 }
 0x31c   : > { %v3822_v47 = vsel %vm3790_vm1, %v3198_v62, 0.0  ;;  %v3200_v63 = vpop.f32.mrb[53].mxu1  ;;  %v3797_v2 = vadd.f32 %v3796_v0, %v3795_v40  ;;  %v3809_v9 = vsel %vm3790_vm1, %v3159_v1, 0.0  ;;  %v3161_v11 = vpop.f32.mrb[26].mxu0 }
 0x31d   : > { %v3823_v7 = vadd.f32 %v3822_v47, %v3821_v41  ;;  %v3835_v10 = vsel %vm3790_vm1, %v3200_v63, 0.0  ;;  %v3202_v53 = vpop.f32.mrb[54].mxu1  ;;  %v3810_v12 = vadd.f32 %v3809_v9, %v3808_v24  ;;  %v3162_v38 = vpop.f32.mrb[27].mxu0 }
 0x31e   : > { %v3836_v8 = vadd.f32 %v3835_v10, %v3834_v17  ;;  %v3203_v5 = vpop.f32.mrb[55].mxu1 }
 0x32a   : > { %v3239_v6 = vpop.f32.mrb[28].mxu0 }
 0x32b   : > { %v3280_v19 = vpop.f32.mrb[56].mxu1  ;;  %v3848_v21 = vsel %vm3790_vm1, %v3239_v6, 0.0  ;;  %v3241_v20 = vpop.f32.mrb[29].mxu0 }
 0x32c   : > { %v3874_v22 = vsel %vm3790_vm1, %v3280_v19, 0.0  ;;  %v3282_v25 = vpop.f32.mrb[57].mxu1  ;;  %v3849_v26 = vadd.f32 %v3848_v21, %v3847_v33  ;;  %v3861_v28 = vsel %vm3790_vm1, %v3241_v20, 0.0  ;;  %v3243_v3 = vpop.f32.mrb[30].mxu0 }
 0x32d   : > { %v3875_v27 = vadd.f32 %v3874_v22, %v3873_v43  ;;  %v3887_v15 = vsel %vm3790_vm1, %v3282_v25, 0.0  ;;  %v3284_v13 = vpop.f32.mrb[58].mxu1  ;;  %v3862_v29 = vadd.f32 %v3861_v28, %v3860_v59  ;;  %v3244_v31 = vpop.f32.mrb[31].mxu0 }
 0x32e   : > { %v3888_v30 = vadd.f32 %v3887_v15, %v3886_v60  ;;  %v3285_v32 = vpop.f32.mrb[59].mxu1 }
 0x344   : > { %v3324_v35 = vpop.f32.mrb[32].mxu0  ;;  %v3365_v36 = vpop.f32.mrb[60].mxu1 }
 0x345   : > { %v3798_v39 = vsel %vm3790_vm1, %v3324_v35, 0.0  ;;  %v3824_v49 = vsel %vm3790_vm1, %v3365_v36, 0.0  ;;  %v3326_v34 = vpop.f32.mrb[33].mxu0  ;;  %v3367_v40 = vpop.f32.mrb[61].mxu1  ;;  %v7229_v36 = vmov 1983009808  }
 0x346   : > { %v3799_v41 = vadd.f32 %v3798_v39, %v3797_v2  ;;  %v3825_v42 = vadd.f32 %v3824_v49, %v3823_v7  ;;  %v3811_v4 = vsel %vm3790_vm1, %v3326_v34, 0.0  ;;  %v3837_v45 = vsel %vm3790_vm1, %v3367_v40, 0.0  ;;  %v3328_v46 = vpop.f32.mrb[34].mxu0  ;;  %v3369_v24 = vpop.f32.mrb[62].mxu1 }
 0x347   : > { %v3812_v17 = vadd.f32 %v3811_v4, %v3810_v12  ;;  %v3838_v44 = vadd.f32 %v3837_v45, %v3836_v8  ;;  %v3329_v23 = vpop.f32.mrb[35].mxu0  ;;  %v3370_v18 = vpop.f32.mrb[63].mxu1  ;;  %v3906_v39 = vunpack.c.l.s4 %v7229_v36  ;;  %v6824_v36 = vld [vmem:[%s8913_s5 + $0x6c] ss:$16 sps:$4 sm:$0xff] (!%p6273_p5)  }
 0x349   : > { %v3907_v49 = vunpack.c.0.s8 %v3906_v39  ;;  %v6826_v39 = vld [vmem:[%s8913_s5 + $0x60] ss:$16 sps:$4 sm:$0xff] (!%p6273_p5)  }
 0x354   : > { %v3406_v52 = vpop.f32.mrb[36].mxu0  ;;  %v3447_v48 = vpop.f32.mrb[64].mxu1 }
 0x355   : > { %v3850_v37 = vsel %vm3790_vm1, %v3406_v52, 0.0  ;;  %v3876_v54 = vsel %vm3790_vm1, %v3447_v48, 0.0  ;;  %v3408_v55 = vpop.f32.mrb[37].mxu0  ;;  %v3449_v33 = vpop.f32.mrb[65].mxu1  ;;  %v7859_v48 = vsub.s32 %v3907_v49, %v7307_v14  ;;  %v6827_v49 = vld [vmem:[%s8913_s5 + $0x68] ss:$16 sps:$4 sm:$0xff] (!%p6273_p5)  }
 0x356   : > { %v3851_v43 = vadd.f32 %v3850_v37, %v3849_v26  ;;  %v3877_v56 = vadd.f32 %v3876_v54, %v3875_v27  ;;  %v3863_v57 = vsel %vm3790_vm1, %v3408_v55, 0.0  ;;  %v3889_v16 = vsel %vm3790_vm1, %v3449_v33, 0.0  ;;  %v3410_v58 = vpop.f32.mrb[38].mxu0  ;;  %v3451_v59 = vpop.f32.mrb[66].mxu1 }
 0x357   : > { %v3864_v60 = vadd.f32 %v3863_v57, %v3862_v29  ;;  %v3890_v61 = vadd.f32 %v3889_v16, %v3888_v30  ;;  %v3411_v50 = vpop.f32.mrb[39].mxu0  ;;  %v3452_v51 = vpop.f32.mrb[67].mxu1  ;;  %v3788_v16 = vld [vmem:[#allocation2] sm:$0xff] }
 0x364   : > { %v3491_v62 = vpop.f32.mrb[40].mxu0  ;;  %v3532_v0 = vpop.f32.mrb[68].mxu1 }
 0x365   : > { %v3800_v47 = vsel %vm3790_vm1, %v3491_v62, 0.0  ;;  %v3826_v1 = vsel %vm3790_vm1, %v3532_v0, 0.0  ;;  %v3493_v63 = vpop.f32.mrb[41].mxu0  ;;  %v3534_v2 = vpop.f32.mrb[69].mxu1 }
 0x366   : > { %v3801_v7 = vadd.f32 %v3800_v47, %v3799_v41  ;;  %v3827_v9 = vadd.f32 %v3826_v1, %v3825_v42  ;;  %v3813_v10 = vsel %vm3790_vm1, %v3493_v63, 0.0  ;;  %v3839_v11 = vsel %vm3790_vm1, %v3534_v2, 0.0  ;;  %v3495_v53 = vpop.f32.mrb[42].mxu0  ;;  %v3536_v12 = vpop.f32.mrb[70].mxu1 }
 0x367   : > { %v3814_v8 = vadd.f32 %v3813_v10, %v3812_v17  ;;  %v3840_v38 = vadd.f32 %v3839_v11, %v3838_v44  ;;  %v3496_v5 = vpop.f32.mrb[43].mxu0  ;;  %v3537_v6 = vpop.f32.mrb[71].mxu1 }
 0x374   : > { %v3573_v19 = vpop.f32.mrb[44].mxu0  ;;  %v3614_v21 = vpop.f32.mrb[72].mxu1 }
 0x375   : > { %v3852_v22 = vsel %vm3790_vm1, %v3573_v19, 0.0  ;;  %v3878_v20 = vsel %vm3790_vm1, %v3614_v21, 0.0  ;;  %v3575_v25 = vpop.f32.mrb[45].mxu0  ;;  %v3616_v26 = vpop.f32.mrb[73].mxu1  ;;  %v3789_v19 = vld [vmem:[#allocation2 + $0x8] sm:$0xff] }
 0x376   : > { %v3853_v27 = vadd.f32 %v3852_v22, %v3851_v43  ;;  %v3879_v28 = vadd.f32 %v3878_v20, %v3877_v56  ;;  %v3865_v15 = vsel %vm3790_vm1, %v3575_v25, 0.0  ;;  %v3891_v3 = vsel %vm3790_vm1, %v3616_v26, 0.0  ;;  %v3577_v13 = vpop.f32.mrb[46].mxu0  ;;  %v3618_v29 = vpop.f32.mrb[74].mxu1  ;;  %v6804_v20 = vld [vmem:[%s8913_s5 + $0x4] ss:$16 sps:$4 sm:$0xff] (!%p6273_p5)  }
 0x377   : > { %v3866_v30 = vadd.f32 %v3865_v15, %v3864_v60  ;;  %v3892_v31 = vadd.f32 %v3891_v3, %v3890_v61  ;;  %v3578_v32 = vpop.f32.mrb[47].mxu0  ;;  %v3619_v35 = vpop.f32.mrb[75].mxu1  ;;  %v6806_v25 = vld [vmem:[%s8913_s5 + $0xc] ss:$16 sps:$4 sm:$0xff] (!%p6273_p5)   ;;  %5611 = vmatprep.subr.bf16.mxu0 (!%p6273_p5), %v6804_v20  ;;  %v6808_v26 = vld [vmem:[%s8913_s5] ss:$16 sps:$4 sm:$0xff] (!%p6273_p5)  }
 0x378   : > { %5775 = vmatprep.subr.bf16.mxu1 (!%p6273_p5), %v6806_v25  ;;  %5612 = vmatpush1.bf16.msra.mxu0 (!%p6273_p5), %v6808_v26  ;;  %v6812_v15 = vld [vmem:[%s8913_s5 + $0x2c] ss:$16 sps:$4 sm:$0xff] (!%p6273_p5)   ;;  %v6814_v3 = vld [vmem:[%s8913_s5 + $0x20] ss:$16 sps:$4 sm:$0xff] (!%p6273_p5)   ;;  %v6815_v13 = vld [vmem:[%s8913_s5 + $0x28] ss:$16 sps:$4 sm:$0xff] (!%p6273_p5)  }
 0x379   : > { %v6816_v29 = vld [vmem:[%s8913_s5 + $0x44] ss:$16 sps:$4 sm:$0xff] (!%p6273_p5)   ;;  %v6821_v32 = vld [vmem:[%s8913_s5 + $0x48] ss:$16 sps:$4 sm:$0xff] (!%p6273_p5)  }
 0x37a   : > { %v6822_v35 = vld [vmem:[%s8913_s5 + $0x64] ss:$16 sps:$4 sm:$0xff] (!%p6273_p5)   ;;  %v6881_v20 = vld [vmem:[%s8913_s5 + $0x188] ss:$16 sps:$4 sm:$0xff] (!%p6273_p5)  }
 0x37b   : > { %v6882_v26 = vld [vmem:[%s8913_s5 + $0x1a4] ss:$16 sps:$4 sm:$0xff] (!%p6273_p5)  }
 0x3c4   : > { %v3658_v34 = vpop.f32.mrb[48].mxu0  ;;  %v3699_v40 = vpop.f32.mrb[76].mxu1 }
 0x3c5   : > { %v3802_v41 = vsel %vm3790_vm1, %v3658_v34, 0.0  ;;  %v3828_v42 = vsel %vm3790_vm1, %v3699_v40, 0.0  ;;  %v3660_v4 = vpop.f32.mrb[49].mxu0  ;;  %v3701_v45 = vpop.f32.mrb[77].mxu1  ;;  %v6828_v34 = vld [vmem:[%s8913_s5 + $0x84] ss:$16 sps:$4 sm:$0xff] (!%p6273_p5)  }
 0x3c6   : > { %v3803_v46 = vadd.f32 %v3802_v41, %v3801_v7  ;;  %v3829_v24 = vadd.f32 %v3828_v42, %v3827_v9  ;;  %v3815_v17 = vsel %vm3790_vm1, %v3660_v4, 0.0  ;;  %v3841_v44 = vsel %vm3790_vm1, %v3701_v45, 0.0  ;;  %v3662_v23 = vpop.f32.mrb[50].mxu0  ;;  %v3703_v18 = vpop.f32.mrb[78].mxu1  ;;  %v6830_v40 = vld [vmem:[%s8913_s5 + $0x8c] ss:$16 sps:$4 sm:$0xff] (!%p6273_p5)  }
 0x3c7   : > { %v3816_v52 = vadd.f32 %v3815_v17, %v3814_v8  ;;  %v3842_v37 = vadd.f32 %v3841_v44, %v3840_v38  ;;  %v3663_v54 = vpop.f32.mrb[51].mxu0  ;;  %v3704_v55 = vpop.f32.mrb[79].mxu1  ;;  %v6832_v41 = vld [vmem:[%s8913_s5 + $0x80] ss:$16 sps:$4 sm:$0xff] (!%p6273_p5)   ;;  %v6833_v42 = vld [vmem:[%s8913_s5 + $0x88] ss:$16 sps:$4 sm:$0xff] (!%p6273_p5)  }
 0x3c8   : > { %v6834_v4 = vld [vmem:[%s8913_s5 + $0xa4] ss:$16 sps:$4 sm:$0xff] (!%p6273_p5)   ;;  %v6836_v45 = vld [vmem:[%s8913_s5 + $0xac] ss:$16 sps:$4 sm:$0xff] (!%p6273_p5)   ;;  %v6844_v23 = vld [vmem:[%s8913_s5 + $0xc0] ss:$16 sps:$4 sm:$0xff] (!%p6273_p5)  }
 0x3c9   : > { %v3903_v33 = vcombine.low %v3803_v46, %v3816_v52  ;;  %v3904_v43 = vcombine.low %v3829_v24, %v3842_v37  ;;  %v6838_v46 = vld [vmem:[%s8913_s5 + $0xa0] ss:$16 sps:$4 sm:$0xff] (!%p6273_p5)   ;;  %v6839_v24 = vld [vmem:[%s8913_s5 + $0xa8] ss:$16 sps:$4 sm:$0xff] (!%p6273_p5)   ;;  %v6840_v17 = vld [vmem:[%s8913_s5 + $0xc4] ss:$16 sps:$4 sm:$0xff] (!%p6273_p5)  }
 0x3ca   : > { %v6842_v44 = vld [vmem:[%s8913_s5 + $0xcc] ss:$16 sps:$4 sm:$0xff] (!%p6273_p5)   ;;  %v6845_v18 = vld [vmem:[%s8913_s5 + $0xc8] ss:$16 sps:$4 sm:$0xff] (!%p6273_p5)   ;;  %v6846_v52 = vld [vmem:[%s8913_s5 + $0xe4] ss:$16 sps:$4 sm:$0xff] (!%p6273_p5)  }
 0x3cb   : > { %v3911_v56 = vrot.slane %v3903_v33, %v7859_v48  ;;  %v3918_v57 = vrot.slane %v3904_v43, %v7859_v48  ;;  %v6848_v37 = vld [vmem:[%s8913_s5 + $0xec] ss:$16 sps:$4 sm:$0xff] (!%p6273_p5)   ;;  %v6850_v54 = vld [vmem:[%s8913_s5 + $0xe0] ss:$16 sps:$4 sm:$0xff] (!%p6273_p5)   ;;  %v6851_v55 = vld [vmem:[%s8913_s5 + $0xe8] ss:$16 sps:$4 sm:$0xff] (!%p6273_p5)  }
 0x3cc   : > { %v6852_v33 = vld [vmem:[%s8913_s5 + $0x104] ss:$16 sps:$4 sm:$0xff] (!%p6273_p5)   ;;  %v6854_v43 = vld [vmem:[%s8913_s5 + $0x10c] ss:$16 sps:$4 sm:$0xff] (!%p6273_p5)  }
 0x3cd   : > { %v3919_v58 = vcombine.low %v3911_v56, %v3918_v57  ;;  %v6856_v56 = vld [vmem:[%s8913_s5 + $0x100] ss:$16 sps:$4 sm:$0xff] (!%p6273_p5)   ;;  %v6857_v57 = vld [vmem:[%s8913_s5 + $0x108] ss:$16 sps:$4 sm:$0xff] (!%p6273_p5)  }
 0x3cf   : > { %v3939_v59 = vadd.f32 %v3919_v58, %v3788_v16  ;;  %v6858_v16 = vld [vmem:[%s8913_s5 + $0x124] ss:$16 sps:$4 sm:$0xff] (!%p6273_p5)   ;;  %v6860_v58 = vld [vmem:[%s8913_s5 + $0x12c] ss:$16 sps:$4 sm:$0xff] (!%p6273_p5)  }
 0x3d1   : > { %3941 = vst [vmem:[#allocation2] sm:$0xff] %v3939_v59  ;;  %v6862_v59 = vld [vmem:[%s8913_s5 + $0x120] ss:$16 sps:$4 sm:$0xff] (!%p6273_p5)  }
 0x3d4   : > { %v3740_v60 = vpop.f32.mrb[52].mxu0  ;;  %v3781_v61 = vpop.f32.mrb[80].mxu1 }
 0x3d5   : > { %v3854_v50 = vsel %vm3790_vm1, %v3740_v60, 0.0  ;;  %v3880_v51 = vsel %vm3790_vm1, %v3781_v61, 0.0  ;;  %v3742_v62 = vpop.f32.mrb[53].mxu0  ;;  %v3783_v0 = vpop.f32.mrb[81].mxu1  ;;  %v6863_v60 = vld [vmem:[%s8913_s5 + $0x128] ss:$16 sps:$4 sm:$0xff] (!%p6273_p5)  }
 0x3d6   : > { %v3855_v47 = vadd.f32 %v3854_v50, %v3853_v27  ;;  %v3881_v1 = vadd.f32 %v3880_v51, %v3879_v28  ;;  %v3867_v63 = vsel %vm3790_vm1, %v3742_v62, 0.0  ;;  %v3893_v2 = vsel %vm3790_vm1, %v3783_v0, 0.0  ;;  %v3744_v7 = vpop.f32.mrb[54].mxu0  ;;  %v3785_v9 = vpop.f32.mrb[82].mxu1  ;;  %v6809_v27 = vld [vmem:[%s8913_s5 + $0x8] ss:$16 sps:$4 sm:$0xff] (!%p6273_p5)  }
 0x3d7   : > { %v3868_v10 = vadd.f32 %v3867_v63, %v3866_v30  ;;  %v3894_v11 = vadd.f32 %v3893_v2, %v3892_v31  ;;  %v3745_v53 = vpop.f32.mrb[55].mxu0  ;;  %v3786_v12 = vpop.f32.mrb[83].mxu1  ;;  %v6810_v28 = vld [vmem:[%s8913_s5 + $0x24] ss:$16 sps:$4 sm:$0xff] (!%p6273_p5)   ;;  %5776 = vmatpush1.bf16.msra.mxu1 (!%p6273_p5), %v6809_v27  ;;  %v6818_v30 = vld [vmem:[%s8913_s5 + $0x4c] ss:$16 sps:$4 sm:$0xff] (!%p6273_p5)  }
 0x3d8   : > { %5613 = vmatprep.subr.bf16.mxu0 (!%p6273_p5), %v6810_v28  ;;  %5777 = vmatprep.subr.bf16.mxu1 (!%p6273_p5), %v6812_v15  ;;  %v6820_v31 = vld [vmem:[%s8913_s5 + $0x40] ss:$16 sps:$4 sm:$0xff] (!%p6273_p5)   ;;  %v6864_v61 = vld [vmem:[%s8913_s5 + $0x144] ss:$16 sps:$4 sm:$0xff] (!%p6273_p5)   ;;  %v6866_v50 = vld [vmem:[%s8913_s5 + $0x14c] ss:$16 sps:$4 sm:$0xff] (!%p6273_p5)  }
 0x3d9   : > { %v3920_v8 = vcombine.low %v3855_v47, %v3868_v10  ;;  %v3921_v38 = vcombine.low %v3881_v1, %v3894_v11  ;;  %5614 = vmatpush1.bf16.msra.mxu0 (!%p6273_p5), %v6814_v3  ;;  %v6868_v51 = vld [vmem:[%s8913_s5 + $0x140] ss:$16 sps:$4 sm:$0xff] (!%p6273_p5)   ;;  %v6869_v62 = vld [vmem:[%s8913_s5 + $0x148] ss:$16 sps:$4 sm:$0xff] (!%p6273_p5)   ;;  %v3953_v0 = vsub.s32 (!%p6273_p5), 0, %v7307_v14  ;;  %v3957_v1 = vsub.s32 (!%p6273_p5), 1, %v7307_v14 }
 0x3da   : > { %5615 = vmatprep.subr.bf16.mxu0 (!%p6273_p5), %v6816_v29  ;;  %v6870_v47 = vld [vmem:[%s8913_s5 + $0x164] ss:$16 sps:$4 sm:$0xff] (!%p6273_p5)   ;;  %v3961_v63 = vsub.s32 (!%p6273_p5), 2, %v7307_v14  ;;  %v6872_v2 = vld [vmem:[%s8913_s5 + $0x16c] ss:$16 sps:$4 sm:$0xff] (!%p6273_p5)   ;;  %v3965_v7 = vsub.s32 (!%p6273_p5), 3, %v7307_v14 }
 0x3db   : > { %v3928_v5 = vrot.slane %v3920_v8, %v7859_v48  ;;  %v3935_v6 = vrot.slane %v3921_v38, %v7859_v48  ;;  %3946 = sbr.rel (%p6273_p5) target bundleno = 1672 (0x688), region = 56  ;;  %5778 = vmatpush1.bf16.msra.mxu1 (!%p6273_p5), %v6815_v13  ;;  %v8015_v9 = vld [vmem:[%s8912_s4] sm:$0xff] (!%p6273_p5)  ;;  %v6875_v11 = vld [vmem:[%s8913_s5 + $0x168] ss:$16 sps:$4 sm:$0xff] (!%p6273_p5)   ;;  %v6884_v27 = vld [vmem:[%s8913_s5 + $0x1ac] ss:$16 sps:$4 sm:$0xff] (!%p6273_p5)  }
 0x3dc   : > { %5779 = vmatprep.subr.bf16.mxu1 (!%p6273_p5), %v6818_v30  ;;  %v6874_v10 = vld [vmem:[%s8913_s5 + $0x160] ss:$16 sps:$4 sm:$0xff] (!%p6273_p5)   ;;  %v3954_v53 = vrot.slane (!%p6273_p5), %v8015_v9, %v3953_v0  ;;  %v3958_v12 = vrot.slane (!%p6273_p5), %v8015_v9, %v3957_v1  ;;  %v3962_v8 = vrot.slane (!%p6273_p5), %v8015_v9, %v3961_v63  ;;  %v6876_v38 = vld [vmem:[%s8913_s5 + $0x184] ss:$16 sps:$4 sm:$0xff] (!%p6273_p5)   ;;  %v6887_v29 = vld [vmem:[%s8913_s5 + $0x1a8] ss:$16 sps:$4 sm:$0xff] (!%p6273_p5)  }
 0x3dd   : > { %v3936_v21 = vcombine.low %v3928_v5, %v3935_v6  ;;  %5616 = vmatpush1.bf16.msra.mxu0 (!%p6273_p5), %v6820_v31  ;;  %v6878_v5 = vld [vmem:[%s8913_s5 + $0x18c] ss:$16 sps:$4 sm:$0xff] (!%p6273_p5)   ;;  %v3966_v6 = vrot.slane (!%p6273_p5), %v8015_v9, %v3965_v7  ;;  %v3947_v15 = vld [vmem:[#allocation2] sm:$0xff] (!%p6273_p5)  ;;  %v6927_v1 = vld [vmem:[%s8913_s5 + $0x288] ss:$16 sps:$4 sm:$0xff] (!%p6273_p5)  }
 0x3de   : > { %5617 = vmatprep.subr.bf16.mxu0 (!%p6273_p5), %v6822_v35  ;;  %v6886_v13 = vld [vmem:[%s8913_s5 + $0x1a0] ss:$16 sps:$4 sm:$0xff] (!%p6273_p5)   ;;  %v6888_v30 = vld [vmem:[%s8913_s5 + $0x1c4] ss:$16 sps:$4 sm:$0xff] (!%p6273_p5)   ;;  %v6890_v31 = vld [vmem:[%s8913_s5 + $0x1cc] ss:$16 sps:$4 sm:$0xff] (!%p6273_p5)  }
 0x3df   : > { %v3940_v22 = vadd.f32 %v3936_v21, %v3789_v19  ;;  %5780 = vmatpush1.bf16.msra.mxu1 (!%p6273_p5), %v6821_v32  ;;  %v3983_v19 = vcombine.low (!%p6273_p5), %v3954_v53, %v3958_v12  ;;  %v3984_v21 = vcombine.low (!%p6273_p5), %v3962_v8, %v3966_v6  ;;  %v6929_v0 = vld [vmem:[%s8913_s5 + $0x28c] ss:$16 sps:$4 sm:$0xff] (!%p6273_p5)   ;;  %v6932_v63 = vld [vmem:[%s8913_s5 + $0x2a4] ss:$16 sps:$4 sm:$0xff] (!%p6273_p5)   ;;  %v6930_v7 = vld [vmem:[%s8913_s5 + $0x2a0] ss:$16 sps:$4 sm:$0xff] (!%p6273_p5)  }
 0x3e0   : > { %5781 = vmatprep.subr.bf16.mxu1 (!%p6273_p5), %v6824_v36  ;;  %v6892_v36 = vld [vmem:[%s8913_s5 + $0x1c0] ss:$16 sps:$4 sm:$0xff] (!%p6273_p5)   ;;  %v6941_v53 = vld [vmem:[%s8913_s5 + $0x2cc] ss:$16 sps:$4 sm:$0xff] (!%p6273_p5)   ;;  %v6939_v8 = vld [vmem:[%s8913_s5 + $0x2c8] ss:$16 sps:$4 sm:$0xff] (!%p6273_p5)  }
 0x3e1   : > { %3942 = vst [vmem:[#allocation2 + $0x8] sm:$0xff] %v3940_v22  ;;  %5618 = vmatpush1.bf16.msra.mxu0 (!%p6273_p5), %v6826_v39  ;;  %v6880_v22 = vld [vmem:[%s8913_s5 + $0x180] ss:$16 sps:$4 sm:$0xff] (!%p6273_p5)   ;;  %v3991_v25 = vrot.slane (!%p6273_p5), %v3983_v19, %v7859_v48  ;;  %v3998_v28 = vrot.slane (!%p6273_p5), %v3984_v21, %v7859_v48  ;;  %v6893_v39 = vld [vmem:[%s8913_s5 + $0x1c8] ss:$16 sps:$4 sm:$0xff] (!%p6273_p5)  }
 0x3e2   : > { %5619 = vmatprep.subr.bf16.mxu0 %v6828_v34  ;;  %v6896_v34 = vld [vmem:[%s8913_s5 + $0x1ec] ss:$16 sps:$4 sm:$0xff]   ;;  %v6936_v12 = vld [vmem:[%s8913_s5 + $0x2c0] ss:$16 sps:$4 sm:$0xff]   ;;  %v6945_v19 = vld [vmem:[%s8913_s5 + $0x2e8] ss:$16 sps:$4 sm:$0xff]  }
 0x3e3   : > { %5782 = vmatpush1.bf16.msra.mxu1 %v6827_v49  ;;  %v3999_v3 = vcombine.low %v3991_v25, %v3998_v28  ;;  %v6894_v49 = vld [vmem:[%s8913_s5 + $0x1e4] ss:$16 sps:$4 sm:$0xff]   ;;  %v6942_v6 = vld [vmem:[%s8913_s5 + $0x2e0] ss:$16 sps:$4 sm:$0xff]   ;;  %v6951_v25 = vld [vmem:[%s8913_s5 + $0x308] ss:$16 sps:$4 sm:$0xff]  }
 0x3e4   : > { %5783 = vmatprep.subr.bf16.mxu1 %v6830_v40  ;;  %v6950_v21 = vld [vmem:[%s8913_s5 + $0x304] ss:$16 sps:$4 sm:$0xff]   ;;  %v6954_v28 = vld [vmem:[%s8913_s5 + $0x320] ss:$16 sps:$4 sm:$0xff]  }
 0x3e5   : > { %5620 = vmatpush1.bf16.msra.mxu0 %v6832_v41  ;;  %v4019_v32 = vmul.f32 %v3999_v3, %v3947_v15  ;;  %v6957_v15 = vld [vmem:[%s8913_s5 + $0x328] ss:$16 sps:$4 sm:$0xff]   ;;  %v6962_v3 = vld [vmem:[%s8913_s5 + $0x344] ss:$16 sps:$4 sm:$0xff]  }
 0x3e6   : > { %5621 = vmatprep.subr.bf16.mxu0 %v6834_v4 }
 0x3e7   : > { %5784 = vmatpush1.bf16.msra.mxu1 %v6833_v42  ;;  %v4021_v35 = vmax.f32 %v4019_v32, 0.0  ;;  %v6971_v32 = vld [vmem:[%s8913_s5 + $0x36c] ss:$16 sps:$4 sm:$0xff]  }
 0x3e8   : > { %5785 = vmatprep.subr.bf16.mxu1 %v6836_v45  ;;  %v6898_v45 = vld [vmem:[%s8913_s5 + $0x1e0] ss:$16 sps:$4 sm:$0xff]  }
 0x3e9   : > { %5622 = vmatpush1.bf16.msra.mxu0 %v6838_v46  ;;  %v4032_v40 = vrot.slane %v4021_v35, %v7859_v48  ;;  %v4025_v41 = vcombine.high %v4021_v35, %v4021_v35  ;;  %v6899_v46 = vld [vmem:[%s8913_s5 + $0x1e8] ss:$16 sps:$4 sm:$0xff]   ;;  %v3969_v35 = vsub.s32 4, %v7307_v14 }
 0x3ea   : > { %5623 = vmatprep.subr.bf16.mxu0 %v6840_v17  ;;  %v6902_v17 = vld [vmem:[%s8913_s5 + $0x204] ss:$16 sps:$4 sm:$0xff]  }
 0x3eb   : > { %5786 = vmatpush1.bf16.msra.mxu1 %v6839_v24  ;;  %v4040_v42 = vcombine.high %v4032_v40, %v4032_v40  ;;  %v8073_v4 = vrot.slane %v4025_v41, %v7859_v48  ;;  %v6977_v41 = vld [vmem:[%s8913_s5 + $0x38c] ss:$16 sps:$4 sm:$0xff]  }
 0x3ec   : > { %5787 = vmatprep.subr.bf16.mxu1 %v6842_v44  ;;  %v6905_v44 = vld [vmem:[%s8913_s5 + $0x20c] ss:$16 sps:$4 sm:$0xff]  }
 0x3ed   : > { %5624 = vmatpush1.bf16.msra.mxu0 %v6844_v23  ;;  %v4068_v24 = vpack.c.bf16 %v4040_v42, %v4040_v42  ;;  %v4041_v23 = vcombine.high %v8073_v4, %v8073_v4  ;;  %v3981_v42 = vsub.s32 7, %v7307_v14 }
 0x3ee   : > { %5625 = vmatprep.subr.bf16.mxu0 %v6846_v52  ;;  %v6900_v52 = vld [vmem:[%s8913_s5 + $0x200] ss:$16 sps:$4 sm:$0xff]  }
 0x3ef   : > { %5788 = vmatpush1.bf16.msra.mxu1 %v6845_v18  ;;  %5643 = vmatprep.mubr.bf16.mxu0 %v4068_v24  ;;  %v4067_v18 = vpack.c.bf16 %v4032_v40, %v4032_v40  ;;  %v6974_v40 = vld [vmem:[%s8913_s5 + $0x384] ss:$16 sps:$4 sm:$0xff]  }
 0x3f0   : > { %5789 = vmatprep.subr.bf16.mxu1 %v6848_v37  ;;  %5807 = vmatprep.mubr.bf16.mxu1 %v4068_v24  ;;  %v6903_v37 = vld [vmem:[%s8913_s5 + $0x208] ss:$16 sps:$4 sm:$0xff]   ;;  %v3970_v24 = vrot.slane %v8015_v9, %v3969_v35  ;;  %v7037_v35 = vld [vmem:[%s8913_s5 + $0x4cc] ss:$16 sps:$4 sm:$0xff]  }
 0x3f1   : > { %5626 = vmatpush1.bf16.msra.mxu0 %v6850_v54  ;;  %v6908_v54 = vld [vmem:[%s8913_s5 + $0x224] ss:$16 sps:$4 sm:$0xff]  }
 0x3f2   : > { %5627 = vmatprep.subr.bf16.mxu0 %v6852_v33  ;;  %v4070_v33 = vpack.c.bf16 %v4041_v23, %v4041_v23 }
 0x3f3   : > { %5790 = vmatpush1.bf16.msra.mxu1 %v6851_v55  ;;  %v6911_v55 = vld [vmem:[%s8913_s5 + $0x22c] ss:$16 sps:$4 sm:$0xff]  }
 0x3f4   : > { %5791 = vmatprep.subr.bf16.mxu1 %v6854_v43  ;;  %v6906_v43 = vld [vmem:[%s8913_s5 + $0x220] ss:$16 sps:$4 sm:$0xff]  }
 0x3f5   : > { %5628 = vmatpush1.bf16.msra.mxu0 %v6856_v56  ;;  %v6909_v56 = vld [vmem:[%s8913_s5 + $0x228] ss:$16 sps:$4 sm:$0xff]  }
 0x3f6   : > { %5629 = vmatprep.subr.bf16.mxu0 %v6858_v16  ;;  %v6917_v16 = vld [vmem:[%s8913_s5 + $0x24c] ss:$16 sps:$4 sm:$0xff]  }
 0x3f7   : > { %5792 = vmatpush1.bf16.msra.mxu1 %v6857_v57  ;;  %v6914_v57 = vld [vmem:[%s8913_s5 + $0x244] ss:$16 sps:$4 sm:$0xff]  }
 0x3f8   : > { %5793 = vmatprep.subr.bf16.mxu1 %v6860_v58  ;;  %v6912_v58 = vld [vmem:[%s8913_s5 + $0x240] ss:$16 sps:$4 sm:$0xff]  }
 0x3f9   : > { %5630 = vmatpush1.bf16.msra.mxu0 %v6862_v59  ;;  %v6915_v59 = vld [vmem:[%s8913_s5 + $0x248] ss:$16 sps:$4 sm:$0xff]  }
 0x3fa   : > { %5631 = vmatprep.subr.bf16.mxu0 %v6864_v61  ;;  %v6923_v61 = vld [vmem:[%s8913_s5 + $0x26c] ss:$16 sps:$4 sm:$0xff]  }
 0x3fb   : > { %5794 = vmatpush1.bf16.msra.mxu1 %v6863_v60  ;;  %v6920_v60 = vld [vmem:[%s8913_s5 + $0x264] ss:$16 sps:$4 sm:$0xff]  }
 0x3fc   : > { %5795 = vmatprep.subr.bf16.mxu1 %v6866_v50  ;;  %v6918_v50 = vld [vmem:[%s8913_s5 + $0x260] ss:$16 sps:$4 sm:$0xff]  }
 0x3fd   : > { %5632 = vmatpush1.bf16.msra.mxu0 %v6868_v51  ;;  %v6921_v51 = vld [vmem:[%s8913_s5 + $0x268] ss:$16 sps:$4 sm:$0xff]  }
 0x3fe   : > { %5633 = vmatprep.subr.bf16.mxu0 %v6870_v47  ;;  %v6924_v47 = vld [vmem:[%s8913_s5 + $0x280] ss:$16 sps:$4 sm:$0xff]  }
 0x3ff   : > { %5796 = vmatpush1.bf16.msra.mxu1 %v6869_v62  ;;  %v6926_v62 = vld [vmem:[%s8913_s5 + $0x284] ss:$16 sps:$4 sm:$0xff]  }
 0x400   : > { %5797 = vmatprep.subr.bf16.mxu1 %v6872_v2  ;;  %v6935_v2 = vld [vmem:[%s8913_s5 + $0x2ac] ss:$16 sps:$4 sm:$0xff]  }
 0x401   : > { %5634 = vmatpush1.bf16.msra.mxu0 %v6874_v10  ;;  %v6933_v10 = vld [vmem:[%s8913_s5 + $0x2a8] ss:$16 sps:$4 sm:$0xff]  }
 0x402   : > { %5635 = vmatprep.subr.bf16.mxu0 %v6876_v38  ;;  %v6944_v38 = vld [vmem:[%s8913_s5 + $0x2e4] ss:$16 sps:$4 sm:$0xff]  }
 0x403   : > { %5798 = vmatpush1.bf16.msra.mxu1 %v6875_v11  ;;  %v6938_v11 = vld [vmem:[%s8913_s5 + $0x2c4] ss:$16 sps:$4 sm:$0xff]  }
 0x404   : > { %5799 = vmatprep.subr.bf16.mxu1 %v6878_v5  ;;  %v6947_v5 = vld [vmem:[%s8913_s5 + $0x2ec] ss:$16 sps:$4 sm:$0xff]  }
 0x405   : > { %5636 = vmatpush1.bf16.msra.mxu0 %v6880_v22  ;;  %v6953_v22 = vld [vmem:[%s8913_s5 + $0x30c] ss:$16 sps:$4 sm:$0xff]  }
 0x406   : > { %5637 = vmatprep.subr.bf16.mxu0 %v6882_v26  ;;  %v6956_v26 = vld [vmem:[%s8913_s5 + $0x324] ss:$16 sps:$4 sm:$0xff]  }
 0x407   : > { %5800 = vmatpush1.bf16.msra.mxu1 %v6881_v20  ;;  %v6948_v20 = vld [vmem:[%s8913_s5 + $0x300] ss:$16 sps:$4 sm:$0xff]  }
 0x408   : > { %5801 = vmatprep.subr.bf16.mxu1 %v6884_v27  ;;  %v6959_v27 = vld [vmem:[%s8913_s5 + $0x32c] ss:$16 sps:$4 sm:$0xff]  }
 0x409   : > { %5638 = vmatpush1.bf16.msra.mxu0 %v6886_v13  ;;  %v6965_v13 = vld [vmem:[%s8913_s5 + $0x34c] ss:$16 sps:$4 sm:$0xff]  }
 0x40a   : > { %5639 = vmatprep.subr.bf16.mxu0 %v6888_v30  ;;  %v6963_v30 = vld [vmem:[%s8913_s5 + $0x348] ss:$16 sps:$4 sm:$0xff]  }
 0x40b   : > { %5802 = vmatpush1.bf16.msra.mxu1 %v6887_v29  ;;  %v6960_v29 = vld [vmem:[%s8913_s5 + $0x340] ss:$16 sps:$4 sm:$0xff]  }
 0x40c   : > { %5803 = vmatprep.subr.bf16.mxu1 %v6890_v31  ;;  %v6968_v31 = vld [vmem:[%s8913_s5 + $0x364] ss:$16 sps:$4 sm:$0xff]  }
 0x40d   : > { %5640 = vmatpush1.bf16.msra.mxu0 %v6892_v36  ;;  %v3973_v36 = vsub.s32 5, %v7307_v14 }
 0x40e   : > { %5641 = vmatprep.subr.bf16.mxu0 %v6894_v49  ;;  %v6969_v49 = vld [vmem:[%s8913_s5 + $0x368] ss:$16 sps:$4 sm:$0xff]  }
 0x40f   : > { %5804 = vmatpush1.bf16.msra.mxu1 %v6893_v39  ;;  %v6966_v39 = vld [vmem:[%s8913_s5 + $0x360] ss:$16 sps:$4 sm:$0xff]  }
 0x410   : > { %5805 = vmatprep.subr.bf16.mxu1 %v6896_v34  ;;  %v3977_v34 = vsub.s32 6, %v7307_v14  ;;  %v6983_v14 = vld [vmem:[%s8913_s5 + $0x3ac] ss:$16 sps:$4 sm:$0xff]  }
 0x411   : > { %5642 = vmatpush1.bf16.msra.mxu0 %v6898_v45  ;;  %v6972_v45 = vld [vmem:[%s8913_s5 + $0x380] ss:$16 sps:$4 sm:$0xff]  }
 0x412   : > { %5652 = vmatprep.subr.bf16.mxu0 %v6902_v17  ;;  %v6980_v17 = vld [vmem:[%s8913_s5 + $0x3a4] ss:$16 sps:$4 sm:$0xff]   ;;  %v3978_v23 = vrot.slane %v8015_v9, %v3977_v34  ;;  %v7043_v34 = vld [vmem:[%s8913_s5 + $0x4ec] ss:$16 sps:$4 sm:$0xff]  }
 0x413   : > { %5806 = vmatpush1.bf16.msra.mxu1 %v6899_v46  ;;  %v6975_v46 = vld [vmem:[%s8913_s5 + $0x388] ss:$16 sps:$4 sm:$0xff]  }
 0x414   : > { %5816 = vmatprep.subr.bf16.mxu1 %v6905_v44  ;;  %5644 = vmatmul.mubr.bf16.vlgmr.msra.gmra.mrb[0].mxu0 %v4067_v18  ;;  %v3974_v44 = vrot.slane %v8015_v9, %v3973_v36  ;;  %v7032_v36 = vld [vmem:[%s8913_s5 + $0x4c0] ss:$16 sps:$4 sm:$0xff]  }
 0x415   : > { %5653 = vmatpush1.bf16.msra.mxu0 %v6900_v52  ;;  %5684 = vmatprep.mubr.bf16.mxu0 %v4070_v33  ;;  %v6978_v52 = vld [vmem:[%s8913_s5 + $0x3a0] ss:$16 sps:$4 sm:$0xff]  }
 0x416   : > { %5808 = vmatmul.mubr.bf16.vlgmr.msra.gmra.mrb[0].mxu1 %v4067_v18  ;;  %5654 = vmatprep.subr.bf16.mxu0 %v6908_v54  ;;  %v3982_v18 = vrot.slane %v8015_v9, %v3981_v42  ;;  %v6986_v54 = vld [vmem:[%s8913_s5 + $0x3c4] ss:$16 sps:$4 sm:$0xff]   ;;  %v6989_v9 = vld [vmem:[%s8913_s5 + $0x3cc] ss:$16 sps:$4 sm:$0xff]  }
 0x417   : > { %5817 = vmatpush1.bf16.msra.mxu1 %v6903_v37  ;;  %5848 = vmatprep.mubr.bf16.mxu1 %v4070_v33  ;;  %v6981_v37 = vld [vmem:[%s8913_s5 + $0x3a8] ss:$16 sps:$4 sm:$0xff]   ;;  %v7046_v42 = vld [vmem:[%s8913_s5 + $0x504] ss:$16 sps:$4 sm:$0xff]  }
 0x418   : > { %5818 = vmatprep.subr.bf16.mxu1 %v6911_v55  ;;  %v4000_v55 = vcombine.low %v3970_v24, %v3974_v44  ;;  %v4001_v33 = vcombine.low %v3978_v23, %v3982_v18  ;;  %v7047_v24 = vld [vmem:[%s8913_s5 + $0x508] ss:$16 sps:$4 sm:$0xff]   ;;  %v7050_v44 = vld [vmem:[%s8913_s5 + $0x520] ss:$16 sps:$4 sm:$0xff]   ;;  %v7058_v18 = vld [vmem:[%s8913_s5 + $0x544] ss:$16 sps:$4 sm:$0xff]  }
 0x419   : > { %5655 = vmatpush1.bf16.msra.mxu0 %v6906_v43  ;;  %v6984_v43 = vld [vmem:[%s8913_s5 + $0x3c0] ss:$16 sps:$4 sm:$0xff]   ;;  %v7053_v23 = vld [vmem:[%s8913_s5 + $0x528] ss:$16 sps:$4 sm:$0xff]  }
 0x41a   : > { %5656 = vmatprep.subr.bf16.mxu0 %v6914_v57  ;;  %v6992_v57 = vld [vmem:[%s8913_s5 + $0x3e4] ss:$16 sps:$4 sm:$0xff]  }
 0x41b   : > { %5819 = vmatpush1.bf16.msra.mxu1 %v6909_v56  ;;  %v6987_v56 = vld [vmem:[%s8913_s5 + $0x3c8] ss:$16 sps:$4 sm:$0xff]  }
 0x41c   : > { %5820 = vmatprep.subr.bf16.mxu1 %v6917_v16  ;;  %v6995_v16 = vld [vmem:[%s8913_s5 + $0x3ec] ss:$16 sps:$4 sm:$0xff]  }
 0x41d   : > { %5657 = vmatpush1.bf16.msra.mxu0 %v6912_v58  ;;  %v4008_v58 = vrot.slane %v4000_v55, %v7859_v48  ;;  %v7067_v55 = vld [vmem:[%s8913_s5 + $0x56c] ss:$16 sps:$4 sm:$0xff]  }
 0x41e   : > { %5658 = vmatprep.subr.bf16.mxu0 %v6920_v60  ;;  %v6990_v60 = vld [vmem:[%s8913_s5 + $0x3e0] ss:$16 sps:$4 sm:$0xff]  }
 0x41f   : > { %5821 = vmatpush1.bf16.msra.mxu1 %v6915_v59  ;;  %v4015_v59 = vrot.slane %v4001_v33, %v7859_v48  ;;  %v7062_v33 = vld [vmem:[%s8913_s5 + $0x560] ss:$16 sps:$4 sm:$0xff]  }
 0x420   : > { %5822 = vmatprep.subr.bf16.mxu1 %v6923_v61  ;;  %v6993_v61 = vld [vmem:[%s8913_s5 + $0x3e8] ss:$16 sps:$4 sm:$0xff]  }
 0x421   : > { %5659 = vmatpush1.bf16.msra.mxu0 %v6918_v50  ;;  %v6998_v50 = vld [vmem:[%s8913_s5 + $0x404] ss:$16 sps:$4 sm:$0xff]  }
 0x422   : > { %5660 = vmatprep.subr.bf16.mxu0 %v6926_v62  ;;  %v4016_v62 = vcombine.low %v4008_v58, %v4015_v59  ;;  %v7071_v58 = vld [vmem:[%s8913_s5 + $0x588] ss:$16 sps:$4 sm:$0xff]   ;;  %v7076_v59 = vld [vmem:[%s8913_s5 + $0x5a4] ss:$16 sps:$4 sm:$0xff]  }
 0x423   : > { %5823 = vmatpush1.bf16.msra.mxu1 %v6921_v51  ;;  %v7001_v51 = vld [vmem:[%s8913_s5 + $0x40c] ss:$16 sps:$4 sm:$0xff]  }
 0x424   : > { %5824 = vmatprep.subr.bf16.mxu1 %v6929_v0  ;;  %v6996_v0 = vld [vmem:[%s8913_s5 + $0x400] ss:$16 sps:$4 sm:$0xff]  }
 0x425   : > { %5661 = vmatpush1.bf16.msra.mxu0 %v6924_v47  ;;  %v4069_v47 = vpack.c.bf16 %v8073_v4, %v8073_v4  ;;  %v7002_v4 = vld [vmem:[%s8913_s5 + $0x420] ss:$16 sps:$4 sm:$0xff]  }
 0x426   : > { %5662 = vmatprep.subr.bf16.mxu0 %v6932_v63  ;;  %v7004_v63 = vld [vmem:[%s8913_s5 + $0x424] ss:$16 sps:$4 sm:$0xff]  }
 0x427   : > { %5825 = vmatpush1.bf16.msra.mxu1 %v6927_v1  ;;  %v6999_v1 = vld [vmem:[%s8913_s5 + $0x408] ss:$16 sps:$4 sm:$0xff]  }
 0x428   : > { %5826 = vmatprep.subr.bf16.mxu1 %v6935_v2  ;;  %v3948_v2 = vld [vmem:[#allocation2 + $0x8] sm:$0xff] }
 0x429   : > { %5663 = vmatpush1.bf16.msra.mxu0 %v6930_v7  ;;  %v7007_v7 = vld [vmem:[%s8913_s5 + $0x42c] ss:$16 sps:$4 sm:$0xff]  }
 0x42a   : > { %5664 = vmatprep.subr.bf16.mxu0 %v6938_v11 }
 0x42b   : > { %5827 = vmatpush1.bf16.msra.mxu1 %v6933_v10  ;;  %v4020_v10 = vmul.f32 %v4016_v62, %v3948_v2  ;;  %v7085_v62 = vld [vmem:[%s8913_s5 + $0x5cc] ss:$16 sps:$4 sm:$0xff]  }
 0x42c   : > { %5828 = vmatprep.subr.bf16.mxu1 %v6941_v53  ;;  %v7005_v53 = vld [vmem:[%s8913_s5 + $0x428] ss:$16 sps:$4 sm:$0xff]   ;;  %v7091_v2 = vld [vmem:[%s8913_s5 + $0x5ec] ss:$16 sps:$4 sm:$0xff]  }
 0x42d   : > { %5665 = vmatpush1.bf16.msra.mxu0 %v6936_v12  ;;  %v8308_v11 = vmax.f32 %v4020_v10, 0.0  ;;  %v7010_v12 = vld [vmem:[%s8913_s5 + $0x444] ss:$16 sps:$4 sm:$0xff]   ;;  %v7086_v10 = vld [vmem:[%s8913_s5 + $0x5e0] ss:$16 sps:$4 sm:$0xff]  }
 0x42e   : > { %5666 = vmatprep.subr.bf16.mxu0 %v6944_v38 }
 0x42f   : > { %5829 = vmatpush1.bf16.msra.mxu1 %v6939_v8  ;;  %v7013_v8 = vld [vmem:[%s8913_s5 + $0x44c] ss:$16 sps:$4 sm:$0xff]   ;;  %v8321_v38 = vrot.slane %v8308_v11, %v7859_v48 }
 0x430   : > { %5830 = vmatprep.subr.bf16.mxu1 %v6947_v5  ;;  %v7008_v5 = vld [vmem:[%s8913_s5 + $0x440] ss:$16 sps:$4 sm:$0xff]  }
 0x431   : > { %5667 = vmatpush1.bf16.msra.mxu0 %v6942_v6  ;;  %v4057_v6 = vcombine.high %v8321_v38, %v8321_v38 }
 0x432   : > { %5668 = vmatprep.subr.bf16.mxu0 %v6950_v21  ;;  %v7016_v21 = vld [vmem:[%s8913_s5 + $0x464] ss:$16 sps:$4 sm:$0xff]  }
 0x433   : > { %5831 = vmatpush1.bf16.msra.mxu1 %v6945_v19  ;;  %v7011_v19 = vld [vmem:[%s8913_s5 + $0x448] ss:$16 sps:$4 sm:$0xff]  }
 0x434   : > { %5832 = vmatprep.subr.bf16.mxu1 %v6953_v22  ;;  %v7019_v22 = vld [vmem:[%s8913_s5 + $0x46c] ss:$16 sps:$4 sm:$0xff]  }
 0x435   : > { %5669 = vmatpush1.bf16.msra.mxu0 %v6948_v20  ;;  %v4072_v20 = vpack.c.bf16 %v4057_v6, %v4057_v6  ;;  %v7100_v6 = vld [vmem:[%s8913_s5 + $0x624] ss:$16 sps:$4 sm:$0xff]  }
 0x436   : > { %5670 = vmatprep.subr.bf16.mxu0 %v6956_v26  ;;  %v7017_v26 = vld [vmem:[%s8913_s5 + $0x468] ss:$16 sps:$4 sm:$0xff]  }
 0x437   : > { %5833 = vmatpush1.bf16.msra.mxu1 %v6951_v25  ;;  %v7014_v25 = vld [vmem:[%s8913_s5 + $0x460] ss:$16 sps:$4 sm:$0xff]  }
 0x438   : > { %5834 = vmatprep.subr.bf16.mxu1 %v6959_v27  ;;  %v7022_v27 = vld [vmem:[%s8913_s5 + $0x484] ss:$16 sps:$4 sm:$0xff]  }
 0x439   : > { %5671 = vmatpush1.bf16.msra.mxu0 %v6954_v28  ;;  %v7025_v28 = vld [vmem:[%s8913_s5 + $0x48c] ss:$16 sps:$4 sm:$0xff]  }
 0x43a   : > { %5672 = vmatprep.subr.bf16.mxu0 %v6962_v3  ;;  %v7023_v3 = vld [vmem:[%s8913_s5 + $0x488] ss:$16 sps:$4 sm:$0xff]  }
 0x43b   : > { %5835 = vmatpush1.bf16.msra.mxu1 %v6957_v15  ;;  %v7020_v15 = vld [vmem:[%s8913_s5 + $0x480] ss:$16 sps:$4 sm:$0xff]  }
 0x43c   : > { %5836 = vmatprep.subr.bf16.mxu1 %v6965_v13  ;;  %v7028_v13 = vld [vmem:[%s8913_s5 + $0x4a4] ss:$16 sps:$4 sm:$0xff]  }
 0x43d   : > { %5673 = vmatpush1.bf16.msra.mxu0 %v6960_v29  ;;  %v7031_v29 = vld [vmem:[%s8913_s5 + $0x4ac] ss:$16 sps:$4 sm:$0xff]  }
 0x43e   : > { %5674 = vmatprep.subr.bf16.mxu0 %v6968_v31  ;;  %v7029_v31 = vld [vmem:[%s8913_s5 + $0x4a8] ss:$16 sps:$4 sm:$0xff]  }
 0x43f   : > { %5837 = vmatpush1.bf16.msra.mxu1 %v6963_v30  ;;  %v7026_v30 = vld [vmem:[%s8913_s5 + $0x4a0] ss:$16 sps:$4 sm:$0xff]  }
 0x440   : > { %5838 = vmatprep.subr.bf16.mxu1 %v6971_v32  ;;  %v7034_v32 = vld [vmem:[%s8913_s5 + $0x4c4] ss:$16 sps:$4 sm:$0xff]  }
 0x441   : > { %5675 = vmatpush1.bf16.msra.mxu0 %v6966_v39  ;;  %v7035_v39 = vld [vmem:[%s8913_s5 + $0x4c8] ss:$16 sps:$4 sm:$0xff]  }
 0x442   : > { %5676 = vmatprep.subr.bf16.mxu0 %v6974_v40  ;;  %v7038_v40 = vld [vmem:[%s8913_s5 + $0x4e0] ss:$16 sps:$4 sm:$0xff]  }
 0x443   : > { %5839 = vmatpush1.bf16.msra.mxu1 %v6969_v49  ;;  %v7040_v49 = vld [vmem:[%s8913_s5 + $0x4e4] ss:$16 sps:$4 sm:$0xff]  }
 0x444   : > { %5840 = vmatprep.subr.bf16.mxu1 %v6977_v41  ;;  %v7041_v41 = vld [vmem:[%s8913_s5 + $0x4e8] ss:$16 sps:$4 sm:$0xff]  }
 0x445   : > { %5677 = vmatpush1.bf16.msra.mxu0 %v6972_v45  ;;  %v7049_v45 = vld [vmem:[%s8913_s5 + $0x50c] ss:$16 sps:$4 sm:$0xff]  }
 0x446   : > { %5678 = vmatprep.subr.bf16.mxu0 %v6980_v17  ;;  %v7052_v17 = vld [vmem:[%s8913_s5 + $0x524] ss:$16 sps:$4 sm:$0xff]  }
 0x447   : > { %5841 = vmatpush1.bf16.msra.mxu1 %v6975_v46  ;;  %v7044_v46 = vld [vmem:[%s8913_s5 + $0x500] ss:$16 sps:$4 sm:$0xff]  }
 0x448   : > { %5842 = vmatprep.subr.bf16.mxu1 %v6983_v14  ;;  %v7055_v14 = vld [vmem:[%s8913_s5 + $0x52c] ss:$16 sps:$4 sm:$0xff]  }
 0x449   : > { %5679 = vmatpush1.bf16.msra.mxu0 %v6978_v52  ;;  %v7061_v52 = vld [vmem:[%s8913_s5 + $0x54c] ss:$16 sps:$4 sm:$0xff]  }
 0x44a   : > { %5680 = vmatprep.subr.bf16.mxu0 %v6986_v54  ;;  %v7059_v54 = vld [vmem:[%s8913_s5 + $0x548] ss:$16 sps:$4 sm:$0xff]  }
 0x44b   : > { %5843 = vmatpush1.bf16.msra.mxu1 %v6981_v37  ;;  %v7056_v37 = vld [vmem:[%s8913_s5 + $0x540] ss:$16 sps:$4 sm:$0xff]  }
 0x44c   : > { %5844 = vmatprep.subr.bf16.mxu1 %v6989_v9  ;;  %v7064_v9 = vld [vmem:[%s8913_s5 + $0x564] ss:$16 sps:$4 sm:$0xff]  }
 0x44d   : > { %5681 = vmatpush1.bf16.msra.mxu0 %v6984_v43  ;;  %v7065_v43 = vld [vmem:[%s8913_s5 + $0x568] ss:$16 sps:$4 sm:$0xff]  }
 0x44e   : > { %5682 = vmatprep.subr.bf16.mxu0 %v6992_v57  ;;  %v7073_v57 = vld [vmem:[%s8913_s5 + $0x58c] ss:$16 sps:$4 sm:$0xff]  }
 0x44f   : > { %5845 = vmatpush1.bf16.msra.mxu1 %v6987_v56  ;;  %v7070_v56 = vld [vmem:[%s8913_s5 + $0x584] ss:$16 sps:$4 sm:$0xff]  }
 0x450   : > { %5846 = vmatprep.subr.bf16.mxu1 %v6995_v16  ;;  %v7068_v16 = vld [vmem:[%s8913_s5 + $0x580] ss:$16 sps:$4 sm:$0xff]  }
 0x451   : > { %5683 = vmatpush1.bf16.msra.mxu0 %v6990_v60  ;;  %v7079_v60 = vld [vmem:[%s8913_s5 + $0x5ac] ss:$16 sps:$4 sm:$0xff]  }
 0x452   : > { %5693 = vmatprep.subr.bf16.mxu0 %v6998_v50  ;;  %v7077_v50 = vld [vmem:[%s8913_s5 + $0x5a8] ss:$16 sps:$4 sm:$0xff]  }
 0x453   : > { %5847 = vmatpush1.bf16.msra.mxu1 %v6993_v61  ;;  %v7074_v61 = vld [vmem:[%s8913_s5 + $0x5a0] ss:$16 sps:$4 sm:$0xff]  }
 0x454   : > { %5857 = vmatprep.subr.bf16.mxu1 %v7001_v51  ;;  %5685 = vmatmul.mubr.bf16.vlgmr.msra.gmra.mrb[0].mxu0 %v4069_v47  ;;  %v7082_v51 = vld [vmem:[%s8913_s5 + $0x5c4] ss:$16 sps:$4 sm:$0xff]  }
 0x455   : > { %5694 = vmatpush1.bf16.msra.mxu0 %v6996_v0  ;;  %5725 = vmatprep.mubr.bf16.mxu0 %v4072_v20  ;;  %v4042_v0 = vcombine.high %v8308_v11, %v8308_v11  ;;  %v7094_v11 = vld [vmem:[%s8913_s5 + $0x604] ss:$16 sps:$4 sm:$0xff]  }
 0x456   : > { %5849 = vmatmul.mubr.bf16.vlgmr.msra.gmra.mrb[0].mxu1 %v4069_v47  ;;  %5695 = vmatprep.subr.bf16.mxu0 %v7004_v63  ;;  %v7080_v47 = vld [vmem:[%s8913_s5 + $0x5c0] ss:$16 sps:$4 sm:$0xff]   ;;  %v7088_v63 = vld [vmem:[%s8913_s5 + $0x5e4] ss:$16 sps:$4 sm:$0xff]  }
 0x457   : > { %5858 = vmatpush1.bf16.msra.mxu1 %v6999_v1  ;;  %5889 = vmatprep.mubr.bf16.mxu1 %v4072_v20  ;;  %v7083_v1 = vld [vmem:[%s8913_s5 + $0x5c8] ss:$16 sps:$4 sm:$0xff]   ;;  %v7106_v20 = vld [vmem:[%s8913_s5 + $0x644] ss:$16 sps:$4 sm:$0xff]  }
 0x458   : > { %5859 = vmatprep.subr.bf16.mxu1 %v7007_v7  ;;  %v8484_v7 = vrot.slane %v4042_v0, %v7859_v48  ;;  %v7097_v48 = vld [vmem:[%s8913_s5 + $0x60c] ss:$16 sps:$4 sm:$0xff]  }
 0x459   : > { %5696 = vmatpush1.bf16.msra.mxu0 %v7002_v4  ;;  %v7089_v4 = vld [vmem:[%s8913_s5 + $0x5e8] ss:$16 sps:$4 sm:$0xff]   ;;  %v7175_v0 = vld [vmem:[%s8913_s5 + $0x7ac] ss:$16 sps:$4 sm:$0xff]  }
 0x45a   : > { %5697 = vmatprep.subr.bf16.mxu0 %v7010_v12  ;;  %v4071_v12 = vpack.c.bf16 %v8321_v38, %v8321_v38  ;;  %v7103_v38 = vld [vmem:[%s8913_s5 + $0x62c] ss:$16 sps:$4 sm:$0xff]  }
 0x45b   : > { %5860 = vmatpush1.bf16.msra.mxu1 %v7005_v53  ;;  %v4058_v53 = vcombine.high %v8484_v7, %v8484_v7 }
 0x45c   : > { %5861 = vmatprep.subr.bf16.mxu1 %v7013_v8  ;;  %v7092_v8 = vld [vmem:[%s8913_s5 + $0x600] ss:$16 sps:$4 sm:$0xff]  }
 0x45d   : > { %5698 = vmatpush1.bf16.msra.mxu0 %v7008_v5  ;;  %v7095_v5 = vld [vmem:[%s8913_s5 + $0x608] ss:$16 sps:$4 sm:$0xff]  }
 0x45e   : > { %5699 = vmatprep.subr.bf16.mxu0 %v7016_v21  ;;  %v7098_v21 = vld [vmem:[%s8913_s5 + $0x620] ss:$16 sps:$4 sm:$0xff]  }
 0x45f   : > { %5862 = vmatpush1.bf16.msra.mxu1 %v7011_v19  ;;  %v4074_v19 = vpack.c.bf16 %v4058_v53, %v4058_v53  ;;  %v5959_v53 = vld [vmem:[%s8914_s6 + $0x80] sm:$0xff] }
 0x460   : > { %5863 = vmatprep.subr.bf16.mxu1 %v7019_v22  ;;  %v7101_v22 = vld [vmem:[%s8913_s5 + $0x628] ss:$16 sps:$4 sm:$0xff]  }
 0x461   : > { %5700 = vmatpush1.bf16.msra.mxu0 %v7014_v25  ;;  %v7109_v25 = vld [vmem:[%s8913_s5 + $0x64c] ss:$16 sps:$4 sm:$0xff]  }
 0x462   : > { %5701 = vmatprep.subr.bf16.mxu0 %v7022_v27  ;;  %v7107_v27 = vld [vmem:[%s8913_s5 + $0x648] ss:$16 sps:$4 sm:$0xff]  }
 0x463   : > { %5864 = vmatpush1.bf16.msra.mxu1 %v7017_v26  ;;  %v7104_v26 = vld [vmem:[%s8913_s5 + $0x640] ss:$16 sps:$4 sm:$0xff]  }
 0x464   : > { %5865 = vmatprep.subr.bf16.mxu1 %v7025_v28  ;;  %v7112_v28 = vld [vmem:[%s8913_s5 + $0x664] ss:$16 sps:$4 sm:$0xff]  }
 0x465   : > { %5702 = vmatpush1.bf16.msra.mxu0 %v7020_v15  ;;  %v7115_v15 = vld [vmem:[%s8913_s5 + $0x66c] ss:$16 sps:$4 sm:$0xff]  }
 0x466   : > { %5703 = vmatprep.subr.bf16.mxu0 %v7028_v13  ;;  %v7113_v13 = vld [vmem:[%s8913_s5 + $0x668] ss:$16 sps:$4 sm:$0xff]  }
 0x467   : > { %5866 = vmatpush1.bf16.msra.mxu1 %v7023_v3  ;;  %v7110_v3 = vld [vmem:[%s8913_s5 + $0x660] ss:$16 sps:$4 sm:$0xff]  }
 0x468   : > { %5867 = vmatprep.subr.bf16.mxu1 %v7031_v29  ;;  %v7118_v29 = vld [vmem:[%s8913_s5 + $0x684] ss:$16 sps:$4 sm:$0xff]  }
 0x469   : > { %5704 = vmatpush1.bf16.msra.mxu0 %v7026_v30  ;;  %v7121_v30 = vld [vmem:[%s8913_s5 + $0x68c] ss:$16 sps:$4 sm:$0xff]  }
 0x46a   : > { %5705 = vmatprep.subr.bf16.mxu0 %v7034_v32  ;;  %v7119_v32 = vld [vmem:[%s8913_s5 + $0x688] ss:$16 sps:$4 sm:$0xff]  }
 0x46b   : > { %5868 = vmatpush1.bf16.msra.mxu1 %v7029_v31  ;;  %v7116_v31 = vld [vmem:[%s8913_s5 + $0x680] ss:$16 sps:$4 sm:$0xff]  }
 0x46c   : > { %5869 = vmatprep.subr.bf16.mxu1 %v7037_v35  ;;  %v7124_v35 = vld [vmem:[%s8913_s5 + $0x6a4] ss:$16 sps:$4 sm:$0xff]  }
 0x46d   : > { %5706 = vmatpush1.bf16.msra.mxu0 %v7032_v36  ;;  %v7127_v36 = vld [vmem:[%s8913_s5 + $0x6ac] ss:$16 sps:$4 sm:$0xff]  }
 0x46e   : > { %5707 = vmatprep.subr.bf16.mxu0 %v7040_v49  ;;  %v7125_v49 = vld [vmem:[%s8913_s5 + $0x6a8] ss:$16 sps:$4 sm:$0xff]  }
 0x46f   : > { %5870 = vmatpush1.bf16.msra.mxu1 %v7035_v39  ;;  %v7122_v39 = vld [vmem:[%s8913_s5 + $0x6a0] ss:$16 sps:$4 sm:$0xff]  }
 0x470   : > { %5871 = vmatprep.subr.bf16.mxu1 %v7043_v34  ;;  %v7130_v34 = vld [vmem:[%s8913_s5 + $0x6c4] ss:$16 sps:$4 sm:$0xff]  }
 0x471   : > { %5708 = vmatpush1.bf16.msra.mxu0 %v7038_v40  ;;  %v7133_v40 = vld [vmem:[%s8913_s5 + $0x6cc] ss:$16 sps:$4 sm:$0xff]  }
 0x472   : > { %5709 = vmatprep.subr.bf16.mxu0 %v7046_v42  ;;  %v7131_v42 = vld [vmem:[%s8913_s5 + $0x6c8] ss:$16 sps:$4 sm:$0xff]  }
 0x473   : > { %5872 = vmatpush1.bf16.msra.mxu1 %v7041_v41  ;;  %v7128_v41 = vld [vmem:[%s8913_s5 + $0x6c0] ss:$16 sps:$4 sm:$0xff]  }
 0x474   : > { %5873 = vmatprep.subr.bf16.mxu1 %v7049_v45  ;;  %v7136_v45 = vld [vmem:[%s8913_s5 + $0x6e4] ss:$16 sps:$4 sm:$0xff]  }
 0x475   : > { %5710 = vmatpush1.bf16.msra.mxu0 %v7044_v46  ;;  %v7139_v46 = vld [vmem:[%s8913_s5 + $0x6ec] ss:$16 sps:$4 sm:$0xff]  }
 0x476   : > { %5711 = vmatprep.subr.bf16.mxu0 %v7052_v17  ;;  %v7137_v17 = vld [vmem:[%s8913_s5 + $0x6e8] ss:$16 sps:$4 sm:$0xff]  }
 0x477   : > { %5874 = vmatpush1.bf16.msra.mxu1 %v7047_v24  ;;  %v7134_v24 = vld [vmem:[%s8913_s5 + $0x6e0] ss:$16 sps:$4 sm:$0xff]  }
 0x478   : > { %5875 = vmatprep.subr.bf16.mxu1 %v7055_v14  ;;  %v7142_v14 = vld [vmem:[%s8913_s5 + $0x704] ss:$16 sps:$4 sm:$0xff]  }
 0x479   : > { %5712 = vmatpush1.bf16.msra.mxu0 %v7050_v44  ;;  %v7145_v44 = vld [vmem:[%s8913_s5 + $0x70c] ss:$16 sps:$4 sm:$0xff]  }
 0x47a   : > { %5713 = vmatprep.subr.bf16.mxu0 %v7058_v18  ;;  %v7143_v18 = vld [vmem:[%s8913_s5 + $0x708] ss:$16 sps:$4 sm:$0xff]  }
 0x47b   : > { %5876 = vmatpush1.bf16.msra.mxu1 %v7053_v23  ;;  %v7140_v23 = vld [vmem:[%s8913_s5 + $0x700] ss:$16 sps:$4 sm:$0xff]  }
 0x47c   : > { %5877 = vmatprep.subr.bf16.mxu1 %v7061_v52  ;;  %v7148_v52 = vld [vmem:[%s8913_s5 + $0x724] ss:$16 sps:$4 sm:$0xff]  }
 0x47d   : > { %5714 = vmatpush1.bf16.msra.mxu0 %v7056_v37  ;;  %v7151_v37 = vld [vmem:[%s8913_s5 + $0x72c] ss:$16 sps:$4 sm:$0xff]  }
 0x47e   : > { %5715 = vmatprep.subr.bf16.mxu0 %v7064_v9  ;;  %v7149_v9 = vld [vmem:[%s8913_s5 + $0x728] ss:$16 sps:$4 sm:$0xff]  }
 0x47f   : > { %5878 = vmatpush1.bf16.msra.mxu1 %v7059_v54  ;;  %v7146_v54 = vld [vmem:[%s8913_s5 + $0x720] ss:$16 sps:$4 sm:$0xff]  }
 0x480   : > { %5879 = vmatprep.subr.bf16.mxu1 %v7067_v55  ;;  %v7154_v55 = vld [vmem:[%s8913_s5 + $0x744] ss:$16 sps:$4 sm:$0xff]  }
 0x481   : > { %5716 = vmatpush1.bf16.msra.mxu0 %v7062_v33  ;;  %v7157_v33 = vld [vmem:[%s8913_s5 + $0x74c] ss:$16 sps:$4 sm:$0xff]  }
 0x482   : > { %5717 = vmatprep.subr.bf16.mxu0 %v7070_v56  ;;  %v7155_v56 = vld [vmem:[%s8913_s5 + $0x748] ss:$16 sps:$4 sm:$0xff]  }
 0x483   : > { %5880 = vmatpush1.bf16.msra.mxu1 %v7065_v43  ;;  %v7152_v43 = vld [vmem:[%s8913_s5 + $0x740] ss:$16 sps:$4 sm:$0xff]  }
 0x484   : > { %5881 = vmatprep.subr.bf16.mxu1 %v7073_v57  ;;  %v7160_v57 = vld [vmem:[%s8913_s5 + $0x764] ss:$16 sps:$4 sm:$0xff]  }
 0x485   : > { %5718 = vmatpush1.bf16.msra.mxu0 %v7068_v16  ;;  %v7163_v16 = vld [vmem:[%s8913_s5 + $0x76c] ss:$16 sps:$4 sm:$0xff]  }
 0x486   : > { %5719 = vmatprep.subr.bf16.mxu0 %v7076_v59  ;;  %v7161_v59 = vld [vmem:[%s8913_s5 + $0x768] ss:$16 sps:$4 sm:$0xff]  }
 0x487   : > { %5882 = vmatpush1.bf16.msra.mxu1 %v7071_v58  ;;  %v7158_v58 = vld [vmem:[%s8913_s5 + $0x760] ss:$16 sps:$4 sm:$0xff]  }
 0x488   : > { %5883 = vmatprep.subr.bf16.mxu1 %v7079_v60  ;;  %v7166_v60 = vld [vmem:[%s8913_s5 + $0x784] ss:$16 sps:$4 sm:$0xff]  }
 0x489   : > { %5720 = vmatpush1.bf16.msra.mxu0 %v7074_v61  ;;  %v7169_v61 = vld [vmem:[%s8913_s5 + $0x78c] ss:$16 sps:$4 sm:$0xff]  }
 0x48a   : > { %5721 = vmatprep.subr.bf16.mxu0 %v7082_v51  ;;  %v7167_v51 = vld [vmem:[%s8913_s5 + $0x788] ss:$16 sps:$4 sm:$0xff]  }
 0x48b   : > { %5884 = vmatpush1.bf16.msra.mxu1 %v7077_v50  ;;  %v7164_v50 = vld [vmem:[%s8913_s5 + $0x780] ss:$16 sps:$4 sm:$0xff]  }
 0x48c   : > { %5885 = vmatprep.subr.bf16.mxu1 %v7085_v62  ;;  %v7172_v62 = vld [vmem:[%s8913_s5 + $0x7a4] ss:$16 sps:$4 sm:$0xff]  }
 0x48d   : > { %5722 = vmatpush1.bf16.msra.mxu0 %v7080_v47  ;;  %v7170_v47 = vld [vmem:[%s8913_s5 + $0x7a0] ss:$16 sps:$4 sm:$0xff]  }
 0x48e   : > { %5723 = vmatprep.subr.bf16.mxu0 %v7088_v63  ;;  %v7178_v63 = vld [vmem:[%s8913_s5 + $0x7c4] ss:$16 sps:$4 sm:$0xff]  }
 0x48f   : > { %5886 = vmatpush1.bf16.msra.mxu1 %v7083_v1  ;;  %v7173_v1 = vld [vmem:[%s8913_s5 + $0x7a8] ss:$16 sps:$4 sm:$0xff]  }
 0x490   : > { %5887 = vmatprep.subr.bf16.mxu1 %v7091_v2  ;;  %v7181_v2 = vld [vmem:[%s8913_s5 + $0x7cc] ss:$16 sps:$4 sm:$0xff]  }
 0x491   : > { %5724 = vmatpush1.bf16.msra.mxu0 %v7086_v10  ;;  %v7176_v10 = vld [vmem:[%s8913_s5 + $0x7c0] ss:$16 sps:$4 sm:$0xff]  }
 0x492   : > { %5734 = vmatprep.subr.bf16.mxu0 %v7094_v11  ;;  %v7184_v11 = vld [vmem:[%s8913_s5 + $0x7e4] ss:$16 sps:$4 sm:$0xff]  }
 0x493   : > { %5888 = vmatpush1.bf16.msra.mxu1 %v7089_v4  ;;  %v7179_v4 = vld [vmem:[%s8913_s5 + $0x7c8] ss:$16 sps:$4 sm:$0xff]  }
 0x494   : > { %5898 = vmatprep.subr.bf16.mxu1 %v7097_v48  ;;  %5726 = vmatmul.mubr.bf16.vlgmr.msra.gmra.mrb[0].mxu0 %v4071_v12  ;;  %v7187_v48 = vld [vmem:[%s8913_s5 + $0x7ec] ss:$16 sps:$4 sm:$0xff]  }
 0x495   : > { %5735 = vmatpush1.bf16.msra.mxu0 %v7092_v8  ;;  %5766 = vmatprep.mubr.bf16.mxu0 %v4074_v19  ;;  %v5991_v8 = vld [vmem:[%s8914_s6 + $0x180] sm:$0xff] }
 0x496   : > { %5890 = vmatmul.mubr.bf16.vlgmr.msra.gmra.mrb[0].mxu1 %v4071_v12  ;;  %5736 = vmatprep.subr.bf16.mxu0 %v7100_v6  ;;  %v5960_v12 = vld [vmem:[%s8914_s6 + $0x88] sm:$0xff]  ;;  %v7182_v6 = vld [vmem:[%s8913_s5 + $0x7e0] ss:$16 sps:$4 sm:$0xff]  }
 0x497   : > { %5899 = vmatpush1.bf16.msra.mxu1 %v7095_v5  ;;  %5930 = vmatprep.mubr.bf16.mxu1 %v4074_v19  ;;  %v5992_v5 = vld [vmem:[%s8914_s6 + $0x188] sm:$0xff]  ;;  %v5943_v19 = vld [vmem:[%s8914_s6] sm:$0xff] }
 0x498   : > { %5900 = vmatprep.subr.bf16.mxu1 %v7103_v38  ;;  %v7185_v38 = vld [vmem:[%s8913_s5 + $0x7e8] ss:$16 sps:$4 sm:$0xff]  }
 0x499   : > { %5737 = vmatpush1.bf16.msra.mxu0 %v7098_v21  ;;  %v5944_v21 = vld [vmem:[%s8914_s6 + $0x8] sm:$0xff] }
 0x49a   : > { %5738 = vmatprep.subr.bf16.mxu0 %v7106_v20  ;;  %v6638_v20 = vpack.c.bf16 %v5992_v5, %v5991_v8  ;;  %v5953_v5 = vld [vmem:[%s8914_s6 + $0x50] sm:$0xff] }
 0x49b   : > { %5901 = vmatpush1.bf16.msra.mxu1 %v7101_v22  ;;  %v6606_v22 = vpack.c.bf16 %v5960_v12, %v5959_v53  ;;  %v6002_v53 = vld [vmem:[%s8914_s6 + $0x1d8] sm:$0xff] }
 0x49c   : > { %5902 = vmatprep.subr.bf16.mxu1 %v7109_v25  ;;  %v5975_v25 = vld [vmem:[%s8914_s6 + $0x100] sm:$0xff] }
 0x49d   : > { %5739 = vmatpush1.bf16.msra.mxu0 %v7104_v26  ;;  %v5976_v26 = vld [vmem:[%s8914_s6 + $0x108] sm:$0xff] }
 0x49e   : > { %5740 = vmatprep.subr.bf16.mxu0 %v7112_v28  ;;  %v5962_v28 = vld [vmem:[%s8914_s6 + $0x98] sm:$0xff] }
 0x49f   : > { %5903 = vmatpush1.bf16.msra.mxu1 %v7107_v27  ;;  %v5961_v27 = vld [vmem:[%s8914_s6 + $0x90] sm:$0xff] }
 0x4a0   : > { %5904 = vmatprep.subr.bf16.mxu1 %v7115_v15  ;;  %v5993_v15 = vld [vmem:[%s8914_s6 + $0x190] sm:$0xff] }
 0x4a1   : > { %5741 = vmatpush1.bf16.msra.mxu0 %v7110_v3  ;;  %v5994_v3 = vld [vmem:[%s8914_s6 + $0x198] sm:$0xff] }
 0x4a2   : > { %5742 = vmatprep.subr.bf16.mxu0 %v7118_v29  ;;  %v6608_v29 = vpack.c.bf16 %v5944_v21, %v5943_v19  ;;  %v5985_v21 = vld [vmem:[%s8914_s6 + $0x150] sm:$0xff] }
 0x4a3   : > { %5905 = vmatpush1.bf16.msra.mxu1 %v7113_v13  ;;  %v4073_v13 = vpack.c.bf16 %v8484_v7, %v8484_v7  ;;  %v5977_v7 = vld [vmem:[%s8914_s6 + $0x110] sm:$0xff] }
 0x4a4   : > { %5906 = vmatprep.subr.bf16.mxu1 %v7121_v30  ;;  %v6640_v30 = vpack.c.bf16 %v5976_v26, %v5975_v25  ;;  %v5972_v25 = vld [vmem:[%s8914_s6 + $0xe8] sm:$0xff]  ;;  %v6003_v26 = vld [vmem:[%s8914_s6 + $0x1e0] sm:$0xff] }
 0x4a5   : > { %5743 = vmatpush1.bf16.msra.mxu0 %v7116_v31  ;;  %v5945_v31 = vld [vmem:[%s8914_s6 + $0x10] sm:$0xff] }
 0x4a6   : > { %5744 = vmatprep.subr.bf16.mxu0 %v7124_v35  ;;  %v6610_v35 = vpack.c.bf16 %v5962_v28, %v5961_v27  ;;  %v6004_v27 = vld [vmem:[%s8914_s6 + $0x1e8] sm:$0xff] }
 0x4a7   : > { %5907 = vmatpush1.bf16.msra.mxu1 %v7119_v32  ;;  %v5946_v32 = vld [vmem:[%s8914_s6 + $0x18] sm:$0xff] }
 0x4a8   : > { %5908 = vmatprep.subr.bf16.mxu1 %v7127_v36  ;;  %v6642_v36 = vpack.c.bf16 %v5994_v3, %v5993_v15  ;;  %v5955_v3 = vld [vmem:[%s8914_s6 + $0x60] sm:$0xff] }
 0x4a9   : > { %5745 = vmatpush1.bf16.msra.mxu0 %v7122_v39  ;;  %v5978_v39 = vld [vmem:[%s8914_s6 + $0x118] sm:$0xff] }
 0x4aa   : > { %5746 = vmatprep.subr.bf16.mxu0 %v7130_v34  ;;  %v5964_v34 = vld [vmem:[%s8914_s6 + $0xa8] sm:$0xff] }
 0x4ab   : > { %5909 = vmatpush1.bf16.msra.mxu1 %v7125_v49  ;;  %v5963_v49 = vld [vmem:[%s8914_s6 + $0xa0] sm:$0xff] }
 0x4ac   : > { %5910 = vmatprep.subr.bf16.mxu1 %v7133_v40  ;;  %v5995_v40 = vld [vmem:[%s8914_s6 + $0x1a0] sm:$0xff] }
 0x4ad   : > { %5747 = vmatpush1.bf16.msra.mxu0 %v7128_v41  ;;  %v5996_v41 = vld [vmem:[%s8914_s6 + $0x1a8] sm:$0xff] }
 0x4ae   : > { %5748 = vmatprep.subr.bf16.mxu0 %v7136_v45  ;;  %v6644_v45 = vpack.c.bf16 %v5978_v39, %v5977_v7  ;;  %v5973_v7 = vld [vmem:[%s8914_s6 + $0xf0] sm:$0xff]  ;;  %v5974_v39 = vld [vmem:[%s8914_s6 + $0xf8] sm:$0xff] }
 0x4af   : > { %5911 = vmatpush1.bf16.msra.mxu1 %v7131_v42  ;;  %v6612_v42 = vpack.c.bf16 %v5946_v32, %v5945_v31  ;;  %v5987_v31 = vld [vmem:[%s8914_s6 + $0x160] sm:$0xff]  ;;  %v5988_v32 = vld [vmem:[%s8914_s6 + $0x168] sm:$0xff] }
 0x4b0   : > { %5912 = vmatprep.subr.bf16.mxu1 %v7139_v46  ;;  %v5947_v46 = vld [vmem:[%s8914_s6 + $0x20] sm:$0xff] }
 0x4b1   : > { %5749 = vmatpush1.bf16.msra.mxu0 %v7134_v24  ;;  %v5948_v24 = vld [vmem:[%s8914_s6 + $0x28] sm:$0xff] }
 0x4b2   : > { %5750 = vmatprep.subr.bf16.mxu0 %v7142_v14  ;;  %v6646_v14 = vpack.c.bf16 %v5996_v41, %v5995_v40  ;;  %v6006_v40 = vld [vmem:[%s8914_s6 + $0x1f8] sm:$0xff]  ;;  %v5957_v41 = vld [vmem:[%s8914_s6 + $0x70] sm:$0xff] }
 0x4b3   : > { %5913 = vmatpush1.bf16.msra.mxu1 %v7137_v17  ;;  %v6614_v17 = vpack.c.bf16 %v5964_v34, %v5963_v49  ;;  %v6005_v49 = vld [vmem:[%s8914_s6 + $0x1f0] sm:$0xff]  ;;  %v6634_v34 = vpack.c.bf16 %v5974_v39, %v5973_v7 }
 0x4b4   : > { %5914 = vmatprep.subr.bf16.mxu1 %v7145_v44  ;;  %v5979_v44 = vld [vmem:[%s8914_s6 + $0x120] sm:$0xff] }
 0x4b5   : > { %5751 = vmatpush1.bf16.msra.mxu0 %v7140_v23  ;;  %v5980_v23 = vld [vmem:[%s8914_s6 + $0x128] sm:$0xff] }
 0x4b6   : > { %5752 = vmatprep.subr.bf16.mxu0 %v7148_v52  ;;  %v5966_v52 = vld [vmem:[%s8914_s6 + $0xb8] sm:$0xff] }
 0x4b7   : > { %5915 = vmatpush1.bf16.msra.mxu1 %v7143_v18  ;;  %v5965_v18 = vld [vmem:[%s8914_s6 + $0xb0] sm:$0xff] }
 0x4b8   : > { %5916 = vmatprep.subr.bf16.mxu1 %v7151_v37  ;;  %v5997_v37 = vld [vmem:[%s8914_s6 + $0x1b0] sm:$0xff] }
 0x4b9   : > { %5753 = vmatpush1.bf16.msra.mxu0 %v7146_v54  ;;  %v5998_v54 = vld [vmem:[%s8914_s6 + $0x1b8] sm:$0xff] }
 0x4ba   : > { %5754 = vmatprep.subr.bf16.mxu0 %v7154_v55  ;;  %v6648_v55 = vpack.c.bf16 %v5980_v23, %v5979_v44 }
 0x4bb   : > { %5917 = vmatpush1.bf16.msra.mxu1 %v7149_v9  ;;  %v6616_v9 = vpack.c.bf16 %v5948_v24, %v5947_v46  ;;  %v5989_v24 = vld [vmem:[%s8914_s6 + $0x170] sm:$0xff] }
 0x4bc   : > { %5918 = vmatprep.subr.bf16.mxu1 %v7157_v33  ;;  %v5949_v33 = vld [vmem:[%s8914_s6 + $0x30] sm:$0xff] }
 0x4bd   : > { %5755 = vmatpush1.bf16.msra.mxu0 %v7152_v43  ;;  %v5950_v43 = vld [vmem:[%s8914_s6 + $0x38] sm:$0xff] }
 0x4be   : > { %5756 = vmatprep.subr.bf16.mxu0 %v7160_v57  ;;  %v6650_v57 = vpack.c.bf16 %v5998_v54, %v5997_v37 }
 0x4bf   : > { %5919 = vmatpush1.bf16.msra.mxu1 %v7155_v56  ;;  %v6618_v56 = vpack.c.bf16 %v5966_v52, %v5965_v18 }
 0x4c0   : > { %5920 = vmatprep.subr.bf16.mxu1 %v7163_v16  ;;  %v5981_v16 = vld [vmem:[%s8914_s6 + $0x130] sm:$0xff] }
 0x4c1   : > { %5757 = vmatpush1.bf16.msra.mxu0 %v7158_v58  ;;  %v5982_v58 = vld [vmem:[%s8914_s6 + $0x138] sm:$0xff] }
 0x4c2   : > { %5758 = vmatprep.subr.bf16.mxu0 %v7166_v60  ;;  %v5968_v60 = vld [vmem:[%s8914_s6 + $0xc8] sm:$0xff] }
 0x4c3   : > { %5921 = vmatpush1.bf16.msra.mxu1 %v7161_v59  ;;  %v5967_v59 = vld [vmem:[%s8914_s6 + $0xc0] sm:$0xff] }
 0x4c4   : > { %5922 = vmatprep.subr.bf16.mxu1 %v7169_v61  ;;  %v5999_v61 = vld [vmem:[%s8914_s6 + $0x1c0] sm:$0xff] }
 0x4c5   : > { %5759 = vmatpush1.bf16.msra.mxu0 %v7164_v50  ;;  %v6000_v50 = vld [vmem:[%s8914_s6 + $0x1c8] sm:$0xff] }
 0x4c6   : > { %5760 = vmatprep.subr.bf16.mxu0 %v7172_v62  ;;  %v6652_v62 = vpack.c.bf16 %v5982_v58, %v5981_v16 }
 0x4c7   : > { %5923 = vmatpush1.bf16.msra.mxu1 %v7167_v51  ;;  %v6620_v51 = vpack.c.bf16 %v5950_v43, %v5949_v33 }
 0x4c8   : > { %5924 = vmatprep.subr.bf16.mxu1 %v7175_v0  ;;  %v5951_v0 = vld [vmem:[%s8914_s6 + $0x40] sm:$0xff] }
 0x4c9   : > { %5761 = vmatpush1.bf16.msra.mxu0 %v7170_v47  ;;  %v5952_v47 = vld [vmem:[%s8914_s6 + $0x48] sm:$0xff] }
 0x4ca   : > { %5762 = vmatprep.subr.bf16.mxu0 %v7178_v63  ;;  %v6654_v63 = vpack.c.bf16 %v6000_v50, %v5999_v61  ;;  %v6624_v12 = vpack.c.bf16 %v5952_v47, %v5951_v0 }
 0x4cb   : > { %5925 = vmatpush1.bf16.msra.mxu1 %v7173_v1  ;;  %v6622_v1 = vpack.c.bf16 %v5968_v60, %v5967_v59 }
 0x4cc   : > { %5926 = vmatprep.subr.bf16.mxu1 %v7181_v2  ;;  %v5983_v2 = vld [vmem:[%s8914_s6 + $0x140] sm:$0xff] }
 0x4cd   : > { %5763 = vmatpush1.bf16.msra.mxu0 %v7176_v10  ;;  %v5984_v10 = vld [vmem:[%s8914_s6 + $0x148] sm:$0xff] }
 0x4ce   : > { %5764 = vmatprep.subr.bf16.mxu0 %v7184_v11  ;;  %v5970_v11 = vld [vmem:[%s8914_s6 + $0xd8] sm:$0xff]  ;;  %v6656_v8 = vpack.c.bf16 %v5984_v10, %v5983_v2 }
 0x4cf   : > { %5927 = vmatpush1.bf16.msra.mxu1 %v7179_v4  ;;  %v5969_v4 = vld [vmem:[%s8914_s6 + $0xd0] sm:$0xff] }
 0x4d0   : > { %5928 = vmatprep.subr.bf16.mxu1 %v7187_v48  ;;  %v6001_v48 = vld [vmem:[%s8914_s6 + $0x1d0] sm:$0xff] }
 0x4d1   : > { %5765 = vmatpush1.bf16.msra.mxu0 %v7182_v6  ;;  %v5954_v6 = vld [vmem:[%s8914_s6 + $0x58] sm:$0xff]  ;;  %v6658_v19 = vpack.c.bf16 %v6002_v53, %v6001_v48 }
 0x4d2   : > { %6607 = vmatprep.subr.bf16.mxu0 %v6606_v22  ;;  %v5986_v22 = vld [vmem:[%s8914_s6 + $0x158] sm:$0xff]  ;;  %v6628_v28 = vpack.c.bf16 %v5954_v6, %v5953_v5 }
 0x4d3   : > { %5929 = vmatpush1.bf16.msra.mxu1 %v7185_v38  ;;  %v6626_v38 = vpack.c.bf16 %v5970_v11, %v5969_v4  ;;  %v6660_v15 = vpack.c.bf16 %v5986_v22, %v5985_v21 }
 0x4d4   : > { %6639 = vmatprep.subr.bf16.mxu1 %v6638_v20  ;;  %5767 = vmatmul.mubr.bf16.vlgmr.msra.gmra.mrb[0].mxu0 %v4073_v13  ;;  %v5971_v20 = vld [vmem:[%s8914_s6 + $0xe0] sm:$0xff] }
 0x4d5   : > { %6609 = vmatpush3.bf16.msra.mxu0 %v6608_v29  ;;  %v6662_v29 = vpack.c.bf16 %v6004_v27, %v6003_v26 }
 0x4d6   : > { %5931 = vmatmul.mubr.bf16.vlgmr.msra.gmra.mrb[0].mxu1 %v4073_v13  ;;  %6611 = vmatprep.subr.bf16.mxu0 %v6610_v35  ;;  %v6630_v13 = vpack.c.bf16 %v5972_v25, %v5971_v20 }
 0x4d7   : > { %6641 = vmatpush3.bf16.msra.mxu1 %v6640_v30  ;;  %v5956_v30 = vld [vmem:[%s8914_s6 + $0x68] sm:$0xff] }
 0x4d8   : > { %6643 = vmatprep.subr.bf16.mxu1 %v6642_v36  ;;  %v6632_v35 = vpack.c.bf16 %v5956_v30, %v5955_v3  ;;  %v6664_v36 = vpack.c.bf16 %v5988_v32, %v5987_v31 }
 0x4d9   : > { %6613 = vmatpush3.bf16.msra.mxu0 %v6612_v42  ;;  %v5958_v42 = vld [vmem:[%s8914_s6 + $0x78] sm:$0xff] }
 0x4da   : > { %6615 = vmatprep.subr.bf16.mxu0 %v6614_v17  ;;  %v6636_v46 = vpack.c.bf16 %v5958_v42, %v5957_v41  ;;  %v5990_v17 = vld [vmem:[%s8914_s6 + $0x178] sm:$0xff] }
 0x4db   : > { %6645 = vmatpush3.bf16.msra.mxu1 %v6644_v45  ;;  %v6666_v45 = vpack.c.bf16 %v6006_v40, %v6005_v49 }
 0x4dc   : > { %6647 = vmatprep.subr.bf16.mxu1 %v6646_v14  ;;  %v6668_v14 = vpack.c.bf16 %v5990_v17, %v5989_v24 }
 0x4dd   : > { %6617 = vmatpush3.bf16.msra.mxu0 %v6616_v9 }
 0x4de   : > { %6619 = vmatprep.subr.bf16.mxu0 %v6618_v56 }
 0x4df   : > { %6649 = vmatpush3.bf16.msra.mxu1 %v6648_v55 }
 0x4e0   : > { %6651 = vmatprep.subr.bf16.mxu1 %v6650_v57 }
 0x4e1   : > { %6621 = vmatpush3.bf16.msra.mxu0 %v6620_v51 }
 0x4e2   : > { %6623 = vmatprep.subr.bf16.mxu0 %v6622_v1 }
 0x4e3   : > { %6653 = vmatpush3.bf16.msra.mxu1 %v6652_v62 }
 0x4e4   : > { %6655 = vmatprep.subr.bf16.mxu1 %v6654_v63 }
 0x4e5   : > { %6625 = vmatpush3.bf16.msra.mxu0 %v6624_v12 }
 0x4e6   : > { %6627 = vmatprep.subr.bf16.mxu0 %v6626_v38 }
 0x4e7   : > { %6657 = vmatpush3.bf16.msra.mxu1 %v6656_v8 }
 0x4e8   : > { %6659 = vmatprep.subr.bf16.mxu1 %v6658_v19 }
 0x4e9   : > { %6629 = vmatpush3.bf16.msra.mxu0 %v6628_v28 }
 0x4ea   : > { %6631 = vmatprep.subr.bf16.mxu0 %v6630_v13 }
 0x4eb   : > { %6661 = vmatpush3.bf16.msra.mxu1 %v6660_v15 }
 0x4ec   : > { %6663 = vmatprep.subr.bf16.mxu1 %v6662_v29 }
 0x4ed   : > { %6633 = vmatpush3.bf16.msra.mxu0 %v6632_v35 }
 0x4ee   : > { %6635 = vmatprep.subr.bf16.mxu0 %v6634_v34 }
 0x4ef   : > { %6665 = vmatpush3.bf16.msra.mxu1 %v6664_v36 }
 0x4f0   : > { %6667 = vmatprep.subr.bf16.mxu1 %v6666_v45 }
 0x4f1   : > { %6637 = vmatpush3.bf16.msra.mxu0 %v6636_v46 }
 0x4f3   : > { %6669 = vmatpush3.bf16.msra.mxu1 %v6668_v14 }
 0x5a7   : > { %v5768_v44 = vpop.f32.mrb[0].mxu0 }
 0x5a8   : > { %v5770_v18 = vpop.f32.mrb[1].mxu0  ;;  %v5939_v33 = vmax.f32 %v5768_v44, 0.0 }
 0x5a9   : > { %v5932_v23 = vpop.f32.mrb[0].mxu1  ;;  %v5940_v37 = vmax.f32 %v5770_v18, 0.0  ;;  %v5772_v9 = vpop.f32.mrb[2].mxu0 }
 0x5aa   : > { %v5934_v52 = vpop.f32.mrb[1].mxu1  ;;  %v5941_v43 = vmax.f32 %v5932_v23, 0.0  ;;  %v5773_v56 = vpop.f32.mrb[3].mxu0 }
 0x5ab   : > { %v5942_v54 = vmax.f32 %v5934_v52, 0.0  ;;  %v5936_v55 = vpop.f32.mrb[2].mxu1  ;;  %6071 = vmatprep.mubr.f32.mxu0 %v5940_v37 }
 0x5ac   : > { %v5937_v57 = vpop.f32.mrb[3].mxu1  ;;  %6072 = vmatmul.mubr.f32.vlgmr.msra.gmra.mrb[4].mxu0 %v5939_v33 }
 0x5ad   : > { %6141 = vmatprep.mubr.f32.mxu1 %v5942_v54 }
 0x5ae   : > { %6142 = vmatmul.mubr.f32.vlgmr.msra.gmra.mrb[4].mxu1 %v5941_v43 }
 0x67f   : > { %v6568_v16 = vpop.f32.mrb[4].mxu0 }
 0x680   : > { %v6569_v59 = vpop.f32.mrb[5].mxu0 }
 0x681   : > { %v6603_v58 = vpop.f32.mrb[4].mxu1  ;;  %v6570_v61 = vadd.f32 %v6569_v59, %v6568_v16 }
 0x682   : > { %v6604_v60 = vpop.f32.mrb[5].mxu1 }
 0x683   : > { %v6605_v50 = vadd.f32 %v6604_v60, %v6603_v58 }
 0x685   : > { %v6144_v51 = vadd.f32 %v6605_v50, %v6570_v61 }
 0x687   : > { %6148 = vst.msk [vmem:[#allocation3] sm:$0x3] %vm6147_vm2, %v6144_v51 }
 0x688 PF: > { %p6782_p6 = scmp.eq.s32.totalorder %s7277_s25, 6  ;;  %s7230_s9 = smov [#allocation3]  }
 0x689   : > { %s6156_s10 = sshll.u32 %s7230_s9, 4  ;;  %s6157_s10 = int_to_ptr.vmem [resolvable:$true] %s6156_s10 }
 0x68a   : > { %s7188_s11 = scalar_lea.vmem %s6157_s10, 32  ;;  %p7195_p10 = scmp.lt.s32.totalorder %s6157_s10, %s6157_s10 }
 0x68b   : > { %p7189_p7 = scmp.ne.s32.totalorder %s6157_s10, %s7188_s11  ;;  %p7196_p11 = scmp.lt.s32.totalorder %s7188_s11, %s7188_s11 }
 0x68d   : > { %p7190_p8 = pnand %p7189_p7, %p6782_p6  ;;  %p7197_p12 = por %p7196_p11, %p7195_p10 }
 0x68f   : > { %p7191_p9 = pneg %p7190_p8 }
 0x691   : > { %p7198_p13 = pnand %p7197_p12, %p7191_p9 }
 0x693   : > { %7201 = shalt.err (!%p7198_p13)
}
 0x694   : > { %s7202_s14 = scalar_lea.hbm %s8915_s7, 32 }
 0x695   : > { %p7203_p0 = scmp.ne.s32.totalorder %s8915_s7, %s7202_s14  ;;  %p7208_p3 = scmp.lt.u32.totalorder %s7202_s14, %s8915_s7 }
 0x697   : > { %p7204_p1 = pnand %p7203_p0, %p6782_p6 }
 0x699   : > { %p7205_p2 = pneg %p7204_p1 }
 0x69b   : > { %p7210_p4 = pnand %p7208_p3, %p7205_p2 }
 0x69d   : > { %7213 = shalt.err (!%p7210_p4)
}
 0x69e   : > { %6779 = dma.vmem_to_hbm [thread:$0]  (%p6782_p6), %s6157_s10, 32, %s8915_s7, [#allocation4]  }
 0x69f   : > { %7219 = dma.done.wait (%p6782_p6), [#allocation4], 32  }
 0x6a0   : > { %7221 = vsyncadd (%p6782_p6), [#allocation4], 4294967264 }
 0x6a1 PF: > { %s18_s24 = sadd.s32 1, %s7224_s24  }
 0x6a2   : > { %p15_p5 = scmp.ge.s32.totalorder %s18_s24, 9  }
 0x6a4   :  { %17 = sbr.rel (!%p15_p5) target bundleno = 1 (0x1), region = 92 }
 0x6ab   :  { %6169 = vsyncpa [#allocation4], 1 }
 0x6ac   :  { %6171 = vsyncpa [#allocation4 + $0x1], 1 }

</bundles_post_ra>
